<compile_context>
chip_gen: v7x
topology: tpu7x:2x2x1
jax: 0.10.0
libtpu: 0.0.40
codegen_flags: <defaults>
</compile_context>

<pallas_src>
import functools

import jax
import jax.numpy as jnp
from jax.experimental import pallas as pl
from jax.experimental.pallas import tpu as pltpu

BN_EPS = 1e-5
_VMEM = pl.BlockSpec(memory_space=pltpu.MemorySpace.VMEM)


def _round_up(x, m):
    return (x + m - 1) // m * m


def _vmem_limit(need_bytes):
    """Chip-aware scoped-VMEM budget (generous, clamped below physical VMEM)."""
    try:
        cap = int(pltpu.get_tpu_info().vmem_capacity_bytes)
    except Exception:            # conservative fallback = v7x per-core VMEM
        cap = 64 << 20
    ceiling = int(cap * 0.85)
    want = max(int(1.5 * need_bytes) + (16 << 20), 32 << 20)
    return int(min(want, ceiling))


# ----------------------------------------------------------------------------
# In-kernel helpers (pure functions of values)
# ----------------------------------------------------------------------------
def _bn_act(y, vec, relu):
    """Training-mode BatchNorm over rows, single-pass stats.

    y: (rows, C) f32.  vec: (3, C) f32 with rows = [conv bias, gamma, beta]
    (only gamma/beta are used here; the bias is added by the caller).
    """
    n = y.shape[0]
    s1 = jnp.sum(y, axis=0, keepdims=True)
    s2 = jnp.sum(y * y, axis=0, keepdims=True)
    mean = s1 * (1.0 / n)
    var = jnp.maximum(s2 * (1.0 / n) - mean * mean, 0.0)
    scale = vec[1:2, :] * jax.lax.rsqrt(var + BN_EPS)      # gamma / sqrt(var+eps)
    shift = vec[2:3, :] - mean * scale                     # beta - mean*scale
    out = y * scale + shift                                # one fused FMA pass
    return jnp.maximum(out, 0.0) if relu else out


# ----------------------------------------------------------------------------
# Kernel 1: conv_in = 3x3 conv (pad=1, tightly packed K) + BN + ReLU  -> bf16
# ----------------------------------------------------------------------------
def _conv_in_kernel(B, H, W, Cin, Kin,
                    x_ref, w_ref, vec_ref, o_ref, pad_ref, cols_ref):
    rows = B * H * W
    pad_ref[...] = jnp.zeros_like(pad_ref)
    pad_ref[:, 1:H + 1, 1:W + 1, :] = x_ref[...].astype(jnp.bfloat16)

    # Pack the 9 taps tightly along K (columns [k*Cin, (k+1)*Cin)); only the
    # lane-padding tail beyond 9*Cin needs explicit zeros.
    if Kin > 9 * Cin:
        cols_ref[:, 9 * Cin:] = jnp.zeros((rows, Kin - 9 * Cin), jnp.bfloat16)
    for k in range(9):
        ky, kx = divmod(k, 3)
        cols_ref[:, k * Cin:(k + 1) * Cin] = (
            pad_ref[:, ky:ky + H, kx:kx + W, :].reshape(rows, Cin))

    vec = vec_ref[...]
    acc = jnp.dot(cols_ref[...], w_ref[...],
                  preferred_element_type=jnp.float32) + vec[0:1, :]
    y = _bn_act(acc, vec, relu=True)
    o_ref[...] = y.reshape(o_ref.shape).astype(o_ref.dtype)


def conv_in_block(x, w, vec):
    """x: (B,H,W,Cin) f32;  w: (Kin, C) bf16 packed-tap weights;  vec: (3,C)."""
    B, H, W, Cin = x.shape
    Kin, C = w.shape
    rows = B * H * W
    need = (x.size * 4 + Kin * C * 2 + rows * C * 2
            + B * (H + 2) * (W + 2) * Cin * 2 + rows * Kin * 2 + 2 * rows * C * 4)
    kern = functools.partial(_conv_in_kernel, B, H, W, Cin, Kin)
    return pl.pallas_call(
        kern,
        out_shape=jax.ShapeDtypeStruct((B, H, W, C), jnp.bfloat16),
        in_specs=[_VMEM] * 3,
        out_specs=_VMEM,
        scratch_shapes=[pltpu.VMEM((B, H + 2, W + 2, Cin), jnp.bfloat16),
                        pltpu.VMEM((rows, Kin), jnp.bfloat16)],
        compiler_params=pltpu.CompilerParams(vmem_limit_bytes=_vmem_limit(need)),
        cost_estimate=pl.CostEstimate(
            flops=2 * rows * Kin * C, transcendentals=C,
            bytes_accessed=x.size * 4 + Kin * C * 2 + rows * C * 2),
    )(x, w, vec)


# ----------------------------------------------------------------------------
# Kernel 2: the fused residual tower (grid over layers) + fused 1x1 head convs
#   each step:  relu( BN(conv2( relu(BN(conv1(act))) )) + act )  -> act (VMEM)
#   last step:  head = relu( BN( act @ Wh + bh ) )               -> HBM (rows,3)
# ----------------------------------------------------------------------------
def _tower_kernel(B, H, W, C,
                  x_ref, w1_ref, p1_ref, w2_ref, p2_ref, wh_ref, ph_ref,
                  h_ref, act_ref, pad_ref):
    l = pl.program_id(0)
    rows = B * H * W

    @pl.when(l == 0)
    def _init():
        # Zero once: only the 1-pixel border stays zero, the interior is
        # overwritten by every conv below.
        pad_ref[...] = jnp.zeros_like(pad_ref)
        act_ref[...] = x_ref[...].astype(jnp.float32)

    def conv3(w_ref, vec):
        # 9 per-tap MXU matmuls accumulated in f32 (no im2col scratch).
        acc = None
        for k in range(9):
            ky, kx = divmod(k, 3)
            tap = pad_ref[:, ky:ky + H, kx:kx + W, :].reshape(rows, C)
            d = jnp.dot(tap, w_ref[k], preferred_element_type=jnp.float32)
            acc = d if acc is None else acc + d
        return acc + vec[0:1, :]          # conv bias

    x = act_ref[...]                                        # (B,H,W,C) f32

    # conv1 + BN + ReLU (intermediate never leaves VMEM)
    pad_ref[:, 1:H + 1, 1:W + 1, :] = x.astype(jnp.bfloat16)
    p1 = p1_ref[...]
    y = _bn_act(conv3(w1_ref, p1), p1, relu=True)

    # conv2 + BN + residual add + ReLU (residual path stays f32 in VMEM)
    pad_ref[:, 1:H + 1, 1:W + 1, :] = y.reshape(B, H, W, C).astype(jnp.bfloat16)
    p2 = p2_ref[...]
    z = _bn_act(conv3(w2_ref, p2), p2, relu=False)
    z = jnp.maximum(z + x.reshape(rows, C), 0.0)
    act_ref[...] = z.reshape(B, H, W, C)

    # Fused policy/value 1x1 head convs + per-channel BN + ReLU on the final
    # layer: the (rows, C) activation never goes back to HBM.
    @pl.when(l == pl.num_programs(0) - 1)
    def _heads():
        ph = ph_ref[...]
        hh = jnp.dot(z.astype(jnp.bfloat16), wh_ref[...],
                     preferred_element_type=jnp.float32) + ph[0:1, :]
        h_ref[...] = _bn_act(hh, ph, relu=True)


def res_tower(x, w1_all, p1_all, w2_all, p2_all, wh, ph):
    B, H, W, C = x.shape
    L = w1_all.shape[0]
    rows = B * H * W
    need = (x.size * 2                              # input (bf16), fetched once
            + 2 * 2 * 9 * C * C * 2                 # double-buffered w1/w2 blocks
            + rows * C * 4                          # persistent activation
            + B * (H + 2) * (W + 2) * C * 2         # bf16 padded buffer
            + rows * 3 * 4                          # heads output
            + 3 * rows * C * 4)                     # acc / y / z temporaries
    kern = functools.partial(_tower_kernel, B, H, W, C)
    return pl.pallas_call(
        kern,
        out_shape=jax.ShapeDtypeStruct((rows, 3), jnp.float32),
        grid=(L,),
        in_specs=[
            pl.BlockSpec((B, H, W, C), lambda l: (0, 0, 0, 0)),     # fetched once
            pl.BlockSpec((None, 9, C, C), lambda l: (l, 0, 0, 0)),  # conv1 weights (layer l)
            pl.BlockSpec((None, 3, C), lambda l: (l, 0, 0)),        # conv1 bias/gamma/beta
            pl.BlockSpec((None, 9, C, C), lambda l: (l, 0, 0, 0)),  # conv2 weights (layer l)
            pl.BlockSpec((None, 3, C), lambda l: (l, 0, 0)),        # conv2 bias/gamma/beta
            pl.BlockSpec((C, 3), lambda l: (0, 0)),                 # fused head 1x1 weights
            pl.BlockSpec((3, 3), lambda l: (0, 0)),                 # head bias/gamma/beta
        ],
        out_specs=pl.BlockSpec((rows, 3), lambda l: (0, 0)),        # written at l == L-1
        scratch_shapes=[pltpu.VMEM((B, H, W, C), jnp.float32),      # resident activation
                        pltpu.VMEM((B, H + 2, W + 2, C), jnp.bfloat16)],
        compiler_params=pltpu.CompilerParams(
            dimension_semantics=("arbitrary",),                     # sequential layer axis
            vmem_limit_bytes=_vmem_limit(need)),
        cost_estimate=pl.CostEstimate(
            flops=L * 2 * 2 * rows * 9 * C * C + 2 * rows * C * 3,
            transcendentals=2 * L * C + 3,
            bytes_accessed=(x.size * 2 + (w1_all.size + w2_all.size) * 2
                            + (p1_all.size + p2_all.size) * 4
                            + wh.size * 2 + ph.size * 4 + rows * 3 * 4)),
    )(x, w1_all, p1_all, w2_all, p2_all, wh, ph)


# ----------------------------------------------------------------------------
# Kernel 3: fused head FCs  (policy Linear;  value Linear->ReLU->Linear->Tanh)
# ----------------------------------------------------------------------------
def _heads_fc_kernel(hp_ref, hv_ref, wp_ref, bp_ref, wv1_ref, bv1_ref,
                     wv2_ref, bv2_ref, p_ref, v_ref):
    p = jnp.dot(hp_ref[...].astype(jnp.bfloat16), wp_ref[...],
                preferred_element_type=jnp.float32) + bp_ref[...]
    p_ref[...] = p

    v = jnp.dot(hv_ref[...].astype(jnp.bfloat16), wv1_ref[...],
                preferred_element_type=jnp.float32) + bv1_ref[...]
    v = jnp.maximum(v, 0.0)
    v = jnp.dot(v.astype(jnp.bfloat16), wv2_ref[...],
                preferred_element_type=jnp.float32) + bv2_ref[...]
    v_ref[...] = jnp.tanh(v)


def heads_fc(hp, hv, wp, bp, wv1, bv1, wv2, bv2):
    B = hp.shape[0]
    A = wp.shape[1]
    Hdn = wv1.shape[1]
    need = (hp.size * 4 + hv.size * 4 + wp.size * 2 + wv1.size * 2
            + wv2.size * 2 + B * A * 4 + B * Hdn * 4)
    flops = 2 * B * (hp.shape[1] * A + hv.shape[1] * Hdn + Hdn * 1)
    return pl.pallas_call(
        _heads_fc_kernel,
        out_shape=(jax.ShapeDtypeStruct((B, A), jnp.float32),
                   jax.ShapeDtypeStruct((B, 1), jnp.float32)),
        in_specs=[_VMEM] * 8,
        out_specs=(_VMEM, _VMEM),
        compiler_params=pltpu.CompilerParams(vmem_limit_bytes=_vmem_limit(need)),
        cost_estimate=pl.CostEstimate(flops=flops, transcendentals=B,
                                      bytes_accessed=need),
    )(hp, hv, wp, bp, wv1, bv1, wv2, bv2)


# ----------------------------------------------------------------------------
# Deterministic synthetic parameters
# ----------------------------------------------------------------------------
def init_params(key, obs_shape, num_actions, num_layers, num_filters):
    assert num_layers >= 1
    c_in, width, height = obs_shape
    H, W = width, height
    F = num_filters
    keys = iter(jax.random.split(key, 4 * num_layers + 16))

    def vec_params(cout):
        """(3, cout) f32 rows = [conv bias, BN gamma, BN beta]."""
        b = 0.01 * jax.random.normal(next(keys), (1, cout), jnp.float32)
        return jnp.concatenate(
            [b, jnp.ones((1, cout), jnp.float32),
             jnp.zeros((1, cout), jnp.float32)], axis=0)

    def conv3_w(cin, cout):
        return 0.05 * jax.random.normal(next(keys), (3, 3, cin, cout), jnp.float32)

    def linear(cin, cout):
        w = 0.05 * jax.random.normal(next(keys), (cin, cout), jnp.float32)
        b = 0.01 * jax.random.normal(next(keys), (1, cout), jnp.float32)
        return w, b

    # conv_in: pack the 9 taps tightly along K (row order (ky, kx, cin)) and
    # zero-pad K up to a lane multiple of 128.
    kin = _round_up(9 * c_in, 128)
    w_in = conv3_w(c_in, F).reshape(9 * c_in, F)
    w_in = jnp.pad(w_in, ((0, kin - 9 * c_in), (0, 0))).astype(jnp.bfloat16)
    vec_in = vec_params(F)

    # Residual tower: stacked per-layer weights (L, 9, F, F) + (L, 3, F).
    w1, p1, w2, p2 = [], [], [], []
    for _ in range(num_layers):
        w1.append(conv3_w(F, F).reshape(9, F, F))
        p1.append(vec_params(F))
        w2.append(conv3_w(F, F).reshape(9, F, F))
        p2.append(vec_params(F))
    w1 = jnp.stack(w1).astype(jnp.bfloat16)
    p1 = jnp.stack(p1)
    w2 = jnp.stack(w2).astype(jnp.bfloat16)
    p2 = jnp.stack(p2)

    # Fused head 1x1 convs: channels [0,1] = policy, [2] = value (per-channel
    # BN statistics are identical to running the two BatchNorms separately).
    pw, pb = linear(F, 2)
    vw, vb = linear(F, 1)
    wh = jnp.concatenate([pw, vw], axis=1).astype(jnp.bfloat16)        # (F, 3)
    bh = jnp.concatenate([pb, vb], axis=1)                             # (1, 3)
    ph = jnp.concatenate(
        [bh, jnp.ones((1, 3), jnp.float32), jnp.zeros((1, 3), jnp.float32)], 0)

    # Policy FC: fold the PyTorch NCHW flatten into the weight rows at init
    # time (PyTorch row order (c, h, w) -> our NHWC row order (h, w, c)).
    wp, bp = linear(2 * H * W, num_actions)
    wp = wp.reshape(2, H * W, num_actions).transpose(1, 0, 2)
    wp = wp.reshape(2 * H * W, num_actions)
    wv1, bv1 = linear(H * W, 256)
    wv2, bv2 = linear(256, 1)

    return {
        "conv_in": (w_in, vec_in),
        "tower": (w1, p1, w2, p2, wh, ph),
        "p_fc": (wp.astype(jnp.bfloat16), bp),
        "v_fc1": (wv1.astype(jnp.bfloat16), bv1),
        "v_fc2": (wv2.astype(jnp.bfloat16), bv2),
    }


# ----------------------------------------------------------------------------
# Forward pass  (3 pallas_calls total: conv_in, fused tower+head-conv, head FCs)
# ----------------------------------------------------------------------------
def policy_forward(params, x_nchw):
    x = jnp.transpose(x_nchw, (0, 2, 3, 1)).astype(jnp.float32)    # NCHW -> NHWC
    x = conv_in_block(x, *params["conv_in"])                       # bf16 (B,H,W,F)
    B, H, W, _ = x.shape

    h = res_tower(x, *params["tower"])                             # (B*H*W, 3) f32
    h = h.reshape(B, H * W, 3)
    hp = h[:, :, 0:2].reshape(B, 2 * H * W)   # NHWC flatten; p_fc rows pre-permuted
    hv = h[:, :, 2]                           # value head has C=1: reshape only

    return heads_fc(hp, hv, *params["p_fc"], *params["v_fc1"], *params["v_fc2"])


if __name__ == "__main__":
    obs_shape = (4, 8, 8)        # (channels, width, height)
    num_actions = 16
    num_layers = 2               # small stand-in for the default 19
    num_filters = 32             # small stand-in for the default 256
    batch = 2

    key = jax.random.PRNGKey(0)
    pkey, xkey = jax.random.split(key)
    params = init_params(pkey, obs_shape, num_actions, num_layers, num_filters)
    x = jax.random.normal(xkey, (batch,) + obs_shape, dtype=jnp.float32)

    p, v = jax.jit(policy_forward)(params, x)
    jax.block_until_ready((p, v))

    assert p.shape == (batch, num_actions), p.shape
    assert v.shape == (batch, 1), v.shape
    assert bool(jnp.all(jnp.isfinite(p))) and bool(jnp.all(jnp.isfinite(v)))
    assert bool(jnp.all(jnp.abs(v) <= 1.0))      # tanh-bounded value
    print("KERNEL_OK")
</pallas_src>

<mosaic_0001>
module attributes {stable_mosaic.version = 11 : i64} {
  func.func @_conv_in_kernel(%arg0: memref<2x8x8x4xf32, #tpu.memory_space<vmem>>, %arg1: memref<128x32xbf16, #tpu.memory_space<vmem>>, %arg2: memref<3x32xf32, #tpu.memory_space<vmem>>, %arg3: memref<2x8x8x32xbf16, #tpu.memory_space<vmem>>, %arg4: memref<2x10x10x4xbf16, #tpu.memory_space<vmem>>, %arg5: memref<128x128xbf16, #tpu.memory_space<vmem>>) attributes {dimension_semantics = [], scalar_prefetch = 0 : i64, scratch_operands = 2 : i64, tpu.core_type = #tpu.core_type<tc>} {
    %cst = arith.constant 0.000000e+00 : bf16
    %0 = vector.broadcast %cst : bf16 to vector<2x10x10x4xbf16>
    %c0 = arith.constant 0 : index
    %c0_0 = arith.constant 0 : index
    %c0_1 = arith.constant 0 : index
    %c0_2 = arith.constant 0 : index
    %1 = vector.load %arg4[%c0, %c0_0, %c0_1, %c0_2] : memref<2x10x10x4xbf16, #tpu.memory_space<vmem>>, vector<2x10x10x4xbf16>
    tpu.vector_store %arg4[%c0, %c0_0, %c0_1, %c0_2], %0 {strides = array<i32>} : memref<2x10x10x4xbf16, #tpu.memory_space<vmem>>, vector<2x10x10x4xbf16>,
    %c0_3 = arith.constant 0 : index
    %c0_4 = arith.constant 0 : index
    %c0_5 = arith.constant 0 : index
    %c0_6 = arith.constant 0 : index
    %2 = vector.load %arg0[%c0_3, %c0_4, %c0_5, %c0_6] : memref<2x8x8x4xf32, #tpu.memory_space<vmem>>, vector<2x8x8x4xf32>
    %3 = arith.truncf %2 : vector<2x8x8x4xf32> to vector<2x8x8x4xbf16>
    %c0_7 = arith.constant 0 : index
    %c1 = arith.constant 1 : index
    %c1_8 = arith.constant 1 : index
    %c0_9 = arith.constant 0 : index
    %4 = vector.load %arg4[%c0_7, %c1, %c1_8, %c0_9] : memref<2x10x10x4xbf16, #tpu.memory_space<vmem>>, vector<2x8x8x4xbf16>
    tpu.vector_store %arg4[%c0_7, %c1, %c1_8, %c0_9], %3 {strides = array<i32>} : memref<2x10x10x4xbf16, #tpu.memory_space<vmem>>, vector<2x8x8x4xbf16>,
    %cst_10 = arith.constant 0.000000e+00 : bf16
    %5 = vector.broadcast %cst_10 : bf16 to vector<128x92xbf16>
    %c0_11 = arith.constant 0 : index
    %c36 = arith.constant 36 : index
    %6 = vector.load %arg5[%c0_11, %c36] : memref<128x128xbf16, #tpu.memory_space<vmem>>, vector<128x92xbf16>
    tpu.vector_store %arg5[%c0_11, %c36], %5 {strides = array<i32>} : memref<128x128xbf16, #tpu.memory_space<vmem>>, vector<128x92xbf16>,
    %c0_12 = arith.constant 0 : index
    %c0_13 = arith.constant 0 : index
    %c0_14 = arith.constant 0 : index
    %c0_15 = arith.constant 0 : index
    %7 = vector.load %arg4[%c0_12, %c0_13, %c0_14, %c0_15] : memref<2x10x10x4xbf16, #tpu.memory_space<vmem>>, vector<2x8x8x4xbf16>
    %8 = vector.shape_cast %7 : vector<2x8x8x4xbf16> to vector<128x4xbf16>
    %c0_16 = arith.constant 0 : index
    %c0_17 = arith.constant 0 : index
    %9 = vector.load %arg5[%c0_16, %c0_17] : memref<128x128xbf16, #tpu.memory_space<vmem>>, vector<128x4xbf16>
    tpu.vector_store %arg5[%c0_16, %c0_17], %8 {strides = array<i32>} : memref<128x128xbf16, #tpu.memory_space<vmem>>, vector<128x4xbf16>,
    %c0_18 = arith.constant 0 : index
    %c0_19 = arith.constant 0 : index
    %c1_20 = arith.constant 1 : index
    %c0_21 = arith.constant 0 : index
    %10 = vector.load %arg4[%c0_18, %c0_19, %c1_20, %c0_21] : memref<2x10x10x4xbf16, #tpu.memory_space<vmem>>, vector<2x8x8x4xbf16>
    %11 = vector.shape_cast %10 : vector<2x8x8x4xbf16> to vector<128x4xbf16>
    %c0_22 = arith.constant 0 : index
    %c4 = arith.constant 4 : index
    %12 = vector.load %arg5[%c0_22, %c4] : memref<128x128xbf16, #tpu.memory_space<vmem>>, vector<128x4xbf16>
    tpu.vector_store %arg5[%c0_22, %c4], %11 {strides = array<i32>} : memref<128x128xbf16, #tpu.memory_space<vmem>>, vector<128x4xbf16>,
    %c0_23 = arith.constant 0 : index
    %c0_24 = arith.constant 0 : index
    %c2 = arith.constant 2 : index
    %c0_25 = arith.constant 0 : index
    %13 = vector.load %arg4[%c0_23, %c0_24, %c2, %c0_25] : memref<2x10x10x4xbf16, #tpu.memory_space<vmem>>, vector<2x8x8x4xbf16>
    %14 = vector.shape_cast %13 : vector<2x8x8x4xbf16> to vector<128x4xbf16>
    %c0_26 = arith.constant 0 : index
    %c8 = arith.constant 8 : index
    %15 = vector.load %arg5[%c0_26, %c8] : memref<128x128xbf16, #tpu.memory_space<vmem>>, vector<128x4xbf16>
    tpu.vector_store %arg5[%c0_26, %c8], %14 {strides = array<i32>} : memref<128x128xbf16, #tpu.memory_space<vmem>>, vector<128x4xbf16>,
    %c0_27 = arith.constant 0 : index
    %c1_28 = arith.constant 1 : index
    %c0_29 = arith.constant 0 : index
    %c0_30 = arith.constant 0 : index
    %16 = vector.load %arg4[%c0_27, %c1_28, %c0_29, %c0_30] : memref<2x10x10x4xbf16, #tpu.memory_space<vmem>>, vector<2x8x8x4xbf16>
    %17 = vector.shape_cast %16 : vector<2x8x8x4xbf16> to vector<128x4xbf16>
    %c0_31 = arith.constant 0 : index
    %c12 = arith.constant 12 : index
    %18 = vector.load %arg5[%c0_31, %c12] : memref<128x128xbf16, #tpu.memory_space<vmem>>, vector<128x4xbf16>
    tpu.vector_store %arg5[%c0_31, %c12], %17 {strides = array<i32>} : memref<128x128xbf16, #tpu.memory_space<vmem>>, vector<128x4xbf16>,
    %c0_32 = arith.constant 0 : index
    %c1_33 = arith.constant 1 : index
    %c1_34 = arith.constant 1 : index
    %c0_35 = arith.constant 0 : index
    %19 = vector.load %arg4[%c0_32, %c1_33, %c1_34, %c0_35] : memref<2x10x10x4xbf16, #tpu.memory_space<vmem>>, vector<2x8x8x4xbf16>
    %20 = vector.shape_cast %19 : vector<2x8x8x4xbf16> to vector<128x4xbf16>
    %c0_36 = arith.constant 0 : index
    %c16 = arith.constant 16 : index
    %21 = vector.load %arg5[%c0_36, %c16] : memref<128x128xbf16, #tpu.memory_space<vmem>>, vector<128x4xbf16>
    tpu.vector_store %arg5[%c0_36, %c16], %20 {strides = array<i32>} : memref<128x128xbf16, #tpu.memory_space<vmem>>, vector<128x4xbf16>,
    %c0_37 = arith.constant 0 : index
    %c1_38 = arith.constant 1 : index
    %c2_39 = arith.constant 2 : index
    %c0_40 = arith.constant 0 : index
    %22 = vector.load %arg4[%c0_37, %c1_38, %c2_39, %c0_40] : memref<2x10x10x4xbf16, #tpu.memory_space<vmem>>, vector<2x8x8x4xbf16>
    %23 = vector.shape_cast %22 : vector<2x8x8x4xbf16> to vector<128x4xbf16>
    %c0_41 = arith.constant 0 : index
    %c20 = arith.constant 20 : index
    %24 = vector.load %arg5[%c0_41, %c20] : memref<128x128xbf16, #tpu.memory_space<vmem>>, vector<128x4xbf16>
    tpu.vector_store %arg5[%c0_41, %c20], %23 {strides = array<i32>} : memref<128x128xbf16, #tpu.memory_space<vmem>>, vector<128x4xbf16>,
    %c0_42 = arith.constant 0 : index
    %c2_43 = arith.constant 2 : index
    %c0_44 = arith.constant 0 : index
    %c0_45 = arith.constant 0 : index
    %25 = vector.load %arg4[%c0_42, %c2_43, %c0_44, %c0_45] : memref<2x10x10x4xbf16, #tpu.memory_space<vmem>>, vector<2x8x8x4xbf16>
    %26 = vector.shape_cast %25 : vector<2x8x8x4xbf16> to vector<128x4xbf16>
    %c0_46 = arith.constant 0 : index
    %c24 = arith.constant 24 : index
    %27 = vector.load %arg5[%c0_46, %c24] : memref<128x128xbf16, #tpu.memory_space<vmem>>, vector<128x4xbf16>
    tpu.vector_store %arg5[%c0_46, %c24], %26 {strides = array<i32>} : memref<128x128xbf16, #tpu.memory_space<vmem>>, vector<128x4xbf16>,
    %c0_47 = arith.constant 0 : index
    %c2_48 = arith.constant 2 : index
    %c1_49 = arith.constant 1 : index
    %c0_50 = arith.constant 0 : index
    %28 = vector.load %arg4[%c0_47, %c2_48, %c1_49, %c0_50] : memref<2x10x10x4xbf16, #tpu.memory_space<vmem>>, vector<2x8x8x4xbf16>
    %29 = vector.shape_cast %28 : vector<2x8x8x4xbf16> to vector<128x4xbf16>
    %c0_51 = arith.constant 0 : index
    %c28 = arith.constant 28 : index
    %30 = vector.load %arg5[%c0_51, %c28] : memref<128x128xbf16, #tpu.memory_space<vmem>>, vector<128x4xbf16>
    tpu.vector_store %arg5[%c0_51, %c28], %29 {strides = array<i32>} : memref<128x128xbf16, #tpu.memory_space<vmem>>, vector<128x4xbf16>,
    %c0_52 = arith.constant 0 : index
    %c2_53 = arith.constant 2 : index
    %c2_54 = arith.constant 2 : index
    %c0_55 = arith.constant 0 : index
    %31 = vector.load %arg4[%c0_52, %c2_53, %c2_54, %c0_55] : memref<2x10x10x4xbf16, #tpu.memory_space<vmem>>, vector<2x8x8x4xbf16>
    %32 = vector.shape_cast %31 : vector<2x8x8x4xbf16> to vector<128x4xbf16>
    %c0_56 = arith.constant 0 : index
    %c32 = arith.constant 32 : index
    %33 = vector.load %arg5[%c0_56, %c32] : memref<128x128xbf16, #tpu.memory_space<vmem>>, vector<128x4xbf16>
    tpu.vector_store %arg5[%c0_56, %c32], %32 {strides = array<i32>} : memref<128x128xbf16, #tpu.memory_space<vmem>>, vector<128x4xbf16>,
    %c0_57 = arith.constant 0 : index
    %c0_58 = arith.constant 0 : index
    %34 = vector.load %arg2[%c0_57, %c0_58] : memref<3x32xf32, #tpu.memory_space<vmem>>, vector<3x32xf32>
    %c0_59 = arith.constant 0 : index
    %c0_60 = arith.constant 0 : index
    %35 = vector.load %arg5[%c0_59, %c0_60] : memref<128x128xbf16, #tpu.memory_space<vmem>>, vector<128x128xbf16>
    %c0_61 = arith.constant 0 : index
    %c0_62 = arith.constant 0 : index
    %36 = vector.load %arg1[%c0_61, %c0_62] : memref<128x32xbf16, #tpu.memory_space<vmem>>, vector<128x32xbf16>
    %cst_63 = arith.constant dense<0.000000e+00> : vector<128x32xf32>
    %37 = tpu.matmul %35, %36, %cst_63 {dimension_numbers = #tpu.dot_dimension_numbers<[1], [0], [0], [1], [0, 0, 1, 1], [], []>} : vector<128x128xbf16>, vector<128x32xbf16>, vector<128x32xf32> -> vector<128x32xf32>
    %38 = vector.extract_strided_slice %34 {offsets = [0, 0], sizes = [1, 32], strides = [1, 1]} : vector<3x32xf32> to vector<1x32xf32>
    %39 = vector.broadcast %38 : vector<1x32xf32> to vector<128x32xf32>
    %40 = arith.addf %37, %39 : vector<128x32xf32>
    %cst_64 = arith.constant dense<0.000000e+00> : vector<32xf32>
    %41 = vector.multi_reduction <add>, %40, %cst_64 [0] : vector<128x32xf32> to vector<32xf32>
    %42 = vector.shape_cast %41 : vector<32xf32> to vector<1x32xf32>
    %43 = arith.mulf %40, %40 : vector<128x32xf32>
    %cst_65 = arith.constant dense<0.000000e+00> : vector<32xf32>
    %44 = vector.multi_reduction <add>, %43, %cst_65 [0] : vector<128x32xf32> to vector<32xf32>
    %45 = vector.shape_cast %44 : vector<32xf32> to vector<1x32xf32>
    %cst_66 = arith.constant 7.812500e-03 : f32
    %46 = vector.broadcast %cst_66 : f32 to vector<1x32xf32>
    %47 = arith.mulf %42, %46 : vector<1x32xf32>
    %cst_67 = arith.constant 7.812500e-03 : f32
    %48 = vector.broadcast %cst_67 : f32 to vector<1x32xf32>
    %49 = arith.mulf %45, %48 : vector<1x32xf32>
    %50 = arith.mulf %47, %47 : vector<1x32xf32>
    %51 = arith.subf %49, %50 : vector<1x32xf32>
    %cst_68 = arith.constant 0.000000e+00 : f32
    %52 = vector.broadcast %cst_68 : f32 to vector<1x32xf32>
    %53 = arith.maximumf %51, %52 : vector<1x32xf32>
    %54 = vector.extract_strided_slice %34 {offsets = [1, 0], sizes = [1, 32], strides = [1, 1]} : vector<3x32xf32> to vector<1x32xf32>
    %cst_69 = arith.constant 9.99999974E-6 : f32
    %55 = vector.broadcast %cst_69 : f32 to vector<1x32xf32>
    %56 = arith.addf %53, %55 : vector<1x32xf32>
    %57 = math.rsqrt %56 : vector<1x32xf32>
    %58 = arith.mulf %54, %57 : vector<1x32xf32>
    %59 = vector.extract_strided_slice %34 {offsets = [2, 0], sizes = [1, 32], strides = [1, 1]} : vector<3x32xf32> to vector<1x32xf32>
    %60 = arith.mulf %47, %58 : vector<1x32xf32>
    %61 = arith.subf %59, %60 : vector<1x32xf32>
    %62 = vector.broadcast %58 : vector<1x32xf32> to vector<128x32xf32>
    %63 = arith.mulf %40, %62 : vector<128x32xf32>
    %64 = vector.broadcast %61 : vector<1x32xf32> to vector<128x32xf32>
    %65 = arith.addf %63, %64 : vector<128x32xf32>
    %cst_70 = arith.constant 0.000000e+00 : f32
    %66 = vector.broadcast %cst_70 : f32 to vector<128x32xf32>
    %67 = arith.maximumf %65, %66 : vector<128x32xf32>
    %68 = vector.shape_cast %67 : vector<128x32xf32> to vector<2x8x8x32xf32>
    %69 = arith.truncf %68 : vector<2x8x8x32xf32> to vector<2x8x8x32xbf16>
    %c0_71 = arith.constant 0 : index
    %c0_72 = arith.constant 0 : index
    %c0_73 = arith.constant 0 : index
    %c0_74 = arith.constant 0 : index
    %70 = vector.load %arg3[%c0_71, %c0_72, %c0_73, %c0_74] : memref<2x8x8x32xbf16, #tpu.memory_space<vmem>>, vector<2x8x8x32xbf16>
    tpu.vector_store %arg3[%c0_71, %c0_72, %c0_73, %c0_74], %69 {strides = array<i32>} : memref<2x8x8x32xbf16, #tpu.memory_space<vmem>>, vector<2x8x8x32xbf16>,
    return
  }
}

module attributes {stable_mosaic.version = 11 : i64} {
  func.func @_tower_kernel(%arg0: i32, %arg1: memref<2x8x8x32xbf16, #tpu.memory_space<vmem>>, %arg2: memref<1x9x32x32xbf16, #tpu.memory_space<vmem>>, %arg3: memref<1x3x32xf32, #tpu.memory_space<vmem>>, %arg4: memref<1x9x32x32xbf16, #tpu.memory_space<vmem>>, %arg5: memref<1x3x32xf32, #tpu.memory_space<vmem>>, %arg6: memref<32x3xbf16, #tpu.memory_space<vmem>>, %arg7: memref<3x3xf32, #tpu.memory_space<vmem>>, %arg8: memref<128x3xf32, #tpu.memory_space<vmem>>, %arg9: memref<2x8x8x32xf32, #tpu.memory_space<vmem>>, %arg10: memref<2x10x10x32xbf16, #tpu.memory_space<vmem>>) attributes {dimension_semantics = [#tpu.dimension_semantics<arbitrary>], iteration_bounds = array<i64: 2>, scalar_prefetch = 0 : i64, scratch_operands = 2 : i64, tpu.core_type = #tpu.core_type<tc>, window_params = [{pipeline_mode = #tpu.pipeline_mode<synchronous>, transform_indices = @transform_0, window_bounds = array<i64: 2, 8, 8, 32>}, {transform_indices = @transform_1, window_bounds = array<i64: 1, 9, 32, 32>}, {transform_indices = @transform_2, window_bounds = array<i64: 1, 3, 32>}, {transform_indices = @transform_3, window_bounds = array<i64: 1, 9, 32, 32>}, {transform_indices = @transform_4, window_bounds = array<i64: 1, 3, 32>}, {pipeline_mode = #tpu.pipeline_mode<synchronous>, transform_indices = @transform_5, window_bounds = array<i64: 32, 3>}, {pipeline_mode = #tpu.pipeline_mode<synchronous>, transform_indices = @transform_6, window_bounds = array<i64: 3, 3>}, {pipeline_mode = #tpu.pipeline_mode<synchronous>, transform_indices = @transform_7, window_bounds = array<i64: 128, 3>}]} {
    %c0_i32 = arith.constant 0 : i32
    %0 = arith.cmpi eq, %arg0, %c0_i32 : i32
    %1 = arith.extui %0 : i1 to i32
    %c0_i32_0 = arith.constant 0 : i32
    %2 = arith.cmpi ne, %1, %c0_i32_0 : i32
    scf.if %2 {
      %cst_190 = arith.constant 0.000000e+00 : bf16
      %186 = vector.broadcast %cst_190 : bf16 to vector<2x10x10x32xbf16>
      %c0_191 = arith.constant 0 : index
      %c0_192 = arith.constant 0 : index
      %c0_193 = arith.constant 0 : index
      %c0_194 = arith.constant 0 : index
      %187 = vector.load %arg10[%c0_191, %c0_192, %c0_193, %c0_194] : memref<2x10x10x32xbf16, #tpu.memory_space<vmem>>, vector<2x10x10x32xbf16>
      tpu.vector_store %arg10[%c0_191, %c0_192, %c0_193, %c0_194], %186 {strides = array<i32>} : memref<2x10x10x32xbf16, #tpu.memory_space<vmem>>, vector<2x10x10x32xbf16>,
      %c0_195 = arith.constant 0 : index
      %c0_196 = arith.constant 0 : index
      %c0_197 = arith.constant 0 : index
      %c0_198 = arith.constant 0 : index
      %188 = vector.load %arg1[%c0_195, %c0_196, %c0_197, %c0_198] : memref<2x8x8x32xbf16, #tpu.memory_space<vmem>>, vector<2x8x8x32xbf16>
      %189 = arith.extf %188 : vector<2x8x8x32xbf16> to vector<2x8x8x32xf32>
      %c0_199 = arith.constant 0 : index
      %c0_200 = arith.constant 0 : index
      %c0_201 = arith.constant 0 : index
      %c0_202 = arith.constant 0 : index
      %190 = vector.load %arg9[%c0_199, %c0_200, %c0_201, %c0_202] : memref<2x8x8x32xf32, #tpu.memory_space<vmem>>, vector<2x8x8x32xf32>
      tpu.vector_store %arg9[%c0_199, %c0_200, %c0_201, %c0_202], %189 {strides = array<i32>} : memref<2x8x8x32xf32, #tpu.memory_space<vmem>>, vector<2x8x8x32xf32>,
    } else {
    }
    %c0 = arith.constant 0 : index
    %c0_1 = arith.constant 0 : index
    %c0_2 = arith.constant 0 : index
    %c0_3 = arith.constant 0 : index
    %3 = vector.load %arg9[%c0, %c0_1, %c0_2, %c0_3] : memref<2x8x8x32xf32, #tpu.memory_space<vmem>>, vector<2x8x8x32xf32>
    %4 = arith.truncf %3 : vector<2x8x8x32xf32> to vector<2x8x8x32xbf16>
    %c0_4 = arith.constant 0 : index
    %c1 = arith.constant 1 : index
    %c1_5 = arith.constant 1 : index
    %c0_6 = arith.constant 0 : index
    %5 = vector.load %arg10[%c0_4, %c1, %c1_5, %c0_6] : memref<2x10x10x32xbf16, #tpu.memory_space<vmem>>, vector<2x8x8x32xbf16>
    tpu.vector_store %arg10[%c0_4, %c1, %c1_5, %c0_6], %4 {strides = array<i32>} : memref<2x10x10x32xbf16, #tpu.memory_space<vmem>>, vector<2x8x8x32xbf16>,
    %c0_7 = arith.constant 0 : index
    %c0_8 = arith.constant 0 : index
    %c0_9 = arith.constant 0 : index
    %6 = vector.load %arg3[%c0_7, %c0_8, %c0_9] : memref<1x3x32xf32, #tpu.memory_space<vmem>>, vector<1x3x32xf32>
    %7 = vector.shape_cast %6 : vector<1x3x32xf32> to vector<3x32xf32>
    %c0_10 = arith.constant 0 : index
    %c0_11 = arith.constant 0 : index
    %c0_12 = arith.constant 0 : index
    %c0_13 = arith.constant 0 : index
    %8 = vector.load %arg10[%c0_10, %c0_11, %c0_12, %c0_13] : memref<2x10x10x32xbf16, #tpu.memory_space<vmem>>, vector<2x8x8x32xbf16>
    %9 = vector.shape_cast %8 : vector<2x8x8x32xbf16> to vector<128x32xbf16>
    %c0_14 = arith.constant 0 : index
    %c0_15 = arith.constant 0 : index
    %c0_16 = arith.constant 0 : index
    %c0_17 = arith.constant 0 : index
    %10 = vector.load %arg2[%c0_14, %c0_15, %c0_16, %c0_17] : memref<1x9x32x32xbf16, #tpu.memory_space<vmem>>, vector<1x1x32x32xbf16>
    %11 = vector.shape_cast %10 : vector<1x1x32x32xbf16> to vector<32x32xbf16>
    %cst = arith.constant dense<0.000000e+00> : vector<128x32xf32>
    %12 = tpu.matmul %9, %11, %cst {dimension_numbers = #tpu.dot_dimension_numbers<[1], [0], [0], [1], [0, 0, 1, 1], [], []>} : vector<128x32xbf16>, vector<32x32xbf16>, vector<128x32xf32> -> vector<128x32xf32>
    %c0_18 = arith.constant 0 : index
    %c0_19 = arith.constant 0 : index
    %c1_20 = arith.constant 1 : index
    %c0_21 = arith.constant 0 : index
    %13 = vector.load %arg10[%c0_18, %c0_19, %c1_20, %c0_21] : memref<2x10x10x32xbf16, #tpu.memory_space<vmem>>, vector<2x8x8x32xbf16>
    %14 = vector.shape_cast %13 : vector<2x8x8x32xbf16> to vector<128x32xbf16>
    %c0_22 = arith.constant 0 : index
    %c1_23 = arith.constant 1 : index
    %c0_24 = arith.constant 0 : index
    %c0_25 = arith.constant 0 : index
    %15 = vector.load %arg2[%c0_22, %c1_23, %c0_24, %c0_25] : memref<1x9x32x32xbf16, #tpu.memory_space<vmem>>, vector<1x1x32x32xbf16>
    %16 = vector.shape_cast %15 : vector<1x1x32x32xbf16> to vector<32x32xbf16>
    %cst_26 = arith.constant dense<0.000000e+00> : vector<128x32xf32>
    %17 = tpu.matmul %14, %16, %cst_26 {dimension_numbers = #tpu.dot_dimension_numbers<[1], [0], [0], [1], [0, 0, 1, 1], [], []>} : vector<128x32xbf16>, vector<32x32xbf16>, vector<128x32xf32> -> vector<128x32xf32>
    %18 = arith.addf %12, %17 : vector<128x32xf32>
    %c0_27 = arith.constant 0 : index
    %c0_28 = arith.constant 0 : index
    %c2 = arith.constant 2 : index
    %c0_29 = arith.constant 0 : index
    %19 = vector.load %arg10[%c0_27, %c0_28, %c2, %c0_29] : memref<2x10x10x32xbf16, #tpu.memory_space<vmem>>, vector<2x8x8x32xbf16>
    %20 = vector.shape_cast %19 : vector<2x8x8x32xbf16> to vector<128x32xbf16>
    %c0_30 = arith.constant 0 : index
    %c2_31 = arith.constant 2 : index
    %c0_32 = arith.constant 0 : index
    %c0_33 = arith.constant 0 : index
    %21 = vector.load %arg2[%c0_30, %c2_31, %c0_32, %c0_33] : memref<1x9x32x32xbf16, #tpu.memory_space<vmem>>, vector<1x1x32x32xbf16>
    %22 = vector.shape_cast %21 : vector<1x1x32x32xbf16> to vector<32x32xbf16>
    %cst_34 = arith.constant dense<0.000000e+00> : vector<128x32xf32>
    %23 = tpu.matmul %20, %22, %cst_34 {dimension_numbers = #tpu.dot_dimension_numbers<[1], [0], [0], [1], [0, 0, 1, 1], [], []>} : vector<128x32xbf16>, vector<32x32xbf16>, vector<128x32xf32> -> vector<128x32xf32>
    %24 = arith.addf %18, %23 : vector<128x32xf32>
    %c0_35 = arith.constant 0 : index
    %c1_36 = arith.constant 1 : index
    %c0_37 = arith.constant 0 : index
    %c0_38 = arith.constant 0 : index
    %25 = vector.load %arg10[%c0_35, %c1_36, %c0_37, %c0_38] : memref<2x10x10x32xbf16, #tpu.memory_space<vmem>>, vector<2x8x8x32xbf16>
    %26 = vector.shape_cast %25 : vector<2x8x8x32xbf16> to vector<128x32xbf16>
    %c0_39 = arith.constant 0 : index
    %c3 = arith.constant 3 : index
    %c0_40 = arith.constant 0 : index
    %c0_41 = arith.constant 0 : index
    %27 = vector.load %arg2[%c0_39, %c3, %c0_40, %c0_41] : memref<1x9x32x32xbf16, #tpu.memory_space<vmem>>, vector<1x1x32x32xbf16>
    %28 = vector.shape_cast %27 : vector<1x1x32x32xbf16> to vector<32x32xbf16>
    %cst_42 = arith.constant dense<0.000000e+00> : vector<128x32xf32>
    %29 = tpu.matmul %26, %28, %cst_42 {dimension_numbers = #tpu.dot_dimension_numbers<[1], [0], [0], [1], [0, 0, 1, 1], [], []>} : vector<128x32xbf16>, vector<32x32xbf16>, vector<128x32xf32> -> vector<128x32xf32>
    %30 = arith.addf %24, %29 : vector<128x32xf32>
    %c0_43 = arith.constant 0 : index
    %c1_44 = arith.constant 1 : index
    %c1_45 = arith.constant 1 : index
    %c0_46 = arith.constant 0 : index
    %31 = vector.load %arg10[%c0_43, %c1_44, %c1_45, %c0_46] : memref<2x10x10x32xbf16, #tpu.memory_space<vmem>>, vector<2x8x8x32xbf16>
    %32 = vector.shape_cast %31 : vector<2x8x8x32xbf16> to vector<128x32xbf16>
    %c0_47 = arith.constant 0 : index
    %c4 = arith.constant 4 : index
    %c0_48 = arith.constant 0 : index
    %c0_49 = arith.constant 0 : index
    %33 = vector.load %arg2[%c0_47, %c4, %c0_48, %c0_49] : memref<1x9x32x32xbf16, #tpu.memory_space<vmem>>, vector<1x1x32x32xbf16>
    %34 = vector.shape_cast %33 : vector<1x1x32x32xbf16> to vector<32x32xbf16>
    %cst_50 = arith.constant dense<0.000000e+00> : vector<128x32xf32>
    %35 = tpu.matmul %32, %34, %cst_50 {dimension_numbers = #tpu.dot_dimension_numbers<[1], [0], [0], [1], [0, 0, 1, 1], [], []>} : vector<128x32xbf16>, vector<32x32xbf16>, vector<128x32xf32> -> vector<128x32xf32>
    %36 = arith.addf %30, %35 : vector<128x32xf32>
    %c0_51 = arith.constant 0 : index
    %c1_52 = arith.constant 1 : index
    %c2_53 = arith.constant 2 : index
    %c0_54 = arith.constant 0 : index
    %37 = vector.load %arg10[%c0_51, %c1_52, %c2_53, %c0_54] : memref<2x10x10x32xbf16, #tpu.memory_space<vmem>>, vector<2x8x8x32xbf16>
    %38 = vector.shape_cast %37 : vector<2x8x8x32xbf16> to vector<128x32xbf16>
    %c0_55 = arith.constant 0 : index
    %c5 = arith.constant 5 : index
    %c0_56 = arith.constant 0 : index
    %c0_57 = arith.constant 0 : index
    %39 = vector.load %arg2[%c0_55, %c5, %c0_56, %c0_57] : memref<1x9x32x32xbf16, #tpu.memory_space<vmem>>, vector<1x1x32x32xbf16>
    %40 = vector.shape_cast %39 : vector<1x1x32x32xbf16> to vector<32x32xbf16>
    %cst_58 = arith.constant dense<0.000000e+00> : vector<128x32xf32>
    %41 = tpu.matmul %38, %40, %cst_58 {dimension_numbers = #tpu.dot_dimension_numbers<[1], [0], [0], [1], [0, 0, 1, 1], [], []>} : vector<128x32xbf16>, vector<32x32xbf16>, vector<128x32xf32> -> vector<128x32xf32>
    %42 = arith.addf %36, %41 : vector<128x32xf32>
    %c0_59 = arith.constant 0 : index
    %c2_60 = arith.constant 2 : index
    %c0_61 = arith.constant 0 : index
    %c0_62 = arith.constant 0 : index
    %43 = vector.load %arg10[%c0_59, %c2_60, %c0_61, %c0_62] : memref<2x10x10x32xbf16, #tpu.memory_space<vmem>>, vector<2x8x8x32xbf16>
    %44 = vector.shape_cast %43 : vector<2x8x8x32xbf16> to vector<128x32xbf16>
    %c0_63 = arith.constant 0 : index
    %c6 = arith.constant 6 : index
    %c0_64 = arith.constant 0 : index
    %c0_65 = arith.constant 0 : index
    %45 = vector.load %arg2[%c0_63, %c6, %c0_64, %c0_65] : memref<1x9x32x32xbf16, #tpu.memory_space<vmem>>, vector<1x1x32x32xbf16>
    %46 = vector.shape_cast %45 : vector<1x1x32x32xbf16> to vector<32x32xbf16>
    %cst_66 = arith.constant dense<0.000000e+00> : vector<128x32xf32>
    %47 = tpu.matmul %44, %46, %cst_66 {dimension_numbers = #tpu.dot_dimension_numbers<[1], [0], [0], [1], [0, 0, 1, 1], [], []>} : vector<128x32xbf16>, vector<32x32xbf16>, vector<128x32xf32> -> vector<128x32xf32>
    %48 = arith.addf %42, %47 : vector<128x32xf32>
    %c0_67 = arith.constant 0 : index
    %c2_68 = arith.constant 2 : index
    %c1_69 = arith.constant 1 : index
    %c0_70 = arith.constant 0 : index
    %49 = vector.load %arg10[%c0_67, %c2_68, %c1_69, %c0_70] : memref<2x10x10x32xbf16, #tpu.memory_space<vmem>>, vector<2x8x8x32xbf16>
    %50 = vector.shape_cast %49 : vector<2x8x8x32xbf16> to vector<128x32xbf16>
    %c0_71 = arith.constant 0 : index
    %c7 = arith.constant 7 : index
    %c0_72 = arith.constant 0 : index
    %c0_73 = arith.constant 0 : index
    %51 = vector.load %arg2[%c0_71, %c7, %c0_72, %c0_73] : memref<1x9x32x32xbf16, #tpu.memory_space<vmem>>, vector<1x1x32x32xbf16>
    %52 = vector.shape_cast %51 : vector<1x1x32x32xbf16> to vector<32x32xbf16>
    %cst_74 = arith.constant dense<0.000000e+00> : vector<128x32xf32>
    %53 = tpu.matmul %50, %52, %cst_74 {dimension_numbers = #tpu.dot_dimension_numbers<[1], [0], [0], [1], [0, 0, 1, 1], [], []>} : vector<128x32xbf16>, vector<32x32xbf16>, vector<128x32xf32> -> vector<128x32xf32>
    %54 = arith.addf %48, %53 : vector<128x32xf32>
    %c0_75 = arith.constant 0 : index
    %c2_76 = arith.constant 2 : index
    %c2_77 = arith.constant 2 : index
    %c0_78 = arith.constant 0 : index
    %55 = vector.load %arg10[%c0_75, %c2_76, %c2_77, %c0_78] : memref<2x10x10x32xbf16, #tpu.memory_space<vmem>>, vector<2x8x8x32xbf16>
    %56 = vector.shape_cast %55 : vector<2x8x8x32xbf16> to vector<128x32xbf16>
    %c0_79 = arith.constant 0 : index
    %c8 = arith.constant 8 : index
    %c0_80 = arith.constant 0 : index
    %c0_81 = arith.constant 0 : index
    %57 = vector.load %arg2[%c0_79, %c8, %c0_80, %c0_81] : memref<1x9x32x32xbf16, #tpu.memory_space<vmem>>, vector<1x1x32x32xbf16>
    %58 = vector.shape_cast %57 : vector<1x1x32x32xbf16> to vector<32x32xbf16>
    %cst_82 = arith.constant dense<0.000000e+00> : vector<128x32xf32>
    %59 = tpu.matmul %56, %58, %cst_82 {dimension_numbers = #tpu.dot_dimension_numbers<[1], [0], [0], [1], [0, 0, 1, 1], [], []>} : vector<128x32xbf16>, vector<32x32xbf16>, vector<128x32xf32> -> vector<128x32xf32>
    %60 = arith.addf %54, %59 : vector<128x32xf32>
    %61 = vector.extract_strided_slice %7 {offsets = [0, 0], sizes = [1, 32], strides = [1, 1]} : vector<3x32xf32> to vector<1x32xf32>
    %62 = vector.broadcast %61 : vector<1x32xf32> to vector<128x32xf32>
    %63 = arith.addf %60, %62 : vector<128x32xf32>
    %cst_83 = arith.constant dense<0.000000e+00> : vector<32xf32>
    %64 = vector.multi_reduction <add>, %63, %cst_83 [0] : vector<128x32xf32> to vector<32xf32>
    %65 = vector.shape_cast %64 : vector<32xf32> to vector<1x32xf32>
    %66 = arith.mulf %63, %63 : vector<128x32xf32>
    %cst_84 = arith.constant dense<0.000000e+00> : vector<32xf32>
    %67 = vector.multi_reduction <add>, %66, %cst_84 [0] : vector<128x32xf32> to vector<32xf32>
    %68 = vector.shape_cast %67 : vector<32xf32> to vector<1x32xf32>
    %cst_85 = arith.constant 7.812500e-03 : f32
    %69 = vector.broadcast %cst_85 : f32 to vector<1x32xf32>
    %70 = arith.mulf %65, %69 : vector<1x32xf32>
    %cst_86 = arith.constant 7.812500e-03 : f32
    %71 = vector.broadcast %cst_86 : f32 to vector<1x32xf32>
    %72 = arith.mulf %68, %71 : vector<1x32xf32>
    %73 = arith.mulf %70, %70 : vector<1x32xf32>
    %74 = arith.subf %72, %73 : vector<1x32xf32>
    %cst_87 = arith.constant 0.000000e+00 : f32
    %75 = vector.broadcast %cst_87 : f32 to vector<1x32xf32>
    %76 = arith.maximumf %74, %75 : vector<1x32xf32>
    %77 = vector.extract_strided_slice %7 {offsets = [1, 0], sizes = [1, 32], strides = [1, 1]} : vector<3x32xf32> to vector<1x32xf32>
    %cst_88 = arith.constant 9.99999974E-6 : f32
    %78 = vector.broadcast %cst_88 : f32 to vector<1x32xf32>
    %79 = arith.addf %76, %78 : vector<1x32xf32>
    %80 = math.rsqrt %79 : vector<1x32xf32>
    %81 = arith.mulf %77, %80 : vector<1x32xf32>
    %82 = vector.extract_strided_slice %7 {offsets = [2, 0], sizes = [1, 32], strides = [1, 1]} : vector<3x32xf32> to vector<1x32xf32>
    %83 = arith.mulf %70, %81 : vector<1x32xf32>
    %84 = arith.subf %82, %83 : vector<1x32xf32>
    %85 = vector.broadcast %81 : vector<1x32xf32> to vector<128x32xf32>
    %86 = arith.mulf %63, %85 : vector<128x32xf32>
    %87 = vector.broadcast %84 : vector<1x32xf32> to vector<128x32xf32>
    %88 = arith.addf %86, %87 : vector<128x32xf32>
    %cst_89 = arith.constant 0.000000e+00 : f32
    %89 = vector.broadcast %cst_89 : f32 to vector<128x32xf32>
    %90 = arith.maximumf %88, %89 : vector<128x32xf32>
    %91 = vector.shape_cast %90 : vector<128x32xf32> to vector<2x8x8x32xf32>
    %92 = arith.truncf %91 : vector<2x8x8x32xf32> to vector<2x8x8x32xbf16>
    %c0_90 = arith.constant 0 : index
    %c1_91 = arith.constant 1 : index
    %c1_92 = arith.constant 1 : index
    %c0_93 = arith.constant 0 : index
    %93 = vector.load %arg10[%c0_90, %c1_91, %c1_92, %c0_93] : memref<2x10x10x32xbf16, #tpu.memory_space<vmem>>, vector<2x8x8x32xbf16>
    tpu.vector_store %arg10[%c0_90, %c1_91, %c1_92, %c0_93], %92 {strides = array<i32>} : memref<2x10x10x32xbf16, #tpu.memory_space<vmem>>, vector<2x8x8x32xbf16>,
    %c0_94 = arith.constant 0 : index
    %c0_95 = arith.constant 0 : index
    %c0_96 = arith.constant 0 : index
    %94 = vector.load %arg5[%c0_94, %c0_95, %c0_96] : memref<1x3x32xf32, #tpu.memory_space<vmem>>, vector<1x3x32xf32>
    %95 = vector.shape_cast %94 : vector<1x3x32xf32> to vector<3x32xf32>
    %c0_97 = arith.constant 0 : index
    %c0_98 = arith.constant 0 : index
    %c0_99 = arith.constant 0 : index
    %c0_100 = arith.constant 0 : index
    %96 = vector.load %arg10[%c0_97, %c0_98, %c0_99, %c0_100] : memref<2x10x10x32xbf16, #tpu.memory_space<vmem>>, vector<2x8x8x32xbf16>
    %97 = vector.shape_cast %96 : vector<2x8x8x32xbf16> to vector<128x32xbf16>
    %c0_101 = arith.constant 0 : index
    %c0_102 = arith.constant 0 : index
    %c0_103 = arith.constant 0 : index
    %c0_104 = arith.constant 0 : index
    %98 = vector.load %arg4[%c0_101, %c0_102, %c0_103, %c0_104] : memref<1x9x32x32xbf16, #tpu.memory_space<vmem>>, vector<1x1x32x32xbf16>
    %99 = vector.shape_cast %98 : vector<1x1x32x32xbf16> to vector<32x32xbf16>
    %cst_105 = arith.constant dense<0.000000e+00> : vector<128x32xf32>
    %100 = tpu.matmul %97, %99, %cst_105 {dimension_numbers = #tpu.dot_dimension_numbers<[1], [0], [0], [1], [0, 0, 1, 1], [], []>} : vector<128x32xbf16>, vector<32x32xbf16>, vector<128x32xf32> -> vector<128x32xf32>
    %c0_106 = arith.constant 0 : index
    %c0_107 = arith.constant 0 : index
    %c1_108 = arith.constant 1 : index
    %c0_109 = arith.constant 0 : index
    %101 = vector.load %arg10[%c0_106, %c0_107, %c1_108, %c0_109] : memref<2x10x10x32xbf16, #tpu.memory_space<vmem>>, vector<2x8x8x32xbf16>
    %102 = vector.shape_cast %101 : vector<2x8x8x32xbf16> to vector<128x32xbf16>
    %c0_110 = arith.constant 0 : index
    %c1_111 = arith.constant 1 : index
    %c0_112 = arith.constant 0 : index
    %c0_113 = arith.constant 0 : index
    %103 = vector.load %arg4[%c0_110, %c1_111, %c0_112, %c0_113] : memref<1x9x32x32xbf16, #tpu.memory_space<vmem>>, vector<1x1x32x32xbf16>
    %104 = vector.shape_cast %103 : vector<1x1x32x32xbf16> to vector<32x32xbf16>
    %cst_114 = arith.constant dense<0.000000e+00> : vector<128x32xf32>
    %105 = tpu.matmul %102, %104, %cst_114 {dimension_numbers = #tpu.dot_dimension_numbers<[1], [0], [0], [1], [0, 0, 1, 1], [], []>} : vector<128x32xbf16>, vector<32x32xbf16>, vector<128x32xf32> -> vector<128x32xf32>
    %106 = arith.addf %100, %105 : vector<128x32xf32>
    %c0_115 = arith.constant 0 : index
    %c0_116 = arith.constant 0 : index
    %c2_117 = arith.constant 2 : index
    %c0_118 = arith.constant 0 : index
    %107 = vector.load %arg10[%c0_115, %c0_116, %c2_117, %c0_118] : memref<2x10x10x32xbf16, #tpu.memory_space<vmem>>, vector<2x8x8x32xbf16>
    %108 = vector.shape_cast %107 : vector<2x8x8x32xbf16> to vector<128x32xbf16>
    %c0_119 = arith.constant 0 : index
    %c2_120 = arith.constant 2 : index
    %c0_121 = arith.constant 0 : index
    %c0_122 = arith.constant 0 : index
    %109 = vector.load %arg4[%c0_119, %c2_120, %c0_121, %c0_122] : memref<1x9x32x32xbf16, #tpu.memory_space<vmem>>, vector<1x1x32x32xbf16>
    %110 = vector.shape_cast %109 : vector<1x1x32x32xbf16> to vector<32x32xbf16>
    %cst_123 = arith.constant dense<0.000000e+00> : vector<128x32xf32>
    %111 = tpu.matmul %108, %110, %cst_123 {dimension_numbers = #tpu.dot_dimension_numbers<[1], [0], [0], [1], [0, 0, 1, 1], [], []>} : vector<128x32xbf16>, vector<32x32xbf16>, vector<128x32xf32> -> vector<128x32xf32>
    %112 = arith.addf %106, %111 : vector<128x32xf32>
    %c0_124 = arith.constant 0 : index
    %c1_125 = arith.constant 1 : index
    %c0_126 = arith.constant 0 : index
    %c0_127 = arith.constant 0 : index
    %113 = vector.load %arg10[%c0_124, %c1_125, %c0_126, %c0_127] : memref<2x10x10x32xbf16, #tpu.memory_space<vmem>>, vector<2x8x8x32xbf16>
    %114 = vector.shape_cast %113 : vector<2x8x8x32xbf16> to vector<128x32xbf16>
    %c0_128 = arith.constant 0 : index
    %c3_129 = arith.constant 3 : index
    %c0_130 = arith.constant 0 : index
    %c0_131 = arith.constant 0 : index
    %115 = vector.load %arg4[%c0_128, %c3_129, %c0_130, %c0_131] : memref<1x9x32x32xbf16, #tpu.memory_space<vmem>>, vector<1x1x32x32xbf16>
    %116 = vector.shape_cast %115 : vector<1x1x32x32xbf16> to vector<32x32xbf16>
    %cst_132 = arith.constant dense<0.000000e+00> : vector<128x32xf32>
    %117 = tpu.matmul %114, %116, %cst_132 {dimension_numbers = #tpu.dot_dimension_numbers<[1], [0], [0], [1], [0, 0, 1, 1], [], []>} : vector<128x32xbf16>, vector<32x32xbf16>, vector<128x32xf32> -> vector<128x32xf32>
    %118 = arith.addf %112, %117 : vector<128x32xf32>
    %c0_133 = arith.constant 0 : index
    %c1_134 = arith.constant 1 : index
    %c1_135 = arith.constant 1 : index
    %c0_136 = arith.constant 0 : index
    %119 = vector.load %arg10[%c0_133, %c1_134, %c1_135, %c0_136] : memref<2x10x10x32xbf16, #tpu.memory_space<vmem>>, vector<2x8x8x32xbf16>
    %120 = vector.shape_cast %119 : vector<2x8x8x32xbf16> to vector<128x32xbf16>
    %c0_137 = arith.constant 0 : index
    %c4_138 = arith.constant 4 : index
    %c0_139 = arith.constant 0 : index
    %c0_140 = arith.constant 0 : index
    %121 = vector.load %arg4[%c0_137, %c4_138, %c0_139, %c0_140] : memref<1x9x32x32xbf16, #tpu.memory_space<vmem>>, vector<1x1x32x32xbf16>
    %122 = vector.shape_cast %121 : vector<1x1x32x32xbf16> to vector<32x32xbf16>
    %cst_141 = arith.constant dense<0.000000e+00> : vector<128x32xf32>
    %123 = tpu.matmul %120, %122, %cst_141 {dimension_numbers = #tpu.dot_dimension_numbers<[1], [0], [0], [1], [0, 0, 1, 1], [], []>} : vector<128x32xbf16>, vector<32x32xbf16>, vector<128x32xf32> -> vector<128x32xf32>
    %124 = arith.addf %118, %123 : vector<128x32xf32>
    %c0_142 = arith.constant 0 : index
    %c1_143 = arith.constant 1 : index
    %c2_144 = arith.constant 2 : index
    %c0_145 = arith.constant 0 : index
    %125 = vector.load %arg10[%c0_142, %c1_143, %c2_144, %c0_145] : memref<2x10x10x32xbf16, #tpu.memory_space<vmem>>, vector<2x8x8x32xbf16>
    %126 = vector.shape_cast %125 : vector<2x8x8x32xbf16> to vector<128x32xbf16>
    %c0_146 = arith.constant 0 : index
    %c5_147 = arith.constant 5 : index
    %c0_148 = arith.constant 0 : index
    %c0_149 = arith.constant 0 : index
    %127 = vector.load %arg4[%c0_146, %c5_147, %c0_148, %c0_149] : memref<1x9x32x32xbf16, #tpu.memory_space<vmem>>, vector<1x1x32x32xbf16>
    %128 = vector.shape_cast %127 : vector<1x1x32x32xbf16> to vector<32x32xbf16>
    %cst_150 = arith.constant dense<0.000000e+00> : vector<128x32xf32>
    %129 = tpu.matmul %126, %128, %cst_150 {dimension_numbers = #tpu.dot_dimension_numbers<[1], [0], [0], [1], [0, 0, 1, 1], [], []>} : vector<128x32xbf16>, vector<32x32xbf16>, vector<128x32xf32> -> vector<128x32xf32>
    %130 = arith.addf %124, %129 : vector<128x32xf32>
    %c0_151 = arith.constant 0 : index
    %c2_152 = arith.constant 2 : index
    %c0_153 = arith.constant 0 : index
    %c0_154 = arith.constant 0 : index
    %131 = vector.load %arg10[%c0_151, %c2_152, %c0_153, %c0_154] : memref<2x10x10x32xbf16, #tpu.memory_space<vmem>>, vector<2x8x8x32xbf16>
    %132 = vector.shape_cast %131 : vector<2x8x8x32xbf16> to vector<128x32xbf16>
    %c0_155 = arith.constant 0 : index
    %c6_156 = arith.constant 6 : index
    %c0_157 = arith.constant 0 : index
    %c0_158 = arith.constant 0 : index
    %133 = vector.load %arg4[%c0_155, %c6_156, %c0_157, %c0_158] : memref<1x9x32x32xbf16, #tpu.memory_space<vmem>>, vector<1x1x32x32xbf16>
    %134 = vector.shape_cast %133 : vector<1x1x32x32xbf16> to vector<32x32xbf16>
    %cst_159 = arith.constant dense<0.000000e+00> : vector<128x32xf32>
    %135 = tpu.matmul %132, %134, %cst_159 {dimension_numbers = #tpu.dot_dimension_numbers<[1], [0], [0], [1], [0, 0, 1, 1], [], []>} : vector<128x32xbf16>, vector<32x32xbf16>, vector<128x32xf32> -> vector<128x32xf32>
    %136 = arith.addf %130, %135 : vector<128x32xf32>
    %c0_160 = arith.constant 0 : index
    %c2_161 = arith.constant 2 : index
    %c1_162 = arith.constant 1 : index
    %c0_163 = arith.constant 0 : index
    %137 = vector.load %arg10[%c0_160, %c2_161, %c1_162, %c0_163] : memref<2x10x10x32xbf16, #tpu.memory_space<vmem>>, vector<2x8x8x32xbf16>
    %138 = vector.shape_cast %137 : vector<2x8x8x32xbf16> to vector<128x32xbf16>
    %c0_164 = arith.constant 0 : index
    %c7_165 = arith.constant 7 : index
    %c0_166 = arith.constant 0 : index
    %c0_167 = arith.constant 0 : index
    %139 = vector.load %arg4[%c0_164, %c7_165, %c0_166, %c0_167] : memref<1x9x32x32xbf16, #tpu.memory_space<vmem>>, vector<1x1x32x32xbf16>
    %140 = vector.shape_cast %139 : vector<1x1x32x32xbf16> to vector<32x32xbf16>
    %cst_168 = arith.constant dense<0.000000e+00> : vector<128x32xf32>
    %141 = tpu.matmul %138, %140, %cst_168 {dimension_numbers = #tpu.dot_dimension_numbers<[1], [0], [0], [1], [0, 0, 1, 1], [], []>} : vector<128x32xbf16>, vector<32x32xbf16>, vector<128x32xf32> -> vector<128x32xf32>
    %142 = arith.addf %136, %141 : vector<128x32xf32>
    %c0_169 = arith.constant 0 : index
    %c2_170 = arith.constant 2 : index
    %c2_171 = arith.constant 2 : index
    %c0_172 = arith.constant 0 : index
    %143 = vector.load %arg10[%c0_169, %c2_170, %c2_171, %c0_172] : memref<2x10x10x32xbf16, #tpu.memory_space<vmem>>, vector<2x8x8x32xbf16>
    %144 = vector.shape_cast %143 : vector<2x8x8x32xbf16> to vector<128x32xbf16>
    %c0_173 = arith.constant 0 : index
    %c8_174 = arith.constant 8 : index
    %c0_175 = arith.constant 0 : index
    %c0_176 = arith.constant 0 : index
    %145 = vector.load %arg4[%c0_173, %c8_174, %c0_175, %c0_176] : memref<1x9x32x32xbf16, #tpu.memory_space<vmem>>, vector<1x1x32x32xbf16>
    %146 = vector.shape_cast %145 : vector<1x1x32x32xbf16> to vector<32x32xbf16>
    %cst_177 = arith.constant dense<0.000000e+00> : vector<128x32xf32>
    %147 = tpu.matmul %144, %146, %cst_177 {dimension_numbers = #tpu.dot_dimension_numbers<[1], [0], [0], [1], [0, 0, 1, 1], [], []>} : vector<128x32xbf16>, vector<32x32xbf16>, vector<128x32xf32> -> vector<128x32xf32>
    %148 = arith.addf %142, %147 : vector<128x32xf32>
    %149 = vector.extract_strided_slice %95 {offsets = [0, 0], sizes = [1, 32], strides = [1, 1]} : vector<3x32xf32> to vector<1x32xf32>
    %150 = vector.broadcast %149 : vector<1x32xf32> to vector<128x32xf32>
    %151 = arith.addf %148, %150 : vector<128x32xf32>
    %cst_178 = arith.constant dense<0.000000e+00> : vector<32xf32>
    %152 = vector.multi_reduction <add>, %151, %cst_178 [0] : vector<128x32xf32> to vector<32xf32>
    %153 = vector.shape_cast %152 : vector<32xf32> to vector<1x32xf32>
    %154 = arith.mulf %151, %151 : vector<128x32xf32>
    %cst_179 = arith.constant dense<0.000000e+00> : vector<32xf32>
    %155 = vector.multi_reduction <add>, %154, %cst_179 [0] : vector<128x32xf32> to vector<32xf32>
    %156 = vector.shape_cast %155 : vector<32xf32> to vector<1x32xf32>
    %cst_180 = arith.constant 7.812500e-03 : f32
    %157 = vector.broadcast %cst_180 : f32 to vector<1x32xf32>
    %158 = arith.mulf %153, %157 : vector<1x32xf32>
    %cst_181 = arith.constant 7.812500e-03 : f32
    %159 = vector.broadcast %cst_181 : f32 to vector<1x32xf32>
    %160 = arith.mulf %156, %159 : vector<1x32xf32>
    %161 = arith.mulf %158, %158 : vector<1x32xf32>
    %162 = arith.subf %160, %161 : vector<1x32xf32>
    %cst_182 = arith.constant 0.000000e+00 : f32
    %163 = vector.broadcast %cst_182 : f32 to vector<1x32xf32>
    %164 = arith.maximumf %162, %163 : vector<1x32xf32>
    %165 = vector.extract_strided_slice %95 {offsets = [1, 0], sizes = [1, 32], strides = [1, 1]} : vector<3x32xf32> to vector<1x32xf32>
    %cst_183 = arith.constant 9.99999974E-6 : f32
    %166 = vector.broadcast %cst_183 : f32 to vector<1x32xf32>
    %167 = arith.addf %164, %166 : vector<1x32xf32>
    %168 = math.rsqrt %167 : vector<1x32xf32>
    %169 = arith.mulf %165, %168 : vector<1x32xf32>
    %170 = vector.extract_strided_slice %95 {offsets = [2, 0], sizes = [1, 32], strides = [1, 1]} : vector<3x32xf32> to vector<1x32xf32>
    %171 = arith.mulf %158, %169 : vector<1x32xf32>
    %172 = arith.subf %170, %171 : vector<1x32xf32>
    %173 = vector.broadcast %169 : vector<1x32xf32> to vector<128x32xf32>
    %174 = arith.mulf %151, %173 : vector<128x32xf32>
    %175 = vector.broadcast %172 : vector<1x32xf32> to vector<128x32xf32>
    %176 = arith.addf %174, %175 : vector<128x32xf32>
    %177 = vector.shape_cast %3 : vector<2x8x8x32xf32> to vector<128x32xf32>
    %178 = arith.addf %176, %177 : vector<128x32xf32>
    %cst_184 = arith.constant 0.000000e+00 : f32
    %179 = vector.broadcast %cst_184 : f32 to vector<128x32xf32>
    %180 = arith.maximumf %178, %179 : vector<128x32xf32>
    %181 = vector.shape_cast %180 : vector<128x32xf32> to vector<2x8x8x32xf32>
    %c0_185 = arith.constant 0 : index
    %c0_186 = arith.constant 0 : index
    %c0_187 = arith.constant 0 : index
    %c0_188 = arith.constant 0 : index
    %182 = vector.load %arg9[%c0_185, %c0_186, %c0_187, %c0_188] : memref<2x8x8x32xf32, #tpu.memory_space<vmem>>, vector<2x8x8x32xf32>
    tpu.vector_store %arg9[%c0_185, %c0_186, %c0_187, %c0_188], %181 {strides = array<i32>} : memref<2x8x8x32xf32, #tpu.memory_space<vmem>>, vector<2x8x8x32xf32>,
    %c1_i32 = arith.constant 1 : i32
    %183 = arith.cmpi eq, %arg0, %c1_i32 : i32
    %184 = arith.extui %183 : i1 to i32
    %c0_i32_189 = arith.constant 0 : i32
    %185 = arith.cmpi ne, %184, %c0_i32_189 : i32
    scf.if %185 {
      %c0_190 = arith.constant 0 : index
      %c0_191 = arith.constant 0 : index
      %186 = vector.load %arg7[%c0_190, %c0_191] : memref<3x3xf32, #tpu.memory_space<vmem>>, vector<3x3xf32>
      %187 = arith.truncf %180 : vector<128x32xf32> to vector<128x32xbf16>
      %c0_192 = arith.constant 0 : index
      %c0_193 = arith.constant 0 : index
      %188 = vector.load %arg6[%c0_192, %c0_193] : memref<32x3xbf16, #tpu.memory_space<vmem>>, vector<32x3xbf16>
      %cst_194 = arith.constant dense<0.000000e+00> : vector<128x3xf32>
      %189 = tpu.matmul %187, %188, %cst_194 {dimension_numbers = #tpu.dot_dimension_numbers<[1], [0], [0], [1], [0, 0, 1, 1], [], []>} : vector<128x32xbf16>, vector<32x3xbf16>, vector<128x3xf32> -> vector<128x3xf32>
      %190 = vector.extract_strided_slice %186 {offsets = [0, 0], sizes = [1, 3], strides = [1, 1]} : vector<3x3xf32> to vector<1x3xf32>
      %191 = vector.broadcast %190 : vector<1x3xf32> to vector<128x3xf32>
      %192 = arith.addf %189, %191 : vector<128x3xf32>
      %cst_195 = arith.constant dense<0.000000e+00> : vector<3xf32>
      %193 = vector.multi_reduction <add>, %192, %cst_195 [0] : vector<128x3xf32> to vector<3xf32>
      %194 = vector.shape_cast %193 : vector<3xf32> to vector<1x3xf32>
      %195 = arith.mulf %192, %192 : vector<128x3xf32>
      %cst_196 = arith.constant dense<0.000000e+00> : vector<3xf32>
      %196 = vector.multi_reduction <add>, %195, %cst_196 [0] : vector<128x3xf32> to vector<3xf32>
      %197 = vector.shape_cast %196 : vector<3xf32> to vector<1x3xf32>
      %cst_197 = arith.constant 7.812500e-03 : f32
      %198 = vector.broadcast %cst_197 : f32 to vector<1x3xf32>
      %199 = arith.mulf %194, %198 : vector<1x3xf32>
      %cst_198 = arith.constant 7.812500e-03 : f32
      %200 = vector.broadcast %cst_198 : f32 to vector<1x3xf32>
      %201 = arith.mulf %197, %200 : vector<1x3xf32>
      %202 = arith.mulf %199, %199 : vector<1x3xf32>
      %203 = arith.subf %201, %202 : vector<1x3xf32>
      %cst_199 = arith.constant 0.000000e+00 : f32
      %204 = vector.broadcast %cst_199 : f32 to vector<1x3xf32>
      %205 = arith.maximumf %203, %204 : vector<1x3xf32>
      %206 = vector.extract_strided_slice %186 {offsets = [1, 0], sizes = [1, 3], strides = [1, 1]} : vector<3x3xf32> to vector<1x3xf32>
      %cst_200 = arith.constant 9.99999974E-6 : f32
      %207 = vector.broadcast %cst_200 : f32 to vector<1x3xf32>
      %208 = arith.addf %205, %207 : vector<1x3xf32>
      %209 = math.rsqrt %208 : vector<1x3xf32>
      %210 = arith.mulf %206, %209 : vector<1x3xf32>
      %211 = vector.extract_strided_slice %186 {offsets = [2, 0], sizes = [1, 3], strides = [1, 1]} : vector<3x3xf32> to vector<1x3xf32>
      %212 = arith.mulf %199, %210 : vector<1x3xf32>
      %213 = arith.subf %211, %212 : vector<1x3xf32>
      %214 = vector.broadcast %210 : vector<1x3xf32> to vector<128x3xf32>
      %215 = arith.mulf %192, %214 : vector<128x3xf32>
      %216 = vector.broadcast %213 : vector<1x3xf32> to vector<128x3xf32>
      %217 = arith.addf %215, %216 : vector<128x3xf32>
      %cst_201 = arith.constant 0.000000e+00 : f32
      %218 = vector.broadcast %cst_201 : f32 to vector<128x3xf32>
      %219 = arith.maximumf %217, %218 : vector<128x3xf32>
      %c0_202 = arith.constant 0 : index
      %c0_203 = arith.constant 0 : index
      %220 = vector.load %arg8[%c0_202, %c0_203] : memref<128x3xf32, #tpu.memory_space<vmem>>, vector<128x3xf32>
      tpu.vector_store %arg8[%c0_202, %c0_203], %219 {strides = array<i32>} : memref<128x3xf32, #tpu.memory_space<vmem>>, vector<128x3xf32>,
    } else {
    }
    return
  }
  func.func @transform_0(%arg0: i32) -> (i32, i32, i32, i32) {
    %c0_i32 = arith.constant 0 : i32
    %c0_i32_0 = arith.constant 0 : i32
    %c0_i32_1 = arith.constant 0 : i32
    %c0_i32_2 = arith.constant 0 : i32
    %c0_i32_3 = arith.constant 0 : i32
    return %c0_i32, %c0_i32_0, %c0_i32_1, %c0_i32_2 : i32, i32, i32, i32
  }
  func.func @transform_1(%arg0: i32) -> (i32, i32, i32, i32) {
    %c0_i32 = arith.constant 0 : i32
    %c0_i32_0 = arith.constant 0 : i32
    %c0_i32_1 = arith.constant 0 : i32
    %c0_i32_2 = arith.constant 0 : i32
    return %arg0, %c0_i32, %c0_i32_0, %c0_i32_1 : i32, i32, i32, i32
  }
  func.func @transform_2(%arg0: i32) -> (i32, i32, i32) {
    %c0_i32 = arith.constant 0 : i32
    %c0_i32_0 = arith.constant 0 : i32
    %c0_i32_1 = arith.constant 0 : i32
    return %arg0, %c0_i32, %c0_i32_0 : i32, i32, i32
  }
  func.func @transform_3(%arg0: i32) -> (i32, i32, i32, i32) {
    %c0_i32 = arith.constant 0 : i32
    %c0_i32_0 = arith.constant 0 : i32
    %c0_i32_1 = arith.constant 0 : i32
    %c0_i32_2 = arith.constant 0 : i32
    return %arg0, %c0_i32, %c0_i32_0, %c0_i32_1 : i32, i32, i32, i32
  }
  func.func @transform_4(%arg0: i32) -> (i32, i32, i32) {
    %c0_i32 = arith.constant 0 : i32
    %c0_i32_0 = arith.constant 0 : i32
    %c0_i32_1 = arith.constant 0 : i32
    return %arg0, %c0_i32, %c0_i32_0 : i32, i32, i32
  }
  func.func @transform_5(%arg0: i32) -> (i32, i32) {
    %c0_i32 = arith.constant 0 : i32
    %c0_i32_0 = arith.constant 0 : i32
    %c0_i32_1 = arith.constant 0 : i32
    return %c0_i32, %c0_i32_0 : i32, i32
  }
  func.func @transform_6(%arg0: i32) -> (i32, i32) {
    %c0_i32 = arith.constant 0 : i32
    %c0_i32_0 = arith.constant 0 : i32
    %c0_i32_1 = arith.constant 0 : i32
    return %c0_i32, %c0_i32_0 : i32, i32
  }
  func.func @transform_7(%arg0: i32) -> (i32, i32) {
    %c0_i32 = arith.constant 0 : i32
    %c0_i32_0 = arith.constant 0 : i32
    %c0_i32_1 = arith.constant 0 : i32
    return %c0_i32, %c0_i32_0 : i32, i32
  }
}

module attributes {stable_mosaic.version = 11 : i64} {
  func.func @_heads_fc_kernel(%arg0: memref<2x128xf32, #tpu.memory_space<vmem>>, %arg1: memref<2x64xf32, #tpu.memory_space<vmem>>, %arg2: memref<128x16xbf16, #tpu.memory_space<vmem>>, %arg3: memref<1x16xf32, #tpu.memory_space<vmem>>, %arg4: memref<64x256xbf16, #tpu.memory_space<vmem>>, %arg5: memref<1x256xf32, #tpu.memory_space<vmem>>, %arg6: memref<256x1xbf16, #tpu.memory_space<vmem>>, %arg7: memref<1x1xf32, #tpu.memory_space<vmem>>, %arg8: memref<2x16xf32, #tpu.memory_space<vmem>>, %arg9: memref<2x1xf32, #tpu.memory_space<vmem>>) attributes {dimension_semantics = [], scalar_prefetch = 0 : i64, scratch_operands = 0 : i64, tpu.core_type = #tpu.core_type<tc>} {
    %c0 = arith.constant 0 : index
    %c0_0 = arith.constant 0 : index
    %0 = vector.load %arg0[%c0, %c0_0] : memref<2x128xf32, #tpu.memory_space<vmem>>, vector<2x128xf32>
    %1 = arith.truncf %0 : vector<2x128xf32> to vector<2x128xbf16>
    %c0_1 = arith.constant 0 : index
    %c0_2 = arith.constant 0 : index
    %2 = vector.load %arg2[%c0_1, %c0_2] : memref<128x16xbf16, #tpu.memory_space<vmem>>, vector<128x16xbf16>
    %cst = arith.constant dense<0.000000e+00> : vector<2x16xf32>
    %3 = tpu.matmul %1, %2, %cst {dimension_numbers = #tpu.dot_dimension_numbers<[1], [0], [0], [1], [0, 0, 1, 1], [], []>} : vector<2x128xbf16>, vector<128x16xbf16>, vector<2x16xf32> -> vector<2x16xf32>
    %c0_3 = arith.constant 0 : index
    %c0_4 = arith.constant 0 : index
    %4 = vector.load %arg3[%c0_3, %c0_4] : memref<1x16xf32, #tpu.memory_space<vmem>>, vector<1x16xf32>
    %5 = vector.broadcast %4 : vector<1x16xf32> to vector<2x16xf32>
    %6 = arith.addf %3, %5 : vector<2x16xf32>
    %c0_5 = arith.constant 0 : index
    %c0_6 = arith.constant 0 : index
    %7 = vector.load %arg8[%c0_5, %c0_6] : memref<2x16xf32, #tpu.memory_space<vmem>>, vector<2x16xf32>
    tpu.vector_store %arg8[%c0_5, %c0_6], %6 {strides = array<i32>} : memref<2x16xf32, #tpu.memory_space<vmem>>, vector<2x16xf32>,
    %c0_7 = arith.constant 0 : index
    %c0_8 = arith.constant 0 : index
    %8 = vector.load %arg1[%c0_7, %c0_8] : memref<2x64xf32, #tpu.memory_space<vmem>>, vector<2x64xf32>
    %9 = arith.truncf %8 : vector<2x64xf32> to vector<2x64xbf16>
    %c0_9 = arith.constant 0 : index
    %c0_10 = arith.constant 0 : index
    %10 = vector.load %arg4[%c0_9, %c0_10] : memref<64x256xbf16, #tpu.memory_space<vmem>>, vector<64x256xbf16>
    %cst_11 = arith.constant dense<0.000000e+00> : vector<2x256xf32>
    %11 = tpu.matmul %9, %10, %cst_11 {dimension_numbers = #tpu.dot_dimension_numbers<[1], [0], [0], [1], [0, 0, 1, 1], [], []>} : vector<2x64xbf16>, vector<64x256xbf16>, vector<2x256xf32> -> vector<2x256xf32>
    %c0_12 = arith.constant 0 : index
    %c0_13 = arith.constant 0 : index
    %12 = vector.load %arg5[%c0_12, %c0_13] : memref<1x256xf32, #tpu.memory_space<vmem>>, vector<1x256xf32>
    %13 = vector.broadcast %12 : vector<1x256xf32> to vector<2x256xf32>
    %14 = arith.addf %11, %13 : vector<2x256xf32>
    %cst_14 = arith.constant 0.000000e+00 : f32
    %15 = vector.broadcast %cst_14 : f32 to vector<2x256xf32>
    %16 = arith.maximumf %14, %15 : vector<2x256xf32>
    %17 = arith.truncf %16 : vector<2x256xf32> to vector<2x256xbf16>
    %c0_15 = arith.constant 0 : index
    %c0_16 = arith.constant 0 : index
    %18 = vector.load %arg6[%c0_15, %c0_16] : memref<256x1xbf16, #tpu.memory_space<vmem>>, vector<256x1xbf16>
    %cst_17 = arith.constant dense<0.000000e+00> : vector<2x1xf32>
    %19 = tpu.matmul %17, %18, %cst_17 {dimension_numbers = #tpu.dot_dimension_numbers<[1], [0], [0], [1], [0, 0, 1, 1], [], []>} : vector<2x256xbf16>, vector<256x1xbf16>, vector<2x1xf32> -> vector<2x1xf32>
    %c0_18 = arith.constant 0 : index
    %c0_19 = arith.constant 0 : index
    %20 = vector.load %arg7[%c0_18, %c0_19] : memref<1x1xf32, #tpu.memory_space<vmem>>, vector<1x1xf32>
    %21 = vector.broadcast %20 : vector<1x1xf32> to vector<2x1xf32>
    %22 = arith.addf %19, %21 : vector<2x1xf32>
    %23 = math.tanh %22 : vector<2x1xf32>
    %c0_20 = arith.constant 0 : index
    %c0_21 = arith.constant 0 : index
    %24 = vector.load %arg9[%c0_20, %c0_21] : memref<2x1xf32, #tpu.memory_space<vmem>>, vector<2x1xf32>
    tpu.vector_store %arg9[%c0_20, %c0_21], %23 {strides = array<i32>} : memref<2x1xf32, #tpu.memory_space<vmem>>, vector<2x1xf32>,
    return
  }
}

</mosaic_0001>

<bundles_post_ra>
// kernel: policy_forward.5
= control target key start
LH: loop header
LB: loop body
LE: loop exit
PB: predicated region body
PF: predicated region fallthrough
CT: control target
= control target key end

     0   :  { %s798_s0 = inlined_call_operand.vmem [shape: f32[2,128], index: 0, kind: input, shape index: {}]   ;;  %s799_s1 = inlined_call_operand.vmem [shape: f32[2,64], index: 1, kind: input, shape index: {}]   ;;  %s800_s2 = inlined_call_operand.vmem [shape: bf16[128,16], index: 2, kind: input, shape index: {}]   ;;  %s801_s3 = inlined_call_operand.vmem [shape: f32[1,16], index: 3, kind: input, shape index: {}]   ;;  %s802_s4 = inlined_call_operand.vmem [shape: bf16[64,256], index: 4, kind: input, shape index: {}]   ;;  %s803_s5 = inlined_call_operand.vmem [shape: f32[1,256], index: 5, kind: input, shape index: {}]   ;;  %s804_s6 = inlined_call_operand.vmem [shape: bf16[256,1], index: 6, kind: input, shape index: {}]   ;;  %s805_s7 = inlined_call_operand.<no memory space> [shape: f32[1,1], index: 7, kind: input, shape index: {}]   ;;  %s806_s8 = inlined_call_operand.hbm [shape: f32[2,16], index: 8, kind: output, shape index: {0}]   ;;  %s807_s9 = inlined_call_operand.vmem [shape: f32[2,1], index: 9, kind: output, shape index: {1}]  }
   0x1   :  { %v15_v0 = vstv %s805_s7 }
   0x2   :  { %16 = vst [vmem:[#allocation2] sm:$0x1] %v15_v0 }
   0x3   :  { %v547_v1 = vld [vmem:[%s802_s4 + $0x4] ss:$8 sps:$4 sm:$0xff]   ;;  %v549_v2 = vld [vmem:[%s802_s4] ss:$8 sps:$4 sm:$0xff]   ;;  %v609_v3 = vmov 0   ;;  %v610_v5 = vmov 0.0  }
   0x4   :  { %248 = vmatprep.mubr.bf16.mxu1 %v609_v3  ;;  %216 = vmatprep.subr.bf16.mxu1 %v547_v1  ;;  %v550_v4 = vld [vmem:[%s802_s4 + $0x14] ss:$8 sps:$4 sm:$0xff]   ;;  %v552_v6 = vld [vmem:[%s802_s4 + $0x10] ss:$8 sps:$4 sm:$0xff]   ;;  %v553_v7 = vld [vmem:[%s802_s4 + $0x24] ss:$8 sps:$4 sm:$0xff]  }
   0x5   :  { %523 = vmatprep.subr.bf16.mxu0 %v610_v5  ;;  %217 = vmatpush1.bf16.msra.mxu1 %v549_v2  ;;  %v555_v8 = vld [vmem:[%s802_s4 + $0x20] ss:$8 sps:$4 sm:$0xff]   ;;  %v556_v9 = vld [vmem:[%s802_s4 + $0x34] ss:$8 sps:$4 sm:$0xff]   ;;  %v558_v10 = vld [vmem:[%s802_s4 + $0x30] ss:$8 sps:$4 sm:$0xff]  }
   0x6   :  { %218 = vmatprep.subr.bf16.mxu1 %v550_v4  ;;  %v150_v11 = vld [vmem:[%s799_s1] sm:$0x3]  ;;  %vm212_vm0 = vcmask 523264   ;;  %v568_v16 = vld [vmem:[%s800_s2 + $0x8] sm:$0xff]   ;;  %v571_v18 = vld [vmem:[%s800_s2 + $0x10] sm:$0xff]  }
   0x7   :  { %v559_v12 = vld [vmem:[%s804_s6 + $0x40] sm:$0xff]   ;;  %v151_v14 = vpack.c.bf16 %v150_v11, %v150_v11  ;;  %v561_v17 = vld [vmem:[%s804_s6 + $0x48] sm:$0xff]   ;;  %v563_v20 = vld [vmem:[%s804_s6 + $0x50] sm:$0xff]  }
   0x8   :  { %v565_v13 = vld [vmem:[%s800_s2] sm:$0xff]   ;;  %v562_v19 = vld [vmem:[%s804_s6 + $0x8] sm:$0xff]   ;;  %v564_v21 = vld [vmem:[%s804_s6 + $0x10] sm:$0xff]  }
   0x9   :  { %219 = vmatpush1.bf16.msra.mxu1 %v552_v6  ;;  %v560_v15 = vld [vmem:[%s804_s6] sm:$0xff]   ;;  %524 = vmatpush3.bf16.msra.mxu0 %v565_v13  ;;  %v574_v22 = vld [vmem:[%s800_s2 + $0x18] sm:$0xff]  }
   0xa   :  { %220 = vmatprep.subr.bf16.mxu1 %v553_v7  ;;  %525 = vmatprep.subr.bf16.mxu0 %v610_v5  ;;  %v566_v23 = vld [vmem:[%s804_s6 + $0x58] sm:$0xff]  }
   0xb   :  { %v567_v24 = vld [vmem:[%s804_s6 + $0x18] sm:$0xff]  }
   0xd   :  { %221 = vmatpush1.bf16.msra.mxu1 %v555_v8  ;;  %526 = vmatpush3.bf16.msra.mxu0 %v568_v16 }
   0xe   :  { %222 = vmatprep.subr.bf16.mxu1 %v556_v9  ;;  %527 = vmatprep.subr.bf16.mxu0 %v610_v5 }
  0x11   :  { %223 = vmatpush1.bf16.msra.mxu1 %v558_v10  ;;  %528 = vmatpush3.bf16.msra.mxu0 %v571_v18 }
  0x12   :  { %501 = vmatprep.subr.bf16.mxu1 %v559_v12  ;;  %529 = vmatprep.subr.bf16.mxu0 %v610_v5 }
  0x14   :  { %474 = vmatmul.mubr.msk.bf16.vlgmr.msra.gmra.mrb[0].mxu1 %vm212_vm0, %v151_v14 }
  0x15   :  { %502 = vmatpush3.bf16.msra.mxu1 %v560_v15  ;;  %530 = vmatpush3.bf16.msra.mxu0 %v574_v22 }
  0x16   :  { %503 = vmatprep.subr.bf16.mxu1 %v561_v17  ;;  %531 = vmatprep.subr.bf16.mxu0 %v610_v5 }
  0x19   :  { %504 = vmatpush3.bf16.msra.mxu1 %v562_v19 }
  0x1a   :  { %505 = vmatprep.subr.bf16.mxu1 %v563_v20 }
  0x1d   :  { %506 = vmatpush3.bf16.msra.mxu1 %v564_v21 }
  0x1e   :  { %17 = vsyncpa [#allocation4], 0  ;;  %507 = vmatprep.subr.bf16.mxu1 %v566_v23  ;;  %v569_v25 = vld [vmem:[%s804_s6 + $0x60] sm:$0xff]   ;;  %v572_v27 = vld [vmem:[%s804_s6 + $0x68] sm:$0xff]   ;;  %vm611_vm1 = vmmov 0   ;;  %v162_v39 = vlaneseq  ;;  %vm148_vm2 = vcmask 123904  }
  0x1f   :  { %v570_v26 = vld [vmem:[%s804_s6 + $0x20] sm:$0xff]   ;;  %v573_v28 = vld [vmem:[%s804_s6 + $0x28] sm:$0xff]   ;;  %v575_v29 = vld [vmem:[%s804_s6 + $0x70] sm:$0xff]   ;;  %539 = vmatprep.mubr.msk.bf16.mxu0 %vm611_vm1, %v610_v5 }
  0x20   :  { %v576_v30 = vld [vmem:[%s804_s6 + $0x30] sm:$0xff]   ;;  %v577_v31 = vld [vmem:[%s800_s2 + $0x20] sm:$0xff]   ;;  %v578_v32 = vld [vmem:[%s804_s6 + $0x78] sm:$0xff]   ;;  %v163_v40 = vshrl.u32 %v162_v39, 7 }
  0x21   :  { %508 = vmatpush3.bf16.msra.mxu1 %v567_v24  ;;  %532 = vmatpush3.bf16.msra.mxu0 %v577_v31  ;;  %v579_v33 = vld [vmem:[%s804_s6 + $0x38] sm:$0xff]   ;;  %v580_v34 = vld [vmem:[%s800_s2 + $0x28] sm:$0xff]   ;;  %v581_v35 = vld [vmem:[%s800_s2 + $0x30] sm:$0xff]  }
  0x22   :  { %509 = vmatprep.subr.bf16.mxu1 %v569_v25  ;;  %533 = vmatprep.subr.bf16.mxu0 %v610_v5  ;;  %v582_v36 = vld [vmem:[%s800_s2 + $0x38] sm:$0xff]   ;;  %v35_v37 = vld [vmem:[%s798_s0] sm:$0x3]  ;;  %v164_v41 = vsub.s32 0, %v163_v40  ;;  %v168_v43 = vsub.s32 1, %v163_v40 }
  0x23   :  { %v36_v38 = vpack.c.bf16 %v35_v37, %v35_v37  ;;  %v160_v42 = vld [vmem:[%s803_s5] sm:$0x3]  ;;  %s612_s5 = smov [#allocation3]  }
  0x24   :  { %v165_v44 = vrot.slane %v160_v42, %v164_v41  ;;  %v169_v45 = vrot.slane %v160_v42, %v168_v43  ;;  %v457_v59 = vld [vmem:[%s801_s3] ss:$0 sm:$0xff]  ;;  %s445_s10 = sshll.u32 %s612_s5, 4  ;;  %s446_s10 = int_to_ptr.vmem [resolvable:$true] %s445_s10 }
  0x25   :  { %510 = vmatpush3.bf16.msra.mxu1 %v570_v26  ;;  %534 = vmatpush3.bf16.msra.mxu0 %v580_v34  ;;  %s585_s11 = scalar_lea.vmem %s446_s10, 32  ;;  %p590_p1 = scmp.lt.s32.totalorder %s446_s10, %s446_s10 }
  0x26   :  { %511 = vmatprep.subr.bf16.mxu1 %v572_v27  ;;  %535 = vmatprep.subr.bf16.mxu0 %v610_v5  ;;  %p586_p0 = scmp.ne.s32.totalorder %s446_s10, %s585_s11  ;;  %p591_p2 = scmp.lt.s32.totalorder %s585_s11, %s585_s11 }
  0x28   :  { %p592_p3 = por %p591_p2, %p590_p1 }
  0x29   :  { %512 = vmatpush3.bf16.msra.mxu1 %v573_v28  ;;  %536 = vmatpush3.bf16.msra.mxu0 %v581_v35 }
  0x2a   :  { %513 = vmatprep.subr.bf16.mxu1 %v575_v29  ;;  %537 = vmatprep.subr.bf16.mxu0 %v610_v5  ;;  %p593_p4 = pnand %p592_p3, %p586_p0 }
  0x2d   :  { %514 = vmatpush3.bf16.msra.mxu1 %v576_v30  ;;  %538 = vmatpush3.bf16.msra.mxu0 %v582_v36 }
  0x2e   :  { %515 = vmatprep.subr.bf16.mxu1 %v578_v32 }
  0x30   :  { %540 = vmatmul.mubr.bf16.vlgmr.msra.gmra.mrb[0].mxu0 %v36_v38 }
  0x31   :  { %516 = vmatpush3.bf16.msra.mxu1 %v579_v33 }
  0xe7   :  { %v250_v46 = vpop.f32.mrb[0].mxu1 }
  0xe8   :  { %v251_v47 = vadd.f32 %v250_v46, %v165_v44  ;;  %v252_v48 = vpop.f32.mrb[1].mxu1 }
  0xe9   :  { %v253_v49 = vadd.f32 %v252_v48, %v169_v45  ;;  %v254_v50 = vpop.f32.mrb[2].mxu1 }
  0xea   :  { %v257_v51 = vmax.f32 %v251_v47, 0.0  ;;  %v255_v52 = vpop.f32.mrb[3].mxu1 }
  0xeb   :  { %v258_v53 = vmax.f32 %v253_v49, 0.0 }
  0xec   :  { %v259_v55 = vpack.c.bf16 %v257_v51, %v257_v51 }
  0xed   :  { %v260_v54 = vpack.c.bf16 %v258_v53, %v258_v53 }
  0xef   :  { %428 = vmatprep.mubr.bf16.mxu1 %v260_v54 }
  0xf0   :  { %429 = vmatmul.mubr.bf16.vlgmr.msra.gmra.mrb[4].mxu1 %v259_v55 }
 0x103   :  { %v142_v56 = vpop.f32.mrb[0].mxu0 }
 0x104   :  { %v541_v57 = vpop.f32.mrb[1].mxu0  ;;  %v143_v61 = vadd.f32 %v457_v59, %v142_v56 }
 0x105   :  { %v145_v58 = vpop.f32.mrb[2].mxu0 }
 0x106   :  { %v542_v60 = vpop.f32.mrb[3].mxu0  ;;  %149 = vst.msk [vmem:[#allocation3] sm:$0x3] %vm148_vm2, %v143_v61 }
 0x107   :  { %596 = shalt.err (!%p593_p4)
}
 0x108   :  { %s597_s4 = scalar_lea.hbm %s806_s8, 32 }
 0x109   :  { %p598_p5 = scmp.ne.s32.totalorder %s806_s8, %s597_s4  ;;  %p601_p6 = scmp.lt.u32.totalorder %s597_s4, %s806_s8 }
 0x10b   :  { %p603_p7 = pnand %p601_p6, %p598_p5 }
 0x10d   :  { %606 = shalt.err (!%p603_p7)
}
 0x10e   :  { %448 = dma.vmem_to_hbm [thread:$0]  %s446_s10, 32, %s806_s8, [#allocation4]   ;;  %v475_v63 = vld [vmem:[#allocation2] ss:$0 sm:$0xff]  ;;  %vm437_vm3 = vcmask 1024  }
 0x1c3   :  { %v517_v62 = vpop.f32.mrb[4].mxu1 }
 0x1c4   :  { %v518_v0 = vpop.f32.mrb[5].mxu1 }
 0x1c5   :  { %v519_v1 = vadd.f32 %v518_v0, %v517_v62  ;;  %v520_v2 = vpop.f32.mrb[6].mxu1 }
 0x1c6   :  { %v521_v3 = vpop.f32.mrb[7].mxu1 }
 0x1c7   :  { %v431_v4 = vadd.f32 %v519_v1, %v475_v63 }
 0x1c9   :  { %583 = vtanh.f32 %v431_v4 }
 0x1d3   :  { %v584_v5 = vpop.eup %583 }
 0x1d4   :  { %438 = vst.msk [vmem:[%s807_s9] sm:$0x3] %vm437_vm3, %v584_v5 }
 0x1d5   :  { %607 = dma.done.wait [#allocation4], 32  }
 0x1d6   :  { %608 = vsyncadd [#allocation4], 4294967264 }
 0x1d7   :  { %456 = vsyncpa [#allocation4], 1 }

// kernel: policy_forward.3
= control target key start
LH: loop header
LB: loop body
LE: loop exit
PB: predicated region body
PF: predicated region fallthrough
CT: control target
= control target key end

     0   :  { %vm15_vm0 = vcmask 27648   ;;  %v2799_v0 = vmov 0   ;;  %vm17_vm1 = vcmask 24576   ;;  %vm299_vm2 = vsmask.f32 7938  ;;  %s2800_s28 = smov 12   ;;  %s3815_s0 = inlined_call_operand.vmem [shape: f32[2,8,8,4], index: 0, kind: input, shape index: {}]   ;;  %s3816_s1 = inlined_call_operand.vmem [shape: bf16[128,32], index: 1, kind: input, shape index: {}]   ;;  %s3817_s2 = inlined_call_operand.vmem [shape: f32[3,32], index: 2, kind: input, shape index: {}]   ;;  %s3818_s3 = inlined_call_operand.vmem [shape: bf16[2,8,8,32], index: 3, kind: output, shape index: {}]  }
   0x1   :  { %19 = vst.msk [vmem:[#allocation2 + $0x8] sm:$0xf] %vm15_vm0, %v2799_v0  ;;  %21 = vst.msk [vmem:[#allocation2 + $0x10] sm:$0xf] %vm15_vm0, %v2799_v0  ;;  %v57_v1 = vld [vmem:[%s3815_s0] sm:$0xff]  ;;  %v58_v2 = vld [vmem:[%s3815_s0 + $0x8] sm:$0xff] }
   0x2   :  { %16 = vst.msk [vmem:[#allocation2] sm:$0xf] %vm15_vm0, %v2799_v0  ;;  %23 = vst.msk [vmem:[#allocation2 + $0x18] sm:$0xf] %vm15_vm0, %v2799_v0  ;;  %v2676_v3 = vpack.c.bf16 %v57_v1, %v57_v1  ;;  %v2677_v4 = vpack.c.bf16 %v58_v2, %v58_v2  ;;  %v59_v5 = vld [vmem:[%s3815_s0 + $0x10] sm:$0xff]  ;;  %v60_v6 = vld [vmem:[%s3815_s0 + $0x18] sm:$0xff] }
   0x3   :  { %25 = vst.msk [vmem:[#allocation2 + $0x20] sm:$0xf] %vm15_vm0, %v2799_v0  ;;  %27 = vst.msk [vmem:[#allocation2 + $0x28] sm:$0xf] %vm15_vm0, %v2799_v0  ;;  %v61_v7 = vld [vmem:[%s3815_s0 + $0x20] sm:$0xff]  ;;  %v2678_v8 = vpack.c.bf16 %v59_v5, %v59_v5  ;;  %v2679_v9 = vpack.c.bf16 %v60_v6, %v60_v6  ;;  %vm862_vm4 = vcmask 1042432  }
   0x4   :  { %29 = vst.msk [vmem:[#allocation2 + $0x30] sm:$0xf] %vm15_vm0, %v2799_v0  ;;  %31 = vst.msk [vmem:[#allocation2 + $0x38] sm:$0xf] %vm15_vm0, %v2799_v0  ;;  %v2680_v10 = vpack.c.bf16 %v61_v7, %v61_v7  ;;  %vm305_vm3 = vsmask.f32 256 }
   0x5   :  { %33 = vst.msk [vmem:[#allocation2 + $0x40] sm:$0xf] %vm15_vm0, %v2799_v0  ;;  %35 = vst.msk [vmem:[#allocation2 + $0x48] sm:$0xf] %vm15_vm0, %v2799_v0  ;;  %v138_v11 = vshrl.u32 %v2676_v3, 16  ;;  %v141_v12 = vshll.u32 %v2676_v3, 16 }
   0x6   :  { %37 = vst.msk [vmem:[#allocation2 + $0x50] sm:$0xf] %vm15_vm0, %v2799_v0  ;;  %39 = vst.msk [vmem:[#allocation2 + $0x58] sm:$0xf] %vm15_vm0, %v2799_v0  ;;  %v146_v13 = vshrl.u32 %v2677_v4, 16  ;;  %v149_v14 = vshll.u32 %v2677_v4, 16 }
   0x7   :  { %41 = vst.msk [vmem:[#allocation2 + $0x60] sm:$0xf] %vm15_vm0, %v2799_v0  ;;  %43 = vst.msk [vmem:[#allocation2 + $0x68] sm:$0xf] %vm15_vm0, %v2799_v0  ;;  %v154_v15 = vshrl.u32 %v2678_v8, 16  ;;  %v157_v16 = vshll.u32 %v2678_v8, 16 }
   0x8   :  { %45 = vst.msk [vmem:[#allocation2 + $0x70] sm:$0xf] %vm15_vm0, %v2799_v0  ;;  %47 = vst.msk [vmem:[#allocation2 + $0x78] sm:$0xf] %vm15_vm0, %v2799_v0  ;;  %v162_v17 = vshrl.u32 %v2679_v9, 16  ;;  %v165_v18 = vshll.u32 %v2679_v9, 16 }
   0x9   :  { %49 = vst.msk [vmem:[#allocation2 + $0x80] sm:$0xf] %vm15_vm0, %v2799_v0  ;;  %51 = vst.msk [vmem:[#allocation2 + $0x88] sm:$0xf] %vm15_vm0, %v2799_v0  ;;  %v140_v19 = vrot.slane %v138_v11, 7  ;;  %v148_v20 = vrot.slane %v146_v13, 7 }
   0xa   :  { %53 = vst.msk [vmem:[#allocation2 + $0x90] sm:$0xf] %vm15_vm0, %v2799_v0  ;;  %55 = vst.msk [vmem:[#allocation2 + $0x98] sm:$0xf] %vm15_vm0, %v2799_v0  ;;  %v170_v21 = vshrl.u32 %v2680_v10, 16  ;;  %v62_v22 = vld [vmem:[%s3815_s0 + $0x28] sm:$0xff] }
   0xb   :  { %20 = vst.msk [vmem:[#allocation2 + $0xc] sm:$0x1] %vm17_vm1, %v2799_v0  ;;  %22 = vst.msk [vmem:[#allocation2 + $0x14] sm:$0x1] %vm17_vm1, %v2799_v0  ;;  %v156_v24 = vrot.slane %v154_v15, 7  ;;  %v164_v25 = vrot.slane %v162_v17, 7  ;;  %v143_v27 = vor.u32 %v141_v12, %v140_v19  ;;  %v151_v29 = vor.u32 %v149_v14, %v148_v20 }
   0xc   :  { %18 = vst.msk [vmem:[#allocation2 + $0x4] sm:$0x1] %vm17_vm1, %v2799_v0  ;;  %24 = vst.msk [vmem:[#allocation2 + $0x1c] sm:$0x1] %vm17_vm1, %v2799_v0  ;;  %v173_v26 = vshll.u32 %v2680_v10, 16  ;;  %vm863_vm6 = vcmask 1046532   ;;  %v2681_v40 = vpack.c.bf16 %v62_v22, %v62_v22 }
   0xd   :  { %26 = vst.msk [vmem:[#allocation2 + $0x24] sm:$0x1] %vm17_vm1, %v2799_v0  ;;  %28 = vst.msk [vmem:[#allocation2 + $0x2c] sm:$0x1] %vm17_vm1, %v2799_v0  ;;  %v144_v28 = vrot.slane %v140_v19, 4  ;;  %v152_v30 = vrot.slane %v148_v20, 4  ;;  %v159_v34 = vor.u32 %v157_v16, %v156_v24  ;;  %v167_v36 = vor.u32 %v165_v18, %v164_v25 }
   0xe   :  { %30 = vst.msk [vmem:[#allocation2 + $0x34] sm:$0x1] %vm17_vm1, %v2799_v0  ;;  %32 = vst.msk [vmem:[#allocation2 + $0x3c] sm:$0x1] %vm17_vm1, %v2799_v0  ;;  %v301_v31 = vld [vmem:[#allocation2 + $0x8] sm:$0xf] }
   0xf   :  { %34 = vst.msk [vmem:[#allocation2 + $0x44] sm:$0x1] %vm17_vm1, %v2799_v0  ;;  %36 = vst.msk [vmem:[#allocation2 + $0x4c] sm:$0x1] %vm17_vm1, %v2799_v0  ;;  %v310_v32 = vld [vmem:[#allocation2 + $0x10] sm:$0xf] }
  0x10   :  { %38 = vst.msk [vmem:[#allocation2 + $0x54] sm:$0x1] %vm17_vm1, %v2799_v0  ;;  %40 = vst.msk [vmem:[#allocation2 + $0x5c] sm:$0x1] %vm17_vm1, %v2799_v0  ;;  %v160_v35 = vrot.slane %v156_v24, 4  ;;  %v63_v39 = vld [vmem:[%s3815_s0 + $0x30] sm:$0xff] }
  0x11   :  { %42 = vst.msk [vmem:[#allocation2 + $0x64] sm:$0x1] %vm17_vm1, %v2799_v0  ;;  %44 = vst.msk [vmem:[#allocation2 + $0x6c] sm:$0x1] %vm17_vm1, %v2799_v0  ;;  %v316_v37 = vld [vmem:[#allocation2 + $0x18] sm:$0xf]  ;;  %v2958_v58 = vpack.c.bf16 %v63_v39, %v63_v39 }
  0x12   :  { %46 = vst.msk [vmem:[#allocation2 + $0x74] sm:$0x1] %vm17_vm1, %v2799_v0  ;;  %48 = vst.msk [vmem:[#allocation2 + $0x7c] sm:$0x1] %vm17_vm1, %v2799_v0  ;;  %v322_v38 = vld [vmem:[#allocation2 + $0x20] sm:$0xf] }
  0x13   :  { %50 = vst.msk [vmem:[#allocation2 + $0x84] sm:$0x1] %vm17_vm1, %v2799_v0  ;;  %52 = vst.msk [vmem:[#allocation2 + $0x8c] sm:$0x1] %vm17_vm1, %v2799_v0  ;;  %v168_v43 = vrot.slane %v164_v25, 4  ;;  %v172_v44 = vrot.slane %v170_v21, 7 }
  0x14   :  { %54 = vst.msk [vmem:[#allocation2 + $0x94] sm:$0x1] %vm17_vm1, %v2799_v0  ;;  %56 = vst.msk [vmem:[#allocation2 + $0x9c] sm:$0x1] %vm17_vm1, %v2799_v0  ;;  %v307_v45 = vld [vmem:[#allocation2 + $0xc] sm:$0x1] }
  0x15   :  { %vm2928_vm5 = vmand %vm15_vm0, %vm299_vm2  ;;  %v64_v46 = vld [vmem:[%s3815_s0 + $0x38] sm:$0xff]  ;;  %v328_v49 = vld [vmem:[#allocation2 + $0x28] sm:$0xf]  ;;  %v175_v53 = vor.u32 %v173_v26, %v172_v44  ;;  %v176_v54 = vrot.slane %v172_v44, 4  ;;  %v178_v6 = vshrl.u32 %v2681_v40, 16  ;;  %v181_v14 = vshll.u32 %v2681_v40, 16 }
  0x16   :  { %vm2934_vm7 = vmand %vm17_vm1, %vm305_vm3  ;;  %v302_v41 = vsel %vm2928_vm5, %v143_v27, %v301_v31  ;;  %v311_v42 = vsel %vm2928_vm5, %v151_v29, %v310_v32  ;;  %v317_v47 = vsel %vm2928_vm5, %v159_v34, %v316_v37  ;;  %v323_v48 = vsel %vm2928_vm5, %v167_v36, %v322_v38  ;;  %v313_v51 = vld [vmem:[#allocation2 + $0x14] sm:$0x1]  ;;  %v2954_v52 = vld [vmem:[#allocation2] sm:$0xe]  ;;  %s2801_s29 = smov 24   ;;  %s2802_s30 = smov 20  }
  0x17   :  { %303 = vst [vmem:[#allocation2 + $0x8] sm:$0xf] %v302_v41  ;;  %312 = vst [vmem:[#allocation2 + $0x10] sm:$0xf] %v311_v42  ;;  %v308_v50 = vsel %vm2934_vm7, %v144_v28, %v307_v45  ;;  %v314_v55 = vsel %vm2934_vm7, %v152_v30, %v313_v51  ;;  %v319_v56 = vld [vmem:[#allocation2 + $0x1c] sm:$0x1]  ;;  %v2962_v1 = vpack.c.bf16 %v64_v46, %v64_v46 }
  0x18   :  { %318 = vst [vmem:[#allocation2 + $0x18] sm:$0xf] %v317_v47  ;;  %324 = vst [vmem:[#allocation2 + $0x20] sm:$0xf] %v323_v48  ;;  %v482_v57 = vld [vmem:[#allocation2] sm:$0xf]  ;;  %v320_v60 = vsel %vm2934_vm7, %v160_v35, %v319_v56  ;;  %v329_v2 = vsel %vm2928_vm5, %v175_v53, %v328_v49 }
  0x19   :  { %309 = vst [vmem:[#allocation2 + $0xc] sm:$0x1] %v308_v50  ;;  %315 = vst [vmem:[#allocation2 + $0x14] sm:$0x1] %v314_v55  ;;  %v799_v59 = vld [vmem:[#allocation2 + $0x4] sm:$0x1] }
  0x1a   :  { %v483_v61 = vld [vmem:[#allocation2 + $0x4] sm:$0x1]  ;;  %v518_v62 = vshrl.u32 %v482_v57, 16  ;;  %v521_v63 = vshll.u32 %v482_v57, 16  ;;  %321 = vst [vmem:[#allocation2 + $0x1c] sm:$0x1] %v320_v60  ;;  %vm2973_vm8 = vmor %vm862_vm4, %vm863_vm6 }
  0x1b   :  { %v527_v3 = vshll.u32 %v483_v61, 16  ;;  %v325_v4 = vld [vmem:[#allocation2 + $0x24] sm:$0x1]  ;;  %v331_v5 = vld [vmem:[#allocation2 + $0x2c] sm:$0x1]  ;;  %v2564_v7 = vrot.slane %v2954_v52, 9 }
  0x1c   :  { %330 = vst [vmem:[#allocation2 + $0x28] sm:$0xf] %v329_v2  ;;  %v520_v8 = vrot.slane %v518_v62, 4  ;;  %v523_v9 = vrot.slane %v521_v63, 5  ;;  %v326_v10 = vsel %vm2934_vm7, %v168_v43, %v325_v4  ;;  %v867_v11 = vrot.slane %v799_v59, 5  ;;  %s2803_s4 = smov 8  }
  0x1d   :  { %327 = vst [vmem:[#allocation2 + $0x24] sm:$0x1] %v326_v10  ;;  %v332_v12 = vsel %vm2934_vm7, %v176_v54, %v331_v5  ;;  %v180_v13 = vrot.slane %v178_v6, 7  ;;  %vm514_vm9 = vsmask.f32 3328  ;;  %v2977_v16 = vrot.slane %v527_v3, 5 }
  0x1e   :  { %vm515_vm10 = vsmask.f32 7440  ;;  %333 = vst [vmem:[#allocation2 + $0x2c] sm:$0x1] %v332_v12  ;;  %v186_v17 = vshrl.u32 %v2958_v58, 16  ;;  %v189_v18 = vshll.u32 %v2958_v58, 16  ;;  %v524_v25 = vor.u32 %v523_v9, %v520_v8 }
  0x1f   :  { %v334_v19 = vld [vmem:[#allocation2 + $0x30] sm:$0xf]  ;;  %v194_v20 = vshrl.u32 %v2962_v1, 16  ;;  %v183_v22 = vor.u32 %v181_v14, %v180_v13  ;;  %v2766_v24 = vld [vmem:[#allocation2 + $0x18] ss:$8 sps:$4 sm:$0xff]   ;;  %v184_v42 = vrot.slane %v180_v13, 4  ;;  %v868_v44 = vsel %vm2973_vm8, %v2564_v7, %v867_v11  ;;  %vm3004_vm11 = vmor %vm514_vm9, %vm515_vm10 }
  0x20   :  { %v2765_v21 = vld [vmem:[#allocation2 + $0x8] ss:$8 sps:$4 sm:$0xff]   ;;  %1044 = vrot.lane.b32.xlu1 %v2766_v24, %s2800_s28  ;;  %v1389_v29 = vld [vmem:[#allocation2 + $0xc] sm:$0x1]  ;;  %v337_v30 = vld [vmem:[#allocation2 + $0x34] sm:$0x1] }
  0x21   :  { %1042 = vrot.lane.b32.xlu0 %v2765_v21, %s2800_s28  ;;  %v2767_v26 = vld [vmem:[#allocation2 + $0x10] ss:$8 sps:$4 sm:$0xff]   ;;  %v335_v27 = vsel %vm2928_vm5, %v183_v22, %v334_v19  ;;  %v1388_v28 = vld [vmem:[#allocation2 + $0x8] sm:$0xe]  ;;  %v1391_v34 = vld [vmem:[#allocation2 + $0x14] sm:$0x1]  ;;  %v338_v54 = vsel %vm2934_vm7, %v184_v42, %v337_v30 }
  0x22   :  { %336 = vst [vmem:[#allocation2 + $0x30] sm:$0xf] %v335_v27  ;;  %v1390_v32 = vld [vmem:[#allocation2 + $0x10] sm:$0xe]  ;;  %v2604_v35 = vrot.slane %v1388_v28, 9  ;;  %v1454_v36 = vrot.slane %v1389_v29, 5 }
  0x23   :  { %v2768_v31 = vld [vmem:[#allocation2 + $0x20] ss:$8 sps:$4 sm:$0xff]   ;;  %v2605_v37 = vrot.slane %v1390_v32, 9  ;;  %v2986_v38 = vrot.slane %v524_v25, 4  ;;  %v1458_v39 = vrot.slane %v1391_v34, 5  ;;  %s2804_s5 = smov 32  }
  0x24   :  { %v800_v40 = vld [vmem:[#allocation2 + $0x8] sm:$0xe]  ;;  %v801_v41 = vld [vmem:[#allocation2 + $0xc] sm:$0x1]  ;;  %1632 = vrot.lane.b32.xlu1 %v2768_v31, %s2801_s29  ;;  %v1455_v43 = vsel %vm2973_vm8, %v2604_v35, %v1454_v36  ;;  %v1976_v47 = vld [vmem:[#allocation2 + $0x10] sm:$0xe] }
  0x25   :  { %1630 = vrot.lane.b32.xlu0 %v2767_v26, %s2801_s29  ;;  %v2565_v45 = vrot.slane %v800_v40, 9  ;;  %v871_v46 = vrot.slane %v801_v41, 5  ;;  %v1977_v48 = vld [vmem:[#allocation2 + $0x14] sm:$0x1]  ;;  %v1459_v49 = vsel %vm2973_vm8, %v2605_v37, %v1458_v39  ;;  %v1978_v50 = vld [vmem:[#allocation2 + $0x18] sm:$0xe]  ;;  %v530_v25 = vsel %vm3004_vm11, %v2986_v38, %v2977_v16 }
  0x26   :  { %v1979_v51 = vld [vmem:[#allocation2 + $0x1c] sm:$0x1]  ;;  %v2644_v52 = vrot.slane %v1976_v47, 9  ;;  %v2042_v53 = vrot.slane %v1977_v48, 5  ;;  %v2620_v55 = vcombine.low %v1455_v43, %v1459_v49  ;;  %v2645_v57 = vrot.slane %v1978_v50, 9  ;;  %s2805_s6 = smov 4  }
  0x27   :  { %v872_v56 = vsel %vm2973_vm8, %v2565_v45, %v871_v46  ;;  %v2046_v59 = vrot.slane %v1979_v51, 5  ;;  %v802_v60 = vld [vmem:[#allocation2 + $0x10] sm:$0xe]  ;;  %v803_v61 = vld [vmem:[#allocation2 + $0x14] sm:$0x1]  ;;  %s2806_s7 = smov 16  }
  0x28   :  { %339 = vst [vmem:[#allocation2 + $0x34] sm:$0x1] %v338_v54  ;;  %v2580_v62 = vcombine.low %v868_v44, %v872_v56  ;;  %v2043_v63 = vsel %vm2973_vm8, %v2644_v52, %v2042_v53  ;;  %v804_v2 = vld [vmem:[#allocation2 + $0x18] sm:$0xe]  ;;  %v805_v3 = vld [vmem:[#allocation2 + $0x1c] sm:$0x1] }
  0x29   :  { %v2566_v4 = vrot.slane %v802_v60, 9  ;;  %v875_v5 = vrot.slane %v803_v61, 5  ;;  %1540 = vrot.lane.b32.xlu0 %v2620_v55, %s2802_s30  ;;  %v2047_v7 = vsel %vm2973_vm8, %v2645_v57, %v2046_v59  ;;  %v2567_v8 = vrot.slane %v804_v2, 9  ;;  %v484_v10 = vld [vmem:[#allocation2 + $0x8] sm:$0xf]  ;;  %s2807_s8 = smov 28  }
  0x2a   :  { %v879_v9 = vrot.slane %v805_v3, 5  ;;  %v485_v11 = vld [vmem:[#allocation2 + $0xc] sm:$0x1]  ;;  %953 = vrot.lane.b32.xlu1 %v2580_v62, %s2803_s4  ;;  %v2660_v12 = vcombine.low %v2043_v63, %v2047_v7  ;;  %v532_v14 = vshrl.u32 %v484_v10, 16  ;;  %v535_v19 = vshll.u32 %v484_v10, 16 }
  0x2b   :  { %v876_v13 = vsel %vm2973_vm8, %v2566_v4, %v875_v5  ;;  %v1392_v21 = vld [vmem:[#allocation2 + $0x18] sm:$0xe]  ;;  %v1393_v22 = vld [vmem:[#allocation2 + $0x1c] sm:$0x1]  ;;  %v541_v26 = vshll.u32 %v485_v11, 16  ;;  %vm400_vm12 = vcmask 1047840  }
  0x2c   :  { %v880_v24 = vsel %vm2973_vm8, %v2567_v8, %v879_v9  ;;  %v1394_v27 = vld [vmem:[#allocation2 + $0x20] sm:$0xe]  ;;  %v1395_v28 = vld [vmem:[#allocation2 + $0x24] sm:$0x1]  ;;  %v2606_v29 = vrot.slane %v1392_v21, 9  ;;  %v534_v31 = vrot.slane %v532_v14, 4 }
  0x2d   :  { %v2581_v30 = vcombine.low %v876_v13, %v880_v24  ;;  %v537_v32 = vrot.slane %v535_v19, 5  ;;  %v1462_v34 = vrot.slane %v1393_v22, 5  ;;  %v486_v35 = vld [vmem:[#allocation2 + $0x10] sm:$0xf]  ;;  %2128 = vrot.lane.b32.xlu0 %v2660_v12, %s2804_s5  ;;  %v543_v36 = vrot.slane %v541_v26, 5  ;;  %401 = vst.msk [vmem:[#allocation3] sm:$0xff] %vm400_vm12, %v2799_v0 }
  0x2e   :  { %v2607_v37 = vrot.slane %v1394_v27, 9  ;;  %v1466_v39 = vrot.slane %v1395_v28, 5  ;;  %v487_v40 = vld [vmem:[#allocation2 + $0x14] sm:$0x1]  ;;  %v546_v41 = vshrl.u32 %v486_v35, 16  ;;  %v549_v44 = vshll.u32 %v486_v35, 16 }
  0x2f   :  { %955 = vrot.lane.b32.xlu1 %v2581_v30, %s2803_s4  ;;  %v538_v16 = vor.u32 %v537_v32, %v534_v31  ;;  %v1463_v38 = vsel %vm2973_vm8, %v2606_v29, %v1462_v34  ;;  %v488_v42 = vld [vmem:[#allocation2 + $0x18] sm:$0xf]  ;;  %v489_v43 = vld [vmem:[#allocation2 + $0x1c] sm:$0x1]  ;;  %v555_v45 = vshll.u32 %v487_v40, 16  ;;  %vm473_vm13 = vcmask 31744  }
  0x30   :  { %v1467_v46 = vsel %vm2973_vm8, %v2607_v37, %v1466_v39  ;;  %v548_v47 = vrot.slane %v546_v41, 4  ;;  %v560_v48 = vshrl.u32 %v488_v42, 16  ;;  %v563_v49 = vshll.u32 %v488_v42, 16  ;;  %v1079_v50 = vld [vmem:[#allocation2 + $0x18] sm:$0xf]  ;;  %402 = vst.msk [vmem:[#allocation3 + $0x8] sm:$0xff] %vm400_vm12, %v2799_v0 }
  0x31   :  { %v539_v51 = vrot.slane %v538_v16, 4  ;;  %v2621_v52 = vcombine.low %v1463_v38, %v1467_v46  ;;  %v551_v53 = vrot.slane %v549_v44, 5  ;;  %v557_v54 = vrot.slane %v555_v45, 5  ;;  %v1080_v55 = vld [vmem:[#allocation2 + $0x1c] sm:$0x1]  ;;  %403 = vst.msk [vmem:[#allocation3 + $0x10] sm:$0xff] %vm400_vm12, %v2799_v0 }
  0x32   :  { %v562_v56 = vrot.slane %v560_v48, 4  ;;  %v565_v57 = vrot.slane %v563_v49, 5  ;;  %v569_v59 = vshll.u32 %v489_v43, 16  ;;  %v1081_v60 = vld [vmem:[#allocation2 + $0x20] sm:$0xf]  ;;  %v1136_v61 = vshrl.u32 %v1079_v50, 16 }
  0x33   :  { %v544_v62 = vsel %vm3004_vm11, %v539_v51, %v543_v36  ;;  %1542 = vrot.lane.b32.xlu1 %v2621_v52, %s2802_s30  ;;  %v552_v63 = vor.u32 %v551_v53, %v548_v47  ;;  %v1082_v2 = vld [vmem:[#allocation2 + $0x24] sm:$0x1]  ;;  %v1139_v3 = vshll.u32 %v1079_v50, 16  ;;  %v1145_v4 = vshll.u32 %v1080_v55, 16  ;;  %v1075_v5 = vld [vmem:[#allocation2 + $0x8] sm:$0xf] }
  0x34   :  { %v2556_v7 = vcombine.low %v530_v25, %v544_v62  ;;  %v566_v8 = vor.u32 %v565_v57, %v562_v56  ;;  %v571_v9 = vrot.slane %v569_v59, 5  ;;  %v1138_v10 = vrot.slane %v1136_v61, 4  ;;  %v1076_v24 = vld [vmem:[#allocation2 + $0xc] sm:$0x1]  ;;  %v1077_v29 = vld [vmem:[#allocation2 + $0x10] sm:$0xf] }
  0x35   :  { %v553_v11 = vrot.slane %v552_v63, 4  ;;  %v1141_v12 = vrot.slane %v1139_v3, 5  ;;  %v1147_v13 = vrot.slane %v1145_v4, 5  ;;  %v1150_v14 = vshrl.u32 %v1081_v60, 16  ;;  %v1078_v30 = vld [vmem:[#allocation2 + $0x14] sm:$0x1] }
  0x36   :  { %765 = vrot.lane.b32.xlu0 %v2556_v7, %s2805_s6  ;;  %v567_v19 = vrot.slane %v566_v8, 4  ;;  %v1153_v21 = vshll.u32 %v1081_v60, 16  ;;  %v1159_v22 = vshll.u32 %v1082_v2, 16  ;;  %v1108_v26 = vshrl.u32 %v1075_v5, 16  ;;  %v1667_v37 = vld [vmem:[#allocation2 + $0x20] sm:$0xf] }
  0x37   :  { %v558_v27 = vsel %vm3004_vm11, %v553_v11, %v557_v54  ;;  %v1142_v28 = vor.u32 %v1141_v12, %v1138_v10  ;;  %v1152_v25 = vrot.slane %v1150_v14, 4  ;;  %v1111_v31 = vshll.u32 %v1075_v5, 16  ;;  %v1668_v45 = vld [vmem:[#allocation2 + $0x24] sm:$0x1]  ;;  %v1669_v49 = vld [vmem:[#allocation2 + $0x28] sm:$0xf] }
  0x38   :  { %v572_v32 = vsel %vm3004_vm11, %v567_v19, %v571_v9  ;;  %v1155_v34 = vrot.slane %v1153_v21, 5  ;;  %v1161_v35 = vrot.slane %v1159_v22, 5  ;;  %v1110_v36 = vrot.slane %v1108_v26, 4  ;;  %v1670_v56 = vld [vmem:[#allocation2 + $0x2c] sm:$0x1]  ;;  %404 = vst.msk [vmem:[#allocation3 + $0x18] sm:$0xff] %vm400_vm12, %v2799_v0 }
  0x39   :  { %v2557_v39 = vcombine.low %v558_v27, %v572_v32  ;;  %v1143_v40 = vrot.slane %v1142_v28, 4  ;;  %v1113_v41 = vrot.slane %v1111_v31, 5  ;;  %v1117_v16 = vshll.u32 %v1076_v24, 16  ;;  %v1663_v3 = vld [vmem:[#allocation2 + $0x10] sm:$0xf]  ;;  %405 = vst.msk [vmem:[#allocation3 + $0x20] sm:$0xff] %vm400_vm12, %v2799_v0 }
  0x3a   :  { %v1156_v38 = vor.u32 %v1155_v34, %v1152_v25  ;;  %v1122_v42 = vshrl.u32 %v1077_v29, 16  ;;  %v1125_v43 = vshll.u32 %v1077_v29, 16  ;;  %v1131_v44 = vshll.u32 %v1078_v30, 16  ;;  %v1664_v4 = vld [vmem:[#allocation2 + $0x14] sm:$0x1]  ;;  %406 = vst.msk [vmem:[#allocation3 + $0x28] sm:$0xff] %vm400_vm12, %v2799_v0 }
  0x3b   :  { %767 = vrot.lane.b32.xlu0 %v2557_v39, %s2805_s6  ;;  %v1148_v46 = vsel %vm3004_vm11, %v1143_v40, %v1147_v13  ;;  %v1114_v47 = vor.u32 %v1113_v41, %v1110_v36  ;;  %v1119_v48 = vrot.slane %v1117_v16, 5  ;;  %v1724_v50 = vshrl.u32 %v1667_v37, 16  ;;  %v1665_v10 = vld [vmem:[#allocation2 + $0x18] sm:$0xf]  ;;  %v1666_v21 = vld [vmem:[#allocation2 + $0x1c] sm:$0x1] }
  0x3c   :  { %v1157_v51 = vrot.slane %v1156_v38, 4  ;;  %v1124_v52 = vrot.slane %v1122_v42, 4  ;;  %v1127_v53 = vrot.slane %v1125_v43, 5  ;;  %v1133_v54 = vrot.slane %v1131_v44, 5  ;;  %v490_v30 = vld [vmem:[#allocation2 + $0x20] sm:$0xf] }
  0x3d   :  { %v1115_v55 = vrot.slane %v1114_v47, 4  ;;  %v1726_v57 = vrot.slane %v1724_v50, 4  ;;  %v1727_v59 = vshll.u32 %v1667_v37, 16  ;;  %v1733_v60 = vshll.u32 %v1668_v45, 16  ;;  %v491_v31 = vld [vmem:[#allocation2 + $0x24] sm:$0x1] }
  0x3e   :  { %v1162_v61 = vsel %vm3004_vm11, %v1157_v51, %v1161_v35  ;;  %v1128_v62 = vor.u32 %v1127_v53, %v1124_v52  ;;  %v1738_v63 = vshrl.u32 %v1669_v49, 16  ;;  %v1741_v2 = vshll.u32 %v1669_v49, 16  ;;  %v492_v37 = vld [vmem:[#allocation2 + $0x28] sm:$0xf]  ;;  %v493_v38 = vld [vmem:[#allocation2 + $0x2c] sm:$0x1] }
  0x3f   :  { %v2597_v5 = vcombine.low %v1148_v46, %v1162_v61  ;;  %v1120_v7 = vsel %vm3004_vm11, %v1115_v55, %v1119_v48  ;;  %v1729_v8 = vrot.slane %v1727_v59, 5  ;;  %v1735_v9 = vrot.slane %v1733_v60, 5  ;;  %v1980_v46 = vld [vmem:[#allocation2 + $0x20] sm:$0xe]  ;;  %v1981_v47 = vld [vmem:[#allocation2 + $0x24] sm:$0x1] }
  0x40   :  { %v1129_v11 = vrot.slane %v1128_v62, 4  ;;  %v1740_v12 = vrot.slane %v1738_v63, 4  ;;  %v1743_v13 = vrot.slane %v1741_v2, 5  ;;  %v1747_v14 = vshll.u32 %v1670_v56, 16  ;;  %v1982_v52 = vld [vmem:[#allocation2 + $0x28] sm:$0xe] }
  0x41   :  { %1357 = vrot.lane.b32.xlu1 %v2597_v5, %s2806_s7  ;;  %v1730_v19 = vor.u32 %v1729_v8, %v1726_v57  ;;  %v1696_v22 = vshrl.u32 %v1663_v3, 16  ;;  %v1699_v24 = vshll.u32 %v1663_v3, 16  ;;  %v1705_v26 = vshll.u32 %v1664_v4, 16  ;;  %v1983_v57 = vld [vmem:[#allocation2 + $0x2c] sm:$0x1]  ;;  %407 = vst.msk [vmem:[#allocation3 + $0x30] sm:$0xff] %vm400_vm12, %v2799_v0 }
  0x42   :  { %v1134_v27 = vsel %vm3004_vm11, %v1129_v11, %v1133_v54  ;;  %v1744_v28 = vor.u32 %v1743_v13, %v1740_v12  ;;  %v1749_v25 = vrot.slane %v1747_v14, 5  ;;  %v1710_v29 = vshrl.u32 %v1665_v10, 16  ;;  %408 = vst.msk [vmem:[#allocation3 + $0x38] sm:$0xff] %vm400_vm12, %v2799_v0 }
  0x43   :  { %v2596_v32 = vcombine.low %v1120_v7, %v1134_v27  ;;  %v1731_v34 = vrot.slane %v1730_v19, 4  ;;  %v1698_v35 = vrot.slane %v1696_v22, 4  ;;  %v1701_v36 = vrot.slane %v1699_v24, 5  ;;  %v340_v19 = vld [vmem:[#allocation2 + $0x38] sm:$0xf] }
  0x44   :  { %v1745_v39 = vrot.slane %v1744_v28, 4  ;;  %v1707_v40 = vrot.slane %v1705_v26, 5  ;;  %v1712_v41 = vrot.slane %v1710_v29, 4  ;;  %v1713_v16 = vshll.u32 %v1665_v10, 16  ;;  %v494_v10 = vld [vmem:[#allocation2 + $0x30] sm:$0xf] }
  0x45   :  { %1355 = vrot.lane.b32.xlu0 %v2596_v32, %s2806_s7  ;;  %v1736_v42 = vsel %vm3004_vm11, %v1731_v34, %v1735_v9  ;;  %v1702_v43 = vor.u32 %v1701_v36, %v1698_v35  ;;  %v1719_v44 = vshll.u32 %v1666_v21, 16  ;;  %v574_v45 = vshrl.u32 %v490_v30, 16  ;;  %v343_v27 = vld [vmem:[#allocation2 + $0x3c] sm:$0x1]  ;;  %v495_v28 = vld [vmem:[#allocation2 + $0x34] sm:$0x1] }
  0x46   :  { %v1750_v48 = vsel %vm3004_vm11, %v1745_v39, %v1749_v25  ;;  %v1715_v49 = vrot.slane %v1713_v16, 5  ;;  %v577_v50 = vshll.u32 %v490_v30, 16  ;;  %v583_v51 = vshll.u32 %v491_v31, 16  ;;  %v806_v32 = vld [vmem:[#allocation2 + $0x20] sm:$0xe] }
  0x47   :  { %v2637_v53 = vcombine.low %v1736_v42, %v1750_v48  ;;  %v1703_v54 = vrot.slane %v1702_v43, 4  ;;  %v1721_v55 = vrot.slane %v1719_v44, 5  ;;  %v576_v56 = vrot.slane %v574_v45, 4  ;;  %v807_v34 = vld [vmem:[#allocation2 + $0x24] sm:$0x1] }
  0x48   :  { %v1716_v59 = vor.u32 %v1715_v49, %v1712_v41  ;;  %v579_v60 = vrot.slane %v577_v50, 5  ;;  %v585_v61 = vrot.slane %v583_v51, 5  ;;  %v588_v62 = vshrl.u32 %v492_v37, 16  ;;  %v809_v43 = vld [vmem:[#allocation2 + $0x2c] sm:$0x1] }
  0x49   :  { %1945 = vrot.lane.b32.xlu1 %v2637_v53, %s2807_s8  ;;  %v1708_v63 = vsel %vm3004_vm11, %v1703_v54, %v1707_v40  ;;  %v591_v2 = vshll.u32 %v492_v37, 16  ;;  %v597_v3 = vshll.u32 %v493_v38, 16  ;;  %v2646_v4 = vrot.slane %v1980_v46, 9  ;;  %v808_v40 = vld [vmem:[#allocation2 + $0x28] sm:$0xe] }
  0x4a   :  { %v1717_v5 = vrot.slane %v1716_v59, 4  ;;  %v580_v7 = vor.u32 %v579_v60, %v576_v56  ;;  %v590_v8 = vrot.slane %v588_v62, 4  ;;  %v2050_v9 = vrot.slane %v1981_v47, 5  ;;  %v3072_v46 = vld [vmem:[#allocation2 + $0x30] sm:$0xe] }
  0x4b   :  { %v593_v11 = vrot.slane %v591_v2, 5  ;;  %v599_v12 = vrot.slane %v597_v3, 5  ;;  %v2647_v13 = vrot.slane %v1982_v52, 9  ;;  %v2054_v14 = vrot.slane %v1983_v57, 5  ;;  %v1083_v47 = vld [vmem:[#allocation2 + $0x28] sm:$0xf] }
  0x4c   :  { %v1722_v21 = vsel %vm3004_vm11, %v1717_v5, %v1721_v55  ;;  %v581_v22 = vrot.slane %v580_v7, 4  ;;  %v2051_v24 = vsel %vm2973_vm8, %v2646_v4, %v2050_v9  ;;  %v188_v26 = vrot.slane %v186_v17, 7  ;;  %v65_v17 = vld [vmem:[%s3815_s0 + $0x40] sm:$0xff]  ;;  %v1084_v51 = vld [vmem:[#allocation2 + $0x2c] sm:$0x1] }
  0x4d   :  { %v2636_v25 = vcombine.low %v1708_v63, %v1722_v21  ;;  %v594_v29 = vor.u32 %v593_v11, %v590_v8  ;;  %v2055_v30 = vsel %vm2973_vm8, %v2647_v13, %v2054_v14  ;;  %v602_v31 = vshrl.u32 %v494_v10, 16  ;;  %v811_v55 = vld [vmem:[#allocation2 + $0x34] sm:$0x1]  ;;  %v346_v62 = vld [vmem:[#allocation2 + $0x40] sm:$0xf] }
  0x4e   :  { %v586_v35 = vsel %vm3004_vm11, %v581_v22, %v585_v61  ;;  %v2661_v36 = vcombine.low %v2051_v24, %v2055_v30  ;;  %v191_v37 = vor.u32 %v189_v18, %v188_v26  ;;  %v192_v39 = vrot.slane %v188_v26, 4  ;;  %v1085_v2 = vld [vmem:[#allocation2 + $0x30] sm:$0xf]  ;;  %v349_v11 = vld [vmem:[#allocation2 + $0x44] sm:$0x1] }
  0x4f   :  { %1943 = vrot.lane.b32.xlu0 %v2636_v25, %s2807_s8  ;;  %v595_v41 = vrot.slane %v594_v29, 4  ;;  %v604_v16 = vrot.slane %v602_v31, 4  ;;  %v605_v38 = vshll.u32 %v494_v10, 16  ;;  %v611_v42 = vshll.u32 %v495_v28, 16  ;;  %v2769_v13 = vld [vmem:[#allocation2 + $0x28] ss:$8 sps:$4 sm:$0xff]  }
  0x50   :  { %v341_v44 = vsel %vm2928_vm5, %v191_v37, %v340_v19  ;;  %v344_v58 = vsel %vm2934_vm7, %v192_v39, %v343_v27  ;;  %v2568_v18 = vrot.slane %v806_v32, 9  ;;  %v883_v45 = vrot.slane %v807_v34, 5  ;;  %v1086_v24 = vld [vmem:[#allocation2 + $0x34] sm:$0x1] }
  0x51   :  { %v600_v48 = vsel %vm3004_vm11, %v595_v41, %v599_v12  ;;  %342 = vst [vmem:[#allocation2 + $0x38] sm:$0xf] %v341_v44  ;;  %345 = vst [vmem:[#allocation2 + $0x3c] sm:$0x1] %v344_v58  ;;  %v607_v49 = vrot.slane %v605_v38, 5  ;;  %v2569_v50 = vrot.slane %v808_v40, 9  ;;  %v3078_v56 = vpack.c.bf16 %v65_v17, %v65_v17 }
  0x52   :  { %v2558_v52 = vcombine.low %v586_v35, %v600_v48  ;;  %v884_v53 = vsel %vm2973_vm8, %v2568_v18, %v883_v45  ;;  %v887_v54 = vrot.slane %v809_v43, 5  ;;  %v3081_v59 = vrot.slane %v611_v42, 5  ;;  %v1396_v41 = vld [vmem:[#allocation2 + $0x28] sm:$0xe] }
  0x53   :  { %2130 = vrot.lane.b32.xlu0 %v2661_v36, %s2804_s5  ;;  %v608_v57 = vor.u32 %v607_v49, %v604_v16  ;;  %v196_v60 = vrot.slane %v194_v20, 7  ;;  %v197_v61 = vshll.u32 %v2962_v1, 16  ;;  %v1164_v3 = vshrl.u32 %v1083_v47, 16  ;;  %v66_v1 = vld [vmem:[%s3815_s0 + $0x48] sm:$0xff]  ;;  %v67_v20 = vld [vmem:[%s3815_s0 + $0x50] sm:$0xff] }
  0x54   :  { %769 = vrot.lane.b32.xlu1 %v2558_v52, %s2805_s6  ;;  %v888_v63 = vsel %vm2973_vm8, %v2569_v50, %v887_v54  ;;  %v1167_v4 = vshll.u32 %v1083_v47, 16  ;;  %v1173_v5 = vshll.u32 %v1084_v51, 16  ;;  %v2570_v8 = vrot.slane %v3072_v46, 9  ;;  %v68_v52 = vld [vmem:[%s3815_s0 + $0x58] sm:$0xff] }
  0x55   :  { %v2582_v7 = vcombine.low %v884_v53, %v888_v63  ;;  %v891_v9 = vrot.slane %v811_v55, 5  ;;  %v199_v10 = vor.u32 %v197_v61, %v196_v60  ;;  %v3096_v12 = vrot.slane %v608_v57, 4  ;;  %v2781_v53 = vld [vmem:[%s3816_s1] sm:$0xff]   ;;  %v1397_v61 = vld [vmem:[#allocation2 + $0x2c] sm:$0x1] }
  0x56   :  { %v200_v14 = vrot.slane %v196_v60, 4  ;;  %v1166_v19 = vrot.slane %v1164_v3, 4  ;;  %v1169_v21 = vrot.slane %v1167_v4, 5  ;;  %v3101_v26 = vrot.slane %v1173_v5, 5  ;;  %v1398_v3 = vld [vmem:[#allocation2 + $0x30] sm:$0xe]  ;;  %2708 = vmatprep.subr.bf16.mxu0 %v2781_v53  ;;  %2740 = vmatprep.subr.bf16.mxu1 %v2781_v53 }
  0x57   :  { %957 = vrot.lane.b32.xlu0 %v2582_v7, %s2803_s4  ;;  %v347_v22 = vsel %vm2928_vm5, %v199_v10, %v346_v62  ;;  %v1178_v27 = vshrl.u32 %v1085_v2, 16  ;;  %v1181_v28 = vshll.u32 %v1085_v2, 16  ;;  %v3105_v34 = vpack.c.bf16 %v66_v1, %v66_v1  ;;  %v1399_v4 = vld [vmem:[#allocation2 + $0x34] sm:$0x1]  ;;  %2709 = vmatpush3.bf16.msra.mxu0 %v2781_v53 }
  0x58   :  { %v496_v25 = vld [vmem:[#allocation2 + $0x38] sm:$0xf]  ;;  %v497_v29 = vld [vmem:[#allocation2 + $0x3c] sm:$0x1]  ;;  %348 = vst [vmem:[#allocation2 + $0x40] sm:$0xf] %v347_v22  ;;  %v1170_v31 = vor.u32 %v1169_v21, %v1166_v19  ;;  %v350_v32 = vsel %vm2934_vm7, %v200_v14, %v349_v11  ;;  %v3107_v35 = vpack.c.bf16 %v67_v20, %v67_v20  ;;  %v3111_v18 = vsel %vm2973_vm8, %v2570_v8, %v891_v9 }
  0x59   :  { %v812_v30 = vld [vmem:[#allocation2 + $0x38] sm:$0xe]  ;;  %v616_v36 = vshrl.u32 %v496_v25, 16  ;;  %v619_v37 = vshll.u32 %v496_v25, 16  ;;  %v625_v39 = vshll.u32 %v497_v29, 16  ;;  %v1180_v42 = vrot.slane %v1178_v27, 4  ;;  %2748 = vmatpush3.bf16.msra.mxu1 %v2781_v53 }
  0x5a   :  { %v813_v40 = vld [vmem:[#allocation2 + $0x3c] sm:$0x1]  ;;  %v2571_v17 = vrot.slane %v812_v30, 9  ;;  %351 = vst [vmem:[#allocation2 + $0x44] sm:$0x1] %v350_v32  ;;  %v1171_v38 = vrot.slane %v1170_v31, 4  ;;  %v614_v7 = vsel %vm3004_vm11, %v3096_v12, %v3081_v59  ;;  %v3131_v11 = vpack.c.bf16 %v68_v52, %v68_v52 }
  0x5b   :  { %v895_v16 = vrot.slane %v813_v40, 5  ;;  %v1183_v43 = vrot.slane %v1181_v28, 5  ;;  %v618_v44 = vrot.slane %v616_v36, 4  ;;  %v621_v58 = vrot.slane %v619_v37, 5  ;;  %1046 = vrot.lane.b32.xlu0 %v2769_v13, %s2800_s28  ;;  %v1087_v46 = vld [vmem:[#allocation2 + $0x38] sm:$0xf] }
  0x5c   :  { %v1187_v45 = vshll.u32 %v1086_v24, 16  ;;  %v627_v47 = vrot.slane %v625_v39, 5  ;;  %v1088_v50 = vld [vmem:[#allocation2 + $0x3c] sm:$0x1]  ;;  %v1192_v51 = vshrl.u32 %v1087_v46, 16  ;;  %v1176_v55 = vsel %vm3004_vm11, %v1171_v38, %v3101_v26  ;;  %v2782_v25 = vld [vmem:[%s3816_s1 + $0x8] sm:$0xff]  }
  0x5d   :  { %v3116_v48 = vsel %vm2973_vm8, %v2571_v17, %v895_v16  ;;  %v1184_v49 = vor.u32 %v1183_v43, %v1180_v42  ;;  %v622_v54 = vor.u32 %v621_v58, %v618_v44  ;;  %v1195_v60 = vshll.u32 %v1087_v46, 16  ;;  %v1400_v10 = vld [vmem:[#allocation2 + $0x38] sm:$0xe]  ;;  %v1401_v26 = vld [vmem:[#allocation2 + $0x3c] sm:$0x1]  ;;  %2710 = vmatprep.subr.bf16.mxu0 %v2782_v25  ;;  %2741 = vmatprep.subr.bf16.mxu1 %v2782_v25 }
  0x5e   :  { %v1189_v57 = vrot.slane %v1187_v45, 5  ;;  %v1194_v63 = vrot.slane %v1192_v51, 4  ;;  %v1201_v2 = vshll.u32 %v1088_v50, 16  ;;  %v2608_v5 = vrot.slane %v1396_v41, 9  ;;  %v1671_v28 = vld [vmem:[#allocation2 + $0x30] sm:$0xf]  ;;  %2711 = vmatpush3.bf16.msra.mxu0 %v2782_v25  ;;  %2749 = vmatpush3.bf16.msra.mxu1 %v2782_v25 }
  0x5f   :  { %v1185_v62 = vrot.slane %v1184_v49, 4  ;;  %v623_v8 = vrot.slane %v622_v54, 4  ;;  %v1197_v9 = vrot.slane %v1195_v60, 5  ;;  %v2583_v1 = vcombine.low %v3111_v18, %v3116_v48  ;;  %v1089_v13 = vld [vmem:[#allocation2 + $0x40] sm:$0xf]  ;;  %v2784_v54 = vld [vmem:[%s3816_s1 + $0x10] sm:$0xff]  }
  0x60   :  { %v3137_v19 = vrot.slane %v1201_v2, 5  ;;  %v1470_v21 = vrot.slane %v1397_v61, 5  ;;  %v1206_v24 = vshrl.u32 %v1089_v13, 16  ;;  %v1402_v27 = vld [vmem:[#allocation2 + $0x40] sm:$0xe]  ;;  %v1209_v30 = vshll.u32 %v1089_v13, 16  ;;  %2712 = vmatprep.subr.bf16.mxu0 %v2784_v54  ;;  %2742 = vmatprep.subr.bf16.mxu1 %v2784_v54 }
  0x61   :  { %v1190_v20 = vsel %vm3004_vm11, %v1185_v62, %v1189_v57  ;;  %v1090_v14 = vld [vmem:[#allocation2 + $0x44] sm:$0x1]  ;;  %v628_v59 = vsel %vm3004_vm11, %v623_v8, %v627_v47  ;;  %v1198_v22 = vor.u32 %v1197_v9, %v1194_v63  ;;  %v2609_v40 = vrot.slane %v1398_v3, 9  ;;  %v1672_v41 = vld [vmem:[#allocation2 + $0x34] sm:$0x1]  ;;  %v2786_v2 = vld [vmem:[%s3816_s1 + $0x18] sm:$0xff]  }
  0x62   :  { %v2598_v12 = vcombine.low %v1176_v55, %v1190_v20  ;;  %v2559_v29 = vcombine.low %v614_v7, %v628_v59  ;;  %v1215_v31 = vshll.u32 %v1090_v14, 16  ;;  %v1471_v32 = vsel %vm2973_vm8, %v2608_v5, %v1470_v21  ;;  %v1403_v36 = vld [vmem:[#allocation2 + $0x44] sm:$0x1]  ;;  %v1673_v44 = vld [vmem:[#allocation2 + $0x38] sm:$0xf]  ;;  %2713 = vmatpush3.bf16.msra.mxu0 %v2784_v54  ;;  %2750 = vmatpush3.bf16.msra.mxu1 %v2784_v54 }
  0x63   :  { %v1199_v37 = vrot.slane %v1198_v22, 4  ;;  %v1208_v39 = vrot.slane %v1206_v24, 4  ;;  %v1474_v17 = vrot.slane %v1399_v4, 5  ;;  %v1211_v16 = vrot.slane %v1209_v30, 5  ;;  %v2770_v47 = vld [vmem:[#allocation2 + $0x38] ss:$8 sps:$4 sm:$0xff]   ;;  %2714 = vmatprep.subr.bf16.mxu0 %v2786_v2  ;;  %2743 = vmatprep.subr.bf16.mxu1 %v2786_v2 }
  0x64   :  { %1359 = vrot.lane.b32.xlu0 %v2598_v12, %s2806_s7  ;;  %771 = vrot.lane.b32.xlu1 %v2559_v29, %s2805_s6  ;;  %v1217_v38 = vrot.slane %v1215_v31, 5  ;;  %v2610_v42 = vrot.slane %v1400_v10, 9  ;;  %v1478_v43 = vrot.slane %v1401_v26, 5  ;;  %v2611_v45 = vrot.slane %v1402_v27, 9  ;;  %v2771_v51 = vld [vmem:[#allocation2 + $0x30] ss:$8 sps:$4 sm:$0xff]  }
  0x65   :  { %v1204_v58 = vsel %vm3004_vm11, %v1199_v37, %v3137_v19  ;;  %v1475_v18 = vsel %vm2973_vm8, %v2609_v40, %v1474_v17  ;;  %v1482_v46 = vrot.slane %v1403_v36, 5  ;;  %v1212_v48 = vor.u32 %v1211_v16, %v1208_v39  ;;  %v1674_v52 = vld [vmem:[#allocation2 + $0x3c] sm:$0x1]  ;;  %v1675_v62 = vld [vmem:[#allocation2 + $0x40] sm:$0xf] }
  0x66   :  { %v2622_v49 = vcombine.low %v1471_v32, %v1475_v18  ;;  %v3155_v50 = vsel %vm2973_vm8, %v2610_v42, %v1478_v43  ;;  %v1752_v53 = vshrl.u32 %v1671_v28, 16  ;;  %v1755_v57 = vshll.u32 %v1671_v28, 16  ;;  %v1677_v63 = vld [vmem:[#allocation2 + $0x48] sm:$0xf]  ;;  %v1676_v8 = vld [vmem:[#allocation2 + $0x44] sm:$0x1]  ;;  %2715 = vmatpush3.bf16.msra.mxu0 %v2786_v2  ;;  %2751 = vmatpush3.bf16.msra.mxu1 %v2786_v2 }
  0x67   :  { %v3162_v55 = vsel %vm2973_vm8, %v2611_v45, %v1482_v46  ;;  %v1761_v60 = vshll.u32 %v1672_v41, 16  ;;  %v1766_v61 = vshrl.u32 %v1673_v44, 16  ;;  %v1213_v3 = vrot.slane %v1212_v48, 4  ;;  %v1678_v14 = vld [vmem:[#allocation2 + $0x4c] sm:$0x1]  ;;  %v2787_v25 = vld [vmem:[%s3816_s1 + $0x20] sm:$0xff]  }
  0x68   :  { %959 = vrot.lane.b32.xlu1 %v2583_v1, %s2803_s4  ;;  %1544 = vrot.lane.b32.xlu0 %v2622_v49, %s2802_s30  ;;  %v2623_v4 = vcombine.low %v3155_v50, %v3162_v55  ;;  %v1754_v5 = vrot.slane %v1752_v53, 4  ;;  %v1769_v7 = vshll.u32 %v1673_v44, 16  ;;  %v1757_v9 = vrot.slane %v1755_v57, 5  ;;  %v1984_v12 = vld [vmem:[#allocation2 + $0x30] sm:$0xe]  ;;  %v69_v2 = vld [vmem:[%s3815_s0 + $0x60] sm:$0xff] }
  0x69   :  { %v1763_v10 = vrot.slane %v1761_v60, 5  ;;  %v1768_v20 = vrot.slane %v1766_v61, 4  ;;  %v1775_v13 = vshll.u32 %v1674_v52, 16  ;;  %v1218_v19 = vsel %vm3004_vm11, %v1213_v3, %v1217_v38  ;;  %v1985_v28 = vld [vmem:[#allocation2 + $0x34] sm:$0x1]  ;;  %2716 = vmatprep.subr.bf16.mxu0 %v2787_v25  ;;  %2744 = vmatprep.subr.bf16.mxu1 %v2787_v25  ;;  %v70_v50 = vld [vmem:[%s3815_s0 + $0x68] sm:$0xff] }
  0x6a   :  { %v1771_v1 = vrot.slane %v1769_v7, 5  ;;  %v1780_v21 = vshrl.u32 %v1675_v62, 16  ;;  %v1783_v59 = vshll.u32 %v1675_v62, 16  ;;  %v2599_v22 = vcombine.low %v1204_v58, %v1218_v19  ;;  %v1986_v36 = vld [vmem:[#allocation2 + $0x38] sm:$0xe]  ;;  %2717 = vmatpush3.bf16.msra.mxu0 %v2787_v25  ;;  %2752 = vmatpush3.bf16.msra.mxu1 %v2787_v25 }
  0x6b   :  { %v1758_v24 = vor.u32 %v1757_v9, %v1754_v5  ;;  %v1777_v26 = vrot.slane %v1775_v13, 5  ;;  %v1789_v27 = vshll.u32 %v1676_v8, 16  ;;  %v1794_v32 = vshrl.u32 %v1677_v63, 16  ;;  %v1987_v41 = vld [vmem:[#allocation2 + $0x3c] sm:$0x1] }
  0x6c   :  { %1048 = vrot.lane.b32.xlu1 %v2770_v47, %s2800_s28  ;;  %1634 = vrot.lane.b32.xlu0 %v2771_v51, %s2801_s29  ;;  %v1772_v29 = vor.u32 %v1771_v1, %v1768_v20  ;;  %v1782_v30 = vrot.slane %v1780_v21, 4  ;;  %v1785_v31 = vrot.slane %v1783_v59, 5  ;;  %v1797_v40 = vshll.u32 %v1677_v63, 16  ;;  %v498_v46 = vld [vmem:[#allocation2 + $0x50] sm:$0xf]  ;;  %v2788_v47 = vld [vmem:[%s3816_s1 + $0x28] sm:$0xff]  }
  0x6d   :  { %v1759_v37 = vrot.slane %v1758_v24, 4  ;;  %v1791_v39 = vrot.slane %v1789_v27, 5  ;;  %v1803_v17 = vshll.u32 %v1678_v14, 16  ;;  %v1796_v42 = vrot.slane %v1794_v32, 4  ;;  %v499_v53 = vld [vmem:[#allocation2 + $0x54] sm:$0x1]  ;;  %2718 = vmatprep.subr.bf16.mxu0 %v2788_v47  ;;  %2745 = vmatprep.subr.bf16.mxu1 %v2788_v47 }
  0x6e   :  { %v1773_v16 = vrot.slane %v1772_v29, 4  ;;  %v1786_v38 = vor.u32 %v1785_v31, %v1782_v30  ;;  %v2648_v43 = vrot.slane %v1984_v12, 9  ;;  %v1799_v58 = vrot.slane %v1797_v40, 5  ;;  %v1988_v62 = vld [vmem:[#allocation2 + $0x40] sm:$0xe]  ;;  %v2790_v59 = vld [vmem:[%s3816_s1 + $0x30] sm:$0xff]   ;;  %2719 = vmatpush3.bf16.msra.mxu0 %v2788_v47  ;;  %2753 = vmatpush3.bf16.msra.mxu1 %v2788_v47 }
  0x6f   :  { %v1764_v44 = vsel %vm3004_vm11, %v1759_v37, %v1763_v10  ;;  %v1805_v18 = vrot.slane %v1803_v17, 5  ;;  %v2058_v45 = vrot.slane %v1985_v28, 5  ;;  %v2649_v51 = vrot.slane %v1986_v36, 9  ;;  %v1989_v63 = vld [vmem:[#allocation2 + $0x44] sm:$0x1]  ;;  %2720 = vmatprep.subr.bf16.mxu0 %v2790_v59  ;;  %v2792_v17 = vld [vmem:[%s3816_s1 + $0x38] sm:$0xff]   ;;  %2746 = vmatprep.subr.bf16.mxu1 %v2790_v59 }
  0x70   :  { %1361 = vrot.lane.b32.xlu1 %v2599_v22, %s2806_s7  ;;  %v1778_v48 = vsel %vm3004_vm11, %v1773_v16, %v1777_v26  ;;  %v1787_v49 = vrot.slane %v1786_v38, 4  ;;  %v2062_v52 = vrot.slane %v1987_v41, 5  ;;  %v1800_v57 = vor.u32 %v1799_v58, %v1796_v42  ;;  %v2772_v3 = vld [vmem:[#allocation2 + $0x40] ss:$8 sps:$4 sm:$0xff]   ;;  %v352_v9 = vld [vmem:[#allocation2 + $0x58] sm:$0xf] }
  0x71   :  { %v2638_v54 = vcombine.low %v1764_v44, %v1778_v48  ;;  %v2059_v60 = vsel %vm2973_vm8, %v2648_v43, %v2058_v45  ;;  %v202_v61 = vshrl.u32 %v3078_v56, 16  ;;  %v205_v8 = vshll.u32 %v3078_v56, 16  ;;  %v355_v10 = vld [vmem:[#allocation2 + $0x5c] sm:$0x1]  ;;  %v1990_v21 = vld [vmem:[#allocation2 + $0x48] sm:$0xe] }
  0x72   :  { %v1792_v5 = vsel %vm3004_vm11, %v1787_v49, %v1791_v39  ;;  %v2063_v7 = vsel %vm2973_vm8, %v2649_v51, %v2062_v52  ;;  %v630_v20 = vshrl.u32 %v498_v46, 16  ;;  %v1801_v13 = vrot.slane %v1800_v57, 4  ;;  %v1991_v22 = vld [vmem:[#allocation2 + $0x4c] sm:$0x1]  ;;  %v814_v40 = vld [vmem:[#allocation2 + $0x50] sm:$0xe]  ;;  %2721 = vmatpush3.bf16.msra.mxu0 %v2790_v59  ;;  %2754 = vmatpush3.bf16.msra.mxu1 %v2790_v59 }
  0x73   :  { %1947 = vrot.lane.b32.xlu0 %v2638_v54, %s2807_s8  ;;  %v2662_v14 = vcombine.low %v2059_v60, %v2063_v7  ;;  %v204_v19 = vrot.slane %v202_v61, 7  ;;  %v633_v1 = vshll.u32 %v498_v46, 16  ;;  %v639_v12 = vshll.u32 %v499_v53, 16  ;;  %v815_v43 = vld [vmem:[#allocation2 + $0x54] sm:$0x1]  ;;  %2722 = vmatprep.subr.bf16.mxu0 %v2792_v17 }
  0x74   :  { %1546 = vrot.lane.b32.xlu1 %v2623_v4, %s2802_s30  ;;  %v632_v56 = vrot.slane %v630_v20, 4  ;;  %v2650_v24 = vrot.slane %v1988_v62, 9  ;;  %v2066_v26 = vrot.slane %v1989_v63, 5  ;;  %v1806_v27 = vsel %vm3004_vm11, %v1801_v13, %v1805_v18  ;;  %v358_v45 = vld [vmem:[#allocation2 + $0x60] sm:$0xf]  ;;  %2747 = vmatprep.subr.bf16.mxu1 %v2792_v17 }
  0x75   :  { %v207_v28 = vor.u32 %v205_v8, %v204_v19  ;;  %v208_v25 = vrot.slane %v204_v19, 4  ;;  %v635_v29 = vrot.slane %v633_v1, 5  ;;  %v2639_v30 = vcombine.low %v1792_v5, %v1806_v27  ;;  %v361_v46 = vld [vmem:[#allocation2 + $0x64] sm:$0x1]  ;;  %v364_v47 = vld [vmem:[#allocation2 + $0x68] sm:$0xf] }
  0x76   :  { %v2067_v31 = vsel %vm2973_vm8, %v2650_v24, %v2066_v26  ;;  %v2651_v32 = vrot.slane %v1990_v21, 9  ;;  %v3209_v36 = vpack.c.bf16 %v69_v2, %v69_v2  ;;  %v2070_v39 = vrot.slane %v1991_v22, 5  ;;  %v367_v48 = vld [vmem:[#allocation2 + $0x6c] sm:$0x1]  ;;  %v376_v19 = vld [vmem:[#allocation2 + $0x78] sm:$0xf]  ;;  %2723 = vmatpush3.bf16.msra.mxu0 %v2792_v17  ;;  %2755 = vmatpush3.bf16.msra.mxu1 %v2792_v17 }
  0x77   :  { %2132 = vrot.lane.b32.xlu0 %v2662_v14, %s2804_s5  ;;  %v353_v55 = vsel %vm2928_vm5, %v207_v28, %v352_v9  ;;  %v356_v4 = vsel %vm2934_vm7, %v208_v25, %v355_v10  ;;  %v636_v37 = vor.u32 %v635_v29, %v632_v56  ;;  %v210_v41 = vshrl.u32 %v3105_v34, 16  ;;  %v373_v14 = vld [vmem:[#allocation2 + $0x74] sm:$0x1]  ;;  %v2791_v6 = vld [vmem:[#allocation2 + $0x30] ss:$8 sps:$4 sm:$0xff]  }
  0x78   :  { %1636 = vrot.lane.b32.xlu1 %v2772_v3, %s2801_s29  ;;  %354 = vst [vmem:[#allocation2 + $0x58] sm:$0xf] %v353_v55  ;;  %357 = vst [vmem:[#allocation2 + $0x5c] sm:$0x1] %v356_v4  ;;  %v213_v16 = vshll.u32 %v3105_v34, 16  ;;  %v218_v38 = vshrl.u32 %v3107_v35, 16  ;;  %v2071_v18 = vsel %vm2973_vm8, %v2651_v32, %v2070_v39  ;;  %v3233_v49 = vpack.c.bf16 %v70_v50, %v70_v50 }
  0x79   :  { %v221_v42 = vshll.u32 %v3107_v35, 16  ;;  %v3227_v44 = vrot.slane %v636_v37, 4  ;;  %v3229_v58 = vrot.slane %v639_v12, 5  ;;  %v2663_v34 = vcombine.low %v2067_v31, %v2071_v18  ;;  %v370_v3 = vld [vmem:[#allocation2 + $0x70] sm:$0xf]  ;;  %477 = vst.msk [vmem:[#allocation3 + $0x18] sm:$0xff] %vm473_vm13, %v2791_v6 }
  0x7a   :  { %v212_v51 = vrot.slane %v210_v41, 7  ;;  %v220_v52 = vrot.slane %v218_v38, 7  ;;  %v226_v35 = vshrl.u32 %v3131_v11, 16  ;;  %v2572_v53 = vrot.slane %v814_v40, 9 }
  0x7b   :  { %v899_v54 = vrot.slane %v815_v43, 5  ;;  %v229_v57 = vshll.u32 %v3131_v11, 16  ;;  %v234_v60 = vshrl.u32 %v3209_v36, 16  ;;  %2134 = vrot.lane.b32.xlu0 %v2663_v34, %s2804_s5  ;;  %v237_v8 = vshll.u32 %v3209_v36, 16 }
  0x7c   :  { %1949 = vrot.lane.b32.xlu1 %v2639_v30, %s2807_s8  ;;  %v215_v61 = vor.u32 %v213_v16, %v212_v51  ;;  %v216_v62 = vrot.slane %v212_v51, 4  ;;  %v223_v63 = vor.u32 %v221_v42, %v220_v52  ;;  %v224_v2 = vrot.slane %v220_v52, 4 }
  0x7d   :  { %v228_v5 = vrot.slane %v226_v35, 7  ;;  %v3240_v7 = vrot.slane %v234_v60, 7  ;;  %v242_v11 = vshrl.u32 %v3233_v49, 16  ;;  %v900_v56 = vsel %vm2973_vm8, %v2572_v53, %v899_v54 }
  0x7e   :  { %v359_v9 = vsel %vm2928_vm5, %v215_v61, %v358_v45  ;;  %v362_v10 = vsel %vm2934_vm7, %v216_v62, %v361_v46  ;;  %v365_v20 = vsel %vm2928_vm5, %v223_v63, %v364_v47  ;;  %v368_v13 = vsel %vm2934_vm7, %v224_v2, %v367_v48 }
  0x7f   :  { %v500_v1 = vld [vmem:[#allocation2 + $0x58] sm:$0xf]  ;;  %v501_v21 = vld [vmem:[#allocation2 + $0x5c] sm:$0x1]  ;;  %360 = vst [vmem:[#allocation2 + $0x60] sm:$0xf] %v359_v9  ;;  %v231_v12 = vor.u32 %v229_v57, %v228_v5  ;;  %v239_v22 = vor.u32 %v237_v8, %v3240_v7  ;;  %v642_v52 = vsel %vm3004_vm11, %v3227_v44, %v3229_v58 }
  0x80   :  { %363 = vst [vmem:[#allocation2 + $0x64] sm:$0x1] %v362_v10  ;;  %366 = vst [vmem:[#allocation2 + $0x68] sm:$0xf] %v365_v20  ;;  %v816_v59 = vld [vmem:[#allocation2 + $0x58] sm:$0xe] }
  0x81   :  { %369 = vst [vmem:[#allocation2 + $0x6c] sm:$0x1] %v368_v13  ;;  %v644_v24 = vshrl.u32 %v500_v1, 16  ;;  %v647_v26 = vshll.u32 %v500_v1, 16  ;;  %v653_v27 = vshll.u32 %v501_v21, 16  ;;  %v2573_v25 = vrot.slane %v816_v59, 9 }
  0x82   :  { %v817_v28 = vld [vmem:[#allocation2 + $0x5c] sm:$0x1]  ;;  %v232_v30 = vrot.slane %v228_v5, 4  ;;  %v371_v31 = vsel %vm2928_vm5, %v231_v12, %v370_v3  ;;  %v1091_v32 = vld [vmem:[#allocation2 + $0x58] sm:$0xf]  ;;  %v377_v36 = vsel %vm2928_vm5, %v239_v22, %v376_v19  ;;  %v240_v51 = vrot.slane %v3240_v7, 4 }
  0x83   :  { %v903_v29 = vrot.slane %v817_v28, 5  ;;  %v646_v50 = vrot.slane %v644_v24, 4  ;;  %v649_v55 = vrot.slane %v647_v26, 5  ;;  %v655_v4 = vrot.slane %v653_v27, 5  ;;  %372 = vst [vmem:[#allocation2 + $0x70] sm:$0xf] %v371_v31 }
  0x84   :  { %v1092_v37 = vld [vmem:[#allocation2 + $0x5c] sm:$0x1]  ;;  %v1220_v39 = vshrl.u32 %v1091_v32, 16  ;;  %378 = vst [vmem:[#allocation2 + $0x78] sm:$0xf] %v377_v36  ;;  %v1223_v17 = vshll.u32 %v1091_v32, 16  ;;  %v374_v16 = vsel %vm2934_vm7, %v232_v30, %v373_v14 }
  0x85   :  { %v904_v40 = vsel %vm2973_vm8, %v2573_v25, %v903_v29  ;;  %v1229_v41 = vshll.u32 %v1092_v37, 16  ;;  %v3263_v38 = vld [vmem:[#allocation2 + $0x58] sm:$0xe]  ;;  %v3265_v42 = vld [vmem:[#allocation2 + $0x5c] sm:$0x1]  ;;  %v650_v43 = vor.u32 %v649_v55, %v646_v50  ;;  %v3277_v57 = vrot.slane %v242_v11, 7 }
  0x86   :  { %v2584_v18 = vcombine.low %v900_v56, %v904_v40  ;;  %v1222_v45 = vrot.slane %v1220_v39, 4  ;;  %375 = vst [vmem:[#allocation2 + $0x74] sm:$0x1] %v374_v16  ;;  %v2612_v46 = vrot.slane %v3263_v38, 9  ;;  %v1225_v47 = vrot.slane %v1223_v17, 5  ;;  %v71_v11 = vld [vmem:[%s3815_s0 + $0x70] sm:$0xff] }
  0x87   :  { %v3268_v48 = vrot.slane %v1229_v41, 5  ;;  %v1486_v34 = vrot.slane %v3265_v42, 5  ;;  %v651_v35 = vrot.slane %v650_v43, 4  ;;  %v502_v53 = vld [vmem:[#allocation2 + $0x60] sm:$0xf]  ;;  %v3291_v50 = vpack.c.bf16 %v71_v11, %v71_v11  ;;  %v72_v42 = vld [vmem:[%s3815_s0 + $0x78] sm:$0xff] }
  0x88   :  { %v503_v54 = vld [vmem:[#allocation2 + $0x64] sm:$0x1]  ;;  %961 = vrot.lane.b32.xlu0 %v2584_v18, %s2803_s4  ;;  %v504_v60 = vld [vmem:[#allocation2 + $0x68] sm:$0xf]  ;;  %v505_v61 = vld [vmem:[#allocation2 + $0x6c] sm:$0x1]  ;;  %v1226_v2 = vor.u32 %v1225_v47, %v1222_v45 }
  0x89   :  { %v658_v62 = vshrl.u32 %v502_v53, 16  ;;  %v661_v63 = vshll.u32 %v502_v53, 16  ;;  %v379_v3 = vld [vmem:[#allocation2 + $0x7c] sm:$0x1]  ;;  %v656_v5 = vsel %vm3004_vm11, %v651_v35, %v655_v4  ;;  %v667_v7 = vshll.u32 %v503_v54, 16 }
  0x8a   :  { %v672_v8 = vshrl.u32 %v504_v60, 16  ;;  %v675_v9 = vshll.u32 %v504_v60, 16  ;;  %v818_v44 = vld [vmem:[#allocation2 + $0x60] sm:$0xe]  ;;  %v2560_v58 = vcombine.low %v642_v52, %v656_v5  ;;  %v681_v13 = vshll.u32 %v505_v61, 16 }
  0x8b   :  { %v660_v10 = vrot.slane %v658_v62, 4  ;;  %v663_v20 = vrot.slane %v661_v63, 5  ;;  %v819_v14 = vld [vmem:[#allocation2 + $0x64] sm:$0x1]  ;;  %v669_v19 = vrot.slane %v667_v7, 5  ;;  %v2574_v56 = vrot.slane %v818_v44, 9 }
  0x8c   :  { %v674_v1 = vrot.slane %v672_v8, 4  ;;  %v677_v21 = vrot.slane %v675_v9, 5  ;;  %v820_v59 = vld [vmem:[#allocation2 + $0x68] sm:$0xe]  ;;  %773 = vrot.lane.b32.xlu1 %v2560_v58, %s2805_s6  ;;  %v683_v22 = vrot.slane %v681_v13, 5  ;;  %v907_v26 = vrot.slane %v819_v14, 5 }
  0x8d   :  { %v664_v12 = vor.u32 %v663_v20, %v660_v10  ;;  %v821_v24 = vld [vmem:[#allocation2 + $0x6c] sm:$0x1]  ;;  %v2575_v27 = vrot.slane %v820_v59, 9  ;;  %v2773_v29 = vld [vmem:[#allocation2 + $0x58] ss:$8 sps:$4 sm:$0xff]   ;;  %v3285_v30 = vrot.slane %v1226_v2, 4  ;;  %v380_v31 = vsel %vm2934_vm7, %v240_v51, %v379_v3 }
  0x8e   :  { %v678_v28 = vor.u32 %v677_v21, %v674_v1  ;;  %v911_v25 = vrot.slane %v821_v24, 5  ;;  %v908_v36 = vsel %vm2973_vm8, %v2574_v56, %v907_v26  ;;  %381 = vst [vmem:[#allocation2 + $0x7c] sm:$0x1] %v380_v31  ;;  %v245_v55 = vshll.u32 %v3233_v49, 16  ;;  %1050 = vrot.lane.b32.xlu0 %v2773_v29, %s2800_s28  ;;  %v1093_v39 = vld [vmem:[#allocation2 + $0x60] sm:$0xf] }
  0x8f   :  { %v665_v32 = vrot.slane %v664_v12, 4  ;;  %v1232_v40 = vsel %vm3004_vm11, %v3285_v30, %v3268_v48  ;;  %v248_v17 = vrot.slane %v3277_v57, 4  ;;  %v1094_v43 = vld [vmem:[#allocation2 + $0x64] sm:$0x1]  ;;  %v1234_v49 = vshrl.u32 %v1093_v39, 16 }
  0x90   :  { %v679_v4 = vrot.slane %v678_v28, 4  ;;  %v912_v37 = vsel %vm2973_vm8, %v2575_v27, %v911_v25  ;;  %v1237_v18 = vshll.u32 %v1093_v39, 16  ;;  %v1095_v45 = vld [vmem:[#allocation2 + $0x68] sm:$0xf]  ;;  %v1243_v51 = vshll.u32 %v1094_v43, 16 }
  0x91   :  { %v670_v41 = vsel %vm3004_vm11, %v665_v32, %v669_v19  ;;  %v2585_v16 = vcombine.low %v908_v36, %v912_v37  ;;  %v1096_v52 = vld [vmem:[#allocation2 + $0x6c] sm:$0x1]  ;;  %v1097_v35 = vld [vmem:[#allocation2 + $0x70] sm:$0xf]  ;;  %v1248_v53 = vshrl.u32 %v1095_v45, 16  ;;  %v247_v54 = vor.u32 %v245_v55, %v3277_v57 }
  0x92   :  { %v684_v47 = vsel %vm3004_vm11, %v679_v4, %v683_v22  ;;  %v1236_v60 = vrot.slane %v1234_v49, 4  ;;  %v1239_v61 = vrot.slane %v1237_v18, 5  ;;  %v1098_v62 = vld [vmem:[#allocation2 + $0x74] sm:$0x1]  ;;  %v1251_v63 = vshll.u32 %v1095_v45, 16 }
  0x93   :  { %v2561_v48 = vcombine.low %v670_v41, %v684_v47  ;;  %v382_v2 = vld [vmem:[#allocation2 + $0x80] sm:$0xf]  ;;  %v1245_v3 = vrot.slane %v1243_v51, 5  ;;  %v1250_v5 = vrot.slane %v1248_v53, 4  ;;  %v1257_v7 = vshll.u32 %v1096_v52, 16 }
  0x94   :  { %v1262_v8 = vshrl.u32 %v1097_v35, 16  ;;  %v1406_v9 = vld [vmem:[#allocation2 + $0x60] sm:$0xe]  ;;  %v1240_v44 = vor.u32 %v1239_v61, %v1236_v60  ;;  %v1253_v58 = vrot.slane %v1251_v63, 5  ;;  %v1265_v10 = vshll.u32 %v1097_v35, 16 }
  0x95   :  { %775 = vrot.lane.b32.xlu1 %v2561_v48, %s2805_s6  ;;  %v1271_v20 = vshll.u32 %v1098_v62, 16  ;;  %v1407_v13 = vld [vmem:[#allocation2 + $0x64] sm:$0x1]  ;;  %v1259_v14 = vrot.slane %v1257_v7, 5  ;;  %v2613_v19 = vrot.slane %v1406_v9, 9  ;;  %v1487_v28 = vsel %vm2973_vm8, %v2612_v46, %v1486_v34  ;;  %v3324_v46 = vpop.permute.xlu0 %1042 }
  0x96   :  { %v1264_v11 = vrot.slane %v1262_v8, 4  ;;  %v1490_v1 = vrot.slane %v1407_v13, 5  ;;  %v1408_v21 = vld [vmem:[#allocation2 + $0x68] sm:$0xe]  ;;  %v385_v59 = vld [vmem:[#allocation2 + $0x84] sm:$0x1]  ;;  %v1254_v22 = vor.u32 %v1253_v58, %v1250_v5  ;;  %v383_v32 = vsel %vm2928_vm5, %v247_v54, %v382_v2 }
  0x97   :  { %v2774_v56 = vld [vmem:[#allocation2 + $0x68] ss:$8 sps:$4 sm:$0xff]   ;;  %v1241_v12 = vrot.slane %v1240_v44, 4  ;;  %v1267_v24 = vrot.slane %v1265_v10, 5  ;;  %v1273_v26 = vrot.slane %v1271_v20, 5  ;;  %v2614_v30 = vrot.slane %v1408_v21, 9 }
  0x98   :  { %v1409_v27 = vld [vmem:[#allocation2 + $0x6c] sm:$0x1]  ;;  %v1410_v25 = vld [vmem:[#allocation2 + $0x70] sm:$0xe]  ;;  %v1411_v29 = vld [vmem:[#allocation2 + $0x74] sm:$0x1]  ;;  %v1491_v38 = vsel %vm2973_vm8, %v2613_v19, %v1490_v1  ;;  %v386_v18 = vsel %vm2934_vm7, %v248_v17, %v385_v59  ;;  %v3340_v35 = vpack.c.bf16 %v72_v42, %v72_v42 }
  0x99   :  { %v1494_v31 = vrot.slane %v1409_v27, 5  ;;  %963 = vrot.lane.b32.xlu1 %v2585_v16, %s2803_s4  ;;  %v1246_v36 = vsel %vm3004_vm11, %v1241_v12, %v1245_v3  ;;  %v1255_v55 = vrot.slane %v1254_v22, 4  ;;  %v1268_v4 = vor.u32 %v1267_v24, %v1264_v11  ;;  %384 = vst [vmem:[#allocation2 + $0x80] sm:$0xf] %v383_v32  ;;  %v1679_v47 = vld [vmem:[#allocation2 + $0x60] sm:$0xf]  ;;  %v3346_v10 = vpop.permute.xlu0 %1630 }
  0x9a   :  { %v2600_v34 = vcombine.low %v1232_v40, %v1246_v36  ;;  %v2615_v39 = vrot.slane %v1410_v25, 9  ;;  %v1498_v41 = vrot.slane %v1411_v29, 5  ;;  %v250_v49 = vshrl.u32 %v3291_v50, 16  ;;  %v1680_v51 = vld [vmem:[#allocation2 + $0x64] sm:$0x1] }
  0x9b   :  { %v3328_v37 = vsel %vm2973_vm8, %v2614_v30, %v1494_v31  ;;  %v1260_v16 = vsel %vm3004_vm11, %v1255_v55, %v1259_v14  ;;  %v1269_v43 = vrot.slane %v1268_v4, 4  ;;  %v2624_v40 = vcombine.low %v1487_v28, %v1491_v38  ;;  %v1681_v52 = vld [vmem:[#allocation2 + $0x68] sm:$0xf]  ;;  %387 = vst [vmem:[#allocation2 + $0x84] sm:$0x1] %v386_v18 }
  0x9c   :  { %1363 = vrot.lane.b32.xlu0 %v2600_v34, %s2806_s7  ;;  %v1499_v45 = vsel %vm2973_vm8, %v2615_v39, %v1498_v41  ;;  %v1682_v17 = vld [vmem:[#allocation2 + $0x6c] sm:$0x1]  ;;  %v1808_v54 = vshrl.u32 %v1679_v47, 16  ;;  %v1811_v48 = vshll.u32 %v1679_v47, 16  ;;  %v1683_v60 = vld [vmem:[#allocation2 + $0x70] sm:$0xf] }
  0x9d   :  { %1052 = vrot.lane.b32.xlu1 %v2774_v56, %s2800_s28  ;;  %v1274_v57 = vsel %vm3004_vm11, %v1269_v43, %v1273_v26  ;;  %v2625_v53 = vcombine.low %v3328_v37, %v1499_v45  ;;  %v2775_v62 = vld [vmem:[#allocation2 + $0x60] ss:$8 sps:$4 sm:$0xff]   ;;  %v1817_v63 = vshll.u32 %v1680_v51, 16  ;;  %v1822_v2 = vshrl.u32 %v1681_v52, 16  ;;  %v1684_v5 = vld [vmem:[#allocation2 + $0x74] sm:$0x1]  ;;  %v3354_v18 = vpop.permute.xlu0 %1540 }
  0x9e   :  { %v2601_v61 = vcombine.low %v1260_v16, %v1274_v57  ;;  %v1825_v3 = vshll.u32 %v1681_v52, 16  ;;  %v1810_v7 = vrot.slane %v1808_v54, 4  ;;  %v1813_v8 = vrot.slane %v1811_v48, 5  ;;  %v1685_v44 = vld [vmem:[#allocation2 + $0x78] sm:$0xf] }
  0x9f   :  { %v1831_v9 = vshll.u32 %v1682_v17, 16  ;;  %v1836_v58 = vshrl.u32 %v1683_v60, 16  ;;  %v1819_v20 = vrot.slane %v1817_v63, 5  ;;  %v1824_v13 = vrot.slane %v1822_v2, 4  ;;  %v1686_v11 = vld [vmem:[#allocation2 + $0x7c] sm:$0x1] }
  0xa0   :  { %1548 = vrot.lane.b32.xlu0 %v2624_v40, %s2802_s30  ;;  %v1827_v14 = vrot.slane %v1825_v3, 5  ;;  %v1839_v19 = vshll.u32 %v1683_v60, 16  ;;  %v1814_v1 = vor.u32 %v1813_v8, %v1810_v7  ;;  %v1845_v56 = vshll.u32 %v1684_v5, 16  ;;  %v1992_v12 = vld [vmem:[#allocation2 + $0x60] sm:$0xe]  ;;  %v3364_v7 = vpop.permute.xlu1 %1044 }
  0xa1   :  { %1365 = vrot.lane.b32.xlu1 %v2601_v61, %s2806_s7  ;;  %v1833_v21 = vrot.slane %v1831_v9, 5  ;;  %v1838_v59 = vrot.slane %v1836_v58, 4  ;;  %v1850_v26 = vshrl.u32 %v1685_v44, 16  ;;  %v1853_v27 = vshll.u32 %v1685_v44, 16  ;;  %v1993_v28 = vld [vmem:[#allocation2 + $0x64] sm:$0x1] }
  0xa2   :  { %v1828_v22 = vor.u32 %v1827_v14, %v1824_v13  ;;  %v1841_v24 = vrot.slane %v1839_v19, 5  ;;  %v2776_v25 = vld [vmem:[#allocation2 + $0x70] ss:$8 sps:$4 sm:$0xff]   ;;  %v1815_v29 = vrot.slane %v1814_v1, 4  ;;  %v1847_v30 = vrot.slane %v1845_v56, 5 }
  0xa3   :  { %v1859_v31 = vshll.u32 %v1686_v11, 16  ;;  %v1994_v32 = vld [vmem:[#allocation2 + $0x68] sm:$0xe]  ;;  %v2652_v36 = vrot.slane %v1992_v12, 9  ;;  %v1852_v38 = vrot.slane %v1850_v26, 4  ;;  %v1855_v42 = vrot.slane %v1853_v27, 5 }
  0xa4   :  { %1638 = vrot.lane.b32.xlu0 %v2775_v62, %s2801_s29  ;;  %v1829_v55 = vrot.slane %v1828_v22, 4  ;;  %v1842_v4 = vor.u32 %v1841_v24, %v1838_v59  ;;  %v1995_v34 = vld [vmem:[#allocation2 + $0x6c] sm:$0x1]  ;;  %v1820_v37 = vsel %vm3004_vm11, %v1815_v29, %v1819_v20  ;;  %v2074_v41 = vrot.slane %v1993_v28, 5  ;;  %v506_v43 = vld [vmem:[#allocation2 + $0x70] sm:$0xf]  ;;  %v3370_v24 = vpop.permute.xlu0 %2128 }
  0xa5   :  { %1550 = vrot.lane.b32.xlu1 %v2625_v53, %s2802_s30  ;;  %v1861_v39 = vrot.slane %v1859_v31, 5  ;;  %v2653_v16 = vrot.slane %v1994_v32, 9  ;;  %v1856_v47 = vor.u32 %v1855_v42, %v1852_v38  ;;  %v2078_v51 = vrot.slane %v1995_v34, 5  ;;  %v507_v52 = vld [vmem:[#allocation2 + $0x74] sm:$0x1] }
  0xa6   :  { %v1834_v40 = vsel %vm3004_vm11, %v1829_v55, %v1833_v21  ;;  %v1843_v45 = vrot.slane %v1842_v4, 4  ;;  %v508_v57 = vld [vmem:[#allocation2 + $0x78] sm:$0xf]  ;;  %v2075_v53 = vsel %vm2973_vm8, %v2652_v36, %v2074_v41  ;;  %v509_v54 = vld [vmem:[#allocation2 + $0x7c] sm:$0x1]  ;;  %v686_v48 = vshrl.u32 %v506_v43, 16 }
  0xa7   :  { %v2640_v17 = vcombine.low %v1820_v37, %v1834_v40  ;;  %v689_v60 = vshll.u32 %v506_v43, 16  ;;  %v1857_v62 = vrot.slane %v1856_v47, 4  ;;  %v2079_v63 = vsel %vm2973_vm8, %v2653_v16, %v2078_v51  ;;  %v1996_v3 = vld [vmem:[#allocation2 + $0x70] sm:$0xe]  ;;  %v1997_v5 = vld [vmem:[#allocation2 + $0x74] sm:$0x1]  ;;  %v3379_v43 = vpop.permute.xlu1 %1632 }
  0xa8   :  { %v1848_v61 = vsel %vm3004_vm11, %v1843_v45, %v1847_v30  ;;  %v695_v2 = vshll.u32 %v507_v52, 16  ;;  %v2664_v8 = vcombine.low %v2075_v53, %v2079_v63  ;;  %v688_v9 = vrot.slane %v686_v48, 4  ;;  %v1998_v20 = vld [vmem:[#allocation2 + $0x78] sm:$0xe]  ;;  %v1999_v1 = vld [vmem:[#allocation2 + $0x7c] sm:$0x1] }
  0xa9   :  { %1640 = vrot.lane.b32.xlu1 %v2776_v25, %s2801_s29  ;;  %1951 = vrot.lane.b32.xlu0 %v2640_v17, %s2807_s8  ;;  %v691_v44 = vrot.slane %v689_v60, 5  ;;  %v700_v58 = vshrl.u32 %v508_v57, 16  ;;  %v1862_v13 = vsel %vm3004_vm11, %v1857_v62, %v1861_v39  ;;  %v703_v11 = vshll.u32 %v508_v57, 16  ;;  %v510_v22 = vld [vmem:[#allocation2 + $0x80] sm:$0xf] }
  0xaa   :  { %v697_v14 = vrot.slane %v695_v2, 5  ;;  %v709_v19 = vshll.u32 %v509_v54, 16  ;;  %v2641_v21 = vcombine.low %v1848_v61, %v1862_v13  ;;  %v2654_v12 = vrot.slane %v1996_v3, 9  ;;  %v388_v29 = vld [vmem:[#allocation2 + $0x88] sm:$0xf]  ;;  %v3389_v61 = vpop.permute.xlu0 %765 }
  0xab   :  { %v692_v59 = vor.u32 %v691_v44, %v688_v9  ;;  %v702_v56 = vrot.slane %v700_v58, 4  ;;  %v705_v26 = vrot.slane %v703_v11, 5  ;;  %v2082_v28 = vrot.slane %v1997_v5, 5  ;;  %v391_v30 = vld [vmem:[#allocation2 + $0x8c] sm:$0x1] }
  0xac   :  { %v711_v27 = vrot.slane %v709_v19, 5  ;;  %v2655_v25 = vrot.slane %v1998_v20, 9  ;;  %v511_v31 = vld [vmem:[#allocation2 + $0x84] sm:$0x1]  ;;  %v2086_v36 = vrot.slane %v1999_v1, 5  ;;  %v252_v55 = vrot.slane %v250_v49, 7 }
  0xad   :  { %1953 = vrot.lane.b32.xlu1 %v2641_v21, %s2807_s8  ;;  %2136 = vrot.lane.b32.xlu0 %v2664_v8, %s2804_s5  ;;  %v693_v32 = vrot.slane %v692_v59, 4  ;;  %v253_v4 = vshll.u32 %v3291_v50, 16  ;;  %v822_v38 = vld [vmem:[#allocation2 + $0x70] sm:$0xe]  ;;  %v706_v42 = vor.u32 %v705_v26, %v702_v56  ;;  %v2083_v34 = vsel %vm2973_vm8, %v2654_v12, %v2082_v28  ;;  %v823_v41 = vld [vmem:[#allocation2 + $0x74] sm:$0x1]  ;;  %v3401_v21 = vpop.permute.xlu1 %953 }
  0xae   :  { %v714_v37 = vshrl.u32 %v510_v22, 16  ;;  %v717_v39 = vshll.u32 %v510_v22, 16  ;;  %v824_v16 = vld [vmem:[#allocation2 + $0x78] sm:$0xe]  ;;  %v2087_v45 = vsel %vm2973_vm8, %v2655_v25, %v2086_v36  ;;  %v256_v47 = vrot.slane %v252_v55, 4 }
  0xaf   :  { %v698_v40 = vsel %vm3004_vm11, %v693_v32, %v697_v14  ;;  %v255_v49 = vor.u32 %v253_v4, %v252_v55  ;;  %v825_v50 = vld [vmem:[#allocation2 + $0x7c] sm:$0x1]  ;;  %v707_v51 = vrot.slane %v706_v42, 4  ;;  %v2665_v52 = vcombine.low %v2083_v34, %v2087_v45  ;;  %v826_v5 = vld [vmem:[#allocation2 + $0x80] sm:$0xe]  ;;  %v3407_v4 = vpop.permute.xlu0 %767 }
  0xb0   :  { %v716_v57 = vrot.slane %v714_v37, 4  ;;  %v719_v17 = vrot.slane %v717_v39, 5  ;;  %v392_v54 = vsel %vm2934_vm7, %v256_v47, %v391_v30  ;;  %v723_v48 = vshll.u32 %v511_v31, 16  ;;  %v1099_v8 = vld [vmem:[#allocation2 + $0x78] sm:$0xf] }
  0xb1   :  { %v389_v53 = vsel %vm2928_vm5, %v255_v49, %v388_v29  ;;  %v2576_v60 = vrot.slane %v822_v38, 9  ;;  %v712_v62 = vsel %vm3004_vm11, %v707_v51, %v711_v27  ;;  %2138 = vrot.lane.b32.xlu0 %v2665_v52, %s2804_s5  ;;  %393 = vst [vmem:[#allocation2 + $0x8c] sm:$0x1] %v392_v54  ;;  %v915_v2 = vrot.slane %v823_v41, 5  ;;  %v827_v58 = vld [vmem:[#allocation2 + $0x84] sm:$0x1] }
  0xb2   :  { %390 = vst [vmem:[#allocation2 + $0x88] sm:$0xf] %v389_v53  ;;  %v720_v63 = vor.u32 %v719_v17, %v716_v57  ;;  %v2577_v3 = vrot.slane %v824_v16, 9  ;;  %v2562_v9 = vcombine.low %v698_v40, %v712_v62  ;;  %v919_v44 = vrot.slane %v825_v50, 5  ;;  %v1100_v20 = vld [vmem:[#allocation2 + $0x7c] sm:$0x1]  ;;  %v3414_v53 = vpop.permute.xlu1 %955 }
  0xb3   :  { %v3396_v14 = vrot.slane %v723_v48, 5  ;;  %v916_v11 = vsel %vm2973_vm8, %v2576_v60, %v915_v2  ;;  %v258_v19 = vshrl.u32 %v3340_v35, 16  ;;  %v1101_v1 = vld [vmem:[#allocation2 + $0x80] sm:$0xf]  ;;  %v261_v56 = vshll.u32 %v3340_v35, 16 }
  0xb4   :  { %v3394_v13 = vrot.slane %v720_v63, 4  ;;  %777 = vrot.lane.b32.xlu1 %v2562_v9, %s2805_s6  ;;  %v920_v59 = vsel %vm2973_vm8, %v2577_v3, %v919_v44  ;;  %v1102_v12 = vld [vmem:[#allocation2 + $0x84] sm:$0x1]  ;;  %v1276_v22 = vshrl.u32 %v1099_v8, 16  ;;  %v1279_v26 = vshll.u32 %v1099_v8, 16 }
  0xb5   :  { %v2586_v27 = vcombine.low %v916_v11, %v920_v59  ;;  %v2578_v28 = vrot.slane %v826_v5, 9  ;;  %v923_v25 = vrot.slane %v827_v58, 5  ;;  %v260_v29 = vrot.slane %v258_v19, 7  ;;  %v394_v30 = vld [vmem:[#allocation2 + $0x90] sm:$0xf] }
  0xb6   :  { %v1278_v31 = vrot.slane %v1276_v22, 4  ;;  %v1281_v32 = vrot.slane %v1279_v26, 5  ;;  %v1285_v36 = vshll.u32 %v1100_v20, 16  ;;  %v1290_v55 = vshrl.u32 %v1101_v1, 16  ;;  %v2777_v38 = vld [vmem:[#allocation2 + $0x78] ss:$8 sps:$4 sm:$0xff]  }
  0xb7   :  { %965 = vrot.lane.b32.xlu0 %v2586_v27, %s2803_s4  ;;  %v263_v42 = vor.u32 %v261_v56, %v260_v29  ;;  %v264_v34 = vrot.slane %v260_v29, 4  ;;  %v1293_v35 = vshll.u32 %v1101_v1, 16  ;;  %v1299_v37 = vshll.u32 %v1102_v12, 16  ;;  %v397_v49 = vld [vmem:[#allocation2 + $0x94] sm:$0x1]  ;;  %v3429_v19 = vpop.permute.xlu0 %1355 }
  0xb8   :  { %v513_v41 = vld [vmem:[#allocation2 + $0x8c] sm:$0x1]  ;;  %v726_v16 = vsel %vm3004_vm11, %v3394_v13, %v3396_v14  ;;  %v1282_v45 = vor.u32 %v1281_v32, %v1278_v31  ;;  %v1412_v17 = vld [vmem:[#allocation2 + $0x78] sm:$0xe]  ;;  %v1287_v62 = vrot.slane %v1285_v36, 5  ;;  %v3420_v8 = vsel %vm2973_vm8, %v2578_v28, %v923_v25 }
  0xb9   :  { %v512_v39 = vld [vmem:[#allocation2 + $0x88] sm:$0xf]  ;;  %v737_v51 = vshll.u32 %v513_v41, 16  ;;  %v829_v52 = vld [vmem:[#allocation2 + $0x8c] sm:$0x1]  ;;  %v395_v48 = vsel %vm2928_vm5, %v263_v42, %v394_v30  ;;  %v1292_v9 = vrot.slane %v1290_v55, 4  ;;  %v398_v56 = vsel %vm2934_vm7, %v264_v34, %v397_v49  ;;  %v3433_v55 = vpop.permute.xlu1 %1542 }
  0xba   :  { %v828_v40 = vld [vmem:[#allocation2 + $0x88] sm:$0xe]  ;;  %v728_v47 = vshrl.u32 %v512_v39, 16  ;;  %v731_v50 = vshll.u32 %v512_v39, 16  ;;  %v927_v54 = vrot.slane %v829_v52, 5  ;;  %v1283_v60 = vrot.slane %v1282_v45, 4 }
  0xbb   :  { %v2579_v57 = vrot.slane %v828_v40, 9  ;;  %v1413_v63 = vld [vmem:[#allocation2 + $0x7c] sm:$0x1]  ;;  %v1414_v2 = vld [vmem:[#allocation2 + $0x80] sm:$0xe]  ;;  %1054 = vrot.lane.b32.xlu0 %v2777_v38, %s2800_s28  ;;  %v739_v58 = vrot.slane %v737_v51, 5 }
  0xbc   :  { %v730_v3 = vrot.slane %v728_v47, 4  ;;  %v733_v5 = vrot.slane %v731_v50, 5  ;;  %396 = vst [vmem:[#allocation2 + $0x90] sm:$0xf] %v395_v48  ;;  %v1103_v44 = vld [vmem:[#allocation2 + $0x88] sm:$0xf]  ;;  %v1288_v20 = vsel %vm3004_vm11, %v1283_v60, %v1287_v62 }
  0xbd   :  { %v3425_v23 = vsel %vm2973_vm8, %v2579_v57, %v927_v54  ;;  %v1295_v13 = vrot.slane %v1293_v35, 5  ;;  %v1104_v14 = vld [vmem:[#allocation2 + $0x8c] sm:$0x1]  ;;  %v1415_v11 = vld [vmem:[#allocation2 + $0x84] sm:$0x1]  ;;  %v1301_v59 = vrot.slane %v1299_v37, 5 }
  0xbe   :  { %v734_v1 = vor.u32 %v733_v5, %v730_v3  ;;  %v1304_v12 = vshrl.u32 %v1103_v44, 16  ;;  %v1416_v22 = vld [vmem:[#allocation2 + $0x88] sm:$0xe]  ;;  %399 = vst [vmem:[#allocation2 + $0x94] sm:$0x1] %v398_v56  ;;  %v1307_v27 = vshll.u32 %v1103_v44, 16 }
  0xbf   :  { %v1296_v26 = vor.u32 %v1295_v13, %v1292_v9  ;;  %v1313_v28 = vshll.u32 %v1104_v14, 16  ;;  %v2616_v25 = vrot.slane %v1412_v17, 9  ;;  %v1417_v29 = vld [vmem:[#allocation2 + $0x8c] sm:$0x1]  ;;  %v1502_v32 = vrot.slane %v1413_v63, 5 }
  0xc0   :  { %v735_v30 = vrot.slane %v734_v1, 4  ;;  %v1306_v31 = vrot.slane %v1304_v12, 4  ;;  %v2617_v36 = vrot.slane %v1414_v2, 9  ;;  %v1309_v42 = vrot.slane %v1307_v27, 5  ;;  %v1687_v40 = vld [vmem:[#allocation2 + $0x80] sm:$0xf] }
  0xc1   :  { %v1297_v38 = vrot.slane %v1296_v26, 4  ;;  %v3435_v35 = vrot.slane %v1313_v28, 5  ;;  %v1506_v33 = vrot.slane %v1415_v11, 5  ;;  %v1503_v37 = vsel %vm2973_vm8, %v2616_v25, %v1502_v32  ;;  %v1688_v52 = vld [vmem:[#allocation2 + $0x84] sm:$0x1]  ;;  %v3445_v17 = vpop.permute.xlu0 %1943  ;;  %v3455_v11 = vpop.permute.xlu1 %1357 }
  0xc2   :  { %v740_v34 = vsel %vm3004_vm11, %v735_v30, %v739_v58  ;;  %v2618_v39 = vrot.slane %v1416_v22, 9  ;;  %v1510_v41 = vrot.slane %v1417_v29, 5  ;;  %v1310_v50 = vor.u32 %v1309_v42, %v1306_v31  ;;  %v1689_v57 = vld [vmem:[#allocation2 + $0x88] sm:$0xf]  ;;  %v1690_v3 = vld [vmem:[#allocation2 + $0x8c] sm:$0x1] }
  0xc3   :  { %v2563_v45 = vcombine.low %v726_v16, %v740_v34  ;;  %v1302_v49 = vsel %vm3004_vm11, %v1297_v38, %v1301_v59  ;;  %v1105_v47 = vld [vmem:[#allocation2 + $0x90] sm:$0xf]  ;;  %v1507_v51 = vsel %vm2973_vm8, %v2617_v36, %v1506_v33  ;;  %v2587_v16 = vcombine.low %v3420_v8, %v3425_v23  ;;  %v1693_v29 = vld [vmem:[#allocation2 + $0x98] sm:$0xf]  ;;  %v2779_v33 = vld [vmem:[#allocation2 + $0x80] ss:$8 sps:$4 sm:$0xff]  }
  0xc4   :  { %v2602_v54 = vcombine.low %v1288_v20, %v1302_v49  ;;  %v1318_v48 = vshrl.u32 %v1105_v47, 16  ;;  %v1321_v60 = vshll.u32 %v1105_v47, 16  ;;  %v1418_v62 = vld [vmem:[#allocation2 + $0x90] sm:$0xe]  ;;  %v1311_v63 = vrot.slane %v1310_v50, 4 }
  0xc5   :  { %779 = vrot.lane.b32.xlu1 %v2563_v45, %s2805_s6  ;;  %v2619_v2 = vrot.slane %v1418_v62, 9  ;;  %v1864_v5 = vshrl.u32 %v1687_v40, 16  ;;  %v1106_v9 = vld [vmem:[#allocation2 + $0x94] sm:$0x1]  ;;  %v2626_v13 = vcombine.low %v1503_v37, %v1507_v51  ;;  %v3453_v20 = vsel %vm2973_vm8, %v2618_v39, %v1510_v41  ;;  %v2778_v1 = vld [vmem:[#allocation2 + $0x88] ss:$8 sps:$4 sm:$0xff]   ;;  %v3460_v12 = vpop.permute.xlu0 %2130  ;;  %v3474_v62 = vpop.permute.xlu1 %1945 }
  0xc6   :  { %1367 = vrot.lane.b32.xlu0 %v2602_v54, %s2806_s7  ;;  %v1320_v44 = vrot.slane %v1318_v48, 4  ;;  %v1323_v58 = vrot.slane %v1321_v60, 5  ;;  %v1419_v14 = vld [vmem:[#allocation2 + $0x94] sm:$0x1]  ;;  %v1316_v8 = vsel %vm3004_vm11, %v1311_v63, %v3435_v35  ;;  %v1327_v23 = vshll.u32 %v1106_v9, 16 }
  0xc7   :  { %v1514_v59 = vrot.slane %v1419_v14, 5  ;;  %v1866_v56 = vrot.slane %v1864_v5, 4  ;;  %v1867_v26 = vshll.u32 %v1687_v40, 16  ;;  %v1873_v27 = vshll.u32 %v1688_v52, 16  ;;  %v1691_v25 = vld [vmem:[#allocation2 + $0x90] sm:$0xf] }
  0xc8   :  { %v1324_v22 = vor.u32 %v1323_v58, %v1320_v44  ;;  %v1878_v28 = vshrl.u32 %v1689_v57, 16  ;;  %v1329_v30 = vrot.slane %v1327_v23, 5  ;;  %v1881_v32 = vshll.u32 %v1689_v57, 16  ;;  %v1692_v38 = vld [vmem:[#allocation2 + $0x94] sm:$0x1] }
  0xc9   :  { %967 = vrot.lane.b32.xlu1 %v2587_v16, %s2803_s4  ;;  %v3465_v31 = vsel %vm2973_vm8, %v2619_v2, %v1514_v59  ;;  %v1887_v36 = vshll.u32 %v1690_v3, 16  ;;  %v1869_v34 = vrot.slane %v1867_v26, 5  ;;  %v1875_v37 = vrot.slane %v1873_v27, 5  ;;  %v1694_v39 = vld [vmem:[#allocation2 + $0x9c] sm:$0x1]  ;;  %v3470_v50 = vpop.permute.xlu0 %957 }
  0xca   :  { %v1325_v42 = vrot.slane %v1324_v22, 4  ;;  %1552 = vrot.lane.b32.xlu0 %v2626_v13, %s2802_s30  ;;  %v2627_v35 = vcombine.low %v3453_v20, %v3465_v31  ;;  %v1880_v41 = vrot.slane %v1878_v28, 4  ;;  %v1883_v40 = vrot.slane %v1881_v32, 5  ;;  %v2000_v47 = vld [vmem:[#allocation2 + $0x80] sm:$0xe] }
  0xcb   :  { %v1889_v45 = vrot.slane %v1887_v36, 5  ;;  %v1892_v49 = vshrl.u32 %v1691_v25, 16  ;;  %v1870_v52 = vor.u32 %v1869_v34, %v1866_v56  ;;  %v1895_v57 = vshll.u32 %v1691_v25, 16  ;;  %v2001_v48 = vld [vmem:[#allocation2 + $0x84] sm:$0x1] }
  0xcc   :  { %v1330_v51 = vsel %vm3004_vm11, %v1325_v42, %v1329_v30  ;;  %v1901_v54 = vshll.u32 %v1692_v38, 16  ;;  %v2002_v60 = vld [vmem:[#allocation2 + $0x88] sm:$0xe]  ;;  %v1884_v63 = vor.u32 %v1883_v40, %v1880_v41  ;;  %v1906_v3 = vshrl.u32 %v1693_v29, 16  ;;  %v2003_v5 = vld [vmem:[#allocation2 + $0x8c] sm:$0x1] }
  0xcd   :  { %1056 = vrot.lane.b32.xlu1 %v2778_v1, %s2800_s28  ;;  %v2603_v16 = vcombine.low %v1316_v8, %v1330_v51  ;;  %v1894_v2 = vrot.slane %v1892_v49, 4  ;;  %v1871_v9 = vrot.slane %v1870_v52, 4  ;;  %v1897_v44 = vrot.slane %v1895_v57, 5  ;;  %v3480_v14 = vld [vmem:[#allocation2 + $0x90] sm:$0xe]  ;;  %v1047_v38 = vpop.permute.xlu0 %1046 }
  0xce   :  { %1642 = vrot.lane.b32.xlu0 %v2779_v33, %s2801_s29  ;;  %v3478_v58 = vrot.slane %v1901_v54, 5  ;;  %v1909_v13 = vshll.u32 %v1693_v29, 16  ;;  %v1885_v20 = vrot.slane %v1884_v63, 4  ;;  %v1908_v23 = vrot.slane %v1906_v3, 4  ;;  %v3482_v22 = vld [vmem:[#allocation2 + $0x94] sm:$0x1] }
  0xcf   :  { %v1915_v59 = vshll.u32 %v1694_v39, 16  ;;  %v2656_v56 = vrot.slane %v2000_v47, 9  ;;  %v1876_v1 = vsel %vm3004_vm11, %v1871_v9, %v1875_v37  ;;  %v1898_v8 = vor.u32 %v1897_v44, %v1894_v2  ;;  %v3486_v28 = vld [vmem:[#allocation2 + $0x98] sm:$0xe]  ;;  %v2007_v32 = vld [vmem:[#allocation2 + $0x9c] sm:$0x1]  ;;  %v770_v39 = vpop.permute.xlu1 %769 }
  0xd0   :  { %v1911_v26 = vrot.slane %v1909_v13, 5  ;;  %v2090_v27 = vrot.slane %v2001_v48, 5  ;;  %v1890_v25 = vsel %vm3004_vm11, %v1885_v20, %v1889_v45  ;;  %v2657_v30 = vrot.slane %v2002_v60, 9  ;;  %v2783_v36 = vld [vmem:[#allocation2] ss:$8 sps:$4 sm:$0xff]  }
  0xd1   :  { %1369 = vrot.lane.b32.xlu1 %v2603_v16, %s2806_s7  ;;  %v1917_v29 = vrot.slane %v1915_v59, 5  ;;  %v2094_v31 = vrot.slane %v2003_v5, 5  ;;  %v2642_v42 = vcombine.low %v1876_v1, %v1890_v25  ;;  %v1899_v33 = vrot.slane %v1898_v8, 4  ;;  %v2780_v41 = vld [vmem:[#allocation2 + $0x90] ss:$8 sps:$4 sm:$0xff]   ;;  %474 = vst.msk [vmem:[#allocation3] sm:$0xff] %vm473_vm13, %v2783_v36 }
  0xd2   :  { %v1912_v34 = vor.u32 %v1911_v26, %v1908_v23  ;;  %v2091_v37 = vsel %vm2973_vm8, %v2656_v56, %v2090_v27  ;;  %v2658_v49 = vrot.slane %v3480_v14, 9  ;;  %v2785_v45 = vld [vmem:[#allocation2 + $0x10] ss:$8 sps:$4 sm:$0xff]   ;;  %v2098_v52 = vrot.slane %v3482_v22, 5  ;;  %v2789_v57 = vld [vmem:[#allocation2 + $0x20] ss:$8 sps:$4 sm:$0xff]  }
  0xd3   :  { %v2095_v40 = vsel %vm2973_vm8, %v2657_v30, %v2094_v31  ;;  %1955 = vrot.lane.b32.xlu0 %v2642_v42, %s2807_s8  ;;  %v2659_v54 = vrot.slane %v3486_v28, 9  ;;  %vm789_vm14 = vcmask 64544   ;;  %v1904_v48 = vsel %vm3004_vm11, %v1899_v33, %v3478_v58  ;;  %475 = vst.msk [vmem:[#allocation3 + $0x8] sm:$0xff] %vm473_vm13, %v2785_v45  ;;  %476 = vst.msk [vmem:[#allocation3 + $0x10] sm:$0xff] %vm473_vm13, %v2789_v57  ;;  %v2795_v15 = vld [vmem:[#allocation2 + $0x70] ss:$8 sps:$4 sm:$0xff]  }
  0xd4   :  { %v1913_v47 = vrot.slane %v1912_v34, 4  ;;  %v2666_v51 = vcombine.low %v2091_v37, %v2095_v40  ;;  %v2102_v16 = vrot.slane %v2007_v32, 5  ;;  %vm977_vm15 = vcmask 97344   ;;  %790 = vst.msk [vmem:[#allocation3] sm:$0xff] %vm789_vm14, %v3389_v61  ;;  %791 = vst.msk [vmem:[#allocation3 + $0x8] sm:$0xff] %vm789_vm14, %v3407_v4 }
  0xd5   :  { %1554 = vrot.lane.b32.xlu1 %v2627_v35, %s2802_s30  ;;  %vm1066_vm0 = vcmask 130144   ;;  %vm1379_vm1 = vcmask 162944   ;;  %vm1564_vm2 = vcmask 195744   ;;  %vm1654_vm3 = vcmask 228544   ;;  %792 = vst.msk [vmem:[#allocation3 + $0x10] sm:$0xff] %vm789_vm14, %v770_v39 }
  0xd6   :  { %v1918_v60 = vsel %vm3004_vm11, %v1913_v47, %v1917_v29  ;;  %v1360_v35 = vpop.permute.xlu0 %1359  ;;  %vm1967_vm4 = vcmask 261344   ;;  %vm2152_vm5 = vcmask 294144   ;;  %v772_v0 = vpop.permute.xlu1 %771  ;;  %978 = vst.msk [vmem:[#allocation3] sm:$0xff] %vm977_vm15, %v3401_v21  ;;  %979 = vst.msk [vmem:[#allocation3 + $0x8] sm:$0xff] %vm977_vm15, %v3414_v53  ;;  %v2793_v61 = vld [vmem:[#allocation2 + $0x50] ss:$8 sps:$4 sm:$0xff]   ;;  %v2099_v4 = vsel %vm2973_vm8, %v2658_v49, %v2098_v52 }
  0xd7   :  { %2140 = vrot.lane.b32.xlu0 %v2666_v51, %s2804_s5  ;;  %v2643_v63 = vcombine.low %v1904_v48, %v1918_v60  ;;  %980 = vst.msk [vmem:[#allocation3 + $0x10] sm:$0xff] %vm977_vm15, %v3470_v50  ;;  %v2103_v2 = vsel %vm2973_vm8, %v2659_v54, %v2102_v16  ;;  %v2794_v21 = vld [vmem:[#allocation2 + $0x60] ss:$8 sps:$4 sm:$0xff]   ;;  %v2186_v60 = vlaneseq  ;;  %vm2335_vm6 = vcmask 261120  }
  0xd8   :  { %1068 = vst.msk [vmem:[#allocation3 + $0x8] sm:$0xff] %vm1066_vm0, %v3364_v7  ;;  %1067 = vst.msk [vmem:[#allocation3] sm:$0xff] %vm1066_vm0, %v3324_v46  ;;  %v2796_v53 = vld [vmem:[#allocation2 + $0x80] ss:$8 sps:$4 sm:$0xff]   ;;  %vm2511_vm7 = vcmask 257024  }
  0xd9   :  { %1644 = vrot.lane.b32.xlu1 %v2780_v41, %s2801_s29  ;;  %793 = vst.msk [vmem:[#allocation3 + $0x18] sm:$0xff] %vm789_vm14, %v772_v0  ;;  %v3610_v16 = vshrl.u32 %v2186_v60, 7 }
  0xda   :  { %1069 = vst.msk [vmem:[#allocation3 + $0x10] sm:$0xff] %vm1066_vm0, %v1047_v38  ;;  %v960_v46 = vpop.permute.xlu1 %959  ;;  %v1545_v7 = vpop.permute.xlu0 %1544 }
  0xdb   :  { %1381 = vst.msk [vmem:[#allocation3 + $0x8] sm:$0xff] %vm1379_vm1, %v3455_v11  ;;  %1380 = vst.msk [vmem:[#allocation3] sm:$0xff] %vm1379_vm1, %v3429_v19  ;;  %v2667_v11 = vcombine.low %v2099_v4, %v2103_v2  ;;  %v2188_v6 = vsub.s32 0, %v3610_v16 }
  0xdc   :  { %1382 = vst.msk [vmem:[#allocation3 + $0x10] sm:$0xff] %vm1379_vm1, %v1360_v35  ;;  %v3616_v35 = vld [vmem:[%s3817_s2] sm:$0x7] }
  0xdd   :  { %478 = vst.msk [vmem:[#allocation3 + $0x20] sm:$0xff] %vm473_vm13, %v2793_v61  ;;  %479 = vst.msk [vmem:[#allocation3 + $0x28] sm:$0xff] %vm473_vm13, %v2794_v21  ;;  %1957 = vrot.lane.b32.xlu1 %v2643_v63, %s2807_s8  ;;  %v3619_v61 = vrot.slane %v3616_v35, %v2188_v6 }
  0xde   :  { %1566 = vst.msk [vmem:[#allocation3 + $0x8] sm:$0xff] %vm1564_vm2, %v3433_v55  ;;  %1565 = vst.msk [vmem:[#allocation3] sm:$0xff] %vm1564_vm2, %v3354_v18  ;;  %v1635_v18 = vpop.permute.xlu0 %1634 }
  0xdf   :  { %1656 = vst.msk [vmem:[#allocation3 + $0x8] sm:$0xff] %vm1654_vm3, %v3379_v43  ;;  %1655 = vst.msk [vmem:[#allocation3] sm:$0xff] %vm1654_vm3, %v3346_v10  ;;  %v1049_v10 = vpop.permute.xlu1 %1048 }
  0xe0   :  { %981 = vst.msk [vmem:[#allocation3 + $0x18] sm:$0xff] %vm977_vm15, %v960_v46 }
  0xe1   :  { %1567 = vst.msk [vmem:[#allocation3 + $0x10] sm:$0xff] %vm1564_vm2, %v1545_v7  ;;  %2142 = vrot.lane.b32.xlu1 %v2667_v11, %s2804_s5 }
  0xe2   :  { %480 = vst.msk [vmem:[#allocation3 + $0x30] sm:$0xff] %vm473_vm13, %v2795_v15  ;;  %481 = vst.msk [vmem:[#allocation3 + $0x38] sm:$0xff] %vm473_vm13, %v2796_v53 }
  0xe3   :  { %1969 = vst.msk [vmem:[#allocation3 + $0x8] sm:$0xff] %vm1967_vm4, %v3474_v62  ;;  %1968 = vst.msk [vmem:[#allocation3] sm:$0xff] %vm1967_vm4, %v3445_v17  ;;  %v1362_v43 = vpop.permute.xlu1 %1361 }
  0xe4   :  { %2153 = vst.msk [vmem:[#allocation3] sm:$0xff] %vm2152_vm5, %v3370_v24  ;;  %2154 = vst.msk [vmem:[#allocation3 + $0x8] sm:$0xff] %vm2152_vm5, %v3460_v12 }
  0xe5   :  { %1070 = vst.msk [vmem:[#allocation3 + $0x18] sm:$0xff] %vm1066_vm0, %v1049_v10  ;;  %v1948_v17 = vpop.permute.xlu0 %1947 }
  0xe6   :  { %1657 = vst.msk [vmem:[#allocation3 + $0x10] sm:$0xff] %vm1654_vm3, %v1635_v18 }
  0xe7   :  { %1383 = vst.msk [vmem:[#allocation3 + $0x18] sm:$0xff] %vm1379_vm1, %v1362_v43  ;;  %v1547_v24 = vpop.permute.xlu1 %1546 }
  0xe8   :  { %1970 = vst.msk [vmem:[#allocation3 + $0x10] sm:$0xff] %vm1967_vm4, %v1948_v17 }
  0xe9   :  { %1568 = vst.msk [vmem:[#allocation3 + $0x18] sm:$0xff] %vm1564_vm2, %v1547_v24  ;;  %v2133_v12 = vpop.permute.xlu0 %2132 }
  0xea   :  { %2155 = vst.msk [vmem:[#allocation3 + $0x10] sm:$0xff] %vm2152_vm5, %v2133_v12 }
  0xeb   :  { %v2162_v19 = vld [vmem:[#allocation3] sm:$0xff]  ;;  %v2163_v55 = vld [vmem:[#allocation3 + $0x8] sm:$0xff]  ;;  %v1637_v50 = vpop.permute.xlu1 %1636 }
  0xec   :  { %2724 = vmatprep.mubr.bf16.mxu0 %v2162_v19  ;;  %1658 = vst.msk [vmem:[#allocation3 + $0x18] sm:$0xff] %vm1654_vm3, %v1637_v50 }
  0xed   :  { %2725 = vmatmul.mubr.bf16.vlgmr.msra.gmra.mrb[0].mxu0 %v2163_v55  ;;  %v2135_v3 = vpop.permute.xlu0 %2134 }
  0xef   :  { %v1950_v62 = vpop.permute.xlu1 %1949 }
  0xf0   :  { %1971 = vst.msk [vmem:[#allocation3 + $0x18] sm:$0xff] %vm1967_vm4, %v1950_v62 }
  0xf1   :  { %2156 = vst.msk [vmem:[#allocation3 + $0x18] sm:$0xff] %vm2152_vm5, %v2135_v3  ;;  %v2164_v5 = vld [vmem:[#allocation3 + $0x10] sm:$0xff] }
  0xf2   :  { %2728 = vmatprep.mubr.bf16.mxu0 %v2164_v5 }
  0xf8   :  { %v2165_v9 = vld [vmem:[#allocation3 + $0x18] sm:$0xff] }
  0xf9   :  { %2729 = vmatmul.mubr.bf16.gmra.mrb[4].mxu0 %v2165_v9 }
  0xfa   :  { %v962_v44 = vpop.permute.xlu0 %961 }
  0xfe   :  { %v774_v58 = vpop.permute.xlu1 %773 }
  0xff   :  { %794 = vst.msk [vmem:[#allocation3 + $0x20] sm:$0xff] %vm789_vm14, %v774_v58 }
 0x100   :  { %982 = vst.msk [vmem:[#allocation3 + $0x20] sm:$0xff] %vm977_vm15, %v962_v44  ;;  %v1051_v13 = vpop.permute.xlu0 %1050 }
 0x101   :  { %1071 = vst.msk [vmem:[#allocation3 + $0x20] sm:$0xff] %vm1066_vm0, %v1051_v13 }
 0x107   :  { %v776_v14 = vpop.permute.xlu1 %775 }
 0x108   :  { %795 = vst.msk [vmem:[#allocation3 + $0x28] sm:$0xff] %vm789_vm14, %v776_v14 }
 0x10b   :  { %v964_v20 = vpop.permute.xlu1 %963 }
 0x10c   :  { %983 = vst.msk [vmem:[#allocation3 + $0x28] sm:$0xff] %vm977_vm15, %v964_v20 }
 0x10e   :  { %v1364_v23 = vpop.permute.xlu0 %1363 }
 0x10f   :  { %v1053_v59 = vpop.permute.xlu1 %1052  ;;  %1384 = vst.msk [vmem:[#allocation3 + $0x20] sm:$0xff] %vm1379_vm1, %v1364_v23 }
 0x110   :  { %1072 = vst.msk [vmem:[#allocation3 + $0x28] sm:$0xff] %vm1066_vm0, %v1053_v59 }
 0x112   :  { %v1549_v56 = vpop.permute.xlu0 %1548 }
 0x113   :  { %v1366_v22 = vpop.permute.xlu1 %1365  ;;  %1569 = vst.msk [vmem:[#allocation3 + $0x20] sm:$0xff] %vm1564_vm2, %v1549_v56 }
 0x114   :  { %1385 = vst.msk [vmem:[#allocation3 + $0x28] sm:$0xff] %vm1379_vm1, %v1366_v22 }
 0x116   :  { %v1639_v1 = vpop.permute.xlu0 %1638 }
 0x117   :  { %v1551_v8 = vpop.permute.xlu1 %1550  ;;  %1659 = vst.msk [vmem:[#allocation3 + $0x20] sm:$0xff] %vm1654_vm3, %v1639_v1 }
 0x118   :  { %1570 = vst.msk [vmem:[#allocation3 + $0x28] sm:$0xff] %vm1564_vm2, %v1551_v8 }
 0x11b   :  { %v1641_v26 = vpop.permute.xlu1 %1640  ;;  %v1952_v27 = vpop.permute.xlu0 %1951 }
 0x11c   :  { %1660 = vst.msk [vmem:[#allocation3 + $0x28] sm:$0xff] %vm1654_vm3, %v1641_v26 }
 0x11d   :  { %1972 = vst.msk [vmem:[#allocation3 + $0x20] sm:$0xff] %vm1967_vm4, %v1952_v27 }
 0x11f   :  { %v1954_v28 = vpop.permute.xlu1 %1953  ;;  %v2137_v25 = vpop.permute.xlu0 %2136 }
 0x120   :  { %1973 = vst.msk [vmem:[#allocation3 + $0x28] sm:$0xff] %vm1967_vm4, %v1954_v28 }
 0x121   :  { %2157 = vst.msk [vmem:[#allocation3 + $0x20] sm:$0xff] %vm2152_vm5, %v2137_v25 }
 0x123   :  { %v2139_v29 = vpop.permute.xlu0 %2138 }
 0x124   :  { %2158 = vst.msk [vmem:[#allocation3 + $0x28] sm:$0xff] %vm2152_vm5, %v2139_v29 }
 0x126   :  { %v778_v30 = vpop.permute.xlu1 %777 }
 0x127   :  { %796 = vst.msk [vmem:[#allocation3 + $0x30] sm:$0xff] %vm789_vm14, %v778_v30 }
 0x128   :  { %v2166_v31 = vld [vmem:[#allocation3 + $0x20] sm:$0xff] }
 0x129   :  { %2732 = vmatprep.mubr.bf16.mxu1 %v2166_v31  ;;  %v966_v32 = vpop.permute.xlu0 %965 }
 0x12a   :  { %984 = vst.msk [vmem:[#allocation3 + $0x30] sm:$0xff] %vm977_vm15, %v966_v32 }
 0x12b   :  { %v2167_v36 = vld [vmem:[#allocation3 + $0x28] sm:$0xff] }
 0x12c   :  { %2733 = vmatmul.mubr.bf16.vlgmr.msra.gmra.mrb[0].mxu1 %v2167_v36 }
 0x12d   :  { %v1055_v38 = vpop.permute.xlu0 %1054 }
 0x12e   :  { %1073 = vst.msk [vmem:[#allocation3 + $0x30] sm:$0xff] %vm1066_vm0, %v1055_v38 }
 0x137   :  { %v780_v42 = vpop.permute.xlu1 %779 }
 0x138   :  { %797 = vst.msk [vmem:[#allocation3 + $0x38] sm:$0xff] %vm789_vm14, %v780_v42  ;;  %v1368_v33 = vpop.permute.xlu0 %1367 }
 0x139   :  { %1386 = vst.msk [vmem:[#allocation3 + $0x30] sm:$0xff] %vm1379_vm1, %v1368_v33 }
 0x13b   :  { %v968_v34 = vpop.permute.xlu1 %967 }
 0x13c   :  { %985 = vst.msk [vmem:[#allocation3 + $0x38] sm:$0xff] %vm977_vm15, %v968_v34  ;;  %v1553_v37 = vpop.permute.xlu0 %1552 }
 0x13d   :  { %1571 = vst.msk [vmem:[#allocation3 + $0x30] sm:$0xff] %vm1564_vm2, %v1553_v37 }
 0x13f   :  { %v1057_v39 = vpop.permute.xlu1 %1056 }
 0x140   :  { %1074 = vst.msk [vmem:[#allocation3 + $0x38] sm:$0xff] %vm1066_vm0, %v1057_v39  ;;  %v1643_v41 = vpop.permute.xlu0 %1642 }
 0x141   :  { %1661 = vst.msk [vmem:[#allocation3 + $0x30] sm:$0xff] %vm1654_vm3, %v1643_v41 }
 0x143   :  { %v1370_v40 = vpop.permute.xlu1 %1369 }
 0x144   :  { %1387 = vst.msk [vmem:[#allocation3 + $0x38] sm:$0xff] %vm1379_vm1, %v1370_v40 }
 0x145   :  { %v1956_v49 = vpop.permute.xlu0 %1955 }
 0x146   :  { %1974 = vst.msk [vmem:[#allocation3 + $0x30] sm:$0xff] %vm1967_vm4, %v1956_v49 }
 0x147   :  { %v1555_v45 = vpop.permute.xlu1 %1554 }
 0x148   :  { %1572 = vst.msk [vmem:[#allocation3 + $0x38] sm:$0xff] %vm1564_vm2, %v1555_v45 }
 0x149   :  { %v2141_v47 = vpop.permute.xlu0 %2140 }
 0x14a   :  { %2159 = vst.msk [vmem:[#allocation3 + $0x30] sm:$0xff] %vm2152_vm5, %v2141_v47 }
 0x14b   :  { %v1645_v51 = vpop.permute.xlu1 %1644 }
 0x14c   :  { %1662 = vst.msk [vmem:[#allocation3 + $0x38] sm:$0xff] %vm1654_vm3, %v1645_v51 }
 0x14f   :  { %v1958_v52 = vpop.permute.xlu1 %1957 }
 0x150   :  { %1975 = vst.msk [vmem:[#allocation3 + $0x38] sm:$0xff] %vm1967_vm4, %v1958_v52 }
 0x151   :  { %v2168_v57 = vld [vmem:[#allocation3 + $0x30] sm:$0xff] }
 0x152   :  { %2736 = vmatprep.mubr.bf16.mxu1 %v2168_v57 }
 0x153   :  { %v2143_v54 = vpop.permute.xlu1 %2142 }
 0x154   :  { %2160 = vst.msk [vmem:[#allocation3 + $0x38] sm:$0xff] %vm2152_vm5, %v2143_v54 }
 0x15b   :  { %v2169_v48 = vld [vmem:[#allocation3 + $0x38] sm:$0xff] }
 0x15c   :  { %2737 = vmatmul.mubr.bf16.gmra.mrb[4].mxu1 %v2169_v48 }
 0x1c0   :  { %v2726_v0 = vpop.f32.mrb[0].mxu0 }
 0x1c1   :  { %v2272_v63 = vpop.f32.mrb[1].mxu0  ;;  %v3630_v7 = vadd.f32 %v2726_v0, %v3619_v61 }
 0x1c2   :  { %v2727_v4 = vpop.f32.mrb[2].mxu0  ;;  %v3625_v15 = vadd.f32 %v2272_v63, %v3619_v61 }
 0x1c3   :  { %v2275_v2 = vpop.f32.mrb[3].mxu0  ;;  %v3640_v43 = vadd.f32 %v2727_v4, %v3619_v61  ;;  %v2375_v55 = vmul.f32 %v3630_v7, %v3630_v7  ;;  %v2339_v12 = vsel %vm2335_vm6, %v3630_v7, 0.0 }
 0x1c4   :  { %v3622_v21 = vadd.f32 %v2275_v2, %v3619_v61  ;;  %v2373_v53 = vmul.f32 %v3625_v15, %v3625_v15  ;;  %v2336_v10 = vsel %vm2335_vm6, %v3625_v15, 0.0 }
 0x1c5   :  { %v2376_v50 = vmul.f32 %v3640_v43, %v3640_v43  ;;  %v2392_v3 = vsel %vm2335_vm6, %v2375_v55, 0.0  ;;  %v2341_v58 = vsel %vm2335_vm6, %v3640_v43, 0.0 }
 0x1c6   :  { %v2374_v46 = vmul.f32 %v3622_v21, %v3622_v21  ;;  %v2337_v11 = vsel %vm2335_vm6, %v3622_v21, 0.0  ;;  %v2389_v17 = vsel %vm2335_vm6, %v2373_v53, 0.0 }
 0x1c7   :  { %v2338_v19 = vadd.f32 %v2337_v11, %v2336_v10  ;;  %v2394_v23 = vsel %vm2335_vm6, %v2376_v50, 0.0 }
 0x1c8   :  { %v2390_v18 = vsel %vm2335_vm6, %v2374_v46, 0.0 }
 0x1c9   :  { %v2391_v24 = vadd.f32 %v2390_v18, %v2389_v17  ;;  %v2340_v62 = vadd.f32 %v2339_v12, %v2338_v19 }
 0x1cb   :  { %v2393_v9 = vadd.f32 %v2392_v3, %v2391_v24  ;;  %v2342_v59 = vadd.f32 %v2341_v58, %v2340_v62 }
 0x1cc   :  { %v2730_v5 = vpop.f32.mrb[4].mxu0 }
 0x1cd   :  { %v2288_v44 = vpop.f32.mrb[5].mxu0  ;;  %v3653_v13 = vadd.f32 %v2730_v5, %v3619_v61  ;;  %v2395_v28 = vadd.f32 %v2394_v23, %v2393_v9 }
 0x1ce   :  { %v3656_v14 = vadd.f32 %v2288_v44, %v3619_v61  ;;  %v2731_v20 = vpop.f32.mrb[6].mxu0 }
 0x1cf   :  { %v2291_v56 = vpop.f32.mrb[7].mxu0  ;;  %v3664_v8 = vadd.f32 %v2731_v20, %v3619_v61  ;;  %v2379_v25 = vmul.f32 %v3653_v13, %v3653_v13  ;;  %v2347_v38 = vsel %vm2335_vm6, %v3653_v13, 0.0 }
 0x1d0   :  { %v2343_v22 = vsel %vm2335_vm6, %v3656_v14, 0.0  ;;  %v2377_v1 = vmul.f32 %v3656_v14, %v3656_v14  ;;  %v3667_v26 = vadd.f32 %v2291_v56, %v3619_v61 }
 0x1d1   :  { %v2344_v27 = vadd.f32 %v2343_v22, %v2342_v59  ;;  %v2380_v42 = vmul.f32 %v3664_v8, %v3664_v8  ;;  %v2400_v39 = vsel %vm2335_vm6, %v2379_v25, 0.0  ;;  %v2349_v41 = vsel %vm2335_vm6, %v3664_v8, 0.0 }
 0x1d2   :  { %v2396_v29 = vsel %vm2335_vm6, %v2377_v1, 0.0  ;;  %v2345_v30 = vsel %vm2335_vm6, %v3667_v26, 0.0  ;;  %v2378_v31 = vmul.f32 %v3667_v26, %v3667_v26 }
 0x1d3   :  { %v2397_v32 = vadd.f32 %v2396_v29, %v2395_v28  ;;  %v2346_v36 = vadd.f32 %v2345_v30, %v2344_v27  ;;  %v2402_v45 = vsel %vm2335_vm6, %v2380_v42, 0.0 }
 0x1d4   :  { %v2398_v33 = vsel %vm2335_vm6, %v2378_v31, 0.0 }
 0x1d5   :  { %v2348_v34 = vadd.f32 %v2347_v38, %v2346_v36  ;;  %v2399_v37 = vadd.f32 %v2398_v33, %v2397_v32 }
 0x1d7   :  { %v2401_v40 = vadd.f32 %v2400_v39, %v2399_v37  ;;  %v2350_v49 = vadd.f32 %v2349_v41, %v2348_v34 }
 0x1d9   :  { %v2403_v47 = vadd.f32 %v2402_v45, %v2401_v40 }
 0x1ff   :  { %v2734_v51 = vpop.f32.mrb[0].mxu1 }
 0x200   :  { %v2304_v52 = vpop.f32.mrb[1].mxu1  ;;  %v3686_v57 = vadd.f32 %v2734_v51, %v3619_v61 }
 0x201   :  { %v3689_v54 = vadd.f32 %v2304_v52, %v3619_v61  ;;  %v2735_v48 = vpop.f32.mrb[2].mxu1 }
 0x202   :  { %v2307_v60 = vpop.f32.mrb[3].mxu1  ;;  %v3696_v63 = vadd.f32 %v2735_v48, %v3619_v61  ;;  %v2383_v46 = vmul.f32 %v3686_v57, %v3686_v57  ;;  %v2355_v55 = vsel %vm2335_vm6, %v3686_v57, 0.0 }
 0x203   :  { %v2351_v6 = vsel %vm2335_vm6, %v3689_v54, 0.0  ;;  %v2381_v0 = vmul.f32 %v3689_v54, %v3689_v54  ;;  %v3699_v4 = vadd.f32 %v2307_v60, %v3619_v61 }
 0x204   :  { %v2352_v2 = vadd.f32 %v2351_v6, %v2350_v49  ;;  %v2384_v17 = vmul.f32 %v3696_v63, %v3696_v63  ;;  %v2408_v62 = vsel %vm2335_vm6, %v2383_v46, 0.0  ;;  %v2357_v3 = vsel %vm2335_vm6, %v3696_v63, 0.0 }
 0x205   :  { %v2404_v53 = vsel %vm2335_vm6, %v2381_v0, 0.0  ;;  %v2353_v11 = vsel %vm2335_vm6, %v3699_v4, 0.0  ;;  %v2382_v10 = vmul.f32 %v3699_v4, %v3699_v4 }
 0x206   :  { %v2405_v18 = vadd.f32 %v2404_v53, %v2403_v47  ;;  %v2354_v19 = vadd.f32 %v2353_v11, %v2352_v2  ;;  %v2410_v44 = vsel %vm2335_vm6, %v2384_v17, 0.0 }
 0x207   :  { %v2406_v24 = vsel %vm2335_vm6, %v2382_v10, 0.0 }
 0x208   :  { %v2356_v12 = vadd.f32 %v2355_v55, %v2354_v19  ;;  %v2407_v50 = vadd.f32 %v2406_v24, %v2405_v18 }
 0x20a   :  { %v2409_v5 = vadd.f32 %v2408_v62, %v2407_v50  ;;  %v2358_v9 = vadd.f32 %v2357_v3, %v2356_v12 }
 0x20c   :  { %v2411_v58 = vadd.f32 %v2410_v44, %v2409_v5  ;;  %v2441_v5 = vsub.s32 1, %v3610_v16 }
 0x22f   :  { %v2738_v20 = vpop.f32.mrb[4].mxu1 }
 0x230   :  { %v2320_v23 = vpop.f32.mrb[5].mxu1  ;;  %v3718_v59 = vadd.f32 %v2738_v20, %v3619_v61 }
 0x231   :  { %v2321_v56 = vadd.f32 %v2320_v23, %v3619_v61  ;;  %v2739_v22 = vpop.f32.mrb[6].mxu1 }
 0x232   :  { %v2323_v1 = vpop.f32.mrb[7].mxu1  ;;  %v2332_v25 = vadd.f32 %v2739_v22, %v3619_v61  ;;  %v2387_v31 = vmul.f32 %v3718_v59, %v3718_v59  ;;  %v2363_v34 = vsel %vm2335_vm6, %v3718_v59, 0.0  ;;  %v2461_v22 = vsub.s32 2, %v3610_v16 }
 0x233   :  { %v2359_v27 = vsel %vm2335_vm6, %v2321_v56, 0.0  ;;  %v2385_v28 = vmul.f32 %v2321_v56, %v2321_v56  ;;  %v2324_v29 = vadd.f32 %v2323_v1, %v3619_v61 }
 0x234   :  { %v2360_v30 = vadd.f32 %v2359_v27, %v2358_v9  ;;  %v2388_v37 = vmul.f32 %v2332_v25, %v2332_v25  ;;  %v2416_v61 = vsel %vm2335_vm6, %v2387_v31, 0.0  ;;  %v2365_v49 = vsel %vm2335_vm6, %v2332_v25, 0.0 }
 0x235   :  { %v2412_v32 = vsel %vm2335_vm6, %v2385_v28, 0.0  ;;  %v2361_v36 = vsel %vm2335_vm6, %v2324_v29, 0.0  ;;  %v2386_v38 = vmul.f32 %v2324_v29, %v2324_v29 }
 0x236   :  { %v2413_v42 = vadd.f32 %v2412_v32, %v2411_v58  ;;  %v2362_v33 = vadd.f32 %v2361_v36, %v2360_v30  ;;  %v2418_v51 = vsel %vm2335_vm6, %v2388_v37, 0.0 }
 0x237   :  { %v2414_v39 = vsel %vm2335_vm6, %v2386_v38, 0.0 }
 0x238   :  { %v2364_v41 = vadd.f32 %v2363_v34, %v2362_v33  ;;  %v2415_v40 = vadd.f32 %v2414_v39, %v2413_v42 }
 0x23a   :  { %v2366_v45 = vadd.f32 %v2365_v49, %v2364_v41  ;;  %v2417_v47 = vadd.f32 %v2416_v61, %v2415_v40 }
 0x23c   :  { %v2367_v52 = vrot.slane %v2366_v45, 4  ;;  %v2419_v48 = vadd.f32 %v2418_v51, %v2417_v47 }
 0x23e   :  { %v2368_v60 = vadd.f32 %v2367_v52, %v2366_v45  ;;  %v2420_v6 = vrot.slane %v2419_v48, 4 }
 0x240   :  { %v2369_v0 = vrot.slane %v2368_v60, 2  ;;  %v2421_v2 = vadd.f32 %v2420_v6, %v2419_v48 }
 0x242   :  { %v2370_v46 = vadd.f32 %v2369_v0, %v2368_v60  ;;  %v2422_v53 = vrot.slane %v2421_v2, 2 }
 0x244   :  { %v2371_v11 = vrot.slane %v2370_v46, 1  ;;  %v2423_v10 = vadd.f32 %v2422_v53, %v2421_v2 }
 0x246   :  { %v2372_v18 = vadd.f32 %v2371_v11, %v2370_v46  ;;  %v2424_v19 = vrot.slane %v2423_v10, 1 }
 0x248   :  { %v2425_v55 = vadd.f32 %v2424_v19, %v2423_v10  ;;  %v2426_v17 = vmul.f32 0.0078125, %v2372_v18 }
 0x24a   :  { %v2427_v24 = vmul.f32 0.0078125, %v2425_v55  ;;  %v2428_v12 = vmul.f32 %v2426_v17, %v2426_v17 }
 0x24c   :  { %v2429_v50 = vsub.f32 %v2427_v24, %v2428_v12 }
 0x24e   :  { %v2430_v62 = vmax.f32 %v2429_v50, 0.0 }
 0x250   :  { %v2431_v3 = vadd.f32 1e-05, %v2430_v62 }
 0x252   :  { %2797 = vrsqrt.f32 %v2431_v3 }
 0x25c   :  { %v2798_v9 = vpop.eup %2797 }
 0x25d   :  { %v2433_v44 = vmul.f32 %v2798_v9, %v3616_v35 }
 0x25f   :  { %v2434_v58 = vmul.f32 %v2433_v44, %v2426_v17  ;;  %v2442_v20 = vrot.slane %v2433_v44, %v2441_v5 }
 0x261   :  { %v2436_v23 = vrot.slane %v2434_v58, 7  ;;  %v2443_v1 = vmul.f32 %v2442_v20, %v3625_v15  ;;  %v2444_v27 = vmul.f32 %v2442_v20, %v3622_v21  ;;  %v2445_v28 = vmul.f32 %v2442_v20, %v3630_v7 }
 0x262   :  { %v2449_v30 = vmul.f32 %v2442_v20, %v3653_v13  ;;  %v2450_v32 = vmul.f32 %v2442_v20, %v3664_v8  ;;  %v2451_v36 = vmul.f32 %v2442_v20, %v3689_v54  ;;  %v2452_v38 = vmul.f32 %v2442_v20, %v3699_v4 }
 0x263   :  { %v2438_v31 = vsub.f32 %v3616_v35, %v2436_v23  ;;  %v2453_v42 = vmul.f32 %v2442_v20, %v3686_v57  ;;  %v2454_v16 = vmul.f32 %v2442_v20, %v3696_v63  ;;  %v2455_v33 = vmul.f32 %v2442_v20, %v2321_v56 }
 0x264   :  { %v2456_v15 = vmul.f32 %v2442_v20, %v2324_v29  ;;  %v2446_v21 = vmul.f32 %v2442_v20, %v3640_v43  ;;  %v2457_v7 = vmul.f32 %v2442_v20, %v3718_v59  ;;  %v2458_v34 = vmul.f32 %v2442_v20, %v2332_v25 }
 0x265   :  { %v2462_v13 = vrot.slane %v2438_v31, %v2461_v22  ;;  %v2447_v35 = vmul.f32 %v2442_v20, %v3656_v14  ;;  %v2448_v8 = vmul.f32 %v2442_v20, %v3667_v26 }
 0x267   :  { %v2463_v54 = vadd.f32 %v2462_v13, %v2443_v1  ;;  %v2464_v37 = vadd.f32 %v2462_v13, %v2444_v27  ;;  %v2465_v4 = vadd.f32 %v2462_v13, %v2445_v28  ;;  %v2466_v39 = vadd.f32 %v2462_v13, %v2446_v21 }
 0x268   :  { %v2467_v57 = vadd.f32 %v2462_v13, %v2447_v35  ;;  %v2468_v41 = vadd.f32 %v2462_v13, %v2448_v8  ;;  %v2469_v63 = vadd.f32 %v2462_v13, %v2449_v30  ;;  %v2470_v56 = vadd.f32 %v2462_v13, %v2450_v32 }
 0x269   :  { %v2471_v29 = vadd.f32 %v2462_v13, %v2451_v36  ;;  %v2472_v40 = vadd.f32 %v2462_v13, %v2452_v38  ;;  %v2473_v43 = vadd.f32 %v2462_v13, %v2453_v42  ;;  %v2474_v61 = vadd.f32 %v2462_v13, %v2454_v16 }
 0x26a   :  { %v2475_v59 = vadd.f32 %v2462_v13, %v2455_v33  ;;  %v2476_v25 = vadd.f32 %v2462_v13, %v2456_v15  ;;  %v2477_v49 = vadd.f32 %v2462_v13, %v2457_v7  ;;  %v2478_v45 = vadd.f32 %v2462_v13, %v2458_v34 }
 0x26b   :  { %v2479_v14 = vmax.f32 %v2463_v54, 0.0  ;;  %v2480_v47 = vmax.f32 %v2464_v37, 0.0  ;;  %v2481_v26 = vmax.f32 %v2465_v4, 0.0  ;;  %v2482_v51 = vmax.f32 %v2466_v39, 0.0 }
 0x26c   :  { %v2483_v52 = vmax.f32 %v2467_v57, 0.0  ;;  %v2484_v48 = vmax.f32 %v2468_v41, 0.0  ;;  %v2485_v60 = vmax.f32 %v2469_v63, 0.0  ;;  %v2486_v6 = vmax.f32 %v2470_v56, 0.0 }
 0x26d   :  { %v2487_v0 = vmax.f32 %v2471_v29, 0.0  ;;  %v2488_v2 = vmax.f32 %v2472_v40, 0.0  ;;  %v2489_v46 = vmax.f32 %v2473_v43, 0.0  ;;  %v2490_v53 = vmax.f32 %v2474_v61, 0.0 }
 0x26e   :  { %v2491_v11 = vmax.f32 %v2475_v59, 0.0  ;;  %v2492_v10 = vmax.f32 %v2476_v25, 0.0  ;;  %v2493_v18 = vmax.f32 %v2477_v49, 0.0  ;;  %v2494_v19 = vmax.f32 %v2478_v45, 0.0 }
 0x26f   :  { %v2495_v55 = vpack.c.bf16 %v2479_v14, %v2479_v14  ;;  %v2496_v17 = vpack.c.bf16 %v2480_v47, %v2480_v47  ;;  %v2497_v24 = vpack.c.bf16 %v2481_v26, %v2481_v26  ;;  %v2498_v12 = vpack.c.bf16 %v2482_v51, %v2482_v51 }
 0x270   :  { %v2499_v50 = vpack.c.bf16 %v2483_v52, %v2483_v52  ;;  %v2500_v62 = vpack.c.bf16 %v2484_v48, %v2484_v48  ;;  %v2501_v3 = vpack.c.bf16 %v2485_v60, %v2485_v60  ;;  %v2502_v5 = vpack.c.bf16 %v2486_v6, %v2486_v6 }
 0x271   :  { %v2503_v9 = vpack.c.bf16 %v2487_v0, %v2487_v0  ;;  %v2504_v44 = vpack.c.bf16 %v2488_v2, %v2488_v2  ;;  %v2505_v58 = vpack.c.bf16 %v2489_v46, %v2489_v46  ;;  %v2506_v20 = vpack.c.bf16 %v2490_v53, %v2490_v53  ;;  %2512 = vst.msk [vmem:[%s3818_s3] sm:$0xf] %vm2511_vm7, %v2495_v55 }
 0x272   :  { %2513 = vst.msk [vmem:[%s3818_s3 + $0x4] sm:$0xf] %vm2511_vm7, %v2496_v17  ;;  %2514 = vst.msk [vmem:[%s3818_s3 + $0x8] sm:$0xf] %vm2511_vm7, %v2497_v24  ;;  %v2507_v23 = vpack.c.bf16 %v2491_v11, %v2491_v11  ;;  %v2508_v22 = vpack.c.bf16 %v2492_v10, %v2492_v10  ;;  %v2509_v1 = vpack.c.bf16 %v2493_v18, %v2493_v18 }
 0x273   :  { %2515 = vst.msk [vmem:[%s3818_s3 + $0xc] sm:$0xf] %vm2511_vm7, %v2498_v12  ;;  %v2510_v27 = vpack.c.bf16 %v2494_v19, %v2494_v19  ;;  %2516 = vst.msk [vmem:[%s3818_s3 + $0x10] sm:$0xf] %vm2511_vm7, %v2499_v50 }
 0x274   :  { %2517 = vst.msk [vmem:[%s3818_s3 + $0x14] sm:$0xf] %vm2511_vm7, %v2500_v62  ;;  %2518 = vst.msk [vmem:[%s3818_s3 + $0x18] sm:$0xf] %vm2511_vm7, %v2501_v3 }
 0x275   :  { %2519 = vst.msk [vmem:[%s3818_s3 + $0x1c] sm:$0xf] %vm2511_vm7, %v2502_v5  ;;  %2520 = vst.msk [vmem:[%s3818_s3 + $0x20] sm:$0xf] %vm2511_vm7, %v2503_v9 }
 0x276   :  { %2521 = vst.msk [vmem:[%s3818_s3 + $0x24] sm:$0xf] %vm2511_vm7, %v2504_v44  ;;  %2522 = vst.msk [vmem:[%s3818_s3 + $0x28] sm:$0xf] %vm2511_vm7, %v2505_v58 }
 0x277   :  { %2523 = vst.msk [vmem:[%s3818_s3 + $0x2c] sm:$0xf] %vm2511_vm7, %v2506_v20  ;;  %2524 = vst.msk [vmem:[%s3818_s3 + $0x30] sm:$0xf] %vm2511_vm7, %v2507_v23 }
 0x278   :  { %2525 = vst.msk [vmem:[%s3818_s3 + $0x34] sm:$0xf] %vm2511_vm7, %v2508_v22  ;;  %2526 = vst.msk [vmem:[%s3818_s3 + $0x38] sm:$0xf] %vm2511_vm7, %v2509_v1 }
 0x279   :  { %2527 = vst.msk [vmem:[%s3818_s3 + $0x3c] sm:$0xf] %vm2511_vm7, %v2510_v27 }

// kernel: policy_forward.4
= control target key start
LH: loop header
LB: loop body
LE: loop exit
PB: predicated region body
PF: predicated region fallthrough
CT: control target
= control target key end

     0   :  { %12 = vsyncpa [#allocation5], 0  ;;  %s9055_s24 = smov 0   ;;  %s11333_s0 = inlined_call_operand.vmem [shape: bf16[2,8,8,32], index: 0, kind: input, shape index: {}]   ;;  %s11334_s1 = inlined_call_operand.vmem [shape: bf16[2,9,32,32], index: 1, kind: input, shape index: {}]   ;;  %s11335_s2 = inlined_call_operand.vmem [shape: f32[2,3,32], index: 2, kind: input, shape index: {}]   ;;  %s11336_s3 = inlined_call_operand.vmem [shape: bf16[2,9,32,32], index: 3, kind: input, shape index: {}]   ;;  %s11337_s4 = inlined_call_operand.vmem [shape: f32[2,3,32], index: 4, kind: input, shape index: {}]   ;;  %s11338_s5 = inlined_call_operand.vmem [shape: bf16[32,3], index: 5, kind: input, shape index: {}]   ;;  %s11339_s6 = inlined_call_operand.hbm [shape: f32[3,3], index: 6, kind: input, shape index: {}]   ;;  %s11340_s7 = inlined_call_operand.vmem [shape: f32[128,3], index: 7, kind: output, shape index: {}]  }
   0x1 LB: > { %s9061_s25 = sadd.s32 4294967295, %s9011_s24   ;;  %p7402_p0 = scmp.ge.s32.totalorder %s9011_s24, 1  ;;  %s9011_s24 = sphi %s9055_s24, %s18_s24  }
   0x2   : > { %p211_p1 = scmp.lt.s32.totalorder %s9011_s24, 3  ;;  %p11341_p4 = scmp.eq.s32.totalorder %s9061_s25, 0 }
   0x3   : > { %s9013_s27 = smov [#allocation4]   ;;  %s8973_s9 = scalar_lea.hbm %s11339_s6, 64 }
   0x4   : > { %p9066_p3 = pnand %p7402_p0, %p211_p1  ;;  %s230_s28 = sshll.u32 %s9013_s27, 4  ;;  %s231_s28 = int_to_ptr.vmem [resolvable:$true] %s230_s28 }
   0x5   : > { %p8974_p7 = scmp.ne.s32.totalorder %s11339_s6, %s8973_s9  ;;  %p8980_p11 = scmp.lt.u32.totalorder %s8973_s9, %s11339_s6 }
   0x6   : > { %s11346_s26 = scalar_select %p9066_p3, 1, 0 }
   0x7   : > { %p8847_p5 = pneg %p9066_p3 }
   0x9   : > { %p9075_p6 = pnand %p11341_p4, %p8847_p5 }
   0xb   : > { %p8975_p8 = pneg %p9075_p6 }
   0xd   : > { %p8976_p9 = pnand %p8975_p8, %p8974_p7 }
   0xf   : > { %p8977_p10 = pneg %p8976_p9 }
  0x11   : > { %p8982_p12 = pnand %p8980_p11, %p8977_p10 }
  0x13   : > { %8985 = shalt.err (!%p8982_p12)
}
  0x14   : > { %s8986_s14 = scalar_lea.vmem %s231_s28, 64  ;;  %p8994_p5 = scmp.lt.s32.totalorder %s231_s28, %s231_s28 }
  0x15   : > { %p8987_p13 = scmp.ne.s32.totalorder %s231_s28, %s8986_s14  ;;  %p8995_p2 = scmp.lt.s32.totalorder %s8986_s14, %s8986_s14 }
  0x17   : > { %p8989_p0 = pnand %p8987_p13, %p8975_p8  ;;  %p8996_p4 = por %p8995_p2, %p8994_p5 }
  0x19   : > { %p8990_p1 = pneg %p8989_p0 }
  0x1b   : > { %p8997_p3 = pnand %p8996_p4, %p8990_p1 }
  0x1d   : > { %9000 = shalt.err (!%p8997_p3)
}
  0x1e   : > { %8850 = dma.hbm_to_vmem [thread:$0]  (!%p9075_p6), %s11339_s6, 64, %s231_s28, [#allocation5]  }
  0x1f   : > { %p11348_p7 = scmp.ne.s32.totalorder %s11346_s26, 0 }
  0x21   : > { %273 = sbr.rel (%p11348_p7) target bundleno = 1607 (0x647), region = 48 }
  0x28   : > { %p11349_p9 = scmp.eq.s32.totalorder %s9061_s25, 0 }
  0x2a   : > { %9006 = dma.done.wait (%p11349_p9), [#allocation5], 64   ;;  %p11350_p8 = pmov %p11349_p9 }
  0x2b   : > { %p313_p2 = scmp.lt.s32.totalorder %s9061_s25, 1  ;;  %p11351_p3 = scmp.ne.s32.totalorder %s9061_s25, 0 }
  0x2c   : > { %9008 = vsyncadd (%p11350_p8), [#allocation5], 4294967232  ;;  %vm336_vm0 = vcmask (!%p11351_p3), 257024   ;;  %vm338_vm1 = vcmask (!%p11351_p3), 253952   ;;  %v7974_v0 = vld [vmem:[%s11333_s0] sm:$0xff] (!%p11351_p3)   ;;  %vm410_vm2 = vcmask (!%p11351_p3), 261120  }
  0x2d   : > { %s314_s17 = scalar_select %p313_p2, %s9061_s25, 1 }
  0x2e   : > { %335 = sbr.rel (%p11351_p3) target bundleno = 75 (0x4b), region = 56  ;;  %v8005_v1 = vld [vmem:[%s11333_s0 + $0x8] sm:$0xff] (!%p11351_p3)   ;;  %v9014_v2 = vmov (!%p11351_p3), 0   ;;  %v7975_v3 = vunpack.c.l.bf16 (!%p11351_p3), %v7974_v0  ;;  %v7976_v4 = vunpack.c.h.bf16 (!%p11351_p3), %v7974_v0  ;;  %v8006_v7 = vld [vmem:[%s11333_s0 + $0x10] sm:$0xff] (!%p11351_p3)   ;;  %v8007_v8 = vld [vmem:[%s11333_s0 + $0x18] sm:$0xff] (!%p11351_p3)  }
  0x2f   : > { %s8842_s18 = smul.u32 144, %s314_s17  ;;  %s7408_s19 = sshll.u32 %s314_s17, 2  ;;  %337 = vst.msk [vmem:[#allocation3] sm:$0xf] (!%p11351_p3), %vm336_vm0, %v9014_v2  ;;  %340 = vst.msk [vmem:[#allocation3 + $0x8] sm:$0xf] (!%p11351_p3), %vm336_vm0, %v9014_v2  ;;  %v7979_v5 = vunpack.c.l.bf16 (!%p11351_p3), %v8005_v1  ;;  %v7980_v6 = vunpack.c.h.bf16 (!%p11351_p3), %v8005_v1  ;;  %v7983_v10 = vunpack.c.l.bf16 (!%p11351_p3), %v8006_v7  ;;  %v7984_v11 = vunpack.c.h.bf16 (!%p11351_p3), %v8006_v7 }
  0x30   : > { %s9106_s22 = scalar_lea.vmem %s11335_s2, %s7408_s19  ;;  %s9111_s27 = scalar_lea.vmem %s11337_s4, %s7408_s19  ;;  %342 = vst.msk [vmem:[#allocation3 + $0x10] sm:$0xf] (!%p11351_p3), %vm336_vm0, %v9014_v2  ;;  %344 = vst.msk [vmem:[#allocation3 + $0x18] sm:$0xf] (!%p11351_p3), %vm336_vm0, %v9014_v2  ;;  %v8008_v9 = vld [vmem:[%s11333_s0 + $0x20] sm:$0xff] (!%p11351_p3)   ;;  %v7987_v12 = vunpack.c.l.bf16 (!%p11351_p3), %v8007_v8  ;;  %v7988_v13 = vunpack.c.h.bf16 (!%p11351_p3), %v8007_v8  ;;  %v8009_v14 = vld [vmem:[%s11333_s0 + $0x28] sm:$0xff] (!%p11351_p3)  }
  0x31   : > { %s9116_s30 = scalar_lea.vmem %s11334_s1, %s8842_s18  ;;  %s9121_s10 = scalar_lea.vmem %s11336_s3, %s8842_s18  ;;  %346 = vst.msk [vmem:[#allocation3 + $0x20] sm:$0xf] (!%p11351_p3), %vm336_vm0, %v9014_v2  ;;  %348 = vst.msk [vmem:[#allocation3 + $0x28] sm:$0xf] (!%p11351_p3), %vm336_vm0, %v9014_v2  ;;  %v8010_v15 = vld [vmem:[%s11333_s0 + $0x30] sm:$0xff] (!%p11351_p3)   ;;  %v8011_v16 = vld [vmem:[%s11333_s0 + $0x38] sm:$0xff] (!%p11351_p3)   ;;  %v7991_v17 = vunpack.c.l.bf16 (!%p11351_p3), %v8008_v9  ;;  %v7992_v18 = vunpack.c.h.bf16 (!%p11351_p3), %v8008_v9  ;;  %v7995_v19 = vunpack.c.l.bf16 (!%p11351_p3), %v8009_v14  ;;  %v7996_v20 = vunpack.c.h.bf16 (!%p11351_p3), %v8009_v14 }
  0x32   : > { %350 = vst.msk [vmem:[#allocation3 + $0x30] sm:$0xf] (!%p11351_p3), %vm336_vm0, %v9014_v2  ;;  %352 = vst.msk [vmem:[#allocation3 + $0x38] sm:$0xf] (!%p11351_p3), %vm336_vm0, %v9014_v2  ;;  %v7999_v21 = vunpack.c.l.bf16 (!%p11351_p3), %v8010_v15  ;;  %v8000_v22 = vunpack.c.h.bf16 (!%p11351_p3), %v8010_v15  ;;  %v8003_v23 = vunpack.c.l.bf16 (!%p11351_p3), %v8011_v16  ;;  %v8004_v24 = vunpack.c.h.bf16 (!%p11351_p3), %v8011_v16 }
  0x33   : > { %354 = vst.msk [vmem:[#allocation3 + $0x40] sm:$0xf] (!%p11351_p3), %vm336_vm0, %v9014_v2  ;;  %356 = vst.msk [vmem:[#allocation3 + $0x48] sm:$0xf] (!%p11351_p3), %vm336_vm0, %v9014_v2 }
  0x34   : > { %358 = vst.msk [vmem:[#allocation3 + $0x50] sm:$0xf] (!%p11351_p3), %vm336_vm0, %v9014_v2  ;;  %360 = vst.msk [vmem:[#allocation3 + $0x58] sm:$0xf] (!%p11351_p3), %vm336_vm0, %v9014_v2 }
  0x35   : > { %362 = vst.msk [vmem:[#allocation3 + $0x60] sm:$0xf] %vm336_vm0, %v9014_v2  ;;  %364 = vst.msk [vmem:[#allocation3 + $0x68] sm:$0xf] %vm336_vm0, %v9014_v2 }
  0x36   : > { %366 = vst.msk [vmem:[#allocation3 + $0x70] sm:$0xf] %vm336_vm0, %v9014_v2  ;;  %368 = vst.msk [vmem:[#allocation3 + $0x78] sm:$0xf] %vm336_vm0, %v9014_v2 }
  0x37   : > { %370 = vst.msk [vmem:[#allocation3 + $0x80] sm:$0xf] %vm336_vm0, %v9014_v2  ;;  %372 = vst.msk [vmem:[#allocation3 + $0x88] sm:$0xf] %vm336_vm0, %v9014_v2 }
  0x38   : > { %374 = vst.msk [vmem:[#allocation3 + $0x90] sm:$0xf] %vm336_vm0, %v9014_v2  ;;  %376 = vst.msk [vmem:[#allocation3 + $0x98] sm:$0xf] %vm336_vm0, %v9014_v2 }
  0x39   : > { %339 = vst.msk [vmem:[#allocation3 + $0x4] sm:$0x1] %vm338_vm1, %v9014_v2  ;;  %341 = vst.msk [vmem:[#allocation3 + $0xc] sm:$0x1] %vm338_vm1, %v9014_v2 }
  0x3a   : > { %343 = vst.msk [vmem:[#allocation3 + $0x14] sm:$0x1] %vm338_vm1, %v9014_v2  ;;  %345 = vst.msk [vmem:[#allocation3 + $0x1c] sm:$0x1] %vm338_vm1, %v9014_v2 }
  0x3b   : > { %347 = vst.msk [vmem:[#allocation3 + $0x24] sm:$0x1] %vm338_vm1, %v9014_v2  ;;  %349 = vst.msk [vmem:[#allocation3 + $0x2c] sm:$0x1] %vm338_vm1, %v9014_v2 }
  0x3c   : > { %351 = vst.msk [vmem:[#allocation3 + $0x34] sm:$0x1] %vm338_vm1, %v9014_v2  ;;  %353 = vst.msk [vmem:[#allocation3 + $0x3c] sm:$0x1] %vm338_vm1, %v9014_v2 }
  0x3d   : > { %355 = vst.msk [vmem:[#allocation3 + $0x44] sm:$0x1] %vm338_vm1, %v9014_v2  ;;  %357 = vst.msk [vmem:[#allocation3 + $0x4c] sm:$0x1] %vm338_vm1, %v9014_v2 }
  0x3e   : > { %359 = vst.msk [vmem:[#allocation3 + $0x54] sm:$0x1] %vm338_vm1, %v9014_v2  ;;  %361 = vst.msk [vmem:[#allocation3 + $0x5c] sm:$0x1] %vm338_vm1, %v9014_v2 }
  0x3f   : > { %363 = vst.msk [vmem:[#allocation3 + $0x64] sm:$0x1] %vm338_vm1, %v9014_v2  ;;  %365 = vst.msk [vmem:[#allocation3 + $0x6c] sm:$0x1] %vm338_vm1, %v9014_v2 }
  0x40   : > { %367 = vst.msk [vmem:[#allocation3 + $0x74] sm:$0x1] %vm338_vm1, %v9014_v2  ;;  %369 = vst.msk [vmem:[#allocation3 + $0x7c] sm:$0x1] %vm338_vm1, %v9014_v2 }
  0x41   : > { %371 = vst.msk [vmem:[#allocation3 + $0x84] sm:$0x1] %vm338_vm1, %v9014_v2  ;;  %373 = vst.msk [vmem:[#allocation3 + $0x8c] sm:$0x1] %vm338_vm1, %v9014_v2 }
  0x42   : > { %375 = vst.msk [vmem:[#allocation3 + $0x94] sm:$0x1] %vm338_vm1, %v9014_v2  ;;  %377 = vst.msk [vmem:[#allocation3 + $0x9c] sm:$0x1] %vm338_vm1, %v9014_v2 }
  0x43   : > { %411 = vst.msk [vmem:[#allocation2] sm:$0xff] %vm410_vm2, %v7975_v3  ;;  %412 = vst.msk [vmem:[#allocation2 + $0x8] sm:$0xff] %vm410_vm2, %v7976_v4 }
  0x44   : > { %413 = vst.msk [vmem:[#allocation2 + $0x10] sm:$0xff] %vm410_vm2, %v7979_v5  ;;  %414 = vst.msk [vmem:[#allocation2 + $0x18] sm:$0xff] %vm410_vm2, %v7980_v6 }
  0x45   : > { %415 = vst.msk [vmem:[#allocation2 + $0x20] sm:$0xff] %vm410_vm2, %v7983_v10  ;;  %416 = vst.msk [vmem:[#allocation2 + $0x28] sm:$0xff] %vm410_vm2, %v7984_v11 }
  0x46   : > { %417 = vst.msk [vmem:[#allocation2 + $0x30] sm:$0xff] %vm410_vm2, %v7987_v12  ;;  %418 = vst.msk [vmem:[#allocation2 + $0x38] sm:$0xff] %vm410_vm2, %v7988_v13 }
  0x47   : > { %419 = vst.msk [vmem:[#allocation2 + $0x40] sm:$0xff] %vm410_vm2, %v7991_v17  ;;  %420 = vst.msk [vmem:[#allocation2 + $0x48] sm:$0xff] %vm410_vm2, %v7992_v18 }
  0x48   : > { %421 = vst.msk [vmem:[#allocation2 + $0x50] sm:$0xff] %vm410_vm2, %v7995_v19  ;;  %422 = vst.msk [vmem:[#allocation2 + $0x58] sm:$0xff] %vm410_vm2, %v7996_v20 }
  0x49   : > { %423 = vst.msk [vmem:[#allocation2 + $0x60] sm:$0xff] %vm410_vm2, %v7999_v21  ;;  %424 = vst.msk [vmem:[#allocation2 + $0x68] sm:$0xff] %vm410_vm2, %v8000_v22 }
  0x4a   : > { %425 = vst.msk [vmem:[#allocation2 + $0x70] sm:$0xff] %vm410_vm2, %v8003_v23  ;;  %426 = vst.msk [vmem:[#allocation2 + $0x78] sm:$0xff] %vm410_vm2, %v8004_v24 }
  0x4b PF: > { %v8863_v25 = vld [vmem:[%s9116_s30 + $0x10] sm:$0xff]   ;;  %v8864_v26 = vld [vmem:[%s9116_s30 + $0x18] sm:$0xff]   ;;  %v427_v27 = vld [vmem:[#allocation2] sm:$0xff]  ;;  %vm668_vm3 = vcmask 257024   ;;  %vm674_vm4 = vcmask 253952   ;;  %vm1075_vm12 = vcmask 261120  }
  0x4c   : > { %8202 = vmatprep.subr.bf16.mxu0 %v8863_v25  ;;  %v7941_v28 = vpack.c.bf16 %v427_v27, %v427_v27  ;;  %v9207_v29 = vld [vmem:[#allocation3] sm:$0xf]  ;;  %vm669_vm5 = vsmask.f32 7938  ;;  %vm675_vm6 = vsmask.f32 256 }
  0x4d   : > { %8203 = vmatpush3.bf16.msra.mxu0 %v8863_v25  ;;  %v9209_v30 = vld [vmem:[#allocation3 + $0x4] sm:$0x1]  ;;  %v811_v33 = vshrl.u32 %v9207_v29, 16  ;;  %v814_v34 = vshll.u32 %v9207_v29, 16  ;;  %v671_v35 = vld [vmem:[#allocation3 + $0x8] sm:$0xf]  ;;  %vm9218_vm7 = vmand %vm668_vm3, %vm669_vm5 }
  0x4e   : > { %8204 = vmatprep.subr.bf16.mxu0 %v8864_v26  ;;  %v508_v31 = vshrl.u32 %v7941_v28, 16  ;;  %v511_v32 = vshll.u32 %v7941_v28, 16  ;;  %v820_v36 = vshll.u32 %v9209_v30, 16  ;;  %v9215_v37 = vld [vmem:[%s9116_s30] sm:$0xff]   ;;  %v428_v38 = vld [vmem:[#allocation2 + $0x8] sm:$0xff]  ;;  %v429_v44 = vld [vmem:[#allocation2 + $0x10] sm:$0xff] }
  0x4f   : > { %v677_v41 = vld [vmem:[#allocation3 + $0xc] sm:$0x1]  ;;  %v813_v42 = vrot.slane %v811_v33, 4  ;;  %v816_v43 = vrot.slane %v814_v34, 5  ;;  %v7942_v45 = vpack.c.bf16 %v428_v38, %v428_v38  ;;  %vm9224_vm8 = vmand %vm674_vm4, %vm675_vm6  ;;  %vm807_vm9 = vsmask.f32 3328 }
  0x50   : > { %v510_v39 = vrot.slane %v508_v31, 7  ;;  %vm808_vm10 = vsmask.f32 7440  ;;  %v7943_v47 = vpack.c.bf16 %v429_v44, %v429_v44  ;;  %v430_v48 = vld [vmem:[#allocation2 + $0x18] sm:$0xff]  ;;  %v431_v53 = vld [vmem:[#allocation2 + $0x20] sm:$0xff]  ;;  %v432_v58 = vld [vmem:[#allocation2 + $0x28] sm:$0xff] }
  0x51   : > { %8205 = vmatpush3.bf16.msra.mxu0 %v8864_v26  ;;  %v817_v51 = vor.u32 %v816_v43, %v813_v42  ;;  %v516_v52 = vshrl.u32 %v7942_v45, 16  ;;  %v519_v54 = vshll.u32 %v7942_v45, 16  ;;  %v7944_v57 = vpack.c.bf16 %v430_v48, %v430_v48  ;;  %v680_v63 = vld [vmem:[#allocation3 + $0x10] sm:$0xf]  ;;  %v683_v1 = vld [vmem:[#allocation3 + $0x14] sm:$0x1]  ;;  %vm9249_vm11 = vmor %vm807_vm9, %vm808_vm10 }
  0x52   : > { %8222 = vmatprep.subr.bf16.mxu0 %v9215_v37  ;;  %v513_v49 = vor.u32 %v511_v32, %v510_v39  ;;  %v514_v50 = vrot.slane %v510_v39, 4  ;;  %v524_v55 = vshrl.u32 %v7943_v47, 16  ;;  %v527_v56 = vshll.u32 %v7943_v47, 16  ;;  %v433_v5 = vld [vmem:[#allocation2 + $0x30] sm:$0xff]  ;;  %v686_v9 = vld [vmem:[#allocation3 + $0x18] sm:$0xf] }
  0x53   : > { %v9233_v61 = vrot.slane %v820_v36, 5  ;;  %v518_v62 = vrot.slane %v516_v52, 7  ;;  %v7945_v2 = vpack.c.bf16 %v431_v53, %v431_v53  ;;  %v532_v3 = vshrl.u32 %v7944_v57, 16  ;;  %v689_v10 = vld [vmem:[#allocation3 + $0x1c] sm:$0x1]  ;;  %v435_v27 = vld [vmem:[#allocation2 + $0x40] sm:$0xff] }
  0x54   : > { %v672_v59 = vsel %vm9218_vm7, %v513_v49, %v671_v35  ;;  %v678_v60 = vsel %vm9224_vm8, %v514_v50, %v677_v41  ;;  %v526_v0 = vrot.slane %v524_v55, 7  ;;  %v535_v4 = vshll.u32 %v7944_v57, 16  ;;  %v692_v19 = vld [vmem:[#allocation3 + $0x20] sm:$0xf]  ;;  %v695_v20 = vld [vmem:[#allocation3 + $0x24] sm:$0x1] }
  0x55   : > { %673 = vst [vmem:[#allocation3 + $0x8] sm:$0xf] %v672_v59  ;;  %679 = vst [vmem:[#allocation3 + $0xc] sm:$0x1] %v678_v60  ;;  %v9235_v6 = vrot.slane %v817_v51, 4  ;;  %v521_v7 = vor.u32 %v519_v54, %v518_v62  ;;  %v522_v8 = vrot.slane %v518_v62, 4  ;;  %v7946_v11 = vpack.c.bf16 %v432_v58, %v432_v58 }
  0x56   : > { %v529_v12 = vor.u32 %v527_v56, %v526_v0  ;;  %v530_v13 = vrot.slane %v526_v0, 4  ;;  %v534_v14 = vrot.slane %v532_v3, 7  ;;  %v540_v15 = vshrl.u32 %v7945_v2, 16  ;;  %v698_v26 = vld [vmem:[#allocation3 + $0x28] sm:$0xf]  ;;  %p7928_p4 = scmp.ne.s32.totalorder %s9061_s25, 1 }
  0x57   : > { %v681_v16 = vsel %vm9218_vm7, %v521_v7, %v680_v63  ;;  %v684_v17 = vsel %vm9224_vm8, %v522_v8, %v683_v1  ;;  %v543_v18 = vshll.u32 %v7945_v2, 16  ;;  %v9241_v21 = vpack.c.bf16 %v433_v5, %v433_v5  ;;  %v701_v32 = vld [vmem:[#allocation3 + $0x2c] sm:$0x1]  ;;  %v704_v39 = vld [vmem:[#allocation3 + $0x30] sm:$0xf] }
  0x58   : > { %682 = vst [vmem:[#allocation3 + $0x10] sm:$0xf] %v681_v16  ;;  %685 = vst [vmem:[#allocation3 + $0x14] sm:$0x1] %v684_v17  ;;  %v687_v22 = vsel %vm9218_vm7, %v529_v12, %v686_v9  ;;  %v690_v23 = vsel %vm9224_vm8, %v530_v13, %v689_v10  ;;  %v537_v24 = vor.u32 %v535_v4, %v534_v14  ;;  %v538_v25 = vrot.slane %v534_v14, 4  ;;  %v436_v57 = vld [vmem:[#allocation2 + $0x48] sm:$0xff] }
  0x59   : > { %688 = vst [vmem:[#allocation3 + $0x18] sm:$0xf] %v687_v22  ;;  %691 = vst [vmem:[#allocation3 + $0x1c] sm:$0x1] %v690_v23  ;;  %v542_v31 = vrot.slane %v540_v15, 7  ;;  %v548_v33 = vshrl.u32 %v7946_v11, 16  ;;  %v9262_v47 = vpack.c.bf16 %v435_v27, %v435_v27  ;;  %v823_v48 = vsel %vm9249_vm11, %v9235_v6, %v9233_v61 }
  0x5a   : > { %v551_v34 = vshll.u32 %v7946_v11, 16  ;;  %v693_v35 = vsel %vm9218_vm7, %v537_v24, %v692_v19  ;;  %v696_v36 = vsel %vm9224_vm8, %v538_v25, %v695_v20  ;;  %v556_v38 = vshrl.u32 %v9241_v21, 16  ;;  %v707_v52 = vld [vmem:[#allocation3 + $0x34] sm:$0x1] }
  0x5b   : > { %v545_v43 = vor.u32 %v543_v18, %v542_v31  ;;  %v546_v44 = vrot.slane %v542_v31, 4  ;;  %694 = vst [vmem:[#allocation3 + $0x20] sm:$0xf] %v693_v35  ;;  %697 = vst [vmem:[#allocation3 + $0x24] sm:$0x1] %v696_v36  ;;  %v550_v45 = vrot.slane %v548_v33, 7  ;;  %v9293_v9 = vpack.c.bf16 %v436_v57, %v436_v57 }
  0x5c   : > { %v9258_v41 = vld [vmem:[#allocation3 + $0x8] sm:$0xf]  ;;  %v9260_v42 = vld [vmem:[#allocation3 + $0xc] sm:$0x1]  ;;  %v559_v61 = vshll.u32 %v9241_v21, 16  ;;  %v9280_v0 = vrot.slane %v556_v38, 7 }
  0x5d   : > { %v825_v49 = vshrl.u32 %v9258_v41, 16  ;;  %v828_v50 = vshll.u32 %v9258_v41, 16  ;;  %v834_v51 = vshll.u32 %v9260_v42, 16  ;;  %v699_v53 = vsel %vm9218_vm7, %v545_v43, %v698_v26  ;;  %v710_v31 = vld [vmem:[#allocation3 + $0x38] sm:$0xf] }
  0x5e   : > { %v702_v54 = vsel %vm9224_vm8, %v546_v44, %v701_v32  ;;  %v553_v55 = vor.u32 %v551_v34, %v550_v45  ;;  %v554_v56 = vrot.slane %v550_v45, 4  ;;  %700 = vst [vmem:[#allocation3 + $0x28] sm:$0xf] %v699_v53  ;;  %v572_v3 = vshrl.u32 %v9262_v47, 16 }
  0x5f   : > { %v827_v58 = vrot.slane %v825_v49, 4  ;;  %v830_v59 = vrot.slane %v828_v50, 5  ;;  %v836_v60 = vrot.slane %v834_v51, 5  ;;  %703 = vst [vmem:[#allocation3 + $0x2c] sm:$0x1] %v702_v54  ;;  %v575_v18 = vshll.u32 %v9262_v47, 16 }
  0x60   : > { %v9276_v62 = vld [vmem:[#allocation3 + $0x10] sm:$0xf]  ;;  %v9278_v63 = vld [vmem:[#allocation3 + $0x14] sm:$0x1]  ;;  %v705_v1 = vsel %vm9218_vm7, %v553_v55, %v704_v39  ;;  %v708_v2 = vsel %vm9224_vm8, %v554_v56, %v707_v52  ;;  %v9287_v5 = vld [vmem:[#allocation3 + $0x18] sm:$0xf]  ;;  %v561_v23 = vor.u32 %v559_v61, %v9280_v0 }
  0x61   : > { %v831_v4 = vor.u32 %v830_v59, %v827_v58  ;;  %v9289_v6 = vld [vmem:[#allocation3 + $0x1c] sm:$0x1]  ;;  %v839_v7 = vshrl.u32 %v9276_v62, 16  ;;  %v842_v8 = vshll.u32 %v9276_v62, 16  ;;  %706 = vst [vmem:[#allocation3 + $0x30] sm:$0xf] %v705_v1 }
  0x62   : > { %709 = vst [vmem:[#allocation3 + $0x34] sm:$0x1] %v708_v2  ;;  %v848_v10 = vshll.u32 %v9278_v63, 16  ;;  %v853_v11 = vshrl.u32 %v9287_v5, 16  ;;  %v856_v12 = vshll.u32 %v9287_v5, 16  ;;  %v862_v13 = vshll.u32 %v9289_v6, 16 }
  0x63   : > { %v832_v14 = vrot.slane %v831_v4, 4  ;;  %v841_v15 = vrot.slane %v839_v7, 4  ;;  %v844_v16 = vrot.slane %v842_v8, 5  ;;  %v9299_v17 = vld [vmem:[#allocation3 + $0x20] sm:$0xf]  ;;  %v562_v57 = vrot.slane %v9280_v0, 4 }
  0x64   : > { %v850_v19 = vrot.slane %v848_v10, 5  ;;  %v855_v20 = vrot.slane %v853_v11, 4  ;;  %v858_v21 = vrot.slane %v856_v12, 5  ;;  %v9302_v22 = vld [vmem:[#allocation3 + $0x24] sm:$0x1]  ;;  %v864_v26 = vrot.slane %v862_v13, 5 }
  0x65   : > { %v837_v24 = vsel %vm9249_vm11, %v832_v14, %v836_v60  ;;  %v845_v25 = vor.u32 %v844_v16, %v841_v15  ;;  %v867_v27 = vshrl.u32 %v9299_v17, 16  ;;  %v9308_v34 = vld [vmem:[#allocation3 + $0x28] sm:$0xf]  ;;  %v870_v36 = vshll.u32 %v9299_v17, 16  ;;  %v713_v49 = vld [vmem:[#allocation3 + $0x3c] sm:$0x1] }
  0x66   : > { %v7432_v32 = vcombine.low %v823_v48, %v837_v24  ;;  %v859_v33 = vor.u32 %v858_v21, %v855_v20  ;;  %v9310_v35 = vld [vmem:[#allocation3 + $0x2c] sm:$0x1]  ;;  %v876_v38 = vshll.u32 %v9302_v22, 16  ;;  %v881_v44 = vshrl.u32 %v9308_v34, 16  ;;  %v9329_v2 = vld [vmem:[#allocation3 + $0x50] sm:$0xf] }
  0x67   : > { %v846_v39 = vrot.slane %v845_v25, 4  ;;  %v869_v43 = vrot.slane %v867_v27, 4  ;;  %v884_v45 = vshll.u32 %v9308_v34, 16  ;;  %v872_v48 = vrot.slane %v870_v36, 5  ;;  %v722_v10 = vld [vmem:[#allocation3 + $0x58] sm:$0xf] }
  0x68   : > { %8206 = vmatprep.mubr.msk.bf16.mxu0 %vm1075_vm12, %v7432_v32  ;;  %v860_v50 = vrot.slane %v859_v33, 4  ;;  %v878_v51 = vrot.slane %v876_v38, 5  ;;  %v890_v52 = vshll.u32 %v9310_v35, 16  ;;  %v9318_v53 = vld [vmem:[#allocation3 + $0x30] sm:$0xf]  ;;  %v883_v55 = vrot.slane %v881_v44, 4 }
  0x69   : > { %v851_v54 = vsel %vm9249_vm11, %v846_v39, %v850_v19  ;;  %v886_v56 = vrot.slane %v884_v45, 5  ;;  %v9323_v58 = vld [vmem:[#allocation3 + $0x34] sm:$0x1]  ;;  %v873_v60 = vor.u32 %v872_v48, %v869_v43  ;;  %v711_v1 = vsel %vm9218_vm7, %v561_v23, %v710_v31  ;;  %v8866_v12 = vld [vmem:[%s9116_s30 + $0x8] sm:$0xff]   ;;  %v725_v19 = vld [vmem:[#allocation3 + $0x5c] sm:$0x1] }
  0x6a   : > { %v865_v59 = vsel %vm9249_vm11, %v860_v50, %v864_v26  ;;  %v892_v61 = vrot.slane %v890_v52, 5  ;;  %712 = vst [vmem:[#allocation3 + $0x38] sm:$0xf] %v711_v1  ;;  %v714_v8 = vsel %vm9224_vm8, %v562_v57, %v713_v49  ;;  %v895_v0 = vshrl.u32 %v9318_v53, 16  ;;  %v9334_v11 = vld [vmem:[#allocation3 + $0x54] sm:$0x1] }
  0x6b   : > { %v7433_v4 = vcombine.low %v851_v54, %v865_v59  ;;  %v887_v7 = vor.u32 %v886_v56, %v883_v55  ;;  %v874_v13 = vrot.slane %v873_v60, 4  ;;  %715 = vst [vmem:[#allocation3 + $0x3c] sm:$0x1] %v714_v8  ;;  %v898_v14 = vshll.u32 %v9318_v53, 16  ;;  %v437_v20 = vld [vmem:[#allocation2 + $0x50] sm:$0xff]  ;;  %v9352_v38 = vld [vmem:[%s9116_s30 + $0x20] sm:$0xff]  }
  0x6c   : > { %v904_v15 = vshll.u32 %v9323_v58, 16  ;;  %v574_v16 = vrot.slane %v572_v3, 7  ;;  %v897_v23 = vrot.slane %v895_v0, 4  ;;  %v923_v24 = vshrl.u32 %v9329_v2, 16  ;;  %v438_v45 = vld [vmem:[#allocation2 + $0x58] sm:$0xff] }
  0x6d   : > { %8207 = vmatmul.mubr.msk.bf16.vlgmr.msra.gmra.mrb[0].mxu0 %vm1075_vm12, %v7433_v4  ;;  %v888_v21 = vrot.slane %v887_v7, 4  ;;  %v926_v25 = vshll.u32 %v9329_v2, 16  ;;  %v879_v26 = vsel %vm9249_vm11, %v874_v13, %v878_v51  ;;  %v900_v27 = vrot.slane %v898_v14, 5 }
  0x6e   : > { %8223 = vmatpush3.bf16.msra.mxu0 %v9215_v37  ;;  %v9347_v31 = vrot.slane %v904_v15, 5  ;;  %v577_v47 = vor.u32 %v575_v18, %v574_v16  ;;  %v578_v32 = vrot.slane %v574_v16, 4  ;;  %v925_v33 = vrot.slane %v923_v24, 4  ;;  %v731_v15 = vld [vmem:[#allocation3 + $0x64] sm:$0x1] }
  0x6f   : > { %v893_v3 = vsel %vm9249_vm11, %v888_v21, %v892_v61  ;;  %v928_v36 = vrot.slane %v926_v25, 5  ;;  %8224 = vmatprep.subr.bf16.mxu0 %v8866_v12  ;;  %v901_v43 = vor.u32 %v900_v27, %v897_v23  ;;  %v932_v44 = vshll.u32 %v9334_v11, 16  ;;  %v439_v61 = vld [vmem:[#allocation2 + $0x60] sm:$0xff]  ;;  %v734_v25 = vld [vmem:[#allocation3 + $0x68] sm:$0xf] }
  0x70   : > { %v7434_v39 = vcombine.low %v879_v26, %v893_v3  ;;  %v723_v37 = vsel %vm9218_vm7, %v577_v47, %v722_v10  ;;  %v726_v18 = vsel %vm9224_vm8, %v578_v32, %v725_v19  ;;  %v7951_v50 = vpack.c.bf16 %v437_v20, %v437_v20  ;;  %v728_v10 = vld [vmem:[#allocation3 + $0x60] sm:$0xf]  ;;  %v737_v26 = vld [vmem:[#allocation3 + $0x6c] sm:$0x1] }
  0x71   : > { %724 = vst [vmem:[#allocation3 + $0x58] sm:$0xf] %v723_v37  ;;  %v929_v49 = vor.u32 %v928_v36, %v925_v33  ;;  %v580_v48 = vshrl.u32 %v9293_v9, 16  ;;  %v9361_v51 = vld [vmem:[#allocation3 + $0x38] sm:$0xf]  ;;  %v902_v52 = vrot.slane %v901_v43, 4  ;;  %v7952_v1 = vpack.c.bf16 %v438_v45, %v438_v45 }
  0x72   : > { %8210 = vmatprep.mubr.msk.bf16.mxu0 %vm1075_vm12, %v7434_v39  ;;  %727 = vst [vmem:[#allocation3 + $0x5c] sm:$0x1] %v726_v18  ;;  %v9363_v54 = vrot.slane %v932_v44, 5  ;;  %v583_v55 = vshll.u32 %v9293_v9, 16  ;;  %8225 = vmatpush3.bf16.msra.mxu0 %v8866_v12  ;;  %v9366_v56 = vld [vmem:[#allocation3 + $0x3c] sm:$0x1]  ;;  %v7953_v21 = vpack.c.bf16 %v439_v61, %v439_v61 }
  0x73   : > { %v909_v57 = vshrl.u32 %v9361_v51, 16  ;;  %v912_v59 = vshll.u32 %v9361_v51, 16  ;;  %v582_v60 = vrot.slane %v580_v48, 7  ;;  %8242 = vmatprep.subr.bf16.mxu0 %v9352_v38  ;;  %v918_v4 = vshll.u32 %v9366_v56, 16  ;;  %v740_v39 = vld [vmem:[#allocation3 + $0x70] sm:$0xf] }
  0x74   : > { %v9372_v7 = vrot.slane %v929_v49, 4  ;;  %v588_v8 = vshrl.u32 %v7951_v50, 16  ;;  %v591_v0 = vshll.u32 %v7951_v50, 16  ;;  %v907_v9 = vsel %vm9249_vm11, %v902_v52, %v9347_v31  ;;  %v440_v43 = vld [vmem:[#allocation2 + $0x68] sm:$0xff]  ;;  %v743_v50 = vld [vmem:[#allocation3 + $0x74] sm:$0x1] }
  0x75   : > { %v911_v12 = vrot.slane %v909_v57, 4  ;;  %v914_v13 = vrot.slane %v912_v59, 5  ;;  %v585_v14 = vor.u32 %v583_v55, %v582_v60  ;;  %v920_v16 = vrot.slane %v918_v4, 5  ;;  %v441_v48 = vld [vmem:[#allocation2 + $0x70] sm:$0xff] }
  0x76   : > { %v586_v19 = vrot.slane %v582_v60, 4  ;;  %v590_v20 = vrot.slane %v588_v8, 7  ;;  %v596_v27 = vshrl.u32 %v7952_v1, 16  ;;  %v599_v47 = vshll.u32 %v7952_v1, 16  ;;  %v746_v8 = vld [vmem:[#allocation3 + $0x78] sm:$0xf] }
  0x77   : > { %v915_v23 = vor.u32 %v914_v13, %v911_v12  ;;  %v729_v24 = vsel %vm9218_vm7, %v585_v14, %v728_v10  ;;  %v604_v36 = vshrl.u32 %v7953_v21, 16  ;;  %v607_v13 = vshll.u32 %v7953_v21, 16  ;;  %v749_v14 = vld [vmem:[#allocation3 + $0x7c] sm:$0x1] }
  0x78   : > { %v9379_v3 = vld [vmem:[#allocation3 + $0x58] sm:$0xf]  ;;  %v593_v32 = vor.u32 %v591_v0, %v590_v20  ;;  %v594_v31 = vrot.slane %v590_v20, 4  ;;  %730 = vst [vmem:[#allocation3 + $0x60] sm:$0xf] %v729_v24  ;;  %v732_v33 = vsel %vm9224_vm8, %v586_v19, %v731_v15  ;;  %v598_v49 = vrot.slane %v596_v27, 7 }
  0x79   : > { %v916_v37 = vrot.slane %v915_v23, 4  ;;  %v9383_v44 = vld [vmem:[#allocation3 + $0x5c] sm:$0x1]  ;;  %v937_v45 = vshrl.u32 %v9379_v3, 16  ;;  %v940_v18 = vshll.u32 %v9379_v3, 16  ;;  %v606_v59 = vrot.slane %v604_v36, 7 }
  0x7a   : > { %733 = vst [vmem:[#allocation3 + $0x64] sm:$0x1] %v732_v33  ;;  %v946_v52 = vshll.u32 %v9383_v44, 16  ;;  %v735_v55 = vsel %vm9218_vm7, %v593_v32, %v734_v25  ;;  %v738_v57 = vsel %vm9224_vm8, %v594_v31, %v737_v26  ;;  %v601_v4 = vor.u32 %v599_v47, %v598_v49 }
  0x7b   : > { %v921_v60 = vsel %vm9249_vm11, %v916_v37, %v920_v16  ;;  %v939_v61 = vrot.slane %v937_v45, 4  ;;  %v942_v1 = vrot.slane %v940_v18, 5  ;;  %736 = vst [vmem:[#allocation3 + $0x68] sm:$0xf] %v735_v55  ;;  %739 = vst [vmem:[#allocation3 + $0x6c] sm:$0x1] %v738_v57  ;;  %v7954_v23 = vpack.c.bf16 %v440_v43, %v440_v43 }
  0x7c   : > { %v7435_v0 = vcombine.low %v907_v9, %v921_v60  ;;  %v948_v10 = vrot.slane %v946_v52, 5  ;;  %v602_v12 = vrot.slane %v598_v49, 4  ;;  %v610_v19 = vrot.slane %v606_v59, 4  ;;  %v752_v60 = vld [vmem:[#allocation3 + $0x80] sm:$0xf] }
  0x7d   : > { %v943_v15 = vor.u32 %v942_v1, %v939_v61  ;;  %v741_v20 = vsel %vm9218_vm7, %v601_v4, %v740_v39  ;;  %v935_v16 = vsel %vm9249_vm11, %v9372_v7, %v9363_v54  ;;  %v609_v24 = vor.u32 %v607_v13, %v606_v59 }
  0x7e   : > { %8211 = vmatmul.mubr.msk.bf16.gmra.mrb[4].mxu0 %vm1075_vm12, %v7435_v0  ;;  %742 = vst [vmem:[#allocation3 + $0x70] sm:$0xf] %v741_v20  ;;  %v744_v9 = vsel %vm9224_vm8, %v602_v12, %v743_v50  ;;  %v7955_v21 = vpack.c.bf16 %v441_v48, %v441_v48  ;;  %v750_v27 = vsel %vm9224_vm8, %v610_v19, %v749_v14  ;;  %v612_v47 = vshrl.u32 %v7954_v23, 16 }
  0x7f   : > { %v944_v25 = vrot.slane %v943_v15, 4  ;;  %v9403_v26 = vld [vmem:[#allocation3 + $0x60] sm:$0xf]  ;;  %745 = vst [vmem:[#allocation3 + $0x74] sm:$0x1] %v744_v9  ;;  %v615_v32 = vshll.u32 %v7954_v23, 16  ;;  %v747_v7 = vsel %vm9218_vm7, %v609_v24, %v746_v8 }
  0x80   : > { %v951_v33 = vshrl.u32 %v9403_v26, 16  ;;  %v954_v54 = vshll.u32 %v9403_v26, 16  ;;  %751 = vst [vmem:[#allocation3 + $0x7c] sm:$0x1] %v750_v27  ;;  %v620_v36 = vshrl.u32 %v7955_v21, 16  ;;  %v614_v37 = vrot.slane %v612_v47, 7 }
  0x81   : > { %v9407_v31 = vld [vmem:[#allocation3 + $0x64] sm:$0x1]  ;;  %v949_v39 = vsel %vm9249_vm11, %v944_v25, %v948_v10  ;;  %748 = vst [vmem:[#allocation3 + $0x78] sm:$0xf] %v747_v7  ;;  %v623_v45 = vshll.u32 %v7955_v21, 16  ;;  %vm1418_vm13 = vcmask 1042432  }
  0x82   : > { %v960_v43 = vshll.u32 %v9407_v31, 16  ;;  %v7436_v18 = vcombine.low %v935_v16, %v949_v39  ;;  %v9416_v49 = vld [vmem:[#allocation3 + $0x68] sm:$0xf]  ;;  %v9418_v50 = vld [vmem:[#allocation3 + $0x6c] sm:$0x1]  ;;  %v953_v48 = vrot.slane %v951_v33, 4  ;;  %v617_v4 = vor.u32 %v615_v32, %v614_v37 }
  0x83   : > { %v956_v52 = vrot.slane %v954_v54, 5  ;;  %v965_v55 = vshrl.u32 %v9416_v49, 16  ;;  %v968_v57 = vshll.u32 %v9416_v49, 16  ;;  %v974_v59 = vshll.u32 %v9418_v50, 16  ;;  %v755_v15 = vld [vmem:[#allocation3 + $0x84] sm:$0x1] }
  0x84   : > { %8214 = vmatprep.mubr.msk.bf16.mxu0 %vm1075_vm12, %v7436_v18  ;;  %v962_v1 = vrot.slane %v960_v43, 5  ;;  %v622_v8 = vrot.slane %v620_v36, 7  ;;  %v618_v14 = vrot.slane %v614_v37, 4  ;;  %v753_v47 = vsel %vm9218_vm7, %v617_v4, %v752_v60  ;;  %v758_v32 = vld [vmem:[#allocation3 + $0x88] sm:$0xf] }
  0x85   : > { %v957_v61 = vor.u32 %v956_v52, %v953_v48  ;;  %v967_v0 = vrot.slane %v965_v55, 4  ;;  %v970_v10 = vrot.slane %v968_v57, 5  ;;  %v976_v12 = vrot.slane %v974_v59, 5  ;;  %v9424_v13 = vld [vmem:[#allocation3 + $0x70] sm:$0xf] }
  0x86   : > { %v9426_v20 = vld [vmem:[#allocation3 + $0x74] sm:$0x1]  ;;  %v979_v23 = vshrl.u32 %v9424_v13, 16  ;;  %v982_v16 = vshll.u32 %v9424_v13, 16  ;;  %v625_v24 = vor.u32 %v623_v45, %v622_v8  ;;  %v626_v27 = vrot.slane %v622_v8, 4 }
  0x87   : > { %v958_v19 = vrot.slane %v957_v61, 4  ;;  %v971_v9 = vor.u32 %v970_v10, %v967_v0  ;;  %v9430_v21 = vld [vmem:[#allocation3 + $0x7c] sm:$0x1]  ;;  %v988_v25 = vshll.u32 %v9426_v20, 16  ;;  %754 = vst [vmem:[#allocation3 + $0x80] sm:$0xf] %v753_v47  ;;  %v756_v55 = vsel %vm9224_vm8, %v618_v14, %v755_v15 }
  0x88   : > { %v9437_v54 = vld [vmem:[#allocation3 + $0x78] sm:$0xf]  ;;  %v981_v7 = vrot.slane %v979_v23, 4  ;;  %v984_v36 = vrot.slane %v982_v16, 5  ;;  %v761_v39 = vld [vmem:[#allocation3 + $0x8c] sm:$0x1]  ;;  %v759_v57 = vsel %vm9218_vm7, %v625_v24, %v758_v32 }
  0x89   : > { %v963_v33 = vsel %vm9249_vm11, %v958_v19, %v962_v1  ;;  %v972_v43 = vrot.slane %v971_v9, 4  ;;  %v993_v37 = vshrl.u32 %v9437_v54, 16  ;;  %v996_v45 = vshll.u32 %v9437_v54, 16  ;;  %757 = vst [vmem:[#allocation3 + $0x84] sm:$0x1] %v756_v55 }
  0x8a   : > { %v1002_v18 = vshll.u32 %v9430_v21, 16  ;;  %v985_v48 = vor.u32 %v984_v36, %v981_v7  ;;  %v990_v52 = vrot.slane %v988_v25, 5  ;;  %760 = vst [vmem:[#allocation3 + $0x88] sm:$0xf] %v759_v57  ;;  %v762_v1 = vsel %vm9224_vm8, %v626_v27, %v761_v39 }
  0x8b   : > { %v977_v59 = vsel %vm9249_vm11, %v972_v43, %v976_v12  ;;  %v995_v60 = vrot.slane %v993_v37, 4  ;;  %v998_v61 = vrot.slane %v996_v45, 5  ;;  %763 = vst [vmem:[#allocation3 + $0x8c] sm:$0x1] %v762_v1  ;;  %vm1419_vm14 = vcmask 1046532  }
  0x8c   : > { %v7437_v4 = vcombine.low %v963_v33, %v977_v59  ;;  %v986_v8 = vrot.slane %v985_v48, 4  ;;  %v1004_v10 = vrot.slane %v1002_v18, 5  ;;  %vm9510_vm15 = vmor %vm1418_vm13, %vm1419_vm14  ;;  %vm7149_vm0 = vcmask (!%p7928_p4), 23552  }
  0x8d   : > { %v999_v0 = vor.u32 %v998_v61, %v995_v60  ;;  %v7450_v61 = vcombine.low %v9207_v29, %v9258_v41  ;;  %v8873_v41 = vld [vmem:[%s9116_s30 + $0x28] sm:$0xff]  }
  0x8e   : > { %8215 = vmatmul.mubr.msk.bf16.gmra.mrb[8].mxu0 %vm1075_vm12, %v7437_v4  ;;  %v991_v14 = vsel %vm9249_vm11, %v986_v8, %v990_v52  ;;  %v9453_v19 = vld [vmem:[#allocation3 + $0x80] sm:$0xf]  ;;  %v434_v4 = vld [vmem:[#allocation2 + $0x38] sm:$0xff] }
  0x8f   : > { %v1000_v15 = vrot.slane %v999_v0, 4  ;;  %v1007_v12 = vshrl.u32 %v9453_v19, 16  ;;  %v1010_v23 = vshll.u32 %v9453_v19, 16  ;;  %v442_v8 = vld [vmem:[#allocation2 + $0x78] sm:$0xff]  ;;  %v7948_v0 = vpack.c.bf16 %v434_v4, %v434_v4 }
  0x90   : > { %v9461_v25 = vld [vmem:[#allocation3 + $0x84] sm:$0x1]  ;;  %v1435_v4 = vrot.slane %v9289_v6, 5 }
  0x91   : > { %v1005_v16 = vsel %vm9249_vm11, %v1000_v15, %v1004_v10  ;;  %v9459_v9 = vld [vmem:[#allocation3 + $0x88] sm:$0xf]  ;;  %v1009_v27 = vrot.slane %v1007_v12, 4  ;;  %v1012_v47 = vrot.slane %v1010_v23, 5  ;;  %v1016_v33 = vshll.u32 %v9461_v25, 16 }
  0x92   : > { %v7438_v24 = vcombine.low %v991_v14, %v1005_v16  ;;  %v9463_v32 = vld [vmem:[#allocation3 + $0x8c] sm:$0x1]  ;;  %v1021_v7 = vshrl.u32 %v9459_v9, 16  ;;  %v1024_v36 = vshll.u32 %v9459_v9, 16  ;;  %v7956_v10 = vpack.c.bf16 %v442_v8, %v442_v8 }
  0x93   : > { %v1013_v39 = vor.u32 %v1012_v47, %v1009_v27  ;;  %v1030_v43 = vshll.u32 %v9463_v32, 16  ;;  %v1018_v37 = vrot.slane %v1016_v33, 5  ;;  %v7451_v14 = vcombine.low %v9276_v62, %v9287_v5  ;;  %v716_v47 = vld [vmem:[#allocation3 + $0x40] sm:$0xf]  ;;  %v764_v33 = vld [vmem:[#allocation3 + $0x90] sm:$0xf] }
  0x94   : > { %8218 = vmatprep.mubr.msk.bf16.mxu0 %vm1075_vm12, %v7438_v24  ;;  %v1023_v45 = vrot.slane %v1021_v7, 4  ;;  %v1026_v18 = vrot.slane %v1024_v36, 5  ;;  %v564_v15 = vshrl.u32 %v7948_v0, 16  ;;  %v567_v12 = vshll.u32 %v7948_v0, 16  ;;  %v9487_v62 = vld [vmem:[%s9116_s30 + $0x30] sm:$0xff]  }
  0x95   : > { %v1014_v48 = vrot.slane %v1013_v39, 4  ;;  %v1032_v55 = vrot.slane %v1030_v43, 5  ;;  %v628_v23 = vshrl.u32 %v7956_v10, 16  ;;  %v7452_v16 = vcombine.low %v9299_v17, %v9308_v34 }
  0x96   : > { %v1027_v52 = vor.u32 %v1026_v18, %v1023_v45  ;;  %v631_v29 = vshll.u32 %v7956_v10, 16  ;;  %v566_v24 = vrot.slane %v564_v15, 7  ;;  %v7453_v34 = vcombine.low %v9318_v53, %v9361_v51  ;;  %v767_v45 = vld [vmem:[#allocation3 + $0x94] sm:$0x1]  ;;  %v1370_v51 = vld [vmem:[#allocation3] sm:$0xe] }
  0x97   : > { %v1019_v57 = vsel %vm9249_vm11, %v1014_v48, %v1018_v37  ;;  %v630_v27 = vrot.slane %v628_v23, 7  ;;  %v7454_v39 = vcombine.low %v9329_v2, %v9379_v3  ;;  %v719_v37 = vld [vmem:[#allocation3 + $0x44] sm:$0x1]  ;;  %v1371_v48 = vld [vmem:[#allocation3 + $0x8] sm:$0xe]  ;;  %v7455_v2 = vcombine.low %v9403_v26, %v9416_v49 }
  0x98   : > { %v1028_v59 = vrot.slane %v1027_v52, 4  ;;  %v569_v7 = vor.u32 %v567_v12, %v566_v24  ;;  %v7456_v3 = vcombine.low %v9424_v13, %v9437_v54  ;;  %v1423_v52 = vrot.slane %v9209_v30, 5  ;;  %v1372_v13 = vld [vmem:[#allocation3 + $0x10] sm:$0xe]  ;;  %v1373_v30 = vld [vmem:[#allocation3 + $0x18] sm:$0xe] }
  0x99   : > { %v633_v36 = vor.u32 %v631_v29, %v630_v27  ;;  %v634_v43 = vrot.slane %v630_v27, 4  ;;  %v1374_v54 = vld [vmem:[#allocation3 + $0x20] sm:$0xe]  ;;  %v7470_v0 = vrot.slane %v1372_v13, 9  ;;  %v7471_v10 = vrot.slane %v1373_v30, 9 }
  0x9a   : > { %v1033_v60 = vsel %vm9249_vm11, %v1028_v59, %v1032_v55  ;;  %v717_v5 = vsel %vm9218_vm7, %v569_v7, %v716_v47  ;;  %v1427_v55 = vrot.slane %v9260_v42, 5  ;;  %v7469_v59 = vrot.slane %v1371_v48, 9  ;;  %v1375_v42 = vld [vmem:[#allocation3 + $0x28] sm:$0xe]  ;;  %v1379_v29 = vld [vmem:[#allocation3 + $0x58] sm:$0xe] }
  0x9b   : > { %v7439_v1 = vcombine.low %v1019_v57, %v1033_v60  ;;  %v765_v17 = vsel %vm9218_vm7, %v633_v36, %v764_v33  ;;  %718 = vst [vmem:[#allocation3 + $0x40] sm:$0xf] %v717_v5  ;;  %v768_v53 = vsel %vm9224_vm8, %v634_v43, %v767_v45  ;;  %v7468_v57 = vrot.slane %v1370_v51, 9  ;;  %v8878_v36 = vld [vmem:[%s9116_s30 + $0x38] sm:$0xff]   ;;  %v1382_v45 = vld [vmem:[#allocation3 + $0x70] sm:$0xe] }
  0x9c   : > { %766 = vst [vmem:[#allocation3 + $0x90] sm:$0xf] %v765_v17  ;;  %769 = vst [vmem:[#allocation3 + $0x94] sm:$0x1] %v768_v53  ;;  %v1428_v49 = vsel %vm9510_vm15, %v7469_v59, %v1427_v55  ;;  %v1439_v15 = vrot.slane %v9302_v22, 5  ;;  %v7473_v12 = vrot.slane %v1375_v42, 9  ;;  %v1436_v6 = vsel %vm9510_vm15, %v7471_v10, %v1435_v4 }
  0x9d   : > { %8219 = vmatmul.mubr.msk.bf16.gmra.mrb[12].mxu0 %vm1075_vm12, %v7439_v1  ;;  %v1424_v26 = vsel %vm9510_vm15, %v7468_v57, %v1423_v52  ;;  %v7457_v1 = vcombine.low %v9453_v19, %v9459_v9  ;;  %v1443_v23 = vrot.slane %v9310_v35, 5  ;;  %v1376_v19 = vld [vmem:[#allocation3 + $0x30] sm:$0xe]  ;;  %v1447_v47 = vrot.slane %v9323_v58, 5  ;;  %v1385_v13 = vld [vmem:[#allocation3 + $0x88] sm:$0xe] }
  0x9e   : > { %8226 = vmatprep.mubr.msk.bf16.mxu0 %vm1075_vm12, %v7450_v61  ;;  %v1431_v61 = vrot.slane %v9278_v63, 5  ;;  %v7488_v8 = vcombine.low %v1424_v26, %v1428_v49  ;;  %v1378_v35 = vld [vmem:[#allocation3 + $0x50] sm:$0xe]  ;;  %v1451_v7 = vrot.slane %v9366_v56, 5  ;;  %v1455_v17 = vrot.slane %v9334_v11, 5 }
  0x9f   : > { %v1444_v22 = vsel %vm9510_vm15, %v7473_v12, %v1443_v23  ;;  %v7476_v5 = vrot.slane %v1378_v35, 9  ;;  %v1463_v51 = vrot.slane %v9407_v31, 5  ;;  %v7480_v52 = vrot.slane %v1382_v45, 9  ;;  %v1384_v49 = vld [vmem:[#allocation3 + $0x80] sm:$0xe] }
  0xa0   : > { %v1432_v63 = vsel %vm9510_vm15, %v7470_v0, %v1431_v61  ;;  %v1471_v55 = vrot.slane %v9426_v20, 5  ;;  %v1475_v59 = vrot.slane %v9430_v21, 5  ;;  %v7482_v30 = vrot.slane %v1384_v49, 9  ;;  %v8879_v10 = vld [vmem:[#allocation3 + $0x8] ss:$8 sps:$4 sm:$0xff]  }
  0xa1   : > { %v1456_v43 = vsel %vm9510_vm15, %v7476_v5, %v1455_v17  ;;  %v7483_v61 = vrot.slane %v1385_v13, 9  ;;  %v8881_v12 = vld [vmem:[#allocation3 + $0x18] ss:$8 sps:$4 sm:$0xff]   ;;  %v8882_v23 = vld [vmem:[#allocation3 + $0x28] ss:$8 sps:$4 sm:$0xff]  }
  0xa2   : > { %v9579_v35 = vld [vmem:[#allocation3 + $0xc] sm:$0x1]  ;;  %v1883_v5 = vld [vmem:[#allocation3 + $0x30] sm:$0xf]  ;;  %v1889_v13 = vld [vmem:[#allocation3 + $0x58] sm:$0xf] }
  0xa5   : > { %8227 = vmatmul.mubr.msk.bf16.vlgmr.msra.gmra.mrb[0].mxu0 %vm1075_vm12, %v7451_v14  ;;  %v7472_v14 = vrot.slane %v1374_v54, 9  ;;  %v1479_v54 = vrot.slane %v9461_v25, 5  ;;  %v1873_v25 = vld [vmem:[#allocation3 + $0x8] sm:$0xf] }
  0xa6   : > { %8243 = vmatpush3.bf16.msra.mxu0 %v9352_v38  ;;  %8230 = vmatprep.mubr.msk.bf16.mxu0 %vm1075_vm12, %v7452_v16  ;;  %v570_v38 = vrot.slane %v566_v24, 4  ;;  %v1377_v16 = vld [vmem:[#allocation3 + $0x38] sm:$0xe]  ;;  %v7474_v24 = vrot.slane %v1376_v19, 9  ;;  %v8885_v19 = vld [vmem:[%s9116_s30 + $0x48] sm:$0xff]  }
  0xa7   : > { %8244 = vmatprep.subr.bf16.mxu0 %v8873_v41  ;;  %v1440_v9 = vsel %vm9510_vm15, %v7472_v14, %v1439_v15  ;;  %v7475_v33 = vrot.slane %v1377_v16, 9  ;;  %v1480_v4 = vsel %vm9510_vm15, %v7482_v30, %v1479_v54  ;;  %v1906_v14 = vshrl.u32 %v1873_v25, 16  ;;  %v1877_v16 = vld [vmem:[#allocation3 + $0x18] sm:$0xf] }
  0xa8   : > { %v720_v18 = vsel %vm9224_vm8, %v570_v38, %v719_v37  ;;  %v7490_v27 = vcombine.low %v1440_v9, %v1444_v22  ;;  %v1448_v58 = vsel %vm9510_vm15, %v7474_v24, %v1447_v47  ;;  %v1380_v38 = vld [vmem:[#allocation3 + $0x60] sm:$0xe]  ;;  %v1909_v15 = vshll.u32 %v1873_v25, 16 }
  0xa9   : > { %721 = vst [vmem:[#allocation3 + $0x44] sm:$0x1] %v720_v18  ;;  %v1452_v56 = vsel %vm9510_vm15, %v7475_v33, %v1451_v7  ;;  %v8880_v37 = vld [vmem:[%s9116_s30 + $0x40] sm:$0xff]   ;;  %v7478_v53 = vrot.slane %v1380_v38, 9  ;;  %v1908_v9 = vrot.slane %v1906_v14, 4  ;;  %v1934_v7 = vshrl.u32 %v1877_v16, 16 }
  0xaa   : > { %8245 = vmatpush3.bf16.msra.mxu0 %v8873_v41  ;;  %v7489_v41 = vcombine.low %v1432_v63, %v1436_v6  ;;  %v7491_v18 = vcombine.low %v1448_v58, %v1452_v56  ;;  %v1911_v22 = vrot.slane %v1909_v15, 5  ;;  %v1879_v47 = vld [vmem:[#allocation3 + $0x20] sm:$0xf]  ;;  %v1881_v33 = vld [vmem:[#allocation3 + $0x28] sm:$0xf] }
  0xab   : > { %8262 = vmatprep.subr.bf16.mxu0 %v9487_v62  ;;  %v1464_v26 = vsel %vm9510_vm15, %v7478_v53, %v1463_v51  ;;  %v9590_v58 = vld [vmem:[#allocation3 + $0x24] sm:$0x1]  ;;  %v8883_v56 = vld [vmem:[#allocation3 + $0x38] ss:$8 sps:$4 sm:$0xff]   ;;  %v1948_v38 = vshrl.u32 %v1879_v47, 16  ;;  %v1979_v53 = vshll.u32 %v1883_v5, 16 }
  0xac   : > { %v1912_v17 = vor.u32 %v1911_v22, %v1908_v9  ;;  %v1936_v51 = vrot.slane %v1934_v7, 4  ;;  %v8887_v14 = vld [vmem:[#allocation3 + $0x78] ss:$8 sps:$4 sm:$0xff]   ;;  %v9610_v9 = vld [vmem:[#allocation3 + $0x3c] sm:$0x1] }
  0xad   : > { %8231 = vmatmul.mubr.msk.bf16.gmra.mrb[4].mxu0 %vm1075_vm12, %v7453_v34  ;;  %v7477_v34 = vrot.slane %v1379_v29, 9  ;;  %v9581_v29 = vld [vmem:[#allocation3 + $0x14] sm:$0x1] }
  0xae   : > { %8234 = vmatprep.mubr.msk.bf16.mxu0 %vm1075_vm12, %v7454_v39  ;;  %v1459_v39 = vrot.slane %v9383_v44, 5  ;;  %v1381_v44 = vld [vmem:[#allocation3 + $0x68] sm:$0xe] }
  0xb0   : > { %v1460_v11 = vsel %vm9510_vm15, %v7477_v34, %v1459_v39  ;;  %v1915_v34 = vshll.u32 %v9579_v35, 16  ;;  %v9588_v39 = vld [vmem:[#allocation3 + $0x1c] sm:$0x1] }
  0xb1   : > { %v7492_v48 = vcombine.low %v1456_v43, %v1460_v11  ;;  %v1951_v43 = vshll.u32 %v1879_v47, 16  ;;  %v1962_v11 = vshrl.u32 %v1881_v33, 16 }
  0xb3   : > { %v1953_v49 = vrot.slane %v1951_v43, 5 }
  0xb5   : > { %8235 = vmatmul.mubr.msk.bf16.gmra.mrb[8].mxu0 %vm1075_vm12, %v7455_v2  ;;  %v7479_v2 = vrot.slane %v1381_v44, 9  ;;  %v1965_v44 = vshll.u32 %v1881_v33, 16 }
  0xb6   : > { %8238 = vmatprep.mubr.msk.bf16.mxu0 %vm1075_vm12, %v7456_v3  ;;  %v1467_v3 = vrot.slane %v9418_v50, 5  ;;  %v1472_v50 = vsel %vm9510_vm15, %v7480_v52, %v1471_v55  ;;  %v1917_v52 = vrot.slane %v1915_v34, 5  ;;  %v1943_v55 = vshll.u32 %v9588_v39, 16 }
  0xb8   : > { %v1468_v31 = vsel %vm9510_vm15, %v7479_v2, %v1467_v3  ;;  %v9594_v2 = vld [vmem:[#allocation3 + $0x2c] sm:$0x1]  ;;  %v1913_v3 = vrot.slane %v1912_v17, 4  ;;  %v9605_v25 = vrot.slane %v1943_v55, 5  ;;  %v9633_v55 = vld [vmem:[#allocation3 + $0x44] sm:$0x1] }
  0xb9   : > { %v7493_v21 = vcombine.low %v1464_v26, %v1468_v31  ;;  %v1885_v26 = vld [vmem:[#allocation3 + $0x38] sm:$0xf]  ;;  %v1950_v31 = vrot.slane %v1948_v38, 4 }
  0xbb   : > { %v1954_v15 = vor.u32 %v1953_v49, %v1950_v31 }
  0xbd   : > { %8239 = vmatmul.mubr.msk.bf16.gmra.mrb[12].mxu0 %vm1075_vm12, %v7457_v1  ;;  %v1483_v1 = vrot.slane %v9463_v32, 5  ;;  %v1875_v32 = vld [vmem:[#allocation3 + $0x10] sm:$0xf] }
  0xbe   : > { %8246 = vmatprep.mubr.msk.bf16.mxu0 %vm1075_vm12, %v7488_v8  ;;  %v1920_v63 = vshrl.u32 %v1875_v32, 16  ;;  %v1923_v6 = vshll.u32 %v1875_v32, 16  ;;  %v1993_v32 = vshll.u32 %v1885_v26, 16 }
  0xbf   : > { %v1484_v8 = vsel %vm9510_vm15, %v7483_v61, %v1483_v1  ;;  %v1971_v1 = vshll.u32 %v9594_v2, 16 }
  0xc0   : > { %v7495_v0 = vcombine.low %v1480_v4, %v1484_v8  ;;  %v1922_v24 = vrot.slane %v1920_v63, 4  ;;  %v1887_v4 = vld [vmem:[#allocation3 + $0x40] sm:$0xf]  ;;  %v1990_v8 = vshrl.u32 %v1885_v26, 16 }
  0xc1   : > { %v2004_v22 = vshrl.u32 %v1887_v4, 16  ;;  %v9616_v33 = vrot.slane %v1971_v1, 5 }
  0xc2   : > { %v1992_v7 = vrot.slane %v1990_v8, 4 }
  0xc5   : > { %8247 = vmatmul.mubr.msk.bf16.vlgmr.msra.gmra.mrb[0].mxu0 %vm1075_vm12, %v7489_v41  ;;  %v9584_v41 = vld [vmem:[%s9116_s30 + $0x50] sm:$0xff]  }
  0xc6   : > { %8263 = vmatpush3.bf16.msra.mxu0 %v9487_v62  ;;  %8250 = vmatprep.mubr.msk.bf16.mxu0 %vm1075_vm12, %v7490_v27  ;;  %v1383_v62 = vld [vmem:[#allocation3 + $0x78] sm:$0xe]  ;;  %v1925_v27 = vrot.slane %v1923_v6, 5  ;;  %v1891_v6 = vld [vmem:[#allocation3 + $0x60] sm:$0xf] }
  0xc7   : > { %8264 = vmatprep.subr.bf16.mxu0 %v8878_v36  ;;  %v7481_v57 = vrot.slane %v1383_v62, 9  ;;  %v1929_v62 = vshll.u32 %v9581_v29, 16  ;;  %v2032_v17 = vshrl.u32 %v1891_v6, 16  ;;  %v2035_v34 = vshll.u32 %v1891_v6, 16  ;;  %v9654_v6 = vld [vmem:[#allocation3 + $0x74] sm:$0x1] }
  0xc8   : > { %v1926_v45 = vor.u32 %v1925_v27, %v1922_v24  ;;  %v2018_v24 = vshrl.u32 %v1889_v13, 16 }
  0xc9   : > { %v1476_v20 = vsel %vm9510_vm15, %v7481_v57, %v1475_v59  ;;  %v1957_v57 = vshll.u32 %v9590_v58, 16  ;;  %v9598_v59 = vld [vmem:[#allocation3 + $0x34] sm:$0x1]  ;;  %v1931_v30 = vrot.slane %v1929_v62, 5  ;;  %v2006_v62 = vrot.slane %v2004_v22, 4 }
  0xca   : > { %8265 = vmatpush3.bf16.msra.mxu0 %v8878_v36  ;;  %v7494_v42 = vcombine.low %v1472_v50, %v1476_v20  ;;  %v1937_v36 = vshll.u32 %v1877_v16, 16  ;;  %v1964_v50 = vrot.slane %v1962_v11, 4  ;;  %v1967_v20 = vrot.slane %v1965_v44, 5  ;;  %v9624_v44 = vld [vmem:[#allocation3 + $0x5c] sm:$0x1] }
  0xcb   : > { %8282 = vmatprep.subr.bf16.mxu0 %v8880_v37  ;;  %v1985_v63 = vshll.u32 %v9598_v59, 16  ;;  %v2007_v16 = vshll.u32 %v1887_v4, 16  ;;  %v1999_v11 = vshll.u32 %v9610_v9, 16  ;;  %v2034_v49 = vrot.slane %v2032_v17, 4 }
  0xcc   : > { %v2027_v1 = vshll.u32 %v9624_v44, 16 }
  0xcd   : > { %8251 = vmatmul.mubr.msk.bf16.gmra.mrb[4].mxu0 %vm1075_vm12, %v7491_v18  ;;  %v1976_v18 = vshrl.u32 %v1883_v5, 16  ;;  %v2021_v5 = vshll.u32 %v1889_v13, 16  ;;  %v9621_v43 = vrot.slane %v1985_v63, 5  ;;  %v8888_v13 = vld [vmem:[#allocation3 + $0x88] ss:$8 sps:$4 sm:$0xff]  }
  0xce   : > { %8254 = vmatprep.mubr.msk.bf16.mxu0 %vm1075_vm12, %v7492_v48  ;;  %v1939_v48 = vrot.slane %v1937_v36, 5  ;;  %v1995_v36 = vrot.slane %v1993_v32, 5  ;;  %v2029_v17 = vrot.slane %v2027_v1, 5 }
  0xcf   : > { %v1978_v54 = vrot.slane %v1976_v18, 4  ;;  %v2009_v18 = vrot.slane %v2007_v16, 5  ;;  %v2023_v31 = vrot.slane %v2021_v5, 5 }
  0xd0   : > { %v1940_v61 = vor.u32 %v1939_v48, %v1936_v51  ;;  %v2020_v51 = vrot.slane %v2018_v24, 4  ;;  %v1895_v48 = vld [vmem:[#allocation3 + $0x70] sm:$0xf]  ;;  %v1996_v26 = vor.u32 %v1995_v36, %v1992_v7 }
  0xd1   : > { %v2060_v4 = vshrl.u32 %v1895_v48, 16  ;;  %v2063_v8 = vshll.u32 %v1895_v48, 16  ;;  %v9661_v48 = vld [vmem:[#allocation3 + $0x84] sm:$0x1] }
  0xd2   : > { %v9614_v47 = vrot.slane %v1940_v61, 4  ;;  %v9644_v61 = vrot.slane %v1999_v11, 5 }
  0xd5   : > { %8255 = vmatmul.mubr.msk.bf16.gmra.mrb[8].mxu0 %vm1075_vm12, %v7493_v21  ;;  %v1927_v21 = vrot.slane %v1926_v45, 4 }
  0xd6   : > { %8258 = vmatprep.mubr.msk.bf16.mxu0 %vm1075_vm12, %v7494_v42  ;;  %v1981_v42 = vrot.slane %v1979_v53, 5  ;;  %v9627_v53 = vld [vmem:[#allocation3 + $0x64] sm:$0x1] }
  0xd7   : > { %v1932_v27 = vsel %vm9249_vm11, %v1927_v21, %v1931_v30  ;;  %v2041_v32 = vshll.u32 %v9627_v53, 16 }
  0xdd   : > { %8259 = vmatmul.mubr.msk.bf16.gmra.mrb[12].mxu0 %vm1075_vm12, %v7495_v0  ;;  %v8886_v0 = vld [vmem:[#allocation3 + $0x68] ss:$8 sps:$4 sm:$0xff]  }
  0xde   : > { %8266 = vmatprep.mubr.msk.bf16.mxu0 %vm1075_vm12, %v8879_v10  ;;  %v1918_v10 = vsel %vm9249_vm11, %v1913_v3, %v1917_v52  ;;  %v1946_v52 = vsel %vm9249_vm11, %v9614_v47, %v9605_v25  ;;  %v2013_v25 = vshll.u32 %v9633_v55, 16  ;;  %v2065_v47 = vrot.slane %v2063_v8, 5 }
  0xdf   : > { %v7532_v3 = vcombine.low %v1918_v10, %v1932_v27  ;;  %v2010_v10 = vor.u32 %v2009_v18, %v2006_v62  ;;  %v2062_v27 = vrot.slane %v2060_v4, 4  ;;  %v8890_v18 = vld [vmem:[%s9116_s30 + $0x58] sm:$0xff]  }
  0xe0   : > { %v2015_v5 = vrot.slane %v2013_v25, 5 }
  0xe1   : > { %v2011_v36 = vrot.slane %v2010_v10, 4  ;;  %v2097_v10 = vshll.u32 %v9661_v48, 16 }
  0xe5   : > { %8267 = vmatmul.mubr.msk.bf16.vlgmr.msra.gmra.mrb[0].mxu0 %vm1075_vm12, %v8881_v12  ;;  %v9607_v12 = vrot.slane %v1957_v57, 5  ;;  %v9635_v57 = vld [vmem:[#allocation3 + $0x6c] sm:$0x1] }
  0xe6   : > { %8283 = vmatpush3.bf16.msra.mxu0 %v8880_v37  ;;  %8270 = vmatprep.mubr.msk.bf16.mxu0 %vm1075_vm12, %v8882_v23  ;;  %v8884_v37 = vld [vmem:[#allocation3 + $0x58] ss:$8 sps:$4 sm:$0xff]   ;;  %v1968_v23 = vor.u32 %v1967_v20, %v1964_v50  ;;  %v2037_v50 = vrot.slane %v2035_v34, 5  ;;  %v2055_v63 = vshll.u32 %v9635_v57, 16  ;;  %v2043_v34 = vrot.slane %v2041_v32, 5 }
  0xe7   : > { %8284 = vmatprep.subr.bf16.mxu0 %v8885_v19  ;;  %v1897_v20 = vld [vmem:[#allocation3 + $0x78] sm:$0xf] }
  0xe8   : > { %v9619_v38 = vrot.slane %v1968_v23, 4  ;;  %v2038_v23 = vor.u32 %v2037_v50, %v2034_v49  ;;  %v2074_v16 = vshrl.u32 %v1897_v20, 16  ;;  %v2077_v24 = vshll.u32 %v1897_v20, 16 }
  0xe9   : > { %v2057_v11 = vrot.slane %v2055_v63, 5  ;;  %v2066_v50 = vor.u32 %v2065_v47, %v2062_v27  ;;  %v9678_v63 = vld [vmem:[%s9116_s30 + $0x60] sm:$0xff]  }
  0xea   : > { %8285 = vmatpush3.bf16.msra.mxu0 %v8885_v19  ;;  %v1982_v19 = vor.u32 %v1981_v42, %v1978_v54  ;;  %v1974_v30 = vsel %vm9249_vm11, %v9619_v38, %v9616_v33 }
  0xeb   : > { %8302 = vmatprep.subr.bf16.mxu0 %v9584_v41 }
  0xec   : > { %v1983_v45 = vrot.slane %v1982_v19, 4 }
  0xed   : > { %8271 = vmatmul.mubr.msk.bf16.gmra.mrb[4].mxu0 %vm1075_vm12, %v8883_v56  ;;  %v1955_v56 = vrot.slane %v1954_v15, 4  ;;  %v1997_v15 = vrot.slane %v1996_v26, 4  ;;  %v2079_v26 = vrot.slane %v2077_v24, 5 }
  0xee   : > { %8274 = vmatprep.mubr.msk.bf16.mxu0 %vm1075_vm12, %v8884_v37  ;;  %v1893_v37 = vld [vmem:[#allocation3 + $0x68] sm:$0xf] }
  0xef   : > { %v1960_v21 = vsel %vm9249_vm11, %v1955_v56, %v9607_v12  ;;  %v2046_v54 = vshrl.u32 %v1893_v37, 16  ;;  %v2049_v42 = vshll.u32 %v1893_v37, 16  ;;  %v2024_v12 = vor.u32 %v2023_v31, %v2020_v51  ;;  %v1901_v56 = vld [vmem:[#allocation3 + $0x88] sm:$0xf]  ;;  %v1903_v31 = vld [vmem:[#allocation3 + $0x90] sm:$0xf] }
  0xf0   : > { %v2069_v37 = vshll.u32 %v9654_v6, 16  ;;  %v7533_v62 = vcombine.low %v1946_v52, %v1960_v21  ;;  %v2002_v1 = vsel %vm9249_vm11, %v1997_v15, %v9644_v61  ;;  %v2016_v52 = vsel %vm9249_vm11, %v2011_v36, %v2015_v5  ;;  %v9682_v36 = vld [vmem:[#allocation3 + $0x94] sm:$0x1] }
  0xf1   : > { %v2048_v19 = vrot.slane %v2046_v54, 4  ;;  %v2051_v22 = vrot.slane %v2049_v42, 5  ;;  %v2025_v38 = vrot.slane %v2024_v12, 4  ;;  %v2102_v54 = vshrl.u32 %v1901_v56, 16 }
  0xf2   : > { %v2105_v42 = vshll.u32 %v1901_v56, 16  ;;  %v2071_v8 = vrot.slane %v2069_v37, 5  ;;  %v2067_v61 = vrot.slane %v2066_v50, 4  ;;  %v2116_v25 = vshrl.u32 %v1903_v31, 16 }
  0xf3   : > { %v2052_v51 = vor.u32 %v2051_v22, %v2048_v19  ;;  %v2030_v21 = vsel %vm9249_vm11, %v2025_v38, %v2029_v17  ;;  %v2119_v32 = vshll.u32 %v1903_v31, 16  ;;  %v2104_v12 = vrot.slane %v2102_v54, 4  ;;  %v9680_v19 = vld [vmem:[#allocation3 + $0x8c] sm:$0x1] }
  0xf4   : > { %v7535_v22 = vcombine.low %v2002_v1, %v2016_v52  ;;  %v2111_v17 = vshll.u32 %v9680_v19, 16 }
  0xf5   : > { %8275 = vmatmul.mubr.msk.bf16.gmra.mrb[8].mxu0 %vm1075_vm12, %v8886_v0  ;;  %v1988_v0 = vsel %vm9249_vm11, %v1983_v45, %v9621_v43  ;;  %v2039_v43 = vrot.slane %v2038_v23, 4  ;;  %v9658_v45 = vld [vmem:[#allocation3 + $0x7c] sm:$0x1]  ;;  %v2053_v4 = vrot.slane %v2052_v51, 4  ;;  %v2107_v23 = vrot.slane %v2105_v42, 5 }
  0xf6   : > { %8278 = vmatprep.mubr.msk.bf16.mxu0 %vm1075_vm12, %v8887_v14  ;;  %v1899_v14 = vld [vmem:[#allocation3 + $0x80] sm:$0xf]  ;;  %v7534_v49 = vcombine.low %v1974_v30, %v1988_v0  ;;  %v2083_v0 = vshll.u32 %v9658_v45, 16  ;;  %v2121_v24 = vrot.slane %v2119_v32, 5  ;;  %v2308_v51 = vld [vmem:[#allocation3 + $0x10] sm:$0xe] }
  0xf7   : > { %v2088_v33 = vshrl.u32 %v1899_v14, 16  ;;  %v2091_v7 = vshll.u32 %v1899_v14, 16  ;;  %v2044_v30 = vsel %vm9249_vm11, %v2039_v43, %v2043_v34  ;;  %v2058_v5 = vsel %vm9249_vm11, %v2053_v4, %v2057_v11  ;;  %v2310_v4 = vld [vmem:[#allocation3 + $0x20] sm:$0xe] }
  0xf8   : > { %v2085_v47 = vrot.slane %v2083_v0, 5  ;;  %v2072_v34 = vsel %vm9249_vm11, %v2067_v61, %v2071_v8  ;;  %v2108_v56 = vor.u32 %v2107_v23, %v2104_v12  ;;  %v2125_v43 = vshll.u32 %v9682_v36, 16  ;;  %v2311_v8 = vld [vmem:[#allocation3 + $0x28] sm:$0xe] }
  0xf9   : > { %v2090_v20 = vrot.slane %v2088_v33, 4  ;;  %v7537_v11 = vcombine.low %v2058_v5, %v2072_v34  ;;  %v7551_v54 = vrot.slane %v2308_v51, 9  ;;  %v2361_v42 = vrot.slane %v9581_v29, 5  ;;  %v2312_v29 = vld [vmem:[#allocation3 + $0x30] sm:$0xe] }
  0xfa   : > { %v2109_v31 = vrot.slane %v2108_v56, 4  ;;  %v2127_v50 = vrot.slane %v2125_v43, 5  ;;  %v7553_v32 = vrot.slane %v2310_v4, 9  ;;  %v2373_v12 = vrot.slane %v9594_v2, 5  ;;  %v2318_v51 = vld [vmem:[#allocation3 + $0x70] sm:$0xe] }
  0xfb   : > { %v7555_v23 = vrot.slane %v2312_v29, 9  ;;  %v2381_v5 = vrot.slane %v9610_v9, 5  ;;  %v2385_v34 = vrot.slane %v9633_v55, 5  ;;  %v2413_v29 = vrot.slane %v9680_v19, 5  ;;  %v2808_v19 = vld [vmem:[#allocation3 + $0x10] sm:$0xf] }
  0xfd   : > { %8279 = vmatmul.mubr.msk.bf16.gmra.mrb[12].mxu0 %vm1075_vm12, %v8888_v13  ;;  %v2093_v13 = vrot.slane %v2091_v7, 5  ;;  %v2099_v7 = vrot.slane %v2097_v10, 5 }
  0xfe   : > { %8286 = vmatprep.mubr.msk.bf16.mxu0 %vm1075_vm12, %v7532_v3  ;;  %v2076_v3 = vrot.slane %v2074_v16, 4  ;;  %v7536_v16 = vcombine.low %v2030_v21, %v2044_v30  ;;  %v2309_v21 = vld [vmem:[#allocation3 + $0x18] sm:$0xe] }
  0xff   : > { %v2094_v15 = vor.u32 %v2093_v13, %v2090_v20  ;;  %v2357_v13 = vrot.slane %v9579_v35, 5  ;;  %v2362_v35 = vsel %vm9510_vm15, %v7551_v54, %v2361_v42  ;;  %v7552_v61 = vrot.slane %v2309_v21, 9 }
 0x100   : > { %v2080_v14 = vor.u32 %v2079_v26, %v2076_v3  ;;  %v2113_v3 = vrot.slane %v2111_v17, 5  ;;  %v2405_v42 = vrot.slane %v9658_v45, 5 }
 0x101   : > { %v2095_v33 = vrot.slane %v2094_v15, 4  ;;  %v7554_v15 = vrot.slane %v2311_v8, 9 }
 0x102   : > { %v2081_v27 = vrot.slane %v2080_v14, 4  ;;  %v2114_v1 = vsel %vm9249_vm11, %v2109_v31, %v2113_v3  ;;  %v2369_v14 = vrot.slane %v9590_v58, 5  ;;  %v2319_v3 = vld [vmem:[#allocation3 + $0x78] sm:$0xe] }
 0x103   : > { %v2374_v58 = vsel %vm9510_vm15, %v7554_v15, %v2373_v12  ;;  %v7562_v54 = vrot.slane %v2319_v3, 9  ;;  %v8895_v15 = vld [vmem:[#allocation3 + $0x20] ss:$8 sps:$4 sm:$0xff]   ;;  %v2810_v12 = vld [vmem:[#allocation3 + $0x18] sm:$0xf] }
 0x104   : > { %v2086_v37 = vsel %vm9249_vm11, %v2081_v27, %v2085_v47  ;;  %v2316_v27 = vld [vmem:[#allocation3 + $0x60] sm:$0xe] }
 0x105   : > { %8287 = vmatmul.mubr.msk.bf16.vlgmr.msra.gmra.mrb[0].mxu0 %vm1075_vm12, %v7533_v62  ;;  %v2100_v62 = vsel %vm9249_vm11, %v2095_v33, %v2099_v7  ;;  %v7559_v43 = vrot.slane %v2316_v27, 9  ;;  %v9767_v27 = vld [vmem:[#allocation3 + $0x14] sm:$0x1] }
 0x106   : > { %8303 = vmatpush3.bf16.msra.mxu0 %v9584_v41  ;;  %8290 = vmatprep.mubr.msk.bf16.mxu0 %vm1075_vm12, %v7534_v49  ;;  %v2118_v41 = vrot.slane %v2116_v25, 4  ;;  %v7538_v26 = vcombine.low %v2086_v37, %v2100_v62  ;;  %v2365_v25 = vrot.slane %v9588_v39, 5  ;;  %v2313_v39 = vld [vmem:[#allocation3 + $0x38] sm:$0xe]  ;;  %v2393_v37 = vrot.slane %v9627_v53, 5  ;;  %v8892_v62 = vld [vmem:[%s9116_s30 + $0x68] sm:$0xff]  }
 0x107   : > { %8304 = vmatprep.subr.bf16.mxu0 %v8890_v18  ;;  %v7556_v33 = vrot.slane %v2313_v39, 9  ;;  %v2855_v39 = vshrl.u32 %v2810_v12, 16 }
 0x108   : > { %v2122_v38 = vor.u32 %v2121_v24, %v2118_v41  ;;  %v2370_v41 = vsel %vm9510_vm15, %v7553_v32, %v2369_v14  ;;  %v2314_v24 = vld [vmem:[#allocation3 + $0x40] sm:$0xe]  ;;  %v2394_v53 = vsel %vm9510_vm15, %v7559_v43, %v2393_v37  ;;  %v8893_v14 = vld [vmem:[#allocation3 + $0x10] ss:$8 sps:$4 sm:$0xff]   ;;  %v9772_v37 = vld [vmem:[#allocation3 + $0x1c] sm:$0x1] }
 0x109   : > { %v7557_v17 = vrot.slane %v2314_v24, 9  ;;  %v2382_v9 = vsel %vm9510_vm15, %v7556_v33, %v2381_v5  ;;  %v2816_v43 = vld [vmem:[#allocation3 + $0x30] sm:$0xf] }
 0x10a   : > { %8305 = vmatpush3.bf16.msra.mxu0 %v8890_v18  ;;  %v2307_v18 = vld [vmem:[#allocation3 + $0x8] sm:$0xe]  ;;  %v2123_v49 = vrot.slane %v2122_v38, 4  ;;  %v2389_v38 = vrot.slane %v9624_v44, 5 }
 0x10b   : > { %8322 = vmatprep.subr.bf16.mxu0 %v9678_v63  ;;  %v7550_v20 = vrot.slane %v2307_v18, 9  ;;  %v2386_v55 = vsel %vm9510_vm15, %v7557_v17, %v2385_v34  ;;  %v2317_v18 = vld [vmem:[#allocation3 + $0x68] sm:$0xe] }
 0x10c   : > { %v2128_v52 = vsel %vm9249_vm11, %v2123_v49, %v2127_v50  ;;  %v7560_v31 = vrot.slane %v2317_v18, 9  ;;  %v2397_v50 = vrot.slane %v9635_v57, 5  ;;  %v8897_v34 = vld [vmem:[#allocation3 + $0x40] ss:$8 sps:$4 sm:$0xff]  }
 0x10d   : > { %8291 = vmatmul.mubr.msk.bf16.gmra.mrb[4].mxu0 %vm1075_vm12, %v7535_v22  ;;  %v2358_v30 = vsel %vm9510_vm15, %v7550_v20, %v2357_v13  ;;  %v7539_v0 = vcombine.low %v2114_v1, %v2128_v52  ;;  %v2377_v22 = vrot.slane %v9598_v59, 5  ;;  %v2315_v59 = vld [vmem:[#allocation3 + $0x58] sm:$0xe]  ;;  %v7561_v20 = vrot.slane %v2318_v51, 9  ;;  %v8898_v18 = vld [vmem:[#allocation3 + $0x60] ss:$8 sps:$4 sm:$0xff]  }
 0x10e   : > { %8294 = vmatprep.mubr.msk.bf16.mxu0 %vm1075_vm12, %v7536_v16  ;;  %v7570_v10 = vcombine.low %v2358_v30, %v2362_v35  ;;  %v2366_v16 = vsel %vm9510_vm15, %v7552_v61, %v2365_v25  ;;  %v7558_v56 = vrot.slane %v2315_v59, 9  ;;  %v2401_v13 = vrot.slane %v9654_v6, 5  ;;  %v2321_v30 = vld [vmem:[#allocation3 + $0x88] sm:$0xe]  ;;  %v2322_v35 = vld [vmem:[#allocation3 + $0x90] sm:$0xe] }
 0x10f   : > { %v2378_v2 = vsel %vm9510_vm15, %v7555_v23, %v2377_v22  ;;  %v7571_v47 = vcombine.low %v2366_v16, %v2370_v41  ;;  %v2409_v52 = vrot.slane %v9661_v48, 5  ;;  %v2398_v21 = vsel %vm9510_vm15, %v7560_v31, %v2397_v50  ;;  %v8896_v22 = vld [vmem:[#allocation3 + $0x30] ss:$8 sps:$4 sm:$0xff]   ;;  %v2812_v41 = vld [vmem:[#allocation3 + $0x20] sm:$0xf] }
 0x110   : > { %v7572_v7 = vcombine.low %v2374_v58, %v2378_v2  ;;  %v2390_v44 = vsel %vm9510_vm15, %v7558_v56, %v2389_v38  ;;  %v2402_v57 = vsel %vm9510_vm15, %v7561_v20, %v2401_v13  ;;  %v2406_v6 = vsel %vm9510_vm15, %v7562_v54, %v2405_v42  ;;  %v8899_v16 = vld [vmem:[%s9116_s30 + $0x78] sm:$0xff]   ;;  %v2814_v2 = vld [vmem:[#allocation3 + $0x28] sm:$0xf] }
 0x111   : > { %v7574_v49 = vcombine.low %v2390_v44, %v2394_v53  ;;  %v7575_v48 = vcombine.low %v2398_v21, %v2402_v57  ;;  %v7564_v4 = vrot.slane %v2321_v30, 9  ;;  %v2417_v61 = vrot.slane %v9682_v36, 5  ;;  %v2818_v51 = vld [vmem:[#allocation3 + $0x38] sm:$0xf] }
 0x112   : > { %v2841_v36 = vshrl.u32 %v2808_v19, 16  ;;  %v2844_v23 = vshll.u32 %v2808_v19, 16  ;;  %v2858_v58 = vshll.u32 %v2810_v12, 16  ;;  %v2872_v33 = vshll.u32 %v2812_v41, 16  ;;  %v8900_v21 = vld [vmem:[#allocation3 + $0x70] ss:$8 sps:$4 sm:$0xff]  }
 0x113   : > { %v2883_v5 = vshrl.u32 %v2814_v2, 16  ;;  %v2886_v17 = vshll.u32 %v2814_v2, 16  ;;  %v2857_v56 = vrot.slane %v2855_v39, 4  ;;  %v2900_v31 = vshll.u32 %v2816_v43, 16  ;;  %v2824_v19 = vld [vmem:[#allocation3 + $0x60] sm:$0xf] }
 0x114   : > { %v2843_v24 = vrot.slane %v2841_v36, 4  ;;  %v2846_v59 = vrot.slane %v2844_v23, 5  ;;  %v2860_v38 = vrot.slane %v2858_v58, 5  ;;  %v2874_v53 = vrot.slane %v2872_v33, 5 }
 0x115   : > { %8295 = vmatmul.mubr.msk.bf16.gmra.mrb[8].mxu0 %vm1075_vm12, %v7537_v11  ;;  %v8894_v11 = vld [vmem:[%s9116_s30 + $0x70] sm:$0xff]   ;;  %v2885_v3 = vrot.slane %v2883_v5, 4  ;;  %v2864_v50 = vshll.u32 %v9772_v37, 16  ;;  %v2911_v42 = vshrl.u32 %v2818_v51, 16  ;;  %v2956_v33 = vshll.u32 %v2824_v19, 16 }
 0x116   : > { %8298 = vmatprep.mubr.msk.bf16.mxu0 %vm1075_vm12, %v7538_v26  ;;  %v7573_v26 = vcombine.low %v2382_v9, %v2386_v55  ;;  %v2850_v9 = vshll.u32 %v9767_v27, 16  ;;  %v9775_v55 = vld [vmem:[#allocation3 + $0x24] sm:$0x1] }
 0x117   : > { %v2878_v20 = vshll.u32 %v9775_v55, 16 }
 0x118   : > { %v2852_v54 = vrot.slane %v2850_v9, 5 }
 0x11d   : > { %8299 = vmatmul.mubr.msk.bf16.gmra.mrb[12].mxu0 %vm1075_vm12, %v7539_v0  ;;  %v7565_v0 = vrot.slane %v2322_v35, 9  ;;  %v2820_v35 = vld [vmem:[#allocation3 + $0x40] sm:$0xf] }
 0x11e   : > { %8306 = vmatprep.mubr.msk.bf16.mxu0 %vm1075_vm12, %v7570_v10  ;;  %v2414_v10 = vsel %vm9510_vm15, %v7564_v4, %v2413_v29  ;;  %v8901_v4 = vld [vmem:[#allocation3 + $0x80] ss:$8 sps:$4 sm:$0xff]   ;;  %v2866_v29 = vrot.slane %v2864_v50, 5  ;;  %v2928_v12 = vshll.u32 %v2820_v35, 16 }
 0x11f   : > { %v2418_v25 = vsel %vm9510_vm15, %v7565_v0, %v2417_v61  ;;  %v2880_v0 = vrot.slane %v2878_v20, 5  ;;  %v9785_v61 = vld [vmem:[#allocation3 + $0x34] sm:$0x1]  ;;  %v2958_v20 = vrot.slane %v2956_v33, 5 }
 0x120   : > { %v7577_v32 = vcombine.low %v2414_v10, %v2418_v25  ;;  %v9789_v25 = vld [vmem:[#allocation3 + $0x3c] sm:$0x1]  ;;  %v2906_v2 = vshll.u32 %v9785_v61, 16 }
 0x125   : > { %8307 = vmatmul.mubr.msk.bf16.vlgmr.msra.gmra.mrb[0].mxu0 %vm1075_vm12, %v7571_v47  ;;  %v2869_v47 = vshrl.u32 %v2812_v41, 16 }
 0x126   : > { %8323 = vmatpush3.bf16.msra.mxu0 %v9678_v63  ;;  %8310 = vmatprep.mubr.msk.bf16.mxu0 %vm1075_vm12, %v7572_v7  ;;  %v2320_v63 = vld [vmem:[#allocation3 + $0x80] sm:$0xe] }
 0x127   : > { %8324 = vmatprep.subr.bf16.mxu0 %v8892_v62  ;;  %v7563_v1 = vrot.slane %v2320_v63, 9  ;;  %v9770_v7 = vld [vmem:[%s9116_s30 + $0x80] sm:$0xff]   ;;  %v2871_v44 = vrot.slane %v2869_v47, 4  ;;  %v2888_v63 = vrot.slane %v2886_v17, 5  ;;  %v2953_v47 = vshrl.u32 %v2824_v19, 16 }
 0x129   : > { %v2410_v45 = vsel %vm9510_vm15, %v7563_v1, %v2409_v52  ;;  %v2914_v1 = vshll.u32 %v2818_v51, 16  ;;  %v2875_v57 = vor.u32 %v2874_v53, %v2871_v44  ;;  %v2889_v30 = vor.u32 %v2888_v63, %v2885_v3  ;;  %v9803_v3 = vld [vmem:[#allocation3 + $0x4c] sm:$0x1] }
 0x12a   : > { %8325 = vmatpush3.bf16.msra.mxu0 %v8892_v62  ;;  %v7576_v8 = vcombine.low %v2406_v6, %v2410_v45  ;;  %v2847_v62 = vor.u32 %v2846_v59, %v2843_v24  ;;  %v2902_v45 = vrot.slane %v2900_v31, 5  ;;  %v2920_v24 = vshll.u32 %v9789_v25, 16  ;;  %v9793_v59 = vld [vmem:[#allocation3 + $0x44] sm:$0x1] }
 0x12b   : > { %8342 = vmatprep.subr.bf16.mxu0 %v8894_v11  ;;  %v2890_v41 = vrot.slane %v2889_v30, 4  ;;  %v2934_v63 = vshll.u32 %v9793_v59, 16  ;;  %v2955_v50 = vrot.slane %v2953_v47, 4 }
 0x12c   : > { %v2848_v13 = vrot.slane %v2847_v62, 4  ;;  %v2922_v31 = vrot.slane %v2920_v24, 5 }
 0x12d   : > { %8311 = vmatmul.mubr.msk.bf16.gmra.mrb[4].mxu0 %vm1075_vm12, %v7573_v26  ;;  %v2897_v26 = vshrl.u32 %v2816_v43, 16  ;;  %v2930_v43 = vrot.slane %v2928_v12, 5 }
 0x12e   : > { %8314 = vmatprep.mubr.msk.bf16.mxu0 %vm1075_vm12, %v7574_v49  ;;  %v2861_v49 = vor.u32 %v2860_v38, %v2857_v56  ;;  %v2853_v10 = vsel %vm9249_vm11, %v2848_v13, %v2852_v54  ;;  %v9808_v54 = vld [vmem:[#allocation3 + $0x6c] sm:$0x1] }
 0x12f   : > { %v2899_v6 = vrot.slane %v2897_v26, 4  ;;  %v2908_v26 = vrot.slane %v2906_v2, 5 }
 0x131   : > { %v2903_v58 = vor.u32 %v2902_v45, %v2899_v6  ;;  %v2948_v6 = vshll.u32 %v9803_v3, 16  ;;  %v2830_v45 = vld [vmem:[#allocation3 + $0x78] sm:$0xf] }
 0x132   : > { %v2995_v12 = vshrl.u32 %v2830_v45, 16 }
 0x133   : > { %v2904_v51 = vrot.slane %v2903_v58, 4 }
 0x135   : > { %8315 = vmatmul.mubr.msk.bf16.gmra.mrb[8].mxu0 %vm1075_vm12, %v7575_v48  ;;  %v2822_v48 = vld [vmem:[#allocation3 + $0x48] sm:$0xf] }
 0x136   : > { %8318 = vmatprep.mubr.msk.bf16.mxu0 %vm1075_vm12, %v7576_v8  ;;  %v2862_v8 = vrot.slane %v2861_v49, 4  ;;  %v2939_v36 = vshrl.u32 %v2822_v48, 16  ;;  %v2942_v23 = vshll.u32 %v2822_v48, 16  ;;  %v9806_v49 = vld [vmem:[#allocation3 + $0x64] sm:$0x1]  ;;  %v9811_v48 = vrot.slane %v2934_v63, 5 }
 0x138   : > { %v2867_v5 = vsel %vm9249_vm11, %v2862_v8, %v2866_v29  ;;  %v2941_v62 = vrot.slane %v2939_v36, 4  ;;  %v2944_v9 = vrot.slane %v2942_v23, 5  ;;  %v2909_v8 = vsel %vm9249_vm11, %v2904_v51, %v2908_v26 }
 0x139   : > { %v7614_v13 = vcombine.low %v2853_v10, %v2867_v5  ;;  %v2959_v29 = vor.u32 %v2958_v20, %v2955_v50  ;;  %v2998_v36 = vshll.u32 %v2830_v45, 16  ;;  %v2838_v50 = vld [vmem:[#allocation3 + $0x98] sm:$0xf] }
 0x13a   : > { %v2945_v30 = vor.u32 %v2944_v9, %v2941_v62 }
 0x13b   : > { %v2960_v47 = vrot.slane %v2959_v29, 4  ;;  %v3000_v62 = vrot.slane %v2998_v36, 5  ;;  %v3054_v29 = vshll.u32 %v2838_v50, 16 }
 0x13d   : > { %8319 = vmatmul.mubr.msk.bf16.gmra.mrb[12].mxu0 %vm1075_vm12, %v7577_v32  ;;  %v2913_v32 = vrot.slane %v2911_v42, 4 }
 0x13e   : > { %8326 = vmatprep.mubr.msk.bf16.mxu0 %vm1075_vm12, %v8893_v14  ;;  %v2916_v14 = vrot.slane %v2914_v1, 5 }
 0x140   : > { %v2917_v17 = vor.u32 %v2916_v14, %v2913_v32  ;;  %v2832_v32 = vld [vmem:[#allocation3 + $0x80] sm:$0xf]  ;;  %v2834_v14 = vld [vmem:[#allocation3 + $0x88] sm:$0xf] }
 0x141   : > { %v3012_v58 = vshll.u32 %v2832_v32, 16  ;;  %v3023_v2 = vshrl.u32 %v2834_v14, 16  ;;  %v3026_v24 = vshll.u32 %v2834_v14, 16 }
 0x143   : > { %v3014_v63 = vrot.slane %v3012_v58, 5  ;;  %v3025_v26 = vrot.slane %v3023_v2, 4 }
 0x145   : > { %8327 = vmatmul.mubr.msk.bf16.vlgmr.msra.gmra.mrb[0].mxu0 %vm1075_vm12, %v8895_v15  ;;  %v2925_v15 = vshrl.u32 %v2820_v35, 16 }
 0x146   : > { %8343 = vmatpush3.bf16.msra.mxu0 %v8894_v11  ;;  %8330 = vmatprep.mubr.msk.bf16.mxu0 %vm1075_vm12, %v8896_v22  ;;  %v9778_v11 = vld [vmem:[#allocation3 + $0x2c] sm:$0x1]  ;;  %v2826_v22 = vld [vmem:[#allocation3 + $0x68] sm:$0xf] }
 0x147   : > { %8344 = vmatprep.subr.bf16.mxu0 %v8899_v16  ;;  %v2892_v52 = vshll.u32 %v9778_v11, 16  ;;  %v2970_v56 = vshll.u32 %v2826_v22, 16  ;;  %v2927_v38 = vrot.slane %v2925_v15, 4 }
 0x149   : > { %v2894_v39 = vrot.slane %v2892_v52, 5  ;;  %v2972_v1 = vrot.slane %v2970_v56, 5  ;;  %v2828_v52 = vld [vmem:[#allocation3 + $0x70] sm:$0xf]  ;;  %v9821_v56 = vld [vmem:[#allocation3 + $0x74] sm:$0x1] }
 0x14a   : > { %8345 = vmatpush3.bf16.msra.mxu0 %v8899_v16  ;;  %v2876_v16 = vrot.slane %v2875_v57, 4  ;;  %v2931_v57 = vor.u32 %v2930_v43, %v2927_v38  ;;  %v2981_v10 = vshrl.u32 %v2828_v52, 16  ;;  %v2984_v15 = vshll.u32 %v2828_v52, 16  ;;  %v9834_v52 = vld [vmem:[#allocation3 + $0x84] sm:$0x1] }
 0x14b   : > { %8362 = vmatprep.subr.bf16.mxu0 %v9770_v7  ;;  %v2895_v53 = vsel %vm9249_vm11, %v2890_v41, %v2894_v39  ;;  %v2950_v41 = vrot.slane %v2948_v6, 5  ;;  %v3009_v39 = vshrl.u32 %v2832_v32, 16  ;;  %v2997_v43 = vrot.slane %v2995_v12, 4 }
 0x14c   : > { %v2881_v44 = vsel %vm9249_vm11, %v2876_v16, %v2880_v0  ;;  %v2976_v0 = vshll.u32 %v9808_v54, 16  ;;  %v2946_v16 = vrot.slane %v2945_v30, 4  ;;  %v2986_v38 = vrot.slane %v2984_v15, 5 }
 0x14d   : > { %8331 = vmatmul.mubr.msk.bf16.gmra.mrb[4].mxu0 %vm1075_vm12, %v8897_v34  ;;  %v2967_v34 = vshrl.u32 %v2826_v22, 16  ;;  %v7615_v35 = vcombine.low %v2881_v44, %v2895_v53  ;;  %v2932_v22 = vrot.slane %v2931_v57, 4  ;;  %v9824_v44 = vld [vmem:[#allocation3 + $0x7c] sm:$0x1]  ;;  %v2836_v53 = vld [vmem:[#allocation3 + $0x90] sm:$0xf]  ;;  %v3001_v6 = vor.u32 %v3000_v62, %v2997_v43 }
 0x14e   : > { %8334 = vmatprep.mubr.msk.bf16.mxu0 %vm1075_vm12, %v8898_v18  ;;  %v8902_v18 = vld [vmem:[#allocation3 + $0x90] ss:$8 sps:$4 sm:$0xff]   ;;  %v2978_v5 = vrot.slane %v2976_v0, 5  ;;  %v3011_v51 = vrot.slane %v3009_v39, 4  ;;  %v3004_v45 = vshll.u32 %v9824_v44, 16  ;;  %v3056_v39 = vrot.slane %v3054_v29, 5 }
 0x14f   : > { %v2969_v42 = vrot.slane %v2967_v34, 4  ;;  %v2937_v20 = vsel %vm9249_vm11, %v2932_v22, %v9811_v48  ;;  %v3037_v48 = vshrl.u32 %v2836_v53, 16  ;;  %v3002_v36 = vrot.slane %v3001_v6, 4  ;;  %v3246_v29 = vld [vmem:[#allocation3 + $0x30] sm:$0xe] }
 0x150   : > { %v3015_v0 = vor.u32 %v3014_v63, %v3011_v51  ;;  %v3243_v51 = vld [vmem:[#allocation3 + $0x18] sm:$0xe] }
 0x151   : > { %v2973_v19 = vor.u32 %v2972_v1, %v2969_v42  ;;  %v2990_v1 = vshll.u32 %v9821_v56, 16  ;;  %v3039_v22 = vrot.slane %v3037_v48, 4  ;;  %v3244_v48 = vld [vmem:[#allocation3 + $0x20] sm:$0xe] }
 0x152   : > { %v3016_v58 = vrot.slane %v3015_v0, 4 }
 0x153   : > { %v2974_v34 = vrot.slane %v2973_v19, 4  ;;  %v2992_v19 = vrot.slane %v2990_v1, 5  ;;  %v3292_v1 = vrot.slane %v9767_v27, 5 }
 0x155   : > { %8335 = vmatmul.mubr.msk.bf16.gmra.mrb[8].mxu0 %vm1075_vm12, %v8900_v21  ;;  %v2918_v21 = vrot.slane %v2917_v17, 4  ;;  %v2983_v17 = vrot.slane %v2981_v10, 4  ;;  %v2979_v57 = vsel %vm9249_vm11, %v2974_v34, %v2978_v5  ;;  %v3018_v10 = vshll.u32 %v9834_v52, 16 }
 0x156   : > { %8338 = vmatprep.mubr.msk.bf16.mxu0 %vm1075_vm12, %v8901_v4  ;;  %v2962_v4 = vshll.u32 %v9806_v49, 16 }
 0x157   : > { %v2923_v23 = vsel %vm9249_vm11, %v2918_v21, %v2922_v31  ;;  %v3028_v31 = vrot.slane %v3026_v24, 5  ;;  %v9836_v21 = vld [vmem:[#allocation3 + $0x8c] sm:$0x1]  ;;  %v2987_v30 = vor.u32 %v2986_v38, %v2983_v17  ;;  %v3020_v2 = vrot.slane %v3018_v10, 5 }
 0x158   : > { %v2964_v33 = vrot.slane %v2962_v4, 5  ;;  %v7616_v9 = vcombine.low %v2909_v8, %v2923_v23  ;;  %v3040_v4 = vshll.u32 %v2836_v53, 16  ;;  %v3051_v8 = vshrl.u32 %v2838_v50, 16  ;;  %v3242_v53 = vld [vmem:[#allocation3 + $0x10] sm:$0xe] }
 0x159   : > { %v3032_v32 = vshll.u32 %v9836_v21, 16  ;;  %v2988_v12 = vrot.slane %v2987_v30, 4  ;;  %v3006_v23 = vrot.slane %v3004_v45, 5  ;;  %v3296_v30 = vrot.slane %v9772_v37, 5  ;;  %v3247_v37 = vld [vmem:[#allocation3 + $0x38] sm:$0xe] }
 0x15a   : > { %v2965_v42 = vsel %vm9249_vm11, %v2960_v47, %v2964_v33  ;;  %v9848_v33 = vld [vmem:[#allocation3 + $0x9c] sm:$0x1]  ;;  %v7634_v10 = vrot.slane %v3244_v48, 9 }
 0x15b   : > { %v7618_v15 = vcombine.low %v2965_v42, %v2979_v57  ;;  %v3034_v47 = vrot.slane %v3032_v32, 5  ;;  %v2993_v5 = vsel %vm9249_vm11, %v2988_v12, %v2992_v19  ;;  %v3007_v34 = vsel %vm9249_vm11, %v3002_v36, %v3006_v23 }
 0x15c   : > { %v3060_v62 = vshll.u32 %v9848_v33, 16  ;;  %v7619_v63 = vcombine.low %v2993_v5, %v3007_v34  ;;  %v7632_v42 = vrot.slane %v3242_v53, 9  ;;  %v7633_v57 = vrot.slane %v3243_v51, 9  ;;  %v3253_v53 = vld [vmem:[#allocation3 + $0x78] sm:$0xe] }
 0x15d   : > { %8339 = vmatmul.mubr.msk.bf16.gmra.mrb[12].mxu0 %vm1075_vm12, %v8902_v18  ;;  %v8904_v18 = vld [vmem:[%s9116_s30 + $0x88] sm:$0xff]   ;;  %v3300_v32 = vrot.slane %v9775_v55, 5  ;;  %v3304_v19 = vrot.slane %v9778_v11, 5  ;;  %v3308_v12 = vrot.slane %v9785_v61, 5  ;;  %v7637_v36 = vrot.slane %v3247_v37, 9 }
 0x15e   : > { %8346 = vmatprep.mubr.msk.bf16.mxu0 %vm1075_vm12, %v7614_v13  ;;  %v2951_v13 = vsel %vm9249_vm11, %v2946_v16, %v2950_v41  ;;  %v3042_v16 = vrot.slane %v3040_v4, 5  ;;  %v3053_v41 = vrot.slane %v3051_v8, 4  ;;  %v3293_v4 = vsel %vm9510_vm15, %v7632_v42, %v3292_v1  ;;  %v3245_v8 = vld [vmem:[#allocation3 + $0x28] sm:$0xe]  ;;  %v3248_v55 = vld [vmem:[#allocation3 + $0x40] sm:$0xe] }
 0x15f   : > { %v7617_v14 = vcombine.low %v2937_v20, %v2951_v13  ;;  %v3062_v13 = vrot.slane %v3060_v62, 5  ;;  %v3297_v27 = vsel %vm9510_vm15, %v7633_v57, %v3296_v30  ;;  %v3312_v23 = vrot.slane %v9789_v25, 5  ;;  %v3251_v25 = vld [vmem:[#allocation3 + $0x68] sm:$0xe]  ;;  %v3254_v51 = vld [vmem:[#allocation3 + $0x80] sm:$0xe] }
 0x160   : > { %v3043_v38 = vor.u32 %v3042_v16, %v3039_v22  ;;  %v3057_v43 = vor.u32 %v3056_v39, %v3053_v41  ;;  %v3301_v22 = vsel %vm9510_vm15, %v7634_v10, %v3300_v32  ;;  %v3249_v41 = vld [vmem:[#allocation3 + $0x48] sm:$0xe]  ;;  %v3250_v39 = vld [vmem:[#allocation3 + $0x60] sm:$0xe]  ;;  %v3328_v62 = vrot.slane %v9808_v54, 5  ;;  %v8905_v32 = vld [vmem:[%s9121_s10 + $0x10] sm:$0xff]  }
 0x161   : > { %v3313_v61 = vsel %vm9510_vm15, %v7637_v36, %v3312_v23  ;;  %v7639_v5 = vrot.slane %v3249_v41, 9  ;;  %v7640_v34 = vrot.slane %v3250_v39, 9  ;;  %v3255_v54 = vld [vmem:[#allocation3 + $0x88] sm:$0xe]  ;;  %v7644_v42 = vrot.slane %v3254_v51, 9  ;;  %8382 = vmatprep.subr.bf16.mxu1 %v8905_v32 }
 0x162   : > { %v3044_v50 = vrot.slane %v3043_v38, 4  ;;  %v3058_v20 = vrot.slane %v3057_v43, 4  ;;  %v3324_v38 = vrot.slane %v9806_v49, 5  ;;  %v7641_v43 = vrot.slane %v3251_v25, 9  ;;  %8383 = vmatpush3.bf16.msra.mxu1 %v8905_v32 }
 0x163   : > { %v3340_v1 = vrot.slane %v9834_v52, 5  ;;  %v7645_v57 = vrot.slane %v3255_v54, 9  ;;  %v3344_v30 = vrot.slane %v9836_v21, 5  ;;  %v3257_v21 = vld [vmem:[#allocation3 + $0x98] sm:$0xe]  ;;  %v3352_v37 = vrot.slane %v9848_v33, 5 }
 0x164   : > { %v3063_v45 = vsel %vm9249_vm11, %v3058_v20, %v3062_v13  ;;  %v3329_v49 = vsel %vm9510_vm15, %v7641_v43, %v3328_v62  ;;  %v7643_v20 = vrot.slane %v3253_v53, 9  ;;  %v3336_v13 = vrot.slane %v9824_v44, 5 }
 0x165   : > { %8347 = vmatmul.mubr.msk.bf16.vlgmr.msra.gmra.mrb[0].mxu0 %vm1075_vm12, %v7615_v35  ;;  %v3029_v35 = vor.u32 %v3028_v31, %v3025_v26  ;;  %v3341_v44 = vsel %vm9510_vm15, %v7644_v42, %v3340_v1  ;;  %v3345_v52 = vsel %vm9510_vm15, %v7645_v57, %v3344_v30  ;;  %v3532_v33 = vlaneseq }
 0x166   : > { %8363 = vmatpush3.bf16.msra.mxu0 %v9770_v7  ;;  %8350 = vmatprep.mubr.msk.bf16.mxu0 %vm1075_vm12, %v7616_v9  ;;  %v9846_v7 = vld [vmem:[#allocation3 + $0x94] sm:$0x1]  ;;  %v3021_v9 = vsel %vm9249_vm11, %v3016_v58, %v3020_v2  ;;  %v7638_v2 = vrot.slane %v3248_v55, 9 }
 0x167   : > { %8364 = vmatprep.subr.bf16.mxu0 %v8904_v18  ;;  %v3030_v24 = vrot.slane %v3029_v35, 4  ;;  %v3046_v17 = vshll.u32 %v9846_v7, 16  ;;  %v7652_v35 = vcombine.low %v3293_v4, %v3297_v27  ;;  %v7658_v27 = vcombine.low %v3341_v44, %v3345_v52 }
 0x169   : > { %v3048_v26 = vrot.slane %v3046_v17, 5  ;;  %v3320_v17 = vrot.slane %v9803_v3, 5  ;;  %v3325_v3 = vsel %vm9510_vm15, %v7640_v34, %v3324_v38 }
 0x16a   : > { %8365 = vmatpush3.bf16.msra.mxu0 %v8904_v18  ;;  %v3035_v18 = vsel %vm9249_vm11, %v3030_v24, %v3034_v47  ;;  %v3316_v47 = vrot.slane %v9793_v59, 5  ;;  %v3252_v59 = vld [vmem:[#allocation3 + $0x70] sm:$0xe] }
 0x16b   : > { %v7620_v31 = vcombine.low %v3021_v9, %v3035_v18  ;;  %v3049_v6 = vsel %vm9249_vm11, %v3044_v50, %v3048_v26  ;;  %v3321_v18 = vsel %vm9510_vm15, %v7639_v5, %v3320_v17  ;;  %v7642_v26 = vrot.slane %v3252_v59, 9 }
 0x16c   : > { %v7621_v0 = vcombine.low %v3049_v6, %v3063_v45  ;;  %v3317_v9 = vsel %vm9510_vm15, %v7638_v2, %v3316_v47  ;;  %v3332_v50 = vrot.slane %v9821_v56, 5  ;;  %v3337_v45 = vsel %vm9510_vm15, %v7643_v20, %v3336_v13  ;;  %v3256_v56 = vld [vmem:[#allocation3 + $0x90] sm:$0xe] }
 0x16d   : > { %8351 = vmatmul.mubr.msk.bf16.gmra.mrb[4].mxu0 %vm1075_vm12, %v7617_v14  ;;  %v7635_v14 = vrot.slane %v3245_v8, 9  ;;  %v7646_v4 = vrot.slane %v3256_v56, 9  ;;  %v3348_v8 = vrot.slane %v9846_v7, 5  ;;  %v9928_v7 = vld [vmem:[%s9121_s10] sm:$0xff]  }
 0x16e   : > { %8354 = vmatprep.mubr.msk.bf16.mxu0 %vm1075_vm12, %v7618_v15  ;;  %v7636_v15 = vrot.slane %v3246_v29, 9  ;;  %v3333_v6 = vsel %vm9510_vm15, %v7642_v26, %v3332_v50  ;;  %v7647_v29 = vrot.slane %v3257_v21, 9 }
 0x16f   : > { %v3305_v16 = vsel %vm9510_vm15, %v7635_v14, %v3304_v19  ;;  %v7657_v48 = vcombine.low %v3333_v6, %v3337_v45  ;;  %v8906_v14 = vld [vmem:[%s9121_s10 + $0x18] sm:$0xff]   ;;  %v9931_v19 = vshrl.u32 %v3532_v33, 7 }
 0x170   : > { %v3309_v11 = vsel %vm9510_vm15, %v7636_v15, %v3308_v12  ;;  %v7653_v58 = vcombine.low %v3301_v22, %v3305_v16  ;;  %v3353_v10 = vsel %vm9510_vm15, %v7647_v29, %v3352_v37  ;;  %8384 = vmatprep.subr.bf16.mxu1 %v8906_v14  ;;  %v9937_v12 = vld [vmem:[%s9106_s22] sm:$0x7] }
 0x171   : > { %v7654_v24 = vcombine.low %v3309_v11, %v3313_v61  ;;  %8385 = vmatpush3.bf16.msra.mxu1 %v8906_v14  ;;  %v9934_v15 = vsub.s32 0, %v9931_v19 }
 0x172   : > { %8402 = vmatprep.subr.bf16.mxu1 %v9928_v7 }
 0x173   : > { %11360 = vst [vmem:[#allocation7_spill] sm:$0xff] %v9934_v15  ;;  %v9941_v36 = vrot.slane %v9937_v12, %v9934_v15 }
 0x175   : > { %8355 = vmatmul.mubr.msk.bf16.gmra.mrb[8].mxu0 %vm1075_vm12, %v7619_v63  ;;  %v7655_v63 = vcombine.low %v3317_v9, %v3321_v18 }
 0x176   : > { %8358 = vmatprep.mubr.msk.bf16.mxu0 %vm1075_vm12, %v7620_v31  ;;  %v7656_v31 = vcombine.low %v3325_v3, %v3329_v49 }
 0x17d   : > { %8359 = vmatmul.mubr.msk.bf16.gmra.mrb[12].mxu0 %vm1075_vm12, %v7621_v0  ;;  %v3349_v0 = vsel %vm9510_vm15, %v7646_v4, %v3348_v8 }
 0x17e   : > { %8366 = vmatprep.mubr.msk.bf16.mxu0 %vm1075_vm12, %v7652_v35  ;;  %v7659_v35 = vcombine.low %v3349_v0, %v3353_v10 }
 0x185   : > { %8367 = vmatmul.mubr.msk.bf16.vlgmr.msra.gmra.mrb[0].mxu0 %vm1075_vm12, %v7653_v58 }
 0x186   : > { %8370 = vmatprep.mubr.msk.bf16.mxu0 %vm1075_vm12, %v7654_v24 }
 0x18d   : > { %8371 = vmatmul.mubr.msk.bf16.gmra.mrb[4].mxu0 %vm1075_vm12, %v7655_v63 }
 0x18e   : > { %8374 = vmatprep.mubr.msk.bf16.mxu0 %vm1075_vm12, %v7656_v31 }
 0x195   : > { %8375 = vmatmul.mubr.msk.bf16.gmra.mrb[8].mxu0 %vm1075_vm12, %v7657_v48 }
 0x196   : > { %8378 = vmatprep.mubr.msk.bf16.mxu0 %vm1075_vm12, %v7658_v27 }
 0x19d   : > { %8379 = vmatmul.mubr.msk.bf16.gmra.mrb[12].mxu0 %vm1075_vm12, %v7659_v35 }
 0x258   : > { %v8368_v23 = vpop.f32.mrb[0].mxu0 }
 0x259   : > { %v3453_v22 = vpop.f32.mrb[1].mxu0  ;;  %v9944_v16 = vadd.f32 %v8368_v23, %v9941_v36 }
 0x25a   : > { %v9947_v55 = vadd.f32 %v9941_v36, %v3453_v22  ;;  %v8369_v11 = vpop.f32.mrb[2].mxu0 }
 0x25b   : > { %v3456_v61 = vpop.f32.mrb[3].mxu0  ;;  %v9952_v39 = vadd.f32 %v8369_v11, %v9941_v36  ;;  %v3591_v58 = vmul.f32 %v9944_v16, %v9944_v16  ;;  %v3555_v17 = vsel %vm1075_vm12, %v9944_v16, 0.0 }
 0x25c   : > { %v3589_v41 = vmul.f32 %v9947_v55, %v9947_v55  ;;  %v9955_v25 = vadd.f32 %v9941_v36, %v3456_v61  ;;  %v3552_v2 = vsel %vm1075_vm12, %v9947_v55, 0.0 }
 0x25d   : > { %v3592_v38 = vmul.f32 %v9952_v39, %v9952_v39  ;;  %v3608_v3 = vsel %vm1075_vm12, %v3591_v58, 0.0  ;;  %v3557_v49 = vsel %vm1075_vm12, %v9952_v39, 0.0 }
 0x25e   : > { %v3553_v24 = vsel %vm1075_vm12, %v9955_v25, 0.0  ;;  %v3590_v47 = vmul.f32 %v9955_v25, %v9955_v25  ;;  %v3605_v34 = vsel %vm1075_vm12, %v3589_v41, 0.0 }
 0x25f   : > { %v3554_v5 = vadd.f32 %v3553_v24, %v3552_v2  ;;  %v3610_v50 = vsel %vm1075_vm12, %v3592_v38, 0.0 }
 0x260   : > { %v3606_v43 = vsel %vm1075_vm12, %v3590_v47, 0.0  ;;  %v8372_v62 = vpop.f32.mrb[4].mxu0 }
 0x261   : > { %v3556_v9 = vadd.f32 %v3555_v17, %v3554_v5  ;;  %v3607_v18 = vadd.f32 %v3606_v43, %v3605_v34  ;;  %v3469_v59 = vpop.f32.mrb[5].mxu0  ;;  %v9978_v63 = vadd.f32 %v8372_v62, %v9941_v36 }
 0x262   : > { %v9975_v53 = vadd.f32 %v9941_v36, %v3469_v59  ;;  %v8373_v51 = vpop.f32.mrb[6].mxu0 }
 0x263   : > { %v3609_v54 = vadd.f32 %v3608_v3, %v3607_v18  ;;  %v3558_v26 = vadd.f32 %v3557_v49, %v3556_v9  ;;  %v3472_v31 = vpop.f32.mrb[7].mxu0  ;;  %v9989_v30 = vadd.f32 %v8373_v51, %v9941_v36  ;;  %v3595_v56 = vmul.f32 %v9978_v63, %v9978_v63 }
 0x264   : > { %v3559_v20 = vsel %vm1075_vm12, %v9975_v53, 0.0  ;;  %v3593_v13 = vmul.f32 %v9975_v53, %v9975_v53  ;;  %v9986_v42 = vadd.f32 %v9941_v36, %v3472_v31  ;;  %v3563_v48 = vsel %vm1075_vm12, %v9978_v63, 0.0 }
 0x265   : > { %v3560_v1 = vadd.f32 %v3559_v20, %v3558_v26  ;;  %v3611_v57 = vadd.f32 %v3610_v50, %v3609_v54  ;;  %v3596_v27 = vmul.f32 %v9989_v30, %v9989_v30  ;;  %v3565_v0 = vsel %vm1075_vm12, %v9989_v30, 0.0 }
 0x266   : > { %v3612_v6 = vsel %vm1075_vm12, %v3593_v13, 0.0  ;;  %v3561_v45 = vsel %vm1075_vm12, %v9986_v42, 0.0  ;;  %v3594_v21 = vmul.f32 %v9986_v42, %v9986_v42  ;;  %v3616_v14 = vsel %vm1075_vm12, %v3595_v56, 0.0 }
 0x267   : > { %v3613_v44 = vadd.f32 %v3612_v6, %v3611_v57  ;;  %v3562_v52 = vadd.f32 %v3561_v45, %v3560_v1  ;;  %v3618_v2 = vsel %vm1075_vm12, %v3596_v27, 0.0 }
 0x268   : > { %v8376_v4 = vpop.f32.mrb[8].mxu0  ;;  %v3614_v29 = vsel %vm1075_vm12, %v3594_v21, 0.0 }
 0x269   : > { %v3564_v8 = vadd.f32 %v3563_v48, %v3562_v52  ;;  %v3485_v37 = vpop.f32.mrb[9].mxu0  ;;  %v3615_v10 = vadd.f32 %v3614_v29, %v3613_v44  ;;  %v10010_v33 = vadd.f32 %v8376_v4, %v9941_v36 }
 0x26a   : > { %v10006_v35 = vadd.f32 %v9941_v36, %v3485_v37  ;;  %v8377_v32 = vpop.f32.mrb[10].mxu0 }
 0x26b   : > { %v3566_v23 = vadd.f32 %v3565_v0, %v3564_v8  ;;  %v3488_v22 = vpop.f32.mrb[11].mxu0  ;;  %v3617_v11 = vadd.f32 %v3616_v14, %v3615_v10  ;;  %v10021_v47 = vadd.f32 %v8377_v32, %v9941_v36  ;;  %v3599_v43 = vmul.f32 %v10010_v33, %v10010_v33 }
 0x26c   : > { %v3567_v61 = vsel %vm1075_vm12, %v10006_v35, 0.0  ;;  %v3597_v41 = vmul.f32 %v10006_v35, %v10006_v35  ;;  %v10017_v58 = vadd.f32 %v9941_v36, %v3488_v22  ;;  %v3571_v9 = vsel %vm1075_vm12, %v10010_v33, 0.0 }
 0x26d   : > { %v3568_v24 = vadd.f32 %v3567_v61, %v3566_v23  ;;  %v3619_v5 = vadd.f32 %v3618_v2, %v3617_v11  ;;  %v3600_v49 = vmul.f32 %v10021_v47, %v10021_v47  ;;  %v3573_v26 = vsel %vm1075_vm12, %v10021_v47, 0.0 }
 0x26e   : > { %v3620_v17 = vsel %vm1075_vm12, %v3597_v41, 0.0  ;;  %v3569_v34 = vsel %vm1075_vm12, %v10017_v58, 0.0  ;;  %v3598_v38 = vmul.f32 %v10017_v58, %v10017_v58  ;;  %v3624_v13 = vsel %vm1075_vm12, %v3599_v43, 0.0 }
 0x26f   : > { %v3570_v62 = vadd.f32 %v3569_v34, %v3568_v24  ;;  %v3621_v18 = vadd.f32 %v3620_v17, %v3619_v5  ;;  %v3626_v21 = vsel %vm1075_vm12, %v3600_v49, 0.0 }
 0x270   : > { %v3622_v59 = vsel %vm1075_vm12, %v3598_v38, 0.0  ;;  %v8380_v3 = vpop.f32.mrb[12].mxu0 }
 0x271   : > { %v3572_v51 = vadd.f32 %v3571_v9, %v3570_v62  ;;  %v3501_v54 = vpop.f32.mrb[13].mxu0  ;;  %v3623_v31 = vadd.f32 %v3622_v59, %v3621_v18  ;;  %v10042_v1 = vadd.f32 %v8380_v3, %v9941_v36 }
 0x272   : > { %v10038_v50 = vadd.f32 %v9941_v36, %v3501_v54  ;;  %v8381_v20 = vpop.f32.mrb[14].mxu0 }
 0x273   : > { %v3574_v57 = vadd.f32 %v3573_v26, %v3572_v51  ;;  %v3504_v6 = vpop.f32.mrb[15].mxu0  ;;  %v3625_v45 = vadd.f32 %v3624_v13, %v3623_v31  ;;  %v10053_v4 = vadd.f32 %v8381_v20, %v9941_v36  ;;  %v3603_v0 = vmul.f32 %v10042_v1, %v10042_v1 }
 0x274   : > { %v3575_v56 = vsel %vm1075_vm12, %v10038_v50, 0.0  ;;  %v3601_v44 = vmul.f32 %v10038_v50, %v10038_v50  ;;  %v10049_v52 = vadd.f32 %v9941_v36, %v3504_v6  ;;  %v3579_v32 = vsel %vm1075_vm12, %v10042_v1, 0.0 }
 0x275   : > { %v3576_v48 = vadd.f32 %v3575_v56, %v3574_v57  ;;  %v3627_v27 = vadd.f32 %v3626_v21, %v3625_v45  ;;  %v3604_v23 = vmul.f32 %v10053_v4, %v10053_v4  ;;  %v3581_v11 = vsel %vm1075_vm12, %v10053_v4, 0.0  ;;  %v10071_v56 = vld [vmem:[#allocation3] sm:$0xf] }
 0x276   : > { %v3628_v8 = vsel %vm1075_vm12, %v3601_v44, 0.0  ;;  %v3577_v29 = vsel %vm1075_vm12, %v10049_v52, 0.0  ;;  %v3602_v37 = vmul.f32 %v10049_v52, %v10049_v52  ;;  %v3632_v41 = vsel %vm1075_vm12, %v3603_v0, 0.0 }
 0x277   : > { %v3578_v10 = vadd.f32 %v3577_v29, %v3576_v48  ;;  %v3629_v14 = vadd.f32 %v3628_v8, %v3627_v27  ;;  %v3634_v5 = vsel %vm1075_vm12, %v3604_v23, 0.0  ;;  %v4068_v44 = vshrl.u32 %v10071_v56, 16  ;;  %v4039_v48 = vld [vmem:[#allocation3 + $0x50] sm:$0xf] }
 0x278   : > { %v3630_v36 = vsel %vm1075_vm12, %v3602_v37, 0.0  ;;  %v4071_v21 = vshll.u32 %v10071_v56, 16  ;;  %v4180_v29 = vshrl.u32 %v4039_v48, 16  ;;  %v4183_v37 = vshll.u32 %v4039_v48, 16 }
 0x279   : > { %v3580_v22 = vadd.f32 %v3579_v32, %v3578_v10  ;;  %v3631_v61 = vadd.f32 %v3630_v36, %v3629_v14  ;;  %v4070_v27 = vrot.slane %v4068_v44, 4  ;;  %v10076_v0 = vsub.s32 1, %v9931_v19  ;;  %v10078_v32 = vld [vmem:[#allocation3 + $0x4] sm:$0x1] }
 0x27a   : > { %v4073_v8 = vrot.slane %v4071_v21, 5  ;;  %v4077_v23 = vshll.u32 %v10078_v32, 16 }
 0x27b   : > { %v3582_v2 = vadd.f32 %v3581_v11, %v3580_v22  ;;  %v3633_v24 = vadd.f32 %v3632_v41, %v3631_v61  ;;  %11361 = vst [vmem:[#allocation8_spill] sm:$0xff] %v10076_v0  ;;  %v10082_v22 = vld [vmem:[#allocation3 + $0x54] sm:$0x1]  ;;  %v4182_v11 = vrot.slane %v4180_v29, 4  ;;  %v4185_v61 = vrot.slane %v4183_v37, 5 }
 0x27c   : > { %v4074_v36 = vor.u32 %v4073_v8, %v4070_v27  ;;  %v4189_v41 = vshll.u32 %v10082_v22, 16 }
 0x27d   : > { %v3583_v17 = vrot.slane %v3582_v2, 4  ;;  %v3635_v34 = vadd.f32 %v3634_v5, %v3633_v24  ;;  %v10089_v5 = vsub.s32 2, %v9931_v19 }
 0x27f   : > { %v3584_v38 = vadd.f32 %v3583_v17, %v3582_v2  ;;  %v3636_v43 = vrot.slane %v3635_v34, 4  ;;  %11362 = vst [vmem:[#allocation9_spill] sm:$0xff] %v10089_v5 }
 0x281   : > { %v3585_v62 = vrot.slane %v3584_v38, 2  ;;  %v3637_v9 = vadd.f32 %v3636_v43, %v3635_v34  ;;  %v10094_v43 = vrot.slane %v4074_v36, 4 }
 0x283   : > { %v3586_v18 = vadd.f32 %v3585_v62, %v3584_v38  ;;  %v3638_v59 = vrot.slane %v3637_v9, 2  ;;  %v10096_v62 = vrot.slane %v4077_v23, 5 }
 0x285   : > { %v3587_v3 = vrot.slane %v3586_v18, 1  ;;  %v3639_v49 = vadd.f32 %v3638_v59, %v3637_v9  ;;  %v4186_v59 = vor.u32 %v4185_v61, %v4182_v11 }
 0x287   : > { %v3588_v51 = vadd.f32 %v3587_v3, %v3586_v18  ;;  %v3640_v54 = vrot.slane %v3639_v49, 1  ;;  %v10102_v3 = vrot.slane %v4189_v41, 5 }
 0x289   : > { %v3642_v26 = vmul.f32 0.0078125, %v3588_v51  ;;  %v3641_v31 = vadd.f32 %v3640_v54, %v3639_v49 }
 0x28b   : > { %v3644_v20 = vmul.f32 %v3642_v26, %v3642_v26  ;;  %v3643_v13 = vmul.f32 0.0078125, %v3641_v31 }
 0x28d   : > { %v3645_v57 = vsub.f32 %v3643_v13, %v3644_v20 }
 0x28f   : > { %v3646_v6 = vmax.f32 %v3645_v57, 0.0 }
 0x291   : > { %v3647_v45 = vadd.f32 1e-05, %v3646_v6 }
 0x293   : > { %8947 = vrsqrt.f32 %v3647_v45 }
 0x29d   : > { %v8948_v10 = vpop.eup %8947 }
 0x29e   : > { %v3649_v14 = vmul.f32 %v8948_v10, %v9937_v12 }
 0x2a0   : > { %v3650_v2 = vmul.f32 %v3649_v14, %v3642_v26  ;;  %v10086_v24 = vrot.slane %v3649_v14, %v10076_v0  ;;  %v10148_v26 = vrot.slane %v4186_v59, 4  ;;  %v4015_v59 = vld [vmem:[#allocation3 + $0x84] sm:$0x1] }
 0x2a2   : > { %v3652_v34 = vrot.slane %v3650_v2, 7  ;;  %v3672_v38 = vmul.f32 %v10086_v24, %v10049_v52  ;;  %v3663_v9 = vmul.f32 %v10086_v24, %v9975_v53  ;;  %v3664_v18 = vmul.f32 %v10086_v24, %v9986_v42  ;;  %v10115_v53 = vld [vmem:[#allocation3] sm:$0xe] }
 0x2a3   : > { %v3659_v49 = vmul.f32 %v10086_v24, %v9947_v55  ;;  %v10109_v52 = vmul.f32 %v10086_v24, %v10006_v35  ;;  %v10113_v51 = vmul.f32 %v10086_v24, %v10017_v58  ;;  %v10119_v42 = vmul.f32 %v10086_v24, %v10010_v33 }
 0x2a4   : > { %v3654_v19 = vsub.f32 %v9937_v12, %v3652_v34  ;;  %v10123_v12 = vmul.f32 %v10086_v24, %v10021_v47  ;;  %v10127_v55 = vmul.f32 %v10086_v24, %v10038_v50  ;;  %v10131_v35 = vmul.f32 %v10086_v24, %v10042_v1 }
 0x2a5   : > { %v3660_v54 = vmul.f32 %v10086_v24, %v9955_v25  ;;  %v3661_v33 = vmul.f32 %v10086_v24, %v9944_v16  ;;  %v10142_v47 = vmul.f32 %v10086_v24, %v10053_v4  ;;  %v3662_v50 = vmul.f32 %v10086_v24, %v9952_v39 }
 0x2a6   : > { %v10134_v58 = vrot.slane %v3654_v19, %v10089_v5  ;;  %v3665_v1 = vmul.f32 %v10086_v24, %v9978_v63  ;;  %v3937_v19 = vld [vmem:[#allocation3 + $0xc] sm:$0x1] }
 0x2a8   : > { %v3692_v20 = vadd.f32 %v10134_v58, %v3672_v38  ;;  %v3679_v25 = vadd.f32 %v10134_v58, %v3659_v49  ;;  %v3680_v16 = vadd.f32 %v10134_v58, %v3660_v54  ;;  %v3681_v13 = vadd.f32 %v10134_v58, %v3661_v33 }
 0x2a9   : > { %v3682_v4 = vadd.f32 %v10134_v58, %v3662_v50  ;;  %v3683_v57 = vadd.f32 %v10134_v58, %v3663_v9  ;;  %v3684_v39 = vadd.f32 %v10134_v58, %v3664_v18  ;;  %v3685_v63 = vadd.f32 %v10134_v58, %v3665_v1  ;;  %v4012_v18 = vld [vmem:[#allocation3 + $0x80] sm:$0xf] }
 0x2aa   : > { %v3708_v6 = vmax.f32 %v3692_v20, 0.0  ;;  %v3695_v45 = vmax.f32 %v3679_v25, 0.0  ;;  %v3696_v44 = vmax.f32 %v3680_v16, 0.0  ;;  %v3697_v21 = vmax.f32 %v3681_v13, 0.0  ;;  %v3940_v25 = vld [vmem:[#allocation3 + $0x10] sm:$0xf] }
 0x2ab   : > { %v3698_v48 = vmax.f32 %v3682_v4, 0.0  ;;  %v3699_v27 = vmax.f32 %v3683_v57, 0.0  ;;  %v3700_v8 = vmax.f32 %v3684_v39, 0.0  ;;  %v3701_v29 = vmax.f32 %v3685_v63, 0.0  ;;  %v3943_v39 = vld [vmem:[#allocation3 + $0x14] sm:$0x1] }
 0x2ac   : > { %v7970_v37 = vpack.c.bf16 %v3708_v6, %v3708_v6  ;;  %v7957_v10 = vpack.c.bf16 %v3695_v45, %v3695_v45  ;;  %v7958_v14 = vpack.c.bf16 %v3696_v44, %v3696_v44  ;;  %v7959_v36 = vpack.c.bf16 %v3697_v21, %v3697_v21 }
 0x2ad   : > { %v10159_v23 = vpack.c.bf16 %v3698_v48, %v3698_v48  ;;  %v10161_v11 = vpack.c.bf16 %v3699_v27, %v3699_v27  ;;  %v10163_v61 = vpack.c.bf16 %v3700_v8, %v3700_v8  ;;  %v10165_v41 = vpack.c.bf16 %v3701_v29, %v3701_v29  ;;  %v3946_v27 = vld [vmem:[#allocation3 + $0x18] sm:$0xf]  ;;  %v3949_v8 = vld [vmem:[#allocation3 + $0x1c] sm:$0x1] }
 0x2ae   : > { %v3880_v2 = vshrl.u32 %v7970_v37, 16  ;;  %v3883_v34 = vshll.u32 %v7970_v37, 16  ;;  %v3776_v38 = vshrl.u32 %v7957_v10, 16  ;;  %v3779_v9 = vshll.u32 %v7957_v10, 16 }
 0x2af   : > { %v3784_v49 = vshrl.u32 %v7958_v14, 16  ;;  %v3787_v54 = vshll.u32 %v7958_v14, 16  ;;  %v3792_v33 = vshrl.u32 %v7959_v36, 16  ;;  %v3795_v50 = vshll.u32 %v7959_v36, 16 }
 0x2b0   : > { %v3882_v1 = vrot.slane %v3880_v2, 7  ;;  %v3778_v20 = vrot.slane %v3776_v38, 7  ;;  %v3800_v16 = vshrl.u32 %v10159_v23, 16  ;;  %v3803_v13 = vshll.u32 %v10159_v23, 16  ;;  %v8951_v2 = vld [vmem:[#allocation3 + $0x8] sm:$0xf] }
 0x2b1   : > { %v3786_v4 = vrot.slane %v3784_v49, 7  ;;  %v3794_v57 = vrot.slane %v3792_v33, 7  ;;  %v3808_v63 = vshrl.u32 %v10161_v11, 16  ;;  %v3811_v6 = vshll.u32 %v10161_v11, 16  ;;  %v3952_v49 = vld [vmem:[#allocation3 + $0x20] sm:$0xf] }
 0x2b2   : > { %v3885_v45 = vor.u32 %v3883_v34, %v3882_v1  ;;  %v3886_v44 = vrot.slane %v3882_v1, 4  ;;  %v3781_v21 = vor.u32 %v3779_v9, %v3778_v20  ;;  %v3782_v48 = vrot.slane %v3778_v20, 4  ;;  %v3955_v33 = vld [vmem:[#allocation3 + $0x24] sm:$0x1]  ;;  %v3958_v20 = vld [vmem:[#allocation3 + $0x28] sm:$0xf] }
 0x2b3   : > { %v3789_v29 = vor.u32 %v3787_v54, %v3786_v4  ;;  %v3790_v37 = vrot.slane %v3786_v4, 4  ;;  %v3797_v10 = vor.u32 %v3795_v50, %v3794_v57  ;;  %v3798_v14 = vrot.slane %v3794_v57, 4 }
 0x2b4   : > { %v4013_v36 = vsel %vm9218_vm7, %v3885_v45, %v4012_v18  ;;  %v4016_v23 = vsel %vm9224_vm8, %v3886_v44, %v4015_v59  ;;  %v3935_v11 = vsel %vm9218_vm7, %v3781_v21, %v8951_v2  ;;  %v3938_v34 = vsel %vm9224_vm8, %v3782_v48, %v3937_v19  ;;  %v3973_v2 = vld [vmem:[#allocation3 + $0x3c] sm:$0x1] }
 0x2b5   : > { %4017 = vst [vmem:[#allocation3 + $0x84] sm:$0x1] %v4016_v23  ;;  %4014 = vst [vmem:[#allocation3 + $0x80] sm:$0xf] %v4013_v36  ;;  %v3941_v38 = vsel %vm9218_vm7, %v3789_v29, %v3940_v25  ;;  %v3944_v9 = vsel %vm9224_vm8, %v3790_v37, %v3943_v39  ;;  %v3947_v18 = vsel %vm9218_vm7, %v3797_v10, %v3946_v27  ;;  %v3802_v19 = vrot.slane %v3800_v16, 7 }
 0x2b6   : > { %3936 = vst [vmem:[#allocation3 + $0x8] sm:$0xf] %v3935_v11  ;;  %3939 = vst [vmem:[#allocation3 + $0xc] sm:$0x1] %v3938_v34  ;;  %v3950_v59 = vsel %vm9224_vm8, %v3798_v14, %v3949_v8  ;;  %v3810_v54 = vrot.slane %v3808_v63, 7  ;;  %v3816_v50 = vshrl.u32 %v10163_v61, 16  ;;  %v3687_v39 = vadd.f32 %v10134_v58, %v10109_v52 }
 0x2b7   : > { %3942 = vst [vmem:[#allocation3 + $0x10] sm:$0xf] %v3941_v38  ;;  %3945 = vst [vmem:[#allocation3 + $0x14] sm:$0x1] %v3944_v9  ;;  %v3819_v1 = vshll.u32 %v10163_v61, 16  ;;  %v3824_v4 = vshrl.u32 %v10165_v41, 16  ;;  %v10195_v45 = vadd.f32 %v10134_v58, %v10113_v51  ;;  %v3805_v16 = vor.u32 %v3803_v13, %v3802_v19 }
 0x2b8   : > { %3948 = vst [vmem:[#allocation3 + $0x18] sm:$0xf] %v3947_v18  ;;  %3951 = vst [vmem:[#allocation3 + $0x1c] sm:$0x1] %v3950_v59  ;;  %v3961_v25 = vld [vmem:[#allocation3 + $0x2c] sm:$0x1]  ;;  %v3813_v44 = vor.u32 %v3811_v6, %v3810_v54  ;;  %v10199_v8 = vadd.f32 %v10134_v58, %v10119_v42  ;;  %v4080_v38 = vsel %vm9249_vm11, %v10094_v43, %v10096_v62 }
 0x2b9   : > { %v3827_v57 = vshll.u32 %v10165_v41, 16  ;;  %v3806_v63 = vrot.slane %v3802_v19, 4  ;;  %v3814_v21 = vrot.slane %v3810_v54, 4  ;;  %v3818_v48 = vrot.slane %v3816_v50, 7  ;;  %v10201_v29 = vld [vmem:[#allocation3 + $0x50] sm:$0xe] }
 0x2ba   : > { %v3826_v27 = vrot.slane %v3824_v4, 7  ;;  %v3703_v61 = vmax.f32 %v3687_v39, 0.0  ;;  %v3953_v52 = vsel %vm9218_vm7, %v3805_v16, %v3952_v49  ;;  %v3959_v41 = vsel %vm9218_vm7, %v3813_v44, %v3958_v20  ;;  %v3964_v6 = vld [vmem:[#allocation3 + $0x30] sm:$0xf]  ;;  %v3967_v37 = vld [vmem:[#allocation3 + $0x34] sm:$0x1] }
 0x2bb   : > { %v3956_v51 = vsel %vm9224_vm8, %v3806_v63, %v3955_v33  ;;  %v3962_v13 = vsel %vm9224_vm8, %v3814_v21, %v3961_v25  ;;  %3954 = vst [vmem:[#allocation3 + $0x20] sm:$0xf] %v3953_v52  ;;  %3960 = vst [vmem:[#allocation3 + $0x28] sm:$0xf] %v3959_v41  ;;  %v3821_v42 = vor.u32 %v3819_v1, %v3818_v48  ;;  %v3822_v10 = vrot.slane %v3818_v48, 4 }
 0x2bc   : > { %3957 = vst [vmem:[#allocation3 + $0x24] sm:$0x1] %v3956_v51  ;;  %3963 = vst [vmem:[#allocation3 + $0x2c] sm:$0x1] %v3962_v13  ;;  %v3829_v14 = vor.u32 %v3827_v57, %v3826_v27  ;;  %v3830_v36 = vrot.slane %v3826_v27, 4  ;;  %v10219_v9 = vpack.c.bf16 %v3703_v61, %v3703_v61  ;;  %v3704_v50 = vmax.f32 %v10195_v45, 0.0 }
 0x2bd   : > { %v3970_v23 = vld [vmem:[#allocation3 + $0x38] sm:$0xf]  ;;  %v10211_v11 = vld [vmem:[#allocation3 + $0x8] sm:$0xf]  ;;  %v10213_v34 = vld [vmem:[#allocation3 + $0xc] sm:$0x1]  ;;  %v3965_v62 = vsel %vm9218_vm7, %v3821_v42, %v3964_v6  ;;  %v3968_v25 = vsel %vm9224_vm8, %v3822_v10, %v3967_v37  ;;  %v10252_v13 = vadd.f32 %v10134_v58, %v10123_v12 }
 0x2be   : > { %v4082_v49 = vshrl.u32 %v10211_v11, 16  ;;  %v4085_v19 = vshll.u32 %v10211_v11, 16  ;;  %v4091_v54 = vshll.u32 %v10213_v34, 16  ;;  %v10226_v33 = vld [vmem:[#allocation3 + $0x10] sm:$0xf]  ;;  %v3971_v4 = vsel %vm9218_vm7, %v3829_v14, %v3970_v23 }
 0x2bf   : > { %v10229_v1 = vld [vmem:[#allocation3 + $0x18] sm:$0xf]  ;;  %v10231_v20 = vld [vmem:[#allocation3 + $0x14] sm:$0x1]  ;;  %v10233_v43 = vld [vmem:[#allocation3 + $0x1c] sm:$0x1]  ;;  %v3974_v57 = vsel %vm9224_vm8, %v3830_v36, %v3973_v2 }
 0x2c0   : > { %v4084_v39 = vrot.slane %v4082_v49, 4  ;;  %v4087_v16 = vrot.slane %v4085_v19, 5  ;;  %v4096_v63 = vshrl.u32 %v10226_v33, 16  ;;  %3966 = vst [vmem:[#allocation3 + $0x30] sm:$0xf] %v3965_v62  ;;  %v4099_v21 = vshll.u32 %v10226_v33, 16 }
 0x2c1   : > { %3969 = vst [vmem:[#allocation3 + $0x34] sm:$0x1] %v3968_v25  ;;  %3972 = vst [vmem:[#allocation3 + $0x38] sm:$0xf] %v3971_v4  ;;  %v4105_v48 = vshll.u32 %v10231_v20, 16  ;;  %v4110_v27 = vshrl.u32 %v10229_v1, 16 }
 0x2c2   : > { %3975 = vst [vmem:[#allocation3 + $0x3c] sm:$0x1] %v3974_v57  ;;  %v4113_v61 = vshll.u32 %v10229_v1, 16  ;;  %v4088_v52 = vor.u32 %v4087_v16, %v4084_v39  ;;  %v4098_v51 = vrot.slane %v4096_v63, 4  ;;  %v4119_v41 = vshll.u32 %v10233_v43, 16 }
 0x2c3   : > { %v4093_v6 = vrot.slane %v4091_v54, 5  ;;  %v4101_v37 = vrot.slane %v4099_v21, 5  ;;  %v4112_v42 = vrot.slane %v4110_v27, 4  ;;  %v10254_v14 = vld [vmem:[#allocation3 + $0x20] sm:$0xf]  ;;  %v4107_v23 = vrot.slane %v4105_v48, 5 }
 0x2c4   : > { %v4115_v10 = vrot.slane %v4113_v61, 5  ;;  %v4089_v36 = vrot.slane %v4088_v52, 4  ;;  %v4121_v2 = vrot.slane %v4119_v41, 5  ;;  %v10256_v49 = vld [vmem:[#allocation3 + $0x28] sm:$0xf]  ;;  %v4124_v19 = vshrl.u32 %v10254_v14, 16 }
 0x2c5   : > { %v4102_v62 = vor.u32 %v4101_v37, %v4098_v51  ;;  %v10259_v4 = vld [vmem:[#allocation3 + $0x24] sm:$0x1]  ;;  %v10261_v57 = vld [vmem:[#allocation3 + $0x2c] sm:$0x1]  ;;  %v4127_v12 = vshll.u32 %v10254_v14, 16  ;;  %v4138_v54 = vshrl.u32 %v10256_v49, 16 }
 0x2c6   : > { %v4116_v25 = vor.u32 %v4115_v10, %v4112_v42  ;;  %v4094_v39 = vsel %vm9249_vm11, %v4089_v36, %v4093_v6  ;;  %v4126_v16 = vrot.slane %v4124_v19, 4  ;;  %v4133_v63 = vshll.u32 %v10259_v4, 16  ;;  %v3985_v44 = vld [vmem:[#allocation3 + $0x5c] sm:$0x1]  ;;  %v8921_v46 = vld [vmem:[#allocation3 + $0x8] ss:$8 sps:$4 sm:$0xff]  }
 0x2c7   : > { %v4141_v21 = vshll.u32 %v10256_v49, 16  ;;  %v7690_v48 = vcombine.low %v4080_v38, %v4094_v39  ;;  %v4103_v27 = vrot.slane %v4102_v62, 4  ;;  %v4129_v52 = vrot.slane %v4127_v12, 5  ;;  %v10269_v51 = vld [vmem:[#allocation3 + $0x30] sm:$0xf] }
 0x2c8   : > { %v4117_v61 = vrot.slane %v4116_v25, 4  ;;  %v4135_v41 = vrot.slane %v4133_v63, 5  ;;  %v4140_v37 = vrot.slane %v4138_v54, 4  ;;  %v4147_v10 = vshll.u32 %v10261_v57, 16  ;;  %v10272_v18 = vld [vmem:[#allocation3 + $0x38] sm:$0xf] }
 0x2c9   : > { %v4143_v42 = vrot.slane %v4141_v21, 5  ;;  %8386 = vmatprep.mubr.msk.bf16.mxu1 %vm1075_vm12, %v7690_v48  ;;  %v4108_v6 = vsel %vm9249_vm11, %v4103_v27, %v4107_v23  ;;  %v4130_v36 = vor.u32 %v4129_v52, %v4126_v16  ;;  %v10279_v19 = vld [vmem:[#allocation3 + $0x34] sm:$0x1]  ;;  %v10281_v62 = vld [vmem:[#allocation3 + $0x3c] sm:$0x1]  ;;  %v4152_v25 = vshrl.u32 %v10269_v51, 16 }
 0x2ca   : > { %v4122_v38 = vsel %vm9249_vm11, %v4117_v61, %v4121_v2  ;;  %v4149_v39 = vrot.slane %v4147_v10, 5  ;;  %v4155_v63 = vshll.u32 %v10269_v51, 16  ;;  %v8908_v21 = vld [vmem:[%s9121_s10 + $0x8] sm:$0xff]   ;;  %v4161_v23 = vshll.u32 %v10279_v19, 16 }
 0x2cb   : > { %v7691_v12 = vcombine.low %v4108_v6, %v4122_v38  ;;  %v4144_v54 = vor.u32 %v4143_v42, %v4140_v37  ;;  %v4131_v48 = vrot.slane %v4130_v36, 4  ;;  %v4154_v59 = vrot.slane %v4152_v25, 4 }
 0x2cc   : > { %v4166_v27 = vshrl.u32 %v10272_v18, 16  ;;  %v4157_v16 = vrot.slane %v4155_v63, 5  ;;  %v4169_v61 = vshll.u32 %v10272_v18, 16  ;;  %v4175_v52 = vshll.u32 %v10281_v62, 16  ;;  %v10298_v63 = vld [vmem:[%s9121_s10 + $0x20] sm:$0xff]  }
 0x2cd   : > { %8387 = vmatmul.mubr.msk.bf16.vlgmr.msra.gmra.mrb[0].mxu1 %vm1075_vm12, %v7691_v12  ;;  %v4145_v2 = vrot.slane %v4144_v54, 4  ;;  %v4136_v37 = vsel %vm9249_vm11, %v4131_v48, %v4135_v41  ;;  %v4163_v42 = vrot.slane %v4161_v23, 5  ;;  %v3840_v6 = vshrl.u32 %v10219_v9, 16  ;;  %v3982_v54 = vld [vmem:[#allocation3 + $0x58] sm:$0xf] }
 0x2ce   : > { %8403 = vmatpush3.bf16.msra.mxu1 %v9928_v7  ;;  %v4168_v10 = vrot.slane %v4166_v27, 4  ;;  %v4158_v36 = vor.u32 %v4157_v16, %v4154_v59  ;;  %v4171_v25 = vrot.slane %v4169_v61, 5  ;;  %v4177_v12 = vrot.slane %v4175_v52, 5 }
 0x2cf   : > { %v4150_v38 = vsel %vm9249_vm11, %v4145_v2, %v4149_v39  ;;  %8404 = vmatprep.subr.bf16.mxu1 %v8908_v21  ;;  %v3842_v17 = vrot.slane %v3840_v6, 7  ;;  %v3843_v7 = vshll.u32 %v10219_v9, 16  ;;  %v7966_v41 = vpack.c.bf16 %v3704_v50, %v3704_v50 }
 0x2d0   : > { %v7692_v31 = vcombine.low %v4136_v37, %v4150_v38  ;;  %v4159_v48 = vrot.slane %v4158_v36, 4  ;;  %v4172_v23 = vor.u32 %v4171_v25, %v4168_v10  ;;  %v11363_v39 = vmax.f32 %v10199_v8, 0.0  ;;  %v3988_v10 = vld [vmem:[#allocation3 + $0x60] sm:$0xf] }
 0x2d1   : > { %v3691_v27 = vadd.f32 %v10134_v58, %v10127_v55  ;;  %v3845_v2 = vor.u32 %v3843_v7, %v3842_v17  ;;  %v3846_v16 = vrot.slane %v3842_v17, 4  ;;  %v3848_v61 = vshrl.u32 %v7966_v41, 16  ;;  %v3991_v17 = vld [vmem:[#allocation3 + $0x64] sm:$0x1] }
 0x2d2   : > { %v7967_v59 = vpack.c.bf16 %v11363_v39, %v11363_v39  ;;  %8390 = vmatprep.mubr.msk.bf16.mxu1 %vm1075_vm12, %v7692_v31  ;;  %v3851_v9 = vshll.u32 %v7966_v41, 16  ;;  %8405 = vmatpush3.bf16.msra.mxu1 %v8908_v21  ;;  %v4164_v45 = vsel %vm9249_vm11, %v4159_v48, %v4163_v42  ;;  %v4173_v50 = vrot.slane %v4172_v23, 4  ;;  %v3994_v41 = vld [vmem:[#allocation3 + $0x68] sm:$0xf]  ;;  %v3997_v48 = vld [vmem:[#allocation3 + $0x6c] sm:$0x1] }
 0x2d3   : > { %8422 = vmatprep.subr.bf16.mxu1 %v10298_v63  ;;  %v3983_v8 = vsel %vm9218_vm7, %v3845_v2, %v3982_v54  ;;  %v3986_v55 = vsel %vm9224_vm8, %v3846_v16, %v3985_v44  ;;  %v3850_v31 = vrot.slane %v3848_v61, 7  ;;  %v3706_v6 = vmax.f32 %v10252_v13, 0.0  ;;  %v10328_v16 = vld [vmem:[#allocation3 + $0x80] sm:$0xf]  ;;  %v10330_v61 = vld [vmem:[#allocation3 + $0x84] sm:$0x1] }
 0x2d4   : > { %v3856_v52 = vshrl.u32 %v7967_v59, 16  ;;  %v3859_v37 = vshll.u32 %v7967_v59, 16  ;;  %v4178_v21 = vsel %vm9249_vm11, %v4173_v50, %v4177_v12  ;;  %3984 = vst [vmem:[#allocation3 + $0x58] sm:$0xf] %v3983_v8  ;;  %3987 = vst [vmem:[#allocation3 + $0x5c] sm:$0x1] %v3986_v55  ;;  %v3693_v36 = vadd.f32 %v10134_v58, %v10131_v35 }
 0x2d5   : > { %v3707_v38 = vmax.f32 %v3691_v27, 0.0  ;;  %v7693_v25 = vcombine.low %v4164_v45, %v4178_v21  ;;  %v3853_v7 = vor.u32 %v3851_v9, %v3850_v31  ;;  %v3854_v54 = vrot.slane %v3850_v31, 4  ;;  %v4003_v31 = vld [vmem:[#allocation3 + $0x74] sm:$0x1]  ;;  %v4006_v21 = vld [vmem:[#allocation3 + $0x78] sm:$0xf] }
 0x2d6   : > { %v3858_v42 = vrot.slane %v3856_v52, 7  ;;  %v7968_v44 = vpack.c.bf16 %v3706_v6, %v3706_v6  ;;  %v3709_v13 = vmax.f32 %v3693_v36, 0.0 }
 0x2d7   : > { %v7969_v59 = vpack.c.bf16 %v3707_v38, %v3707_v38  ;;  %8391 = vmatmul.mubr.msk.bf16.gmra.mrb[4].mxu1 %vm1075_vm12, %v7693_v25  ;;  %v3989_v12 = vsel %vm9218_vm7, %v3853_v7, %v3988_v10  ;;  %v3992_v35 = vsel %vm9224_vm8, %v3854_v54, %v3991_v17  ;;  %v4267_v38 = vshll.u32 %v10328_v16, 16 }
 0x2d8   : > { %v3861_v23 = vor.u32 %v3859_v37, %v3858_v42  ;;  %v3862_v39 = vrot.slane %v3858_v42, 4  ;;  %v3864_v27 = vshrl.u32 %v7968_v44, 16  ;;  %3990 = vst [vmem:[#allocation3 + $0x60] sm:$0xf] %v3989_v12  ;;  %3993 = vst [vmem:[#allocation3 + $0x64] sm:$0x1] %v3992_v35  ;;  %v7971_v17 = vpack.c.bf16 %v3709_v13, %v3709_v13 }
 0x2d9   : > { %v3872_v52 = vshrl.u32 %v7969_v59, 16  ;;  %v4000_v37 = vld [vmem:[#allocation3 + $0x70] sm:$0xf]  ;;  %v3867_v8 = vshll.u32 %v7968_v44, 16  ;;  %v3875_v55 = vshll.u32 %v7969_v59, 16  ;;  %v4264_v42 = vshrl.u32 %v10328_v16, 16 }
 0x2da   : > { %v3995_v45 = vsel %vm9218_vm7, %v3861_v23, %v3994_v41  ;;  %v3998_v50 = vsel %vm9224_vm8, %v3862_v39, %v3997_v48  ;;  %v3866_v10 = vrot.slane %v3864_v27, 7  ;;  %v4192_v54 = vsel %vm9249_vm11, %v10148_v26, %v10102_v3  ;;  %v4009_v12 = vld [vmem:[#allocation3 + $0x7c] sm:$0x1] }
 0x2db   : > { %3996 = vst [vmem:[#allocation3 + $0x68] sm:$0xf] %v3995_v45  ;;  %3999 = vst [vmem:[#allocation3 + $0x6c] sm:$0x1] %v3998_v50  ;;  %v3874_v6 = vrot.slane %v3872_v52, 7  ;;  %v3888_v44 = vshrl.u32 %v7971_v17, 16 }
 0x2dc   : > { %v10340_v25 = vld [vmem:[#allocation3 + $0x58] sm:$0xf]  ;;  %v10342_v7 = vld [vmem:[#allocation3 + $0x5c] sm:$0x1]  ;;  %v3869_v41 = vor.u32 %v3867_v8, %v3866_v10  ;;  %v3870_v48 = vrot.slane %v3866_v10, 4 }
 0x2dd   : > { %v4194_v23 = vshrl.u32 %v10340_v25, 16  ;;  %v4197_v39 = vshll.u32 %v10340_v25, 16  ;;  %v4203_v59 = vshll.u32 %v10342_v7, 16  ;;  %v3877_v13 = vor.u32 %v3875_v55, %v3874_v6 }
 0x2de   : > { %v3878_v35 = vrot.slane %v3874_v6, 4  ;;  %v4001_v27 = vsel %vm9218_vm7, %v3869_v41, %v4000_v37  ;;  %v4004_v45 = vsel %vm9224_vm8, %v3870_v48, %v4003_v31  ;;  %v3890_v50 = vrot.slane %v3888_v44, 7  ;;  %v4018_v31 = vld [vmem:[#allocation3 + $0x88] sm:$0xf] }
 0x2df   : > { %v4196_v3 = vrot.slane %v4194_v23, 4  ;;  %v4199_v26 = vrot.slane %v4197_v39, 5  ;;  %v4205_v52 = vrot.slane %v4203_v59, 5  ;;  %4002 = vst [vmem:[#allocation3 + $0x70] sm:$0xf] %v4001_v27  ;;  %v4007_v10 = vsel %vm9218_vm7, %v3877_v13, %v4006_v21 }
 0x2e0   : > { %4005 = vst [vmem:[#allocation3 + $0x74] sm:$0x1] %v4004_v45  ;;  %v10357_v8 = vld [vmem:[#allocation3 + $0x60] sm:$0xf]  ;;  %v10359_v55 = vld [vmem:[#allocation3 + $0x64] sm:$0x1]  ;;  %v4010_v37 = vsel %vm9224_vm8, %v3878_v35, %v4009_v12 }
 0x2e1   : > { %4008 = vst [vmem:[#allocation3 + $0x78] sm:$0xf] %v4007_v10  ;;  %v3891_v6 = vshll.u32 %v7971_v17, 16  ;;  %v3894_v41 = vrot.slane %v3890_v50, 4  ;;  %v11364_v48 = vrot.slane %v10078_v32, 5  ;;  %v11365_v44 = vrot.slane %v10115_v53, 9 }
 0x2e2   : > { %v4200_v21 = vor.u32 %v4199_v26, %v4196_v3  ;;  %v10371_v39 = vld [vmem:[#allocation3 + $0x68] sm:$0xf]  ;;  %v10373_v59 = vld [vmem:[#allocation3 + $0x6c] sm:$0x1]  ;;  %v4208_v13 = vshrl.u32 %v10357_v8, 16  ;;  %v4211_v12 = vshll.u32 %v10357_v8, 16 }
 0x2e3   : > { %v10369_v23 = vsel %vm9510_vm15, %v11365_v44, %v11364_v48  ;;  %4011 = vst [vmem:[#allocation3 + $0x7c] sm:$0x1] %v4010_v37  ;;  %v11366_v17 = vrot.slane %v10082_v22, 5  ;;  %v11367_v32 = vrot.slane %v10201_v29, 9  ;;  %v4217_v35 = vshll.u32 %v10359_v55, 16 }
 0x2e4   : > { %v4222_v27 = vshrl.u32 %v10371_v39, 16  ;;  %v4225_v45 = vshll.u32 %v10371_v39, 16  ;;  %v4231_v3 = vshll.u32 %v10373_v59, 16  ;;  %v4021_v26 = vld [vmem:[#allocation3 + $0x8c] sm:$0x1]  ;;  %v4201_v10 = vrot.slane %v4200_v21, 4 }
 0x2e5   : > { %v10383_v53 = vsel %vm9510_vm15, %v11367_v32, %v11366_v17  ;;  %v4210_v48 = vrot.slane %v4208_v13, 4  ;;  %v4213_v37 = vrot.slane %v4211_v12, 5  ;;  %v3893_v44 = vor.u32 %v3891_v6, %v3890_v50 }
 0x2e6   : > { %v4219_v22 = vrot.slane %v4217_v35, 5  ;;  %v4224_v9 = vrot.slane %v4222_v27, 4  ;;  %v4227_v29 = vrot.slane %v4225_v45, 5  ;;  %v4233_v2 = vrot.slane %v4231_v3, 5  ;;  %v10395_v21 = vld [vmem:[#allocation3 + $0x70] sm:$0xf] }
 0x2e7   : > { %v4206_v17 = vsel %vm9249_vm11, %v4201_v10, %v4205_v52  ;;  %v4214_v32 = vor.u32 %v4213_v37, %v4210_v48  ;;  %v4019_v36 = vsel %vm9218_vm7, %v3893_v44, %v4018_v31  ;;  %v4022_v5 = vsel %vm9224_vm8, %v3894_v41, %v4021_v26  ;;  %v10397_v13 = vld [vmem:[#allocation3 + $0x74] sm:$0x1]  ;;  %v4627_v48 = vld [vmem:[#allocation3 + $0x8] sm:$0xe] }
 0x2e8   : > { %v7694_v0 = vcombine.low %v4192_v54, %v4206_v17  ;;  %v4228_v15 = vor.u32 %v4227_v29, %v4224_v9  ;;  %4020 = vst [vmem:[#allocation3 + $0x88] sm:$0xf] %v4019_v36  ;;  %4023 = vst [vmem:[#allocation3 + $0x8c] sm:$0x1] %v4022_v5  ;;  %v4266_v50 = vrot.slane %v4264_v42, 4  ;;  %v4269_v6 = vrot.slane %v4267_v38, 5 }
 0x2e9   : > { %v4215_v12 = vrot.slane %v4214_v32, 4  ;;  %v10399_v35 = vld [vmem:[#allocation3 + $0x78] sm:$0xf]  ;;  %v4236_v52 = vshrl.u32 %v10395_v21, 16  ;;  %v4239_v31 = vshll.u32 %v10395_v21, 16  ;;  %v4245_v27 = vshll.u32 %v10397_v13, 16 }
 0x2ea   : > { %8394 = vmatprep.mubr.msk.bf16.mxu1 %vm1075_vm12, %v7694_v0  ;;  %v4229_v9 = vrot.slane %v4228_v15, 4  ;;  %v10405_v54 = vld [vmem:[#allocation3 + $0x7c] sm:$0x1]  ;;  %v4250_v41 = vshrl.u32 %v10399_v35, 16  ;;  %v4253_v5 = vshll.u32 %v10399_v35, 16  ;;  %v4270_v42 = vor.u32 %v4269_v6, %v4266_v50 }
 0x2eb   : > { %v4688_v38 = vrot.slane %v10233_v43, 5  ;;  %v4220_v36 = vsel %vm9249_vm11, %v4215_v12, %v4219_v22  ;;  %v4238_v45 = vrot.slane %v4236_v52, 4  ;;  %v4241_v3 = vrot.slane %v4239_v31, 5  ;;  %v4628_v43 = vld [vmem:[#allocation3 + $0x10] sm:$0xe] }
 0x2ec   : > { %v4234_v26 = vsel %vm9249_vm11, %v4229_v9, %v4233_v2  ;;  %v4252_v10 = vrot.slane %v4250_v41, 4  ;;  %v4255_v0 = vrot.slane %v4253_v5, 5  ;;  %v4259_v15 = vshll.u32 %v10405_v54, 16  ;;  %v4629_v12 = vld [vmem:[#allocation3 + $0x18] sm:$0xe] }
 0x2ed   : > { %v7695_v37 = vcombine.low %v4220_v36, %v4234_v26  ;;  %v4242_v44 = vor.u32 %v4241_v3, %v4238_v45  ;;  %v4271_v29 = vrot.slane %v4270_v42, 4  ;;  %v11368_v17 = vshll.u32 %v10330_v61, 16 }
 0x2ee   : > { %v4247_v50 = vrot.slane %v4245_v27, 5  ;;  %v4256_v6 = vor.u32 %v4255_v0, %v4252_v10  ;;  %v4261_v22 = vrot.slane %v4259_v15, 5  ;;  %v3666_v52 = vmul.f32 %v10086_v24, %v9989_v30  ;;  %v4630_v24 = vld [vmem:[#allocation3 + $0x20] sm:$0xe]  ;;  %v4631_v15 = vld [vmem:[#allocation3 + $0x28] sm:$0xe] }
 0x2ef   : > { %v4275_v32 = vrot.slane %v11368_v17, 5  ;;  %8395 = vmatmul.mubr.msk.bf16.gmra.mrb[8].mxu1 %vm1075_vm12, %v7695_v37  ;;  %v4243_v2 = vrot.slane %v4242_v44, 4  ;;  %v10420_v31 = vld [vmem:[#allocation3 + $0x88] sm:$0xf]  ;;  %v10422_v9 = vld [vmem:[#allocation3 + $0x8c] sm:$0x1]  ;;  %v7708_v5 = vcombine.low %v10071_v56, %v10211_v11  ;;  %v7714_v40 = vcombine.low %v10395_v21, %v10399_v35 }
 0x2f0   : > { %v7727_v27 = vrot.slane %v4627_v48, 9  ;;  %v4257_v42 = vrot.slane %v4256_v6, 4  ;;  %v4278_v36 = vshrl.u32 %v10420_v31, 16  ;;  %v4281_v45 = vshll.u32 %v10420_v31, 16  ;;  %v8923_v21 = vld [vmem:[#allocation3 + $0x18] ss:$8 sps:$4 sm:$0xff]  }
 0x2f1   : > { %v4276_v41 = vsel %vm9249_vm11, %v4271_v29, %v4275_v32  ;;  %v4287_v30 = vshll.u32 %v10422_v9, 16  ;;  %v4248_v3 = vsel %vm9249_vm11, %v4243_v2, %v4247_v50  ;;  %v11369_v26 = vrot.slane %v10213_v34, 5  ;;  %v4632_v32 = vld [vmem:[#allocation3 + $0x30] sm:$0xe]  ;;  %v8927_v35 = vld [vmem:[%s9121_s10 + $0x48] sm:$0xff]  }
 0x2f2   : > { %v7728_v0 = vrot.slane %v4628_v43, 9  ;;  %v10440_v48 = vadd.f32 %v10134_v58, %v3666_v52  ;;  %v4262_v37 = vsel %vm9249_vm11, %v4257_v42, %v4261_v22  ;;  %v4280_v44 = vrot.slane %v4278_v36, 4  ;;  %v4633_v52 = vld [vmem:[#allocation3 + $0x38] sm:$0xe] }
 0x2f3   : > { %v10437_v10 = vsel %vm9510_vm15, %v7727_v27, %v11369_v26  ;;  %v4283_v29 = vrot.slane %v4281_v45, 5  ;;  %v4289_v17 = vrot.slane %v4287_v30, 5  ;;  %v7696_v6 = vcombine.low %v4248_v3, %v4262_v37  ;;  %v4635_v36 = vld [vmem:[#allocation3 + $0x58] sm:$0xe]  ;;  %v4637_v37 = vld [vmem:[#allocation3 + $0x68] sm:$0xe] }
 0x2f4   : > { %v7746_v34 = vcombine.low %v10369_v23, %v10437_v10  ;;  %v11370_v50 = vrot.slane %v10231_v20, 5  ;;  %v7729_v2 = vrot.slane %v4629_v12, 9  ;;  %v7730_v26 = vrot.slane %v4630_v24, 9  ;;  %v8922_v23 = vld [vmem:[%s9121_s10 + $0x40] sm:$0xff]   ;;  %v5126_v10 = vld [vmem:[#allocation3 + $0x8] sm:$0xf] }
 0x2f5   : > { %v4284_v27 = vor.u32 %v4283_v29, %v4280_v44  ;;  %v4692_v22 = vrot.slane %v10259_v4, 5  ;;  %v7731_v42 = vrot.slane %v4631_v15, 9  ;;  %8398 = vmatprep.mubr.msk.bf16.mxu1 %vm1075_vm12, %v7696_v6  ;;  %v4696_v20 = vrot.slane %v10261_v57, 5  ;;  %v4638_v29 = vld [vmem:[#allocation3 + $0x70] sm:$0xe] }
 0x2f6   : > { %v10450_v43 = vsel %vm9510_vm15, %v7728_v0, %v11370_v50  ;;  %v10456_v45 = vsel %vm9510_vm15, %v7729_v2, %v4688_v38  ;;  %v7732_v30 = vrot.slane %v4632_v32, 9  ;;  %v4700_v3 = vrot.slane %v10279_v19, 5  ;;  %v4636_v0 = vld [vmem:[#allocation3 + $0x60] sm:$0xe] }
 0x2f7   : > { %v4285_v12 = vrot.slane %v4284_v27, 4  ;;  %v7747_v24 = vcombine.low %v10450_v43, %v10456_v45  ;;  %v10464_v4 = vsel %vm9510_vm15, %v7730_v26, %v4692_v22  ;;  %v7733_v15 = vrot.slane %v4633_v52, 9  ;;  %v4639_v52 = vld [vmem:[#allocation3 + $0x78] sm:$0xe]  ;;  %v5132_v43 = vld [vmem:[#allocation3 + $0x20] sm:$0xf] }
 0x2f8   : > { %v10468_v38 = vsel %vm9510_vm15, %v7731_v42, %v4696_v20  ;;  %v10472_v57 = vsel %vm9510_vm15, %v7732_v30, %v4700_v3  ;;  %v4704_v19 = vrot.slane %v10281_v62, 5  ;;  %v7735_v44 = vrot.slane %v4635_v36, 9  ;;  %v4640_v42 = vld [vmem:[#allocation3 + $0x80] sm:$0xe]  ;;  %v4641_v30 = vld [vmem:[#allocation3 + $0x88] sm:$0xe] }
 0x2f9   : > { %v4290_v32 = vsel %vm9249_vm11, %v4285_v12, %v4289_v17  ;;  %v7748_v6 = vcombine.low %v10464_v4, %v10468_v38  ;;  %v4712_v50 = vrot.slane %v10342_v7, 5  ;;  %v7736_v2 = vrot.slane %v4636_v0, 9 }
 0x2fa   : > { %v7697_v27 = vcombine.low %v4276_v41, %v4290_v32  ;;  %v10482_v26 = vsel %vm9510_vm15, %v7733_v15, %v4704_v19  ;;  %v4716_v22 = vrot.slane %v10359_v55, 5  ;;  %v7737_v62 = vrot.slane %v4637_v37, 9 }
 0x2fb   : > { %v7749_v36 = vcombine.low %v10472_v57, %v10482_v26  ;;  %v10489_v17 = vsel %vm9510_vm15, %v7735_v44, %v4712_v50  ;;  %v4720_v7 = vrot.slane %v10373_v59, 5  ;;  %v7738_v20 = vrot.slane %v4638_v29, 9  ;;  %v10600_v57 = vld [vmem:[%s9121_s10 + $0x50] sm:$0xff]  }
 0x2fc   : > { %8399 = vmatmul.mubr.msk.bf16.gmra.mrb[12].mxu1 %vm1075_vm12, %v7697_v27  ;;  %v7750_v41 = vcombine.low %v10383_v53, %v10489_v17  ;;  %v10497_v55 = vsel %vm9510_vm15, %v7736_v2, %v4716_v22  ;;  %v4724_v3 = vrot.slane %v10397_v13, 5  ;;  %v7739_v0 = vrot.slane %v4639_v52, 9  ;;  %v5128_v53 = vld [vmem:[#allocation3 + $0x10] sm:$0xf] }
 0x2fd   : > { %8406 = vmatprep.mubr.msk.bf16.mxu1 %vm1075_vm12, %v7708_v5  ;;  %v10506_v59 = vsel %vm9510_vm15, %v7737_v62, %v4720_v7  ;;  %v4728_v12 = vrot.slane %v10405_v54, 5  ;;  %v7740_v15 = vrot.slane %v4640_v42, 9  ;;  %v4732_v37 = vrot.slane %v10330_v61, 5  ;;  %v8919_v7 = vld [vmem:[%s9121_s10 + $0x30] sm:$0xff]  }
 0x2fe   : > { %v7751_v19 = vcombine.low %v10497_v55, %v10506_v59  ;;  %v10514_v13 = vsel %vm9510_vm15, %v7738_v20, %v4724_v3  ;;  %v7741_v56 = vrot.slane %v4641_v30, 9  ;;  %v4736_v11 = vrot.slane %v10422_v9, 5  ;;  %v3976_v20 = vld [vmem:[#allocation3 + $0x40] sm:$0xf]  ;;  %v4024_v3 = vld [vmem:[#allocation3 + $0x90] sm:$0xf] }
 0x2ff   : > { %v10519_v5 = vsel %vm9510_vm15, %v7739_v0, %v4728_v12  ;;  %v10523_v54 = vsel %vm9510_vm15, %v7740_v15, %v4732_v37  ;;  %v3702_v61 = vmax.f32 %v10440_v48, 0.0  ;;  %v3694_v44 = vadd.f32 %v10134_v58, %v10142_v47  ;;  %v8915_v48 = vld [vmem:[%s9121_s10 + $0x28] sm:$0xff]   ;;  %v8952_v0 = vld [vmem:[#allocation3 + $0x50] sm:$0xf]  ;;  %v3979_v37 = vld [vmem:[#allocation3 + $0x44] sm:$0x1] }
 0x300   : > { %v7752_v29 = vcombine.low %v10514_v13, %v10519_v5  ;;  %v10532_v32 = vsel %vm9510_vm15, %v7741_v56, %v4736_v11  ;;  %v7709_v52 = vcombine.low %v10226_v33, %v10229_v1  ;;  %v7710_v58 = vcombine.low %v10254_v14, %v10256_v49  ;;  %v10604_v55 = vld [vmem:[#allocation3 + $0x14] sm:$0x1]  ;;  %v5134_v59 = vld [vmem:[#allocation3 + $0x28] sm:$0xf] }
 0x301   : > { %v7753_v9 = vcombine.low %v10523_v54, %v10532_v32  ;;  %v7964_v50 = vpack.c.bf16 %v3702_v61, %v3702_v61  ;;  %v3710_v2 = vmax.f32 %v3694_v44, 0.0  ;;  %v7712_v12 = vcombine.low %v8952_v0, %v10340_v25  ;;  %v8920_v25 = vld [vmem:[%s9121_s10 + $0x38] sm:$0xff]  }
 0x302   : > { %v5159_v45 = vshrl.u32 %v5126_v10, 16  ;;  %v5173_v4 = vshrl.u32 %v5128_v53, 16  ;;  %v5176_v38 = vshll.u32 %v5128_v53, 16  ;;  %v5204_v17 = vshll.u32 %v5132_v43, 16  ;;  %v8926_v32 = vld [vmem:[#allocation3 + $0x58] ss:$8 sps:$4 sm:$0xff]  }
 0x303   : > { %v3832_v47 = vshrl.u32 %v7964_v50, 16  ;;  %v7972_v27 = vpack.c.bf16 %v3710_v2, %v3710_v2  ;;  %v3835_v62 = vshll.u32 %v7964_v50, 16 }
 0x304   : > { %8407 = vmatmul.mubr.msk.bf16.vlgmr.msra.gmra.mrb[0].mxu1 %vm1075_vm12, %v7709_v52  ;;  %v5161_v5 = vrot.slane %v5159_v45, 4  ;;  %v5175_v61 = vrot.slane %v5173_v4, 4  ;;  %v5178_v44 = vrot.slane %v5176_v38, 5  ;;  %v5206_v52 = vrot.slane %v5204_v17, 5 }
 0x305   : > { %8423 = vmatpush3.bf16.msra.mxu1 %v10298_v63  ;;  %8410 = vmatprep.mubr.msk.bf16.mxu1 %vm1075_vm12, %v7710_v58  ;;  %v3834_v22 = vrot.slane %v3832_v47, 7  ;;  %v3896_v42 = vshrl.u32 %v7972_v27, 16  ;;  %v3899_v1 = vshll.u32 %v7972_v27, 16  ;;  %v7711_v63 = vcombine.low %v10269_v51, %v10272_v18 }
 0x306   : > { %8424 = vmatprep.subr.bf16.mxu1 %v8915_v48  ;;  %v7713_v18 = vcombine.low %v10357_v8, %v10371_v39  ;;  %v7715_v51 = vcombine.low %v10328_v16, %v10420_v31  ;;  %v4027_v8 = vld [vmem:[#allocation3 + $0x94] sm:$0x1]  ;;  %v8924_v31 = vld [vmem:[#allocation3 + $0x28] ss:$8 sps:$4 sm:$0xff]   ;;  %v5215_v58 = vshrl.u32 %v5134_v59, 16  ;;  %v5218_v47 = vshll.u32 %v5134_v59, 16 }
 0x307   : > { %v3837_v30 = vor.u32 %v3835_v62, %v3834_v22  ;;  %v3898_v33 = vrot.slane %v3896_v42, 7  ;;  %v3838_v13 = vrot.slane %v3834_v22, 4 }
 0x309   : > { %8425 = vmatpush3.bf16.msra.mxu1 %v8915_v48  ;;  %v3977_v14 = vsel %vm9218_vm7, %v3837_v30, %v3976_v20  ;;  %v3901_v49 = vor.u32 %v3899_v1, %v3898_v33  ;;  %v3980_v56 = vsel %vm9224_vm8, %v3838_v13, %v3979_v37  ;;  %v3902_v39 = vrot.slane %v3898_v33, 4  ;;  %v10610_v48 = vld [vmem:[#allocation3 + $0x24] sm:$0x1]  ;;  %v8929_v37 = vld [vmem:[#allocation3 + $0x78] ss:$8 sps:$4 sm:$0xff]  }
 0x30a   : > { %8442 = vmatprep.subr.bf16.mxu1 %v8919_v7  ;;  %3978 = vst [vmem:[#allocation3 + $0x40] sm:$0xf] %v3977_v14  ;;  %3981 = vst [vmem:[#allocation3 + $0x44] sm:$0x1] %v3980_v56  ;;  %v5182_v20 = vshll.u32 %v10604_v55, 16  ;;  %v5217_v14 = vrot.slane %v5215_v58, 4 }
 0x30b   : > { %v4025_v15 = vsel %vm9218_vm7, %v3901_v49, %v4024_v3  ;;  %v4028_v16 = vsel %vm9224_vm8, %v3902_v39, %v4027_v8  ;;  %v5210_v3 = vshll.u32 %v10610_v48, 16  ;;  %v5220_v49 = vrot.slane %v5218_v47, 5  ;;  %v10617_v13 = vld [vmem:[#allocation3 + $0x2c] sm:$0x1]  ;;  %v5142_v56 = vld [vmem:[#allocation3 + $0x58] sm:$0xf] }
 0x30c   : > { %8411 = vmatmul.mubr.msk.bf16.gmra.mrb[4].mxu1 %vm1075_vm12, %v7711_v63  ;;  %4026 = vst [vmem:[#allocation3 + $0x90] sm:$0xf] %v4025_v15  ;;  %4029 = vst [vmem:[#allocation3 + $0x94] sm:$0x1] %v4028_v16  ;;  %v8928_v15 = vld [vmem:[#allocation3 + $0x68] ss:$8 sps:$4 sm:$0xff]  }
 0x30d   : > { %8414 = vmatprep.mubr.msk.bf16.mxu1 %vm1075_vm12, %v7712_v12  ;;  %v5138_v12 = vld [vmem:[#allocation3 + $0x38] sm:$0xf]  ;;  %v5274_v4 = vshll.u32 %v5142_v56, 16  ;;  %v5146_v58 = vld [vmem:[#allocation3 + $0x68] sm:$0xf] }
 0x30e   : > { %v5243_v53 = vshrl.u32 %v5138_v12, 16 }
 0x311   : > { %v8925_v11 = vld [vmem:[#allocation3 + $0x38] ss:$8 sps:$4 sm:$0xff]  }
 0x312   : > { %v5140_v8 = vld [vmem:[#allocation3 + $0x40] sm:$0xf] }
 0x313   : > { %v5260_v45 = vshll.u32 %v5140_v8, 16  ;;  %v8930_v47 = vld [vmem:[#allocation3 + $0x88] ss:$8 sps:$4 sm:$0xff]  }
 0x314   : > { %8415 = vmatmul.mubr.msk.bf16.gmra.mrb[8].mxu1 %vm1075_vm12, %v7713_v18 }
 0x315   : > { %8418 = vmatprep.mubr.msk.bf16.mxu1 %vm1075_vm12, %v7714_v40 }
 0x31c   : > { %8419 = vmatmul.mubr.msk.bf16.gmra.mrb[12].mxu1 %vm1075_vm12, %v7715_v51 }
 0x31d   : > { %8426 = vmatprep.mubr.msk.bf16.mxu1 %vm1075_vm12, %v7746_v34  ;;  %v5130_v34 = vld [vmem:[#allocation3 + $0x18] sm:$0xf] }
 0x31e   : > { %v5190_v26 = vshll.u32 %v5130_v34, 16 }
 0x320   : > { %v5192_v50 = vrot.slane %v5190_v26, 5 }
 0x324   : > { %8427 = vmatmul.mubr.msk.bf16.vlgmr.msra.gmra.mrb[0].mxu1 %vm1075_vm12, %v7747_v24  ;;  %v5162_v24 = vshll.u32 %v5126_v10, 16 }
 0x325   : > { %8443 = vmatpush3.bf16.msra.mxu1 %v8919_v7  ;;  %8430 = vmatprep.mubr.msk.bf16.mxu1 %vm1075_vm12, %v7748_v6  ;;  %v5187_v6 = vshrl.u32 %v5130_v34, 16  ;;  %v5179_v7 = vor.u32 %v5178_v44, %v5175_v61  ;;  %v5246_v34 = vshll.u32 %v5138_v12, 16  ;;  %v10633_v61 = vld [vmem:[#allocation3 + $0x3c] sm:$0x1]  ;;  %v5245_v44 = vrot.slane %v5243_v53, 4 }
 0x326   : > { %8444 = vmatprep.subr.bf16.mxu1 %v8920_v25  ;;  %v5164_v54 = vrot.slane %v5162_v24, 5  ;;  %v5271_v24 = vshrl.u32 %v5142_v56, 16  ;;  %v5150_v56 = vld [vmem:[#allocation3 + $0x78] sm:$0xf] }
 0x327   : > { %v5180_v51 = vrot.slane %v5179_v7, 4 }
 0x328   : > { %v5165_v62 = vor.u32 %v5164_v54, %v5161_v5 }
 0x329   : > { %8445 = vmatpush3.bf16.msra.mxu1 %v8920_v25  ;;  %v5184_v25 = vrot.slane %v5182_v20, 5  ;;  %v5252_v20 = vshll.u32 %v10633_v61, 16 }
 0x32a   : > { %8462 = vmatprep.subr.bf16.mxu1 %v8922_v23  ;;  %v5166_v18 = vrot.slane %v5165_v62, 4 }
 0x32b   : > { %v5185_v17 = vsel %vm9249_vm11, %v5180_v51, %v5184_v25  ;;  %v5302_v51 = vshll.u32 %v5146_v58, 16 }
 0x32c   : > { %8431 = vmatmul.mubr.msk.bf16.gmra.mrb[4].mxu1 %vm1075_vm12, %v7749_v36  ;;  %v5201_v36 = vshrl.u32 %v5132_v43, 16  ;;  %v5257_v43 = vshrl.u32 %v5140_v8, 16 }
 0x32d   : > { %8434 = vmatprep.mubr.msk.bf16.mxu1 %vm1075_vm12, %v7750_v41  ;;  %v10602_v41 = vld [vmem:[#allocation3 + $0xc] sm:$0x1] }
 0x32e   : > { %v5203_v2 = vrot.slane %v5201_v36, 4  ;;  %v5168_v42 = vshll.u32 %v10602_v41, 16 }
 0x330   : > { %v5207_v1 = vor.u32 %v5206_v52, %v5203_v2  ;;  %v5170_v40 = vrot.slane %v5168_v42, 5  ;;  %v5273_v2 = vrot.slane %v5271_v24, 4  ;;  %v5276_v52 = vrot.slane %v5274_v4, 5 }
 0x332   : > { %v5171_v38 = vsel %vm9249_vm11, %v5166_v18, %v5170_v40  ;;  %v5152_v18 = vld [vmem:[#allocation3 + $0x80] sm:$0xf] }
 0x333   : > { %v7790_v42 = vcombine.low %v5171_v38, %v5185_v17  ;;  %v5344_v53 = vshll.u32 %v5152_v18, 16  ;;  %v8932_v38 = vld [vmem:[%s9121_s10 + $0x58] sm:$0xff]  }
 0x334   : > { %8435 = vmatmul.mubr.msk.bf16.gmra.mrb[8].mxu1 %vm1075_vm12, %v7751_v19  ;;  %v5136_v19 = vld [vmem:[#allocation3 + $0x30] sm:$0xf] }
 0x335   : > { %8438 = vmatprep.mubr.msk.bf16.mxu1 %vm1075_vm12, %v7752_v29  ;;  %v10607_v29 = vld [vmem:[#allocation3 + $0x1c] sm:$0x1]  ;;  %v5229_v27 = vshrl.u32 %v5136_v19, 16  ;;  %v5232_v22 = vshll.u32 %v5136_v19, 16 }
 0x336   : > { %v5196_v33 = vshll.u32 %v10607_v29, 16 }
 0x337   : > { %v5231_v63 = vrot.slane %v5229_v27, 4  ;;  %v5234_v0 = vrot.slane %v5232_v22, 5 }
 0x338   : > { %v5198_v16 = vrot.slane %v5196_v33, 5 }
 0x339   : > { %v5235_v10 = vor.u32 %v5234_v0, %v5231_v63  ;;  %v10643_v63 = vld [vmem:[#allocation3 + $0x64] sm:$0x1] }
 0x33b   : > { %v5236_v54 = vrot.slane %v5235_v10, 4  ;;  %v5341_v10 = vshrl.u32 %v5152_v18, 16 }
 0x33c   : > { %8439 = vmatmul.mubr.msk.bf16.gmra.mrb[12].mxu1 %vm1075_vm12, %v7753_v9  ;;  %v5189_v9 = vrot.slane %v5187_v6, 4  ;;  %v5224_v6 = vshll.u32 %v10617_v13, 16 }
 0x33d   : > { %8446 = vmatprep.mubr.msk.bf16.mxu1 %vm1075_vm12, %v8921_v46  ;;  %v5212_v46 = vrot.slane %v5210_v3, 5  ;;  %v10639_v3 = vld [vmem:[#allocation3 + $0x44] sm:$0x1] }
 0x33e   : > { %v5193_v30 = vor.u32 %v5192_v50, %v5189_v9  ;;  %v5259_v9 = vrot.slane %v5257_v43, 4  ;;  %v5262_v50 = vrot.slane %v5260_v45, 5  ;;  %v5226_v27 = vrot.slane %v5224_v6, 5 }
 0x33f   : > { %v5304_v6 = vrot.slane %v5302_v51, 5 }
 0x340   : > { %v5194_v39 = vrot.slane %v5193_v30, 4  ;;  %v5148_v30 = vld [vmem:[#allocation3 + $0x70] sm:$0xf]  ;;  %v5263_v12 = vor.u32 %v5262_v50, %v5259_v9  ;;  %v5346_v9 = vrot.slane %v5344_v53, 5 }
 0x341   : > { %v5313_v25 = vshrl.u32 %v5148_v30, 16  ;;  %v5316_v8 = vshll.u32 %v5148_v30, 16  ;;  %v5156_v50 = vld [vmem:[#allocation3 + $0x90] sm:$0xf] }
 0x342   : > { %v5199_v59 = vsel %vm9249_vm11, %v5194_v39, %v5198_v16  ;;  %v5254_v39 = vrot.slane %v5252_v20, 5  ;;  %v5266_v16 = vshll.u32 %v10639_v3, 16  ;;  %v5264_v43 = vrot.slane %v5263_v12, 4  ;;  %v10672_v20 = vld [vmem:[#allocation3 + $0x84] sm:$0x1] }
 0x344   : > { %8447 = vmatmul.mubr.msk.bf16.vlgmr.msra.gmra.mrb[0].mxu1 %vm1075_vm12, %v8923_v21  ;;  %v5144_v21 = vld [vmem:[#allocation3 + $0x60] sm:$0xf] }
 0x345   : > { %8463 = vmatpush3.bf16.msra.mxu1 %v8922_v23  ;;  %8450 = vmatprep.mubr.msk.bf16.mxu1 %vm1075_vm12, %v8924_v31  ;;  %v5208_v23 = vrot.slane %v5207_v1, 4  ;;  %v5221_v31 = vor.u32 %v5220_v49, %v5217_v14  ;;  %v5285_v26 = vshrl.u32 %v5144_v21, 16  ;;  %v5288_v36 = vshll.u32 %v5144_v21, 16  ;;  %v10641_v49 = vld [vmem:[#allocation3 + $0x5c] sm:$0x1] }
 0x346   : > { %8464 = vmatprep.subr.bf16.mxu1 %v8927_v35  ;;  %v5327_v21 = vshrl.u32 %v5150_v56, 16 }
 0x347   : > { %v5213_v19 = vsel %vm9249_vm11, %v5208_v23, %v5212_v46  ;;  %v5222_v5 = vrot.slane %v5221_v31, 4  ;;  %v5287_v22 = vrot.slane %v5285_v26, 4  ;;  %v5290_v62 = vrot.slane %v5288_v36, 5 }
 0x348   : > { %v7791_v33 = vcombine.low %v5199_v59, %v5213_v19  ;;  %v5280_v23 = vshll.u32 %v10641_v49, 16  ;;  %v5294_v46 = vshll.u32 %v10643_v63, 16  ;;  %v5330_v31 = vshll.u32 %v5150_v56, 16 }
 0x349   : > { %8465 = vmatpush3.bf16.msra.mxu1 %v8927_v35  ;;  %v10620_v35 = vld [vmem:[#allocation3 + $0x34] sm:$0x1]  ;;  %v5227_v1 = vsel %vm9249_vm11, %v5222_v5, %v5226_v27  ;;  %v5291_v40 = vor.u32 %v5290_v62, %v5287_v22  ;;  %v5315_v26 = vrot.slane %v5313_v25, 4  ;;  %v5318_v36 = vrot.slane %v5316_v8, 5  ;;  %v5154_v5 = vld [vmem:[#allocation3 + $0x88] sm:$0xf] }
 0x34a   : > { %8482 = vmatprep.subr.bf16.mxu1 %v10600_v57  ;;  %v5268_v59 = vrot.slane %v5266_v16, 5  ;;  %v5282_v19 = vrot.slane %v5280_v23, 5  ;;  %v10665_v22 = vld [vmem:[#allocation3 + $0x74] sm:$0x1]  ;;  %v5355_v30 = vshrl.u32 %v5154_v5, 16  ;;  %v5350_v8 = vshll.u32 %v10672_v20, 16 }
 0x34b   : > { %v5292_v4 = vrot.slane %v5291_v40, 4  ;;  %v5319_v62 = vor.u32 %v5318_v36, %v5315_v26  ;;  %v5322_v56 = vshll.u32 %v10665_v22, 16 }
 0x34c   : > { %8451 = vmatmul.mubr.msk.bf16.gmra.mrb[4].mxu1 %vm1075_vm12, %v8925_v11  ;;  %v5238_v11 = vshll.u32 %v10620_v35, 16 }
 0x34d   : > { %8454 = vmatprep.mubr.msk.bf16.mxu1 %vm1075_vm12, %v8926_v32  ;;  %v5248_v32 = vrot.slane %v5246_v34, 5  ;;  %v5320_v25 = vrot.slane %v5319_v62, 4  ;;  %v5324_v53 = vrot.slane %v5322_v56, 5  ;;  %v5618_v56 = vrot.slane %v10607_v29, 5 }
 0x34e   : > { %v5240_v7 = vrot.slane %v5238_v11, 5  ;;  %v5296_v11 = vrot.slane %v5294_v46, 5 }
 0x34f   : > { %v5249_v14 = vor.u32 %v5248_v32, %v5245_v44  ;;  %v5332_v44 = vrot.slane %v5330_v31, 5  ;;  %v5343_v32 = vrot.slane %v5341_v10, 4 }
 0x350   : > { %v5241_v0 = vsel %vm9249_vm11, %v5236_v54, %v5240_v7  ;;  %v5329_v54 = vrot.slane %v5327_v21, 4  ;;  %v5297_v27 = vsel %vm9249_vm11, %v5292_v4, %v5296_v11  ;;  %v10670_v7 = vld [vmem:[%s9121_s10 + $0x60] sm:$0xff]   ;;  %v5560_v11 = vld [vmem:[#allocation3 + $0x8] sm:$0xe] }
 0x351   : > { %v5250_v34 = vrot.slane %v5249_v14, 4  ;;  %v7792_v17 = vcombine.low %v5227_v1, %v5241_v0  ;;  %v5369_v1 = vshrl.u32 %v5156_v50, 16  ;;  %v5372_v14 = vshll.u32 %v5156_v50, 16 }
 0x352   : > { %v5333_v0 = vor.u32 %v5332_v44, %v5329_v54  ;;  %v5347_v12 = vor.u32 %v5346_v9, %v5343_v32  ;;  %v7808_v50 = vrot.slane %v5560_v11, 9 }
 0x353   : > { %v5371_v23 = vrot.slane %v5369_v1, 4  ;;  %v5374_v46 = vrot.slane %v5372_v14, 5  ;;  %v5563_v14 = vld [vmem:[#allocation3 + $0x20] sm:$0xe] }
 0x354   : > { %8455 = vmatmul.mubr.msk.bf16.gmra.mrb[8].mxu1 %vm1075_vm12, %v8928_v15  ;;  %v5277_v15 = vor.u32 %v5276_v52, %v5273_v2  ;;  %v5255_v2 = vsel %vm9249_vm11, %v5250_v34, %v5254_v39  ;;  %v5357_v39 = vrot.slane %v5355_v30, 4  ;;  %v5334_v21 = vrot.slane %v5333_v0, 4  ;;  %v5564_v0 = vld [vmem:[#allocation3 + $0x28] sm:$0xe] }
 0x355   : > { %8458 = vmatprep.mubr.msk.bf16.mxu1 %vm1075_vm12, %v8929_v37  ;;  %v5299_v37 = vshrl.u32 %v5146_v58, 16  ;;  %v10659_v58 = vld [vmem:[#allocation3 + $0x6c] sm:$0x1]  ;;  %v5348_v31 = vrot.slane %v5347_v12, 4  ;;  %v5375_v26 = vor.u32 %v5374_v46, %v5371_v23  ;;  %v5566_v23 = vld [vmem:[#allocation3 + $0x38] sm:$0xe] }
 0x356   : > { %v5278_v45 = vrot.slane %v5277_v15, 4 }
 0x357   : > { %v5301_v24 = vrot.slane %v5299_v37, 4  ;;  %v5308_v37 = vshll.u32 %v10659_v58, 16  ;;  %v5376_v9 = vrot.slane %v5375_v26, 4  ;;  %v5642_v26 = vrot.slane %v10641_v49, 5 }
 0x358   : > { %v5283_v52 = vsel %vm9249_vm11, %v5278_v45, %v5282_v19  ;;  %v10681_v45 = vld [vmem:[#allocation3 + $0x8c] sm:$0x1] }
 0x359   : > { %v7794_v40 = vcombine.low %v5283_v52, %v5297_v27  ;;  %v5310_v10 = vrot.slane %v5308_v37, 5 }
 0x35c   : > { %8459 = vmatmul.mubr.msk.bf16.gmra.mrb[12].mxu1 %vm1075_vm12, %v8930_v47  ;;  %v5269_v47 = vsel %vm9249_vm11, %v5264_v43, %v5268_v59  ;;  %v5352_v43 = vrot.slane %v5350_v8, 5  ;;  %v5364_v59 = vshll.u32 %v10681_v45, 16 }
 0x35d   : > { %8466 = vmatprep.mubr.msk.bf16.mxu1 %vm1075_vm12, %v7790_v42  ;;  %v10667_v42 = vld [vmem:[#allocation3 + $0x7c] sm:$0x1]  ;;  %v7793_v15 = vcombine.low %v5255_v2, %v5269_v47  ;;  %v5610_v2 = vrot.slane %v10602_v41, 5  ;;  %v5614_v47 = vrot.slane %v10604_v55, 5  ;;  %v5565_v55 = vld [vmem:[#allocation3 + $0x30] sm:$0xe] }
 0x35e   : > { %v5336_v18 = vshll.u32 %v10667_v42, 16  ;;  %v5366_v27 = vrot.slane %v5364_v59, 5  ;;  %v7813_v8 = vrot.slane %v5565_v55, 9  ;;  %v8936_v59 = vld [vmem:[%s9121_s10 + $0x70] sm:$0xff]  }
 0x35f   : > { %v5611_v1 = vsel %vm9510_vm15, %v7808_v50, %v5610_v2  ;;  %v5654_v2 = vrot.slane %v10665_v22, 5 }
 0x360   : > { %v5338_v34 = vrot.slane %v5336_v18, 5  ;;  %v7811_v18 = vrot.slane %v5563_v14, 9  ;;  %v5666_v14 = vrot.slane %v10681_v45, 5  ;;  %v6060_v45 = vld [vmem:[#allocation3 + $0x10] sm:$0xf] }
 0x362   : > { %v5339_v36 = vsel %vm9249_vm11, %v5334_v21, %v5338_v34  ;;  %v5567_v21 = vld [vmem:[#allocation3 + $0x40] sm:$0xe] }
 0x364   : > { %8467 = vmatmul.mubr.msk.bf16.vlgmr.msra.gmra.mrb[0].mxu1 %vm1075_vm12, %v7791_v33  ;;  %v5358_v33 = vshll.u32 %v5154_v5, 16  ;;  %v5561_v5 = vld [vmem:[#allocation3 + $0x10] sm:$0xe] }
 0x365   : > { %8483 = vmatpush3.bf16.msra.mxu1 %v10600_v57  ;;  %8470 = vmatprep.mubr.msk.bf16.mxu1 %vm1075_vm12, %v7792_v17  ;;  %v5305_v57 = vor.u32 %v5304_v6, %v5301_v24  ;;  %v10683_v24 = vld [vmem:[#allocation3 + $0x94] sm:$0x1]  ;;  %v5353_v17 = vsel %vm9249_vm11, %v5348_v31, %v5352_v43  ;;  %v7809_v52 = vrot.slane %v5561_v5, 9  ;;  %v5569_v31 = vld [vmem:[#allocation3 + $0x60] sm:$0xe]  ;;  %v5634_v43 = vrot.slane %v10633_v61, 5 }
 0x366   : > { %8484 = vmatprep.subr.bf16.mxu1 %v8932_v38  ;;  %v5360_v16 = vrot.slane %v5358_v33, 5  ;;  %v5378_v19 = vshll.u32 %v10683_v24, 16  ;;  %v7796_v44 = vcombine.low %v5339_v36, %v5353_v17  ;;  %v5562_v33 = vld [vmem:[#allocation3 + $0x18] sm:$0xe]  ;;  %v7817_v36 = vrot.slane %v5569_v31, 9 }
 0x367   : > { %v5306_v51 = vrot.slane %v5305_v57, 4  ;;  %v5615_v41 = vsel %vm9510_vm15, %v7809_v52, %v5614_v47  ;;  %v5646_v17 = vrot.slane %v10643_v63, 5  ;;  %v5571_v63 = vld [vmem:[#allocation3 + $0x70] sm:$0xe]  ;;  %v5573_v5 = vld [vmem:[#allocation3 + $0x80] sm:$0xe] }
 0x368   : > { %v5361_v6 = vor.u32 %v5360_v16, %v5357_v39  ;;  %v5380_v57 = vrot.slane %v5378_v19, 5  ;;  %v7828_v37 = vcombine.low %v5611_v1, %v5615_v41  ;;  %v5630_v39 = vrot.slane %v10620_v35, 5  ;;  %v5570_v19 = vld [vmem:[#allocation3 + $0x68] sm:$0xe]  ;;  %v5575_v1 = vld [vmem:[#allocation3 + $0x90] sm:$0xe] }
 0x369   : > { %8485 = vmatpush3.bf16.msra.mxu1 %v8932_v38  ;;  %v5311_v4 = vsel %vm9249_vm11, %v5306_v51, %v5310_v10  ;;  %v5325_v38 = vsel %vm9249_vm11, %v5320_v25, %v5324_v53  ;;  %v7812_v51 = vrot.slane %v5564_v0, 9  ;;  %v5626_v25 = vrot.slane %v10617_v13, 5  ;;  %v5568_v13 = vld [vmem:[#allocation3 + $0x58] sm:$0xe]  ;;  %v8934_v53 = vld [vmem:[%s9121_s10 + $0x68] sm:$0xff]  }
 0x36a   : > { %8502 = vmatprep.subr.bf16.mxu1 %v10670_v7  ;;  %v7795_v54 = vcombine.low %v5311_v4, %v5325_v38  ;;  %v5362_v32 = vrot.slane %v5361_v6, 4  ;;  %v5381_v30 = vsel %vm9249_vm11, %v5376_v9, %v5380_v57  ;;  %v5631_v46 = vsel %vm9510_vm15, %v7813_v8, %v5630_v39  ;;  %v6064_v39 = vld [vmem:[#allocation3 + $0x20] sm:$0xf] }
 0x36b   : > { %v7814_v10 = vrot.slane %v5566_v23, 9  ;;  %v7815_v4 = vrot.slane %v5567_v21, 9  ;;  %v5638_v38 = vrot.slane %v10639_v3, 5  ;;  %v7816_v6 = vrot.slane %v5568_v13, 9 }
 0x36c   : > { %8471 = vmatmul.mubr.msk.bf16.gmra.mrb[4].mxu1 %vm1075_vm12, %v7793_v15  ;;  %v5367_v62 = vsel %vm9249_vm11, %v5362_v32, %v5366_v27  ;;  %v7810_v15 = vrot.slane %v5562_v33, 9  ;;  %v5647_v49 = vsel %vm9510_vm15, %v7817_v36, %v5646_v17  ;;  %v5650_v9 = vrot.slane %v10659_v58, 5  ;;  %v5574_v58 = vld [vmem:[#allocation3 + $0x88] sm:$0xe]  ;;  %v10773_v17 = vld [vmem:[#allocation3 + $0x24] sm:$0x1] }
 0x36d   : > { %8474 = vmatprep.mubr.msk.bf16.mxu1 %vm1075_vm12, %v7794_v40  ;;  %v7797_v12 = vcombine.low %v5367_v62, %v5381_v30  ;;  %v5622_v40 = vrot.slane %v10610_v48, 5  ;;  %v5627_v48 = vsel %vm9510_vm15, %v7812_v51, %v5626_v25  ;;  %v5635_v61 = vsel %vm9510_vm15, %v7814_v10, %v5634_v43  ;;  %v6062_v51 = vld [vmem:[#allocation3 + $0x18] sm:$0xf]  ;;  %v8939_v43 = vld [vmem:[#allocation3 + $0x40] ss:$8 sps:$4 sm:$0xff]  }
 0x36e   : > { %v5619_v16 = vsel %vm9510_vm15, %v7810_v15, %v5618_v56  ;;  %v7830_v34 = vcombine.low %v5627_v48, %v5631_v46  ;;  %v5639_v3 = vsel %vm9510_vm15, %v7815_v4, %v5638_v38  ;;  %v5643_v11 = vsel %vm9510_vm15, %v7816_v6, %v5642_v26  ;;  %v8935_v56 = vld [vmem:[#allocation3 + $0x10] ss:$8 sps:$4 sm:$0xff]   ;;  %v10766_v48 = vld [vmem:[%s9121_s10 + $0x80] sm:$0xff]   ;;  %v10768_v4 = vld [vmem:[#allocation3 + $0x14] sm:$0x1] }
 0x36f   : > { %v5623_v29 = vsel %vm9510_vm15, %v7811_v18, %v5622_v40  ;;  %v7832_v32 = vcombine.low %v5643_v11, %v5647_v49  ;;  %v7819_v50 = vrot.slane %v5571_v63, 9  ;;  %v5658_v47 = vrot.slane %v10667_v42, 5  ;;  %v8937_v18 = vld [vmem:[#allocation3 + $0x20] ss:$8 sps:$4 sm:$0xff]   ;;  %v8938_v40 = vld [vmem:[#allocation3 + $0x30] ss:$8 sps:$4 sm:$0xff]  }
 0x370   : > { %v7829_v35 = vcombine.low %v5619_v16, %v5623_v29  ;;  %v7821_v27 = vrot.slane %v5573_v5, 9  ;;  %v5662_v57 = vrot.slane %v10672_v20, 5  ;;  %v7822_v41 = vrot.slane %v5574_v58, 9  ;;  %v6066_v16 = vld [vmem:[#allocation3 + $0x28] sm:$0xf] }
 0x371   : > { %v5655_v30 = vsel %vm9510_vm15, %v7819_v50, %v5654_v2  ;;  %v7823_v0 = vrot.slane %v5575_v1, 9  ;;  %v5670_v55 = vrot.slane %v10683_v24, 5  ;;  %v8941_v24 = vld [vmem:[%s9121_s10 + $0x78] sm:$0xff]   ;;  %v6093_v25 = vshrl.u32 %v6060_v45, 16  ;;  %v8943_v58 = vld [vmem:[#allocation3 + $0x80] ss:$8 sps:$4 sm:$0xff]  }
 0x372   : > { %v5663_v33 = vsel %vm9510_vm15, %v7821_v27, %v5662_v57  ;;  %v6096_v8 = vshll.u32 %v6060_v45, 16  ;;  %v6107_v29 = vshrl.u32 %v6062_v51, 16  ;;  %v6110_v23 = vshll.u32 %v6062_v51, 16  ;;  %v10771_v26 = vld [vmem:[#allocation3 + $0x1c] sm:$0x1] }
 0x373   : > { %v5671_v15 = vsel %vm9510_vm15, %v7823_v0, %v5670_v55  ;;  %v6095_v46 = vrot.slane %v6093_v25, 4  ;;  %v6121_v13 = vshrl.u32 %v6064_v39, 16  ;;  %v6124_v31 = vshll.u32 %v6064_v39, 16  ;;  %v6070_v11 = vld [vmem:[#allocation3 + $0x38] sm:$0xf] }
 0x374   : > { %8475 = vmatmul.mubr.msk.bf16.gmra.mrb[8].mxu1 %vm1075_vm12, %v7795_v54  ;;  %v7831_v54 = vcombine.low %v5635_v61, %v5639_v3  ;;  %v6098_v21 = vrot.slane %v6096_v8, 5  ;;  %v6138_v10 = vshll.u32 %v6066_v16, 16  ;;  %v6109_v38 = vrot.slane %v6107_v29, 4  ;;  %v6074_v1 = vld [vmem:[#allocation3 + $0x48] sm:$0xf] }
 0x375   : > { %8478 = vmatprep.mubr.msk.bf16.mxu1 %vm1075_vm12, %v7796_v44  ;;  %v7818_v44 = vrot.slane %v5570_v19, 9  ;;  %v6112_v6 = vrot.slane %v6110_v23, 5  ;;  %v6126_v61 = vrot.slane %v6124_v31, 5  ;;  %v6163_v50 = vshrl.u32 %v6070_v11, 16  ;;  %v6076_v0 = vld [vmem:[#allocation3 + $0x60] sm:$0xf] }
 0x376   : > { %v6099_v36 = vor.u32 %v6098_v21, %v6095_v46  ;;  %v6140_v19 = vrot.slane %v6138_v10, 5  ;;  %v6166_v2 = vshll.u32 %v6070_v11, 16  ;;  %v10789_v51 = vld [vmem:[#allocation3 + $0x3c] sm:$0x1]  ;;  %v6191_v25 = vshrl.u32 %v6074_v1, 16 }
 0x377   : > { %v5651_v62 = vsel %vm9510_vm15, %v7818_v44, %v5650_v9  ;;  %v6113_v5 = vor.u32 %v6112_v6, %v6109_v38  ;;  %v6130_v44 = vshll.u32 %v10773_v17, 16  ;;  %v10780_v9 = vld [vmem:[#allocation3 + $0x2c] sm:$0x1]  ;;  %v6165_v55 = vrot.slane %v6163_v50, 4  ;;  %v6082_v50 = vld [vmem:[#allocation3 + $0x78] sm:$0xf] }
 0x378   : > { %v7833_v42 = vcombine.low %v5651_v62, %v5655_v30  ;;  %v6072_v30 = vld [vmem:[#allocation3 + $0x40] sm:$0xf]  ;;  %v6194_v8 = vshll.u32 %v6074_v1, 16  ;;  %v6205_v39 = vshrl.u32 %v6076_v0, 16  ;;  %v6172_v6 = vshll.u32 %v10789_v51, 16 }
 0x37c   : > { %8479 = vmatmul.mubr.msk.bf16.gmra.mrb[12].mxu1 %vm1075_vm12, %v7797_v12  ;;  %v5667_v12 = vsel %vm9510_vm15, %v7822_v41, %v5666_v14  ;;  %v6144_v14 = vshll.u32 %v10780_v9, 16 }
 0x37d   : > { %8486 = vmatprep.mubr.msk.bf16.mxu1 %vm1075_vm12, %v7828_v37  ;;  %v7835_v37 = vcombine.low %v5667_v12, %v5671_v15  ;;  %v6168_v12 = vrot.slane %v6166_v2, 5  ;;  %v6177_v15 = vshrl.u32 %v6072_v30, 16 }
 0x37e   : > { %v6146_v29 = vrot.slane %v6144_v14, 5 }
 0x37f   : > { %v6169_v31 = vor.u32 %v6168_v12, %v6165_v55  ;;  %v6250_v55 = vshll.u32 %v6082_v50, 16 }
 0x384   : > { %8487 = vmatmul.mubr.msk.bf16.vlgmr.msra.gmra.mrb[0].mxu1 %vm1075_vm12, %v7829_v35  ;;  %v6135_v35 = vshrl.u32 %v6066_v16, 16  ;;  %v6208_v16 = vshll.u32 %v6076_v0, 16  ;;  %v6247_v0 = vshrl.u32 %v6082_v50, 16 }
 0x385   : > { %8503 = vmatpush3.bf16.msra.mxu1 %v10670_v7  ;;  %8490 = vmatprep.mubr.msk.bf16.mxu1 %vm1075_vm12, %v7830_v34  ;;  %v5572_v7 = vld [vmem:[#allocation3 + $0x78] sm:$0xe]  ;;  %v6068_v34 = vld [vmem:[#allocation3 + $0x30] sm:$0xf] }
 0x386   : > { %8504 = vmatprep.subr.bf16.mxu1 %v8934_v53  ;;  %v7820_v52 = vrot.slane %v5572_v7, 9  ;;  %v6137_v3 = vrot.slane %v6135_v35, 4  ;;  %v6149_v49 = vshrl.u32 %v6068_v34, 16  ;;  %v6152_v63 = vshll.u32 %v6068_v34, 16 }
 0x387   : > { %v6102_v7 = vshll.u32 %v10768_v4, 16  ;;  %v6179_v35 = vrot.slane %v6177_v15, 4 }
 0x388   : > { %v5659_v22 = vsel %vm9510_vm15, %v7820_v52, %v5658_v47  ;;  %v8942_v52 = vld [vmem:[#allocation3 + $0x70] ss:$8 sps:$4 sm:$0xff]   ;;  %v6141_v27 = vor.u32 %v6140_v19, %v6137_v3  ;;  %v6151_v57 = vrot.slane %v6149_v49, 4  ;;  %v6154_v62 = vrot.slane %v6152_v63, 5 }
 0x389   : > { %8505 = vmatpush3.bf16.msra.mxu1 %v8934_v53  ;;  %v7834_v20 = vcombine.low %v5659_v22, %v5663_v33  ;;  %v8940_v53 = vld [vmem:[#allocation3 + $0x60] ss:$8 sps:$4 sm:$0xff]   ;;  %v6104_v22 = vrot.slane %v6102_v7, 5  ;;  %v10782_v33 = vld [vmem:[#allocation3 + $0x34] sm:$0x1]  ;;  %v6207_v3 = vrot.slane %v6205_v39, 4 }
 0x38a   : > { %8522 = vmatprep.subr.bf16.mxu1 %v8936_v59  ;;  %v6158_v23 = vshll.u32 %v10782_v33, 16  ;;  %v6210_v19 = vrot.slane %v6208_v16, 5  ;;  %v6080_v7 = vld [vmem:[#allocation3 + $0x70] sm:$0xf] }
 0x38b   : > { %v6233_v1 = vshrl.u32 %v6080_v7, 16  ;;  %v6236_v14 = vshll.u32 %v6080_v7, 16  ;;  %v10831_v7 = vld [vmem:[#allocation3 + $0x7c] sm:$0x1] }
 0x38c   : > { %8491 = vmatmul.mubr.msk.bf16.gmra.mrb[4].mxu1 %vm1075_vm12, %v7831_v54  ;;  %v6116_v54 = vshll.u32 %v10771_v26, 16  ;;  %v6160_v11 = vrot.slane %v6158_v23, 5  ;;  %v8946_v23 = vld [vmem:[%s9121_s10 + $0x88] sm:$0xff]  }
 0x38d   : > { %8494 = vmatprep.mubr.msk.bf16.mxu1 %vm1075_vm12, %v7832_v32  ;;  %v6100_v32 = vrot.slane %v6099_v36, 4  ;;  %v10799_v36 = vld [vmem:[#allocation3 + $0x44] sm:$0x1]  ;;  %v6235_v16 = vrot.slane %v6233_v1, 4  ;;  %v6256_v1 = vshll.u32 %v10831_v7, 16 }
 0x38e   : > { %v6118_v41 = vrot.slane %v6116_v54, 5  ;;  %v6170_v54 = vrot.slane %v6169_v31, 4 }
 0x38f   : > { %v6105_v45 = vsel %vm9249_vm11, %v6100_v32, %v6104_v22  ;;  %v6211_v22 = vor.u32 %v6210_v19, %v6207_v3 }
 0x391   : > { %v6212_v39 = vrot.slane %v6211_v22, 4 }
 0x394   : > { %8495 = vmatmul.mubr.msk.bf16.gmra.mrb[8].mxu1 %vm1075_vm12, %v7833_v42  ;;  %v6114_v42 = vrot.slane %v6113_v5, 4 }
 0x395   : > { %8498 = vmatprep.mubr.msk.bf16.mxu1 %vm1075_vm12, %v7834_v20  ;;  %v6132_v20 = vrot.slane %v6130_v44, 5  ;;  %v10801_v44 = vld [vmem:[#allocation3 + $0x4c] sm:$0x1] }
 0x39c   : > { %8499 = vmatmul.mubr.msk.bf16.gmra.mrb[12].mxu1 %vm1075_vm12, %v7835_v37  ;;  %v6180_v37 = vshll.u32 %v6072_v30, 16 }
 0x39d   : > { %8506 = vmatprep.mubr.msk.bf16.mxu1 %vm1075_vm12, %v8935_v56  ;;  %v6078_v56 = vld [vmem:[#allocation3 + $0x68] sm:$0xf] }
 0x39e   : > { %v6219_v46 = vshrl.u32 %v6078_v56, 16  ;;  %v6222_v21 = vshll.u32 %v6078_v56, 16  ;;  %v6182_v10 = vrot.slane %v6180_v37, 5 }
 0x3a0   : > { %v6221_v49 = vrot.slane %v6219_v46, 4  ;;  %v6224_v63 = vrot.slane %v6222_v21, 5  ;;  %v6183_v32 = vor.u32 %v6182_v10, %v6179_v35  ;;  %v6238_v46 = vrot.slane %v6236_v14, 5 }
 0x3a1   : > { %v6249_v21 = vrot.slane %v6247_v0, 4 }
 0x3a2   : > { %v6184_v15 = vrot.slane %v6183_v32, 4  ;;  %v10835_v32 = vld [vmem:[#allocation3 + $0x8c] sm:$0x1] }
 0x3a3   : > { %v6284_v0 = vshll.u32 %v10835_v32, 16 }
 0x3a4   : > { %8507 = vmatmul.mubr.msk.bf16.vlgmr.msra.gmra.mrb[0].mxu1 %vm1075_vm12, %v8937_v18 }
 0x3a5   : > { %8523 = vmatpush3.bf16.msra.mxu1 %v8936_v59  ;;  %8510 = vmatprep.mubr.msk.bf16.mxu1 %vm1075_vm12, %v8938_v40  ;;  %v6123_v59 = vrot.slane %v6121_v13, 4  ;;  %v6155_v40 = vor.u32 %v6154_v62, %v6151_v57  ;;  %v6119_v13 = vsel %vm9249_vm11, %v6114_v42, %v6118_v41  ;;  %v10807_v57 = vld [vmem:[#allocation3 + $0x64] sm:$0x1]  ;;  %v10809_v62 = vld [vmem:[#allocation3 + $0x6c] sm:$0x1] }
 0x3a6   : > { %8524 = vmatprep.subr.bf16.mxu1 %v8941_v24  ;;  %v7872_v5 = vcombine.low %v6105_v45, %v6119_v13  ;;  %v6084_v42 = vld [vmem:[#allocation3 + $0x80] sm:$0xf]  ;;  %v6086_v41 = vld [vmem:[#allocation3 + $0x88] sm:$0xf]  ;;  %v6214_v37 = vshll.u32 %v10807_v57, 16  ;;  %v6228_v56 = vshll.u32 %v10809_v62, 16 }
 0x3a7   : > { %v6127_v47 = vor.u32 %v6126_v61, %v6123_v59  ;;  %v6156_v38 = vrot.slane %v6155_v40, 4  ;;  %v6193_v59 = vrot.slane %v6191_v25, 4  ;;  %v6196_v61 = vrot.slane %v6194_v8, 5 }
 0x3a8   : > { %v6261_v45 = vshrl.u32 %v6084_v42, 16  ;;  %v6278_v40 = vshll.u32 %v6086_v41, 16  ;;  %v6252_v13 = vrot.slane %v6250_v55, 5  ;;  %v6216_v10 = vrot.slane %v6214_v37, 5 }
 0x3a9   : > { %8525 = vmatpush3.bf16.msra.mxu1 %v8941_v24  ;;  %v6128_v18 = vrot.slane %v6127_v47, 4  ;;  %v6142_v24 = vrot.slane %v6141_v27, 4  ;;  %v6174_v47 = vrot.slane %v6172_v6, 5  ;;  %v6186_v27 = vshll.u32 %v10799_v36, 16 }
 0x3aa   : > { %8542 = vmatprep.subr.bf16.mxu1 %v10766_v48  ;;  %v6197_v30 = vor.u32 %v6196_v61, %v6193_v59  ;;  %v6280_v59 = vrot.slane %v6278_v40, 5  ;;  %v6090_v61 = vld [vmem:[#allocation3 + $0x98] sm:$0xf] }
 0x3ab   : > { %v6133_v34 = vsel %vm9249_vm11, %v6128_v18, %v6132_v20  ;;  %v6225_v20 = vor.u32 %v6224_v63, %v6221_v49  ;;  %v6175_v12 = vsel %vm9249_vm11, %v6170_v54, %v6174_v47  ;;  %v6264_v18 = vshll.u32 %v6084_v42, 16  ;;  %v10833_v54 = vld [vmem:[#allocation3 + $0x84] sm:$0x1] }
 0x3ac   : > { %8511 = vmatmul.mubr.msk.bf16.gmra.mrb[4].mxu1 %vm1075_vm12, %v8939_v43  ;;  %v6147_v43 = vsel %vm9249_vm11, %v6142_v24, %v6146_v29  ;;  %v6275_v24 = vshrl.u32 %v6086_v41, 16  ;;  %v6198_v25 = vrot.slane %v6197_v30, 4  ;;  %v6188_v35 = vrot.slane %v6186_v27, 5 }
 0x3ad   : > { %8514 = vmatprep.mubr.msk.bf16.mxu1 %vm1075_vm12, %v8940_v53  ;;  %v8944_v53 = vld [vmem:[#allocation3 + $0x90] ss:$8 sps:$4 sm:$0xff]   ;;  %v7873_v2 = vcombine.low %v6133_v34, %v6147_v43  ;;  %v6226_v29 = vrot.slane %v6225_v20, 4  ;;  %v6263_v43 = vrot.slane %v6261_v45, 4  ;;  %v6217_v49 = vsel %vm9249_vm11, %v6212_v39, %v6216_v10  ;;  %v10845_v39 = vld [vmem:[#allocation3 + $0x94] sm:$0x1] }
 0x3ae   : > { %v6088_v34 = vld [vmem:[#allocation3 + $0x90] sm:$0xf]  ;;  %v6277_v6 = vrot.slane %v6275_v24, 4  ;;  %v6189_v3 = vsel %vm9249_vm11, %v6184_v15, %v6188_v35  ;;  %v6306_v47 = vshll.u32 %v6090_v61, 16  ;;  %v6270_v42 = vshll.u32 %v10833_v54, 16 }
 0x3af   : > { %v6289_v50 = vshrl.u32 %v6088_v34, 16  ;;  %v6258_v24 = vrot.slane %v6256_v1, 5  ;;  %v6298_v35 = vshll.u32 %v10845_v39, 16  ;;  %v6494_v10 = vld [vmem:[#allocation3 + $0x10] sm:$0xe] }
 0x3b0   : > { %v6308_v37 = vrot.slane %v6306_v47, 5  ;;  %v6498_v47 = vld [vmem:[#allocation3 + $0x30] sm:$0xe] }
 0x3b1   : > { %v6291_v55 = vrot.slane %v6289_v50, 4  ;;  %v6496_v50 = vld [vmem:[#allocation3 + $0x20] sm:$0xe]  ;;  %v7894_v28 = vrot.slane %v6498_v47, 9 }
 0x3b4   : > { %8515 = vmatmul.mubr.msk.bf16.gmra.mrb[8].mxu1 %vm1075_vm12, %v8942_v52  ;;  %v6161_v52 = vsel %vm9249_vm11, %v6156_v38, %v6160_v11  ;;  %v6266_v38 = vrot.slane %v6264_v18, 5  ;;  %v10825_v11 = vld [vmem:[#allocation3 + $0x74] sm:$0x1] }
 0x3b5   : > { %8518 = vmatprep.mubr.msk.bf16.mxu1 %vm1075_vm12, %v8943_v58  ;;  %v6200_v58 = vshll.u32 %v10801_v44, 16  ;;  %v7874_v31 = vcombine.low %v6161_v52, %v6175_v12  ;;  %v6303_v52 = vshrl.u32 %v6090_v61, 16  ;;  %v6242_v27 = vshll.u32 %v10825_v11, 16 }
 0x3b6   : > { %v6267_v30 = vor.u32 %v6266_v38, %v6263_v43  ;;  %v7890_v61 = vrot.slane %v6494_v10, 9 }
 0x3b7   : > { %v6202_v8 = vrot.slane %v6200_v58, 5  ;;  %v6281_v58 = vor.u32 %v6280_v59, %v6277_v6  ;;  %v6305_v15 = vrot.slane %v6303_v52, 4 }
 0x3b8   : > { %v6268_v45 = vrot.slane %v6267_v30, 4  ;;  %v7892_v30 = vrot.slane %v6496_v50, 9  ;;  %v6600_v50 = vrot.slane %v10845_v39, 5 }
 0x3b9   : > { %v6203_v19 = vsel %vm9249_vm11, %v6198_v25, %v6202_v8  ;;  %v6282_v18 = vrot.slane %v6281_v58, 4  ;;  %v6272_v25 = vrot.slane %v6270_v42, 5  ;;  %v6286_v8 = vrot.slane %v6284_v0, 5 }
 0x3ba   : > { %v7875_v22 = vcombine.low %v6189_v3, %v6203_v19  ;;  %v6544_v3 = vrot.slane %v10768_v4, 5  ;;  %v6497_v4 = vld [vmem:[#allocation3 + $0x28] sm:$0xe]  ;;  %v6556_v42 = vrot.slane %v10780_v9, 5 }
 0x3bb   : > { %v7893_v1 = vrot.slane %v6497_v4, 9 }
 0x3bc   : > { %8519 = vmatmul.mubr.msk.bf16.gmra.mrb[12].mxu1 %vm1075_vm12, %v8944_v53  ;;  %v6230_v53 = vrot.slane %v6228_v56, 5  ;;  %v6244_v56 = vrot.slane %v6242_v27, 5  ;;  %v6499_v27 = vld [vmem:[#allocation3 + $0x38] sm:$0xe] }
 0x3bd   : > { %8526 = vmatprep.mubr.msk.bf16.mxu1 %vm1075_vm12, %v7872_v5  ;;  %v6253_v5 = vor.u32 %v6252_v13, %v6249_v21  ;;  %v6273_v13 = vsel %vm9249_vm11, %v6268_v45, %v6272_v25 }
 0x3be   : > { %v6231_v63 = vsel %vm9249_vm11, %v6226_v29, %v6230_v53  ;;  %v6495_v53 = vld [vmem:[#allocation3 + $0x18] sm:$0xe] }
 0x3bf   : > { %v7876_v41 = vcombine.low %v6217_v49, %v6231_v63  ;;  %v6254_v14 = vrot.slane %v6253_v5, 4  ;;  %v7891_v19 = vrot.slane %v6495_v53, 9  ;;  %v6548_v49 = vrot.slane %v10771_v26, 5 }
 0x3c0   : > { %v6300_v63 = vrot.slane %v6298_v35, 5  ;;  %v6507_v35 = vld [vmem:[#allocation3 + $0x88] sm:$0xe] }
 0x3c1   : > { %v6259_v29 = vsel %vm9249_vm11, %v6254_v14, %v6258_v24  ;;  %v6549_v52 = vsel %vm9510_vm15, %v7891_v19, %v6548_v49  ;;  %v6564_v14 = vrot.slane %v10789_v51, 5 }
 0x3c4   : > { %8527 = vmatmul.mubr.msk.bf16.vlgmr.msra.gmra.mrb[0].mxu1 %vm1075_vm12, %v7873_v2  ;;  %v6292_v2 = vshll.u32 %v6088_v34, 16 }
 0x3c5   : > { %8543 = vmatpush3.bf16.msra.mxu1 %v10766_v48  ;;  %8530 = vmatprep.mubr.msk.bf16.mxu1 %vm1075_vm12, %v7874_v31  ;;  %v6239_v48 = vor.u32 %v6238_v46, %v6235_v16  ;;  %v10847_v16 = vld [vmem:[#allocation3 + $0x9c] sm:$0x1]  ;;  %v6309_v46 = vor.u32 %v6308_v37, %v6305_v15  ;;  %v6287_v31 = vsel %vm9249_vm11, %v6282_v18, %v6286_v8  ;;  %v6501_v15 = vld [vmem:[#allocation3 + $0x48] sm:$0xe]  ;;  %v6568_v18 = vrot.slane %v10799_v36, 5 }
 0x3c6   : > { %8544 = vmatprep.subr.bf16.mxu1 %v8946_v23  ;;  %v6294_v12 = vrot.slane %v6292_v2, 5  ;;  %v6312_v21 = vshll.u32 %v10847_v16, 16  ;;  %v7878_v43 = vcombine.low %v6273_v13, %v6287_v31  ;;  %v6545_v2 = vsel %vm9510_vm15, %v7890_v61, %v6544_v3  ;;  %v6503_v37 = vld [vmem:[#allocation3 + $0x68] sm:$0xe]  ;;  %v6504_v36 = vld [vmem:[#allocation3 + $0x70] sm:$0xe] }
 0x3c7   : > { %v6240_v20 = vrot.slane %v6239_v48, 4  ;;  %v6310_v6 = vrot.slane %v6309_v46, 4  ;;  %v7910_v58 = vcombine.low %v6545_v2, %v6549_v52  ;;  %v7897_v24 = vrot.slane %v6501_v15, 9  ;;  %v6505_v31 = vld [vmem:[#allocation3 + $0x78] sm:$0xe] }
 0x3c8   : > { %v6314_v59 = vrot.slane %v6312_v21, 5  ;;  %v6576_v8 = vrot.slane %v10807_v57, 5  ;;  %v6506_v57 = vld [vmem:[#allocation3 + $0x80] sm:$0xe]  ;;  %v7903_v61 = vrot.slane %v6507_v35, 9  ;;  %v6596_v3 = vrot.slane %v10835_v32, 5 }
 0x3c9   : > { %8545 = vmatpush3.bf16.msra.mxu1 %v8946_v23  ;;  %v6245_v40 = vsel %vm9249_vm11, %v6240_v20, %v6244_v56  ;;  %v6295_v23 = vor.u32 %v6294_v12, %v6291_v55  ;;  %v7895_v20 = vrot.slane %v6499_v27, 9  ;;  %v6557_v55 = vsel %vm9510_vm15, %v7893_v1, %v6556_v42 }
 0x3ca   : > { %v7877_v34 = vcombine.low %v6245_v40, %v6259_v29  ;;  %v6315_v5 = vsel %vm9249_vm11, %v6310_v6, %v6314_v59  ;;  %v6572_v40 = vrot.slane %v10801_v44, 5  ;;  %v7899_v29 = vrot.slane %v6503_v37, 9 }
 0x3cb   : > { %v6296_v38 = vrot.slane %v6295_v23, 4  ;;  %v6565_v12 = vsel %vm9510_vm15, %v7895_v20, %v6564_v14  ;;  %v6580_v23 = vrot.slane %v10809_v62, 5  ;;  %v7900_v62 = vrot.slane %v6504_v36, 9 }
 0x3cc   : > { %8531 = vmatmul.mubr.msk.bf16.gmra.mrb[4].mxu1 %vm1075_vm12, %v7875_v22  ;;  %v6552_v22 = vrot.slane %v10773_v17, 5  ;;  %v6500_v17 = vld [vmem:[#allocation3 + $0x40] sm:$0xe]  ;;  %v6573_v21 = vsel %vm9510_vm15, %v7897_v24, %v6572_v40  ;;  %v7902_v6 = vrot.slane %v6506_v57, 9  ;;  %v6592_v59 = vrot.slane %v10833_v54, 5 }
 0x3cd   : > { %8534 = vmatprep.mubr.msk.bf16.mxu1 %vm1075_vm12, %v7876_v41  ;;  %v6301_v48 = vsel %vm9249_vm11, %v6296_v38, %v6300_v63  ;;  %v6560_v41 = vrot.slane %v10782_v33, 5  ;;  %v6502_v33 = vld [vmem:[#allocation3 + $0x60] sm:$0xe]  ;;  %v7896_v51 = vrot.slane %v6500_v17, 9  ;;  %v6581_v13 = vsel %vm9510_vm15, %v7899_v29, %v6580_v23  ;;  %v6509_v54 = vld [vmem:[#allocation3 + $0x98] sm:$0xe] }
 0x3ce   : > { %v7879_v26 = vcombine.low %v6301_v48, %v6315_v5  ;;  %v6553_v0 = vsel %vm9510_vm15, %v7892_v30, %v6552_v22  ;;  %v7898_v25 = vrot.slane %v6502_v33, 9  ;;  %v6588_v38 = vrot.slane %v10831_v7, 5  ;;  %v11371_v30 = vld [vmem:[#allocation7_spill] sm:$0xff] }
 0x3cf   : > { %v6561_v9 = vsel %vm9510_vm15, %v7894_v28, %v6560_v41  ;;  %v7911_v56 = vcombine.low %v6553_v0, %v6557_v55  ;;  %v6569_v46 = vsel %vm9510_vm15, %v7896_v51, %v6568_v18  ;;  %v6593_v7 = vsel %vm9510_vm15, %v7902_v6, %v6592_v59 }
 0x3d0   : > { %v7912_v45 = vcombine.low %v6561_v9, %v6565_v12  ;;  %v6577_v44 = vsel %vm9510_vm15, %v7898_v25, %v6576_v8  ;;  %v7913_v10 = vcombine.low %v6569_v46, %v6573_v21  ;;  %v6597_v63 = vsel %vm9510_vm15, %v7903_v61, %v6596_v3 }
 0x3d1   : > { %v7914_v53 = vcombine.low %v6577_v44, %v6581_v13  ;;  %v7916_v32 = vcombine.low %v6593_v7, %v6597_v63  ;;  %v7905_v2 = vrot.slane %v6509_v54, 9  ;;  %v6604_v52 = vrot.slane %v10847_v16, 5 }
 0x3d3   : > { %v6605_v47 = vsel %vm9510_vm15, %v7905_v2, %v6604_v52 }
 0x3d4   : > { %8535 = vmatmul.mubr.msk.bf16.gmra.mrb[8].mxu1 %vm1075_vm12, %v7877_v34  ;;  %v6584_v34 = vrot.slane %v10825_v11, 5  ;;  %v6508_v11 = vld [vmem:[#allocation3 + $0x90] sm:$0xe] }
 0x3d5   : > { %8538 = vmatprep.mubr.msk.bf16.mxu1 %vm1075_vm12, %v7878_v43  ;;  %v7901_v43 = vrot.slane %v6505_v31, 9  ;;  %v7904_v5 = vrot.slane %v6508_v11, 9 }
 0x3d6   : > { %v6585_v19 = vsel %vm9510_vm15, %v7900_v62, %v6584_v34 }
 0x3d7   : > { %v6589_v49 = vsel %vm9510_vm15, %v7901_v43, %v6588_v38  ;;  %v6601_v4 = vsel %vm9510_vm15, %v7904_v5, %v6600_v50 }
 0x3d8   : > { %v7915_v48 = vcombine.low %v6585_v19, %v6589_v49  ;;  %v7917_v27 = vcombine.low %v6601_v4, %v6605_v47 }
 0x3dc   : > { %8539 = vmatmul.mubr.msk.bf16.gmra.mrb[12].mxu1 %vm1075_vm12, %v7879_v26  ;;  %v10921_v26 = vld [vmem:[%s9111_s27] sm:$0x7] }
 0x3dd   : > { %8546 = vmatprep.mubr.msk.bf16.mxu1 %vm1075_vm12, %v7910_v58  ;;  %v10925_v39 = vrot.slane %v10921_v26, %v11371_v30 }
 0x3e4   : > { %8547 = vmatmul.mubr.msk.bf16.vlgmr.msra.gmra.mrb[0].mxu1 %vm1075_vm12, %v7911_v56 }
 0x3e5   : > { %8550 = vmatprep.mubr.msk.bf16.mxu1 %vm1075_vm12, %v7912_v45 }
 0x3ec   : > { %8551 = vmatmul.mubr.msk.bf16.gmra.mrb[4].mxu1 %vm1075_vm12, %v7913_v10 }
 0x3ed   : > { %8554 = vmatprep.mubr.msk.bf16.mxu1 %vm1075_vm12, %v7914_v53 }
 0x3f4   : > { %8555 = vmatmul.mubr.msk.bf16.gmra.mrb[8].mxu1 %vm1075_vm12, %v7915_v48 }
 0x3f5   : > { %8558 = vmatprep.mubr.msk.bf16.mxu1 %vm1075_vm12, %v7916_v32 }
 0x3fc   : > { %8559 = vmatmul.mubr.msk.bf16.gmra.mrb[12].mxu1 %vm1075_vm12, %v7917_v27 }
 0x4b7   : > { %v8548_v16 = vpop.f32.mrb[0].mxu1 }
 0x4b8   : > { %v6705_v58 = vpop.f32.mrb[1].mxu1  ;;  %v10928_v22 = vadd.f32 %v8548_v16, %v10925_v39 }
 0x4b9   : > { %v10931_v1 = vadd.f32 %v10925_v39, %v6705_v58  ;;  %v8549_v42 = vpop.f32.mrb[2].mxu1 }
 0x4ba   : > { %v6708_v60 = vpop.f32.mrb[3].mxu1  ;;  %v10936_v41 = vadd.f32 %v8549_v42, %v10925_v39  ;;  %v6843_v14 = vmul.f32 %v10928_v22, %v10928_v22  ;;  %v6807_v12 = vsel %vm1075_vm12, %v10928_v22, 0.0 }
 0x4bb   : > { %v6841_v28 = vmul.f32 %v10931_v1, %v10931_v1  ;;  %v10939_v20 = vadd.f32 %v10925_v39, %v6708_v60  ;;  %v6804_v0 = vsel %vm1075_vm12, %v10931_v1, 0.0 }
 0x4bc   : > { %v6844_v33 = vmul.f32 %v10936_v41, %v10936_v41  ;;  %v6860_v24 = vsel %vm1075_vm12, %v6843_v14, 0.0  ;;  %v6809_v40 = vsel %vm1075_vm12, %v10936_v41, 0.0 }
 0x4bd   : > { %v6805_v55 = vsel %vm1075_vm12, %v10939_v20, 0.0  ;;  %v6842_v17 = vmul.f32 %v10939_v20, %v10939_v20  ;;  %v6857_v15 = vsel %vm1075_vm12, %v6841_v28, 0.0 }
 0x4be   : > { %v6806_v9 = vadd.f32 %v6805_v55, %v6804_v0  ;;  %v6862_v36 = vsel %vm1075_vm12, %v6844_v33, 0.0 }
 0x4bf   : > { %v6858_v37 = vsel %vm1075_vm12, %v6842_v17, 0.0  ;;  %v8552_v56 = vpop.f32.mrb[4].mxu1 }
 0x4c0   : > { %v6808_v51 = vadd.f32 %v6807_v12, %v6806_v9  ;;  %v6859_v45 = vadd.f32 %v6858_v37, %v6857_v15  ;;  %v6721_v18 = vpop.f32.mrb[5].mxu1  ;;  %v10962_v23 = vadd.f32 %v8552_v56, %v10925_v39 }
 0x4c1   : > { %v10959_v25 = vadd.f32 %v10925_v39, %v6721_v18  ;;  %v8553_v8 = vpop.f32.mrb[6].mxu1 }
 0x4c2   : > { %v6861_v29 = vadd.f32 %v6860_v24, %v6859_v45  ;;  %v6810_v46 = vadd.f32 %v6809_v40, %v6808_v51  ;;  %v6724_v21 = vpop.f32.mrb[7].mxu1  ;;  %v10973_v10 = vadd.f32 %v8553_v8, %v10925_v39  ;;  %v6847_v34 = vmul.f32 %v10962_v23, %v10962_v23 }
 0x4c3   : > { %v6811_v44 = vsel %vm1075_vm12, %v10959_v25, 0.0  ;;  %v6845_v13 = vmul.f32 %v10959_v25, %v10959_v25  ;;  %v10970_v31 = vadd.f32 %v10925_v39, %v6724_v21  ;;  %v6815_v59 = vsel %vm1075_vm12, %v10962_v23, 0.0 }
 0x4c4   : > { %v6812_v57 = vadd.f32 %v6811_v44, %v6810_v46  ;;  %v6863_v35 = vadd.f32 %v6862_v36, %v6861_v29  ;;  %v6848_v3 = vmul.f32 %v10973_v10, %v10973_v10  ;;  %v6817_v7 = vsel %vm1075_vm12, %v10973_v10, 0.0 }
 0x4c5   : > { %v6864_v62 = vsel %vm1075_vm12, %v6845_v13, 0.0  ;;  %v6813_v53 = vsel %vm1075_vm12, %v10970_v31, 0.0  ;;  %v6846_v6 = vmul.f32 %v10970_v31, %v10970_v31  ;;  %v6868_v5 = vsel %vm1075_vm12, %v6847_v34, 0.0 }
 0x4c6   : > { %v6865_v43 = vadd.f32 %v6864_v62, %v6863_v35  ;;  %v6814_v38 = vadd.f32 %v6813_v53, %v6812_v57  ;;  %v6870_v30 = vsel %vm1075_vm12, %v6848_v3, 0.0 }
 0x4c7   : > { %v8556_v61 = vpop.f32.mrb[8].mxu1  ;;  %v6866_v49 = vsel %vm1075_vm12, %v6846_v6, 0.0 }
 0x4c8   : > { %v6816_v19 = vadd.f32 %v6815_v59, %v6814_v38  ;;  %v6737_v11 = vpop.f32.mrb[9].mxu1  ;;  %v6867_v63 = vadd.f32 %v6866_v49, %v6865_v43  ;;  %v10994_v32 = vadd.f32 %v8556_v61, %v10925_v39 }
 0x4c9   : > { %v10990_v54 = vadd.f32 %v10925_v39, %v6737_v11  ;;  %v8557_v48 = vpop.f32.mrb[10].mxu1 }
 0x4ca   : > { %v6818_v50 = vadd.f32 %v6817_v7, %v6816_v19  ;;  %v6740_v2 = vpop.f32.mrb[11].mxu1  ;;  %v6869_v52 = vadd.f32 %v6868_v5, %v6867_v63  ;;  %v11005_v58 = vadd.f32 %v8557_v48, %v10925_v39  ;;  %v6851_v0 = vmul.f32 %v10994_v32, %v10994_v32 }
 0x4cb   : > { %v6819_v4 = vsel %vm1075_vm12, %v10990_v54, 0.0  ;;  %v6849_v47 = vmul.f32 %v10990_v54, %v10990_v54  ;;  %v11001_v27 = vadd.f32 %v10925_v39, %v6740_v2  ;;  %v6823_v17 = vsel %vm1075_vm12, %v10994_v32, 0.0 }
 0x4cc   : > { %v6820_v16 = vadd.f32 %v6819_v4, %v6818_v50  ;;  %v6871_v42 = vadd.f32 %v6870_v30, %v6869_v52  ;;  %v6852_v33 = vmul.f32 %v11005_v58, %v11005_v58  ;;  %v6825_v51 = vsel %vm1075_vm12, %v11005_v58, 0.0 }
 0x4cd   : > { %v6872_v60 = vsel %vm1075_vm12, %v6849_v47, 0.0  ;;  %v6821_v28 = vsel %vm1075_vm12, %v11001_v27, 0.0  ;;  %v6850_v14 = vmul.f32 %v11001_v27, %v11001_v27  ;;  %v6876_v40 = vsel %vm1075_vm12, %v6851_v0, 0.0 }
 0x4ce   : > { %v6822_v55 = vadd.f32 %v6821_v28, %v6820_v16  ;;  %v6873_v9 = vadd.f32 %v6872_v60, %v6871_v42  ;;  %v6878_v57 = vsel %vm1075_vm12, %v6852_v33, 0.0 }
 0x4cf   : > { %v6874_v12 = vsel %vm1075_vm12, %v6850_v14, 0.0  ;;  %v8560_v15 = vpop.f32.mrb[12].mxu1 }
 0x4d0   : > { %v6824_v37 = vadd.f32 %v6823_v17, %v6822_v55  ;;  %v6753_v56 = vpop.f32.mrb[13].mxu1  ;;  %v6875_v45 = vadd.f32 %v6874_v12, %v6873_v9  ;;  %v11026_v8 = vadd.f32 %v8560_v15, %v10925_v39 }
 0x4d1   : > { %v11022_v18 = vadd.f32 %v10925_v39, %v6753_v56  ;;  %v8561_v24 = vpop.f32.mrb[14].mxu1 }
 0x4d2   : > { %v6826_v29 = vadd.f32 %v6825_v51, %v6824_v37  ;;  %v6756_v46 = vpop.f32.mrb[15].mxu1  ;;  %v6877_v21 = vadd.f32 %v6876_v40, %v6875_v45  ;;  %v6803_v62 = vadd.f32 %v8561_v24, %v10925_v39  ;;  %v6855_v6 = vmul.f32 %v11026_v8, %v11026_v8  ;;  %v11372_v40 = vld [vmem:[#allocation8_spill] sm:$0xff] }
 0x4d3   : > { %v6827_v36 = vsel %vm1075_vm12, %v11022_v18, 0.0  ;;  %v6853_v44 = vmul.f32 %v11022_v18, %v11022_v18  ;;  %v6801_v13 = vadd.f32 %v10925_v39, %v6756_v46  ;;  %v6831_v61 = vsel %vm1075_vm12, %v11026_v8, 0.0 }
 0x4d4   : > { %v6828_v35 = vadd.f32 %v6827_v36, %v6826_v29  ;;  %v6879_v53 = vadd.f32 %v6878_v57, %v6877_v21  ;;  %v6856_v49 = vmul.f32 %v6803_v62, %v6803_v62  ;;  %v6833_v39 = vsel %vm1075_vm12, %v6803_v62, 0.0 }
 0x4d5   : > { %v6880_v34 = vsel %vm1075_vm12, %v6853_v44, 0.0  ;;  %v6829_v43 = vsel %vm1075_vm12, %v6801_v13, 0.0  ;;  %v6854_v38 = vmul.f32 %v6801_v13, %v6801_v13  ;;  %v6884_v63 = vsel %vm1075_vm12, %v6855_v6, 0.0 }
 0x4d6   : > { %v6830_v59 = vadd.f32 %v6829_v43, %v6828_v35  ;;  %v6881_v3 = vadd.f32 %v6880_v34, %v6879_v53  ;;  %v6886_v50 = vsel %vm1075_vm12, %v6856_v49, 0.0 }
 0x4d7   : > { %v6882_v19 = vsel %vm1075_vm12, %v6854_v38, 0.0 }
 0x4d8   : > { %v6832_v11 = vadd.f32 %v6831_v61, %v6830_v59  ;;  %v6883_v7 = vadd.f32 %v6882_v19, %v6881_v3  ;;  %v11373_v61 = vld [vmem:[#allocation9_spill] sm:$0xff] }
 0x4da   : > { %v6834_v48 = vadd.f32 %v6833_v39, %v6832_v11  ;;  %v6885_v5 = vadd.f32 %v6884_v63, %v6883_v7 }
 0x4dc   : > { %v6835_v2 = vrot.slane %v6834_v48, 4  ;;  %v6887_v52 = vadd.f32 %v6886_v50, %v6885_v5  ;;  %v8954_v5 = vld [vmem:[#allocation2 + $0x8] sm:$0xff] }
 0x4de   : > { %v6836_v4 = vadd.f32 %v6835_v2, %v6834_v48  ;;  %v6888_v47 = vrot.slane %v6887_v52, 4  ;;  %v8955_v2 = vld [vmem:[#allocation2 + $0x10] sm:$0xff] }
 0x4e0   : > { %v6837_v30 = vrot.slane %v6836_v4, 2  ;;  %v6889_v16 = vadd.f32 %v6888_v47, %v6887_v52 }
 0x4e2   : > { %v6838_v42 = vadd.f32 %v6837_v30, %v6836_v4  ;;  %v6890_v60 = vrot.slane %v6889_v16, 2  ;;  %v8956_v4 = vld [vmem:[#allocation2 + $0x18] sm:$0xff]  ;;  %v8957_v30 = vld [vmem:[#allocation2 + $0x20] sm:$0xff] }
 0x4e4   : > { %v6839_v28 = vrot.slane %v6838_v42, 1  ;;  %v6891_v14 = vadd.f32 %v6890_v60, %v6889_v16 }
 0x4e6   : > { %v6840_v0 = vadd.f32 %v6839_v28, %v6838_v42  ;;  %v6892_v55 = vrot.slane %v6891_v14, 1  ;;  %v8958_v42 = vld [vmem:[#allocation2 + $0x28] sm:$0xff]  ;;  %v8959_v28 = vld [vmem:[#allocation2 + $0x30] sm:$0xff] }
 0x4e8   : > { %v6894_v17 = vmul.f32 0.0078125, %v6840_v0  ;;  %v6893_v9 = vadd.f32 %v6892_v55, %v6891_v14  ;;  %v8960_v0 = vld [vmem:[#allocation2 + $0x38] sm:$0xff] }
 0x4ea   : > { %v6896_v12 = vmul.f32 %v6894_v17, %v6894_v17  ;;  %v6895_v15 = vmul.f32 0.0078125, %v6893_v9 }
 0x4ec   : > { %v6897_v33 = vsub.f32 %v6895_v15, %v6896_v12  ;;  %v8962_v12 = vld [vmem:[#allocation2 + $0x48] sm:$0xff] }
 0x4ee   : > { %v6898_v37 = vmax.f32 %v6897_v33, 0.0  ;;  %v8963_v33 = vld [vmem:[#allocation2 + $0x50] sm:$0xff] }
 0x4f0   : > { %v6899_v56 = vadd.f32 1e-05, %v6898_v37 }
 0x4f2   : > { %8949 = vrsqrt.f32 %v6899_v56  ;;  %v8964_v56 = vld [vmem:[#allocation2 + $0x58] sm:$0xff] }
 0x4fc   : > { %v8950_v51 = vpop.eup %8949 }
 0x4fd   : > { %v6901_v45 = vmul.f32 %v8950_v51, %v10921_v26 }
 0x4ff   : > { %v6902_v24 = vmul.f32 %v6901_v45, %v6894_v17  ;;  %v6910_v29 = vrot.slane %v6901_v45, %v11372_v40  ;;  %v8961_v17 = vld [vmem:[#allocation2 + $0x40] sm:$0xff]  ;;  %v8966_v40 = vld [vmem:[#allocation2 + $0x68] sm:$0xff] }
 0x500   : > { %v8965_v45 = vld [vmem:[#allocation2 + $0x60] sm:$0xff] }
 0x501   : > { %v6904_v46 = vrot.slane %v6902_v24, 7  ;;  %v6911_v21 = vmul.f32 %v6910_v29, %v10931_v1  ;;  %v6912_v36 = vmul.f32 %v6910_v29, %v10939_v20  ;;  %v6913_v44 = vmul.f32 %v6910_v29, %v10928_v22 }
 0x502   : > { %v6915_v57 = vmul.f32 %v6910_v29, %v10959_v25  ;;  %v6916_v35 = vmul.f32 %v6910_v29, %v10970_v31  ;;  %v6917_v53 = vmul.f32 %v6910_v29, %v10962_v23  ;;  %v6918_v43 = vmul.f32 %v6910_v29, %v10973_v10 }
 0x503   : > { %v6906_v34 = vsub.f32 %v10921_v26, %v6904_v46  ;;  %v6919_v38 = vmul.f32 %v6910_v29, %v10990_v54  ;;  %v6920_v6 = vmul.f32 %v6910_v29, %v11001_v27  ;;  %v6921_v1 = vmul.f32 %v6910_v29, %v10994_v32  ;;  %v8967_v46 = vld [vmem:[#allocation2 + $0x70] sm:$0xff] }
 0x504   : > { %v6922_v20 = vmul.f32 %v6910_v29, %v11005_v58  ;;  %v6923_v22 = vmul.f32 %v6910_v29, %v11022_v18  ;;  %v6924_v59 = vmul.f32 %v6910_v29, %v6801_v13  ;;  %v6914_v25 = vmul.f32 %v6910_v29, %v10936_v41 }
 0x505   : > { %v6925_v31 = vmul.f32 %v6910_v29, %v11026_v8  ;;  %v6926_v23 = vmul.f32 %v6910_v29, %v6803_v62  ;;  %v6930_v26 = vrot.slane %v6906_v34, %v11373_v61  ;;  %v8953_v8 = vld [vmem:[#allocation2] sm:$0xff] }
 0x507   : > { %v6931_v3 = vadd.f32 %v6930_v26, %v6911_v21  ;;  %v6932_v10 = vadd.f32 %v6930_v26, %v6912_v36  ;;  %v6933_v19 = vadd.f32 %v6930_v26, %v6913_v44  ;;  %v6934_v54 = vadd.f32 %v6930_v26, %v6914_v25  ;;  %v8968_v36 = vld [vmem:[#allocation2 + $0x78] sm:$0xff] }
 0x508   : > { %v6935_v49 = vadd.f32 %v6930_v26, %v6915_v57  ;;  %v6936_v27 = vadd.f32 %v6930_v26, %v6916_v35  ;;  %v6937_v11 = vadd.f32 %v6930_v26, %v6917_v53  ;;  %v6938_v32 = vadd.f32 %v6930_v26, %v6918_v43 }
 0x509   : > { %v6939_v39 = vadd.f32 %v6930_v26, %v6919_v38  ;;  %v6940_v58 = vadd.f32 %v6930_v26, %v6920_v6  ;;  %v6941_v7 = vadd.f32 %v6930_v26, %v6921_v1  ;;  %v6942_v18 = vadd.f32 %v6930_v26, %v6922_v20 }
 0x50a   : > { %v6943_v13 = vadd.f32 %v6930_v26, %v6923_v22  ;;  %v6944_v63 = vadd.f32 %v6930_v26, %v6924_v59  ;;  %v6945_v41 = vadd.f32 %v6930_v26, %v6925_v31  ;;  %v6946_v48 = vadd.f32 %v6930_v26, %v6926_v23 }
 0x50b   : > { %v11063_v62 = vadd.f32 %v8953_v8, %v6931_v3  ;;  %v11065_v50 = vadd.f32 %v8954_v5, %v6932_v10  ;;  %v11067_v52 = vadd.f32 %v8955_v2, %v6933_v19  ;;  %v11069_v47 = vadd.f32 %v8956_v4, %v6934_v54  ;;  %v8969_v3 = vld [vmem:[%s11338_s5] sm:$0xff] (!%p7928_p4)   ;;  %v8970_v19 = vld [vmem:[%s11338_s5 + $0x8] sm:$0xff] (!%p7928_p4)  }
 0x50c   : > { %v11071_v16 = vadd.f32 %v8957_v30, %v6935_v49  ;;  %v11073_v60 = vadd.f32 %v8958_v42, %v6936_v27  ;;  %v11075_v14 = vadd.f32 %v8959_v28, %v6937_v11  ;;  %v11077_v55 = vadd.f32 %v8960_v0, %v6938_v32  ;;  %8562 = vmatprep.subr.bf16.mxu0 (!%p7928_p4), %v8969_v3 }
 0x50d   : > { %v6955_v9 = vadd.f32 %v8961_v17, %v6939_v39  ;;  %v6956_v15 = vadd.f32 %v8962_v12, %v6940_v58  ;;  %v6957_v37 = vadd.f32 %v8963_v33, %v6941_v7  ;;  %v6958_v51 = vadd.f32 %v8964_v56, %v6942_v18  ;;  %8563 = vmatpush3.bf16.msra.mxu0 (!%p7928_p4), %v8969_v3  ;;  %v11118_v7 = vld [vmem:[#allocation4] sm:$0x7] (!%p7928_p4)  ;;  %v11374_v18 = vld [vmem:[#allocation7_spill] sm:$0xff] (!%p7928_p4) }
 0x50e   : > { %v6959_v24 = vadd.f32 %v8965_v45, %v6943_v13  ;;  %v6960_v29 = vadd.f32 %v8966_v40, %v6944_v63  ;;  %v6961_v21 = vadd.f32 %v8967_v46, %v6945_v41  ;;  %v6962_v44 = vadd.f32 %v8968_v36, %v6946_v48  ;;  %8838 = vmatprep.subr.bf16.mxu1 (!%p7928_p4), %v8969_v3 }
 0x50f   : > { %v6963_v57 = vmax.f32 %v11063_v62, 0.0  ;;  %v6964_v35 = vmax.f32 %v11065_v50, 0.0  ;;  %v6965_v53 = vmax.f32 %v11067_v52, 0.0  ;;  %v6966_v34 = vmax.f32 %v11069_v47, 0.0  ;;  %8564 = vmatprep.subr.bf16.mxu0 (!%p7928_p4), %v8970_v19  ;;  %8840 = vmatpush3.bf16.msra.mxu1 (!%p7928_p4), %v8969_v3 }
 0x510   : > { %v6967_v43 = vmax.f32 %v11071_v16, 0.0  ;;  %v6968_v38 = vmax.f32 %v11073_v60, 0.0  ;;  %v6969_v6 = vmax.f32 %v11075_v14, 0.0  ;;  %v6970_v1 = vmax.f32 %v11077_v55, 0.0  ;;  %8839 = vmatprep.subr.bf16.mxu1 (!%p7928_p4), %v8970_v19 }
 0x511   : > { %v6971_v20 = vmax.f32 %v6955_v9, 0.0  ;;  %v6972_v22 = vmax.f32 %v6956_v15, 0.0  ;;  %v6973_v59 = vmax.f32 %v6957_v37, 0.0  ;;  %v6974_v25 = vmax.f32 %v6958_v51, 0.0  ;;  %6979 = vst.msk [vmem:[#allocation2] sm:$0xff] %vm1075_vm12, %v6963_v57  ;;  %6980 = vst.msk [vmem:[#allocation2 + $0x8] sm:$0xff] %vm1075_vm12, %v6964_v35  ;;  %8565 = vmatpush3.bf16.msra.mxu0 (!%p7928_p4), %v8970_v19 }
 0x512   : > { %6981 = vst.msk [vmem:[#allocation2 + $0x10] sm:$0xff] %vm1075_vm12, %v6965_v53  ;;  %6982 = vst.msk [vmem:[#allocation2 + $0x18] sm:$0xff] %vm1075_vm12, %v6966_v34  ;;  %v6975_v31 = vmax.f32 %v6959_v24, 0.0  ;;  %v6976_v23 = vmax.f32 %v6960_v29, 0.0  ;;  %v6977_v61 = vmax.f32 %v6961_v21, 0.0  ;;  %v6978_v26 = vmax.f32 %v6962_v44, 0.0 }
 0x513   : > { %6983 = vst.msk [vmem:[#allocation2 + $0x20] sm:$0xff] %vm1075_vm12, %v6967_v43  ;;  %6984 = vst.msk [vmem:[#allocation2 + $0x28] sm:$0xff] %vm1075_vm12, %v6968_v38  ;;  %6998 = sbr.rel (%p7928_p4) target bundleno = 1607 (0x647), region = 60  ;;  %v7000_v10 = vpack.c.bf16 (!%p7928_p4), %v6964_v35, %v6963_v57  ;;  %v7004_v54 = vpack.c.bf16 (!%p7928_p4), %v6972_v22, %v6971_v20  ;;  %v7001_v49 = vpack.c.bf16 (!%p7928_p4), %v6966_v34, %v6965_v53  ;;  %8841 = vmatpush3.bf16.msra.mxu1 (!%p7928_p4), %v8970_v19 }
 0x514   : > { %6985 = vst.msk [vmem:[#allocation2 + $0x30] sm:$0xff] %vm1075_vm12, %v6969_v6  ;;  %6986 = vst.msk [vmem:[#allocation2 + $0x38] sm:$0xff] %vm1075_vm12, %v6970_v1  ;;  %v7002_v27 = vpack.c.bf16 (!%p7928_p4), %v6968_v38, %v6967_v43  ;;  %v7005_v11 = vpack.c.bf16 (!%p7928_p4), %v6974_v25, %v6973_v59  ;;  %v7006_v32 = vpack.c.bf16 (!%p7928_p4), %v6976_v23, %v6975_v31 }
 0x515   : > { %6987 = vst.msk [vmem:[#allocation2 + $0x40] sm:$0xff] %vm1075_vm12, %v6971_v20  ;;  %6988 = vst.msk [vmem:[#allocation2 + $0x48] sm:$0xff] %vm1075_vm12, %v6972_v22  ;;  %8566 = vmatprep.mubr.msk.bf16.mxu0 (!%p7928_p4), %vm1075_vm12, %v7000_v10  ;;  %8574 = vmatprep.mubr.msk.bf16.mxu1 (!%p7928_p4), %vm1075_vm12, %v7004_v54  ;;  %v7003_v39 = vpack.c.bf16 (!%p7928_p4), %v6970_v1, %v6969_v6  ;;  %v7007_v58 = vpack.c.bf16 (!%p7928_p4), %v6978_v26, %v6977_v61 }
 0x516   : > { %6989 = vst.msk [vmem:[#allocation2 + $0x50] sm:$0xff] %vm1075_vm12, %v6973_v59  ;;  %6990 = vst.msk [vmem:[#allocation2 + $0x58] sm:$0xff] %vm1075_vm12, %v6974_v25  ;;  %8567 = vmatmul.mubr.msk.bf16.vlgmr.msra.gmra.mrb[0].mxu0 (!%p7928_p4), %vm1075_vm12, %v7001_v49  ;;  %8575 = vmatmul.mubr.msk.bf16.vlgmr.msra.gmra.mrb[0].mxu1 (!%p7928_p4), %vm1075_vm12, %v7005_v11  ;;  %v11122_v13 = vrot.slane (!%p7928_p4), %v11118_v7, %v11374_v18 }
 0x517   : > { %6991 = vst.msk [vmem:[#allocation2 + $0x60] sm:$0xff] %vm1075_vm12, %v6975_v31  ;;  %6992 = vst.msk [vmem:[#allocation2 + $0x68] sm:$0xff] %vm1075_vm12, %v6976_v23  ;;  %8570 = vmatprep.mubr.msk.bf16.mxu0 (!%p7928_p4), %vm1075_vm12, %v7002_v27  ;;  %8578 = vmatprep.mubr.msk.bf16.mxu1 (!%p7928_p4), %vm1075_vm12, %v7006_v32 }
 0x518   : > { %6993 = vst.msk [vmem:[#allocation2 + $0x70] sm:$0xff] %vm1075_vm12, %v6977_v61  ;;  %6994 = vst.msk [vmem:[#allocation2 + $0x78] sm:$0xff] %vm1075_vm12, %v6978_v26 }
 0x51e   : > { %8571 = vmatmul.mubr.msk.bf16.gmra.mrb[4].mxu0 %vm1075_vm12, %v7003_v39  ;;  %8579 = vmatmul.mubr.msk.bf16.gmra.mrb[4].mxu1 %vm1075_vm12, %v7007_v58 }
 0x5e9   : > { %v8568_v63 = vpop.f32.mrb[0].mxu0  ;;  %v8576_v48 = vpop.f32.mrb[0].mxu1 }
 0x5ea   : > { %v7086_v41 = vpop.f32.mrb[1].mxu0  ;;  %v11125_v8 = vadd.f32 %v8568_v63, %v11122_v13  ;;  %v7118_v50 = vpop.f32.mrb[1].mxu1  ;;  %v11198_v63 = vadd.f32 %v8576_v48, %v11122_v13 }
 0x5eb   : > { %v11128_v62 = vadd.f32 %v7086_v41, %v11122_v13  ;;  %v8569_v5 = vpop.f32.mrb[2].mxu0  ;;  %v8577_v52 = vpop.f32.mrb[2].mxu1  ;;  %v11162_v35 = vadd.f32 %v7118_v50, %v11122_v13 }
 0x5ec   : > { %v7089_v2 = vpop.f32.mrb[3].mxu0  ;;  %v11133_v47 = vadd.f32 %v8569_v5, %v11122_v13  ;;  %v7121_v16 = vpop.f32.mrb[3].mxu1  ;;  %v7189_v42 = vmul.f32 %v11125_v8, %v11125_v8  ;;  %v7153_v55 = vsel %vm7149_vm0, %v11125_v8, 0.0 }
 0x5ed   : > { %v7187_v4 = vmul.f32 %v11128_v62, %v11128_v62  ;;  %v11136_v30 = vadd.f32 %v7089_v2, %v11122_v13  ;;  %v7150_v60 = vsel %vm7149_vm0, %v11128_v62, 0.0  ;;  %v7195_v19 = vmul.f32 %v11162_v35, %v11162_v35 }
 0x5ee   : > { %v7190_v9 = vmul.f32 %v11133_v47, %v11133_v47  ;;  %v7206_v45 = vsel %vm7149_vm0, %v7189_v42, 0.0  ;;  %v7155_v24 = vsel %vm7149_vm0, %v11133_v47, 0.0  ;;  %v11190_v11 = vadd.f32 %v7121_v16, %v11122_v13 }
 0x5ef   : > { %v7151_v28 = vsel %vm7149_vm0, %v11136_v30, 0.0  ;;  %v7188_v14 = vmul.f32 %v11136_v30, %v11136_v30  ;;  %v7203_v17 = vsel %vm7149_vm0, %v7187_v4, 0.0  ;;  %v7165_v58 = vsel %vm7149_vm0, %v11162_v35, 0.0 }
 0x5f0   : > { %v7152_v0 = vadd.f32 %v7151_v28, %v7150_v60  ;;  %v7208_v34 = vsel %vm7149_vm0, %v7190_v9, 0.0  ;;  %v7218_v50 = vsel %vm7149_vm0, %v7195_v19, 0.0  ;;  %v11202_v2 = vadd.f32 %v8577_v52, %v11122_v13 }
 0x5f1   : > { %v7204_v12 = vsel %vm7149_vm0, %v7188_v14, 0.0  ;;  %v8572_v15 = vpop.f32.mrb[4].mxu0  ;;  %v8580_v51 = vpop.f32.mrb[4].mxu1  ;;  %v7196_v42 = vmul.f32 %v11190_v11, %v11190_v11  ;;  %v7167_v48 = vsel %vm7149_vm0, %v11190_v11, 0.0  ;;  %v7197_v14 = vmul.f32 %v11198_v63, %v11198_v63 }
 0x5f2   : > { %v7154_v33 = vadd.f32 %v7153_v55, %v7152_v0  ;;  %v7205_v37 = vadd.f32 %v7204_v12, %v7203_v17  ;;  %v7102_v56 = vpop.f32.mrb[5].mxu0  ;;  %v7134_v46 = vpop.f32.mrb[5].mxu1  ;;  %v11159_v36 = vadd.f32 %v8572_v15, %v11122_v13  ;;  %v7169_v52 = vsel %vm7149_vm0, %v11198_v63, 0.0 }
 0x5f3   : > { %v11156_v40 = vadd.f32 %v7102_v56, %v11122_v13  ;;  %v8573_v29 = vpop.f32.mrb[6].mxu0  ;;  %v8581_v53 = vpop.f32.mrb[6].mxu1  ;;  %v11208_v60 = vadd.f32 %v7134_v46, %v11122_v13  ;;  %v7198_v17 = vmul.f32 %v11202_v2, %v11202_v2  ;;  %v7220_v12 = vsel %vm7149_vm0, %v7196_v42, 0.0 }
 0x5f4   : > { %v7207_v21 = vadd.f32 %v7206_v45, %v7205_v37  ;;  %v7156_v44 = vadd.f32 %v7155_v24, %v7154_v33  ;;  %v7105_v57 = vpop.f32.mrb[7].mxu0  ;;  %v7137_v1 = vpop.f32.mrb[7].mxu1  ;;  %v11173_v59 = vadd.f32 %v8573_v29, %v11122_v13  ;;  %v7193_v23 = vmul.f32 %v11159_v36, %v11159_v36 }
 0x5f5   : > { %v7157_v43 = vsel %vm7149_vm0, %v11156_v40, 0.0  ;;  %v7191_v38 = vmul.f32 %v11156_v40, %v11156_v40  ;;  %v11170_v6 = vadd.f32 %v7105_v57, %v11122_v13  ;;  %v7161_v10 = vsel %vm7149_vm0, %v11159_v36, 0.0 }
 0x5f6   : > { %v7158_v20 = vadd.f32 %v7157_v43, %v7156_v44  ;;  %v7209_v22 = vadd.f32 %v7208_v34, %v7207_v21  ;;  %v7194_v54 = vmul.f32 %v11173_v59, %v11173_v59  ;;  %v7163_v32 = vsel %vm7149_vm0, %v11173_v59, 0.0 }
 0x5f7   : > { %v7210_v25 = vsel %vm7149_vm0, %v7191_v38, 0.0  ;;  %v7159_v31 = vsel %vm7149_vm0, %v11170_v6, 0.0  ;;  %v7192_v3 = vmul.f32 %v11170_v6, %v11170_v6  ;;  %v7214_v18 = vsel %vm7149_vm0, %v7193_v23, 0.0 }
 0x5f8   : > { %v7211_v61 = vadd.f32 %v7210_v25, %v7209_v22  ;;  %v7160_v26 = vadd.f32 %v7159_v31, %v7158_v20  ;;  %v7216_v4 = vsel %vm7149_vm0, %v7194_v54, 0.0  ;;  %v7199_v15 = vmul.f32 %v11208_v60, %v11208_v60 }
 0x5f9   : > { %v7212_v27 = vsel %vm7149_vm0, %v7192_v3, 0.0  ;;  %v11222_v33 = vadd.f32 %v7137_v1, %v11122_v13  ;;  %v7171_v37 = vsel %vm7149_vm0, %v11202_v2, 0.0  ;;  %v7173_v45 = vsel %vm7149_vm0, %v11208_v60, 0.0 }
 0x5fa   : > { %v7162_v49 = vadd.f32 %v7161_v10, %v7160_v26  ;;  %v7213_v39 = vadd.f32 %v7212_v27, %v7211_v61  ;;  %v7222_v24 = vsel %vm7149_vm0, %v7197_v14, 0.0  ;;  %v11230_v29 = vadd.f32 %v8580_v51, %v11122_v13 }
 0x5fb   : > { %v7224_v21 = vsel %vm7149_vm0, %v7198_v17, 0.0  ;;  %v7226_v34 = vsel %vm7149_vm0, %v7199_v15, 0.0  ;;  %v7146_v43 = vadd.f32 %v8581_v53, %v11122_v13  ;;  %v7200_v38 = vmul.f32 %v11222_v33, %v11222_v33 }
 0x5fc   : > { %v7164_v41 = vadd.f32 %v7163_v32, %v7162_v49  ;;  %v7215_v5 = vadd.f32 %v7214_v18, %v7213_v39  ;;  %v7175_v20 = vsel %vm7149_vm0, %v11222_v33, 0.0  ;;  %v7201_v51 = vmul.f32 %v11230_v29, %v11230_v29 }
 0x5fd   : > { %v7177_v25 = vsel %vm7149_vm0, %v11230_v29, 0.0  ;;  %v7202_v23 = vmul.f32 %v7146_v43, %v7146_v43  ;;  %v7228_v26 = vsel %vm7149_vm0, %v7200_v38, 0.0  ;;  %v7179_v13 = vsel %vm7149_vm0, %v7146_v43, 0.0 }
 0x5fe   : > { %v7166_v16 = vadd.f32 %v7165_v58, %v7164_v41  ;;  %v7217_v28 = vadd.f32 %v7216_v4, %v7215_v5  ;;  %v7230_v3 = vsel %vm7149_vm0, %v7201_v51, 0.0 }
 0x5ff   : > { %v7232_v54 = vsel %vm7149_vm0, %v7202_v23, 0.0 }
 0x600   : > { %v7168_v0 = vadd.f32 %v7167_v48, %v7166_v16  ;;  %v7219_v55 = vadd.f32 %v7218_v50, %v7217_v28 }
 0x602   : > { %v7170_v9 = vadd.f32 %v7169_v52, %v7168_v0  ;;  %v7221_v56 = vadd.f32 %v7220_v12, %v7219_v55 }
 0x604   : > { %v7172_v46 = vadd.f32 %v7171_v37, %v7170_v9  ;;  %v7223_v44 = vadd.f32 %v7222_v24, %v7221_v56  ;;  %v11375_v37 = vld [vmem:[#allocation8_spill] sm:$0xff] }
 0x606   : > { %v7174_v57 = vadd.f32 %v7173_v45, %v7172_v46  ;;  %v7225_v1 = vadd.f32 %v7224_v21, %v7223_v44 }
 0x608   : > { %v7176_v22 = vadd.f32 %v7175_v20, %v7174_v57  ;;  %v7227_v31 = vadd.f32 %v7226_v34, %v7225_v1 }
 0x60a   : > { %v7178_v61 = vadd.f32 %v7177_v25, %v7176_v22  ;;  %v7229_v53 = vadd.f32 %v7228_v26, %v7227_v31 }
 0x60c   : > { %v7180_v10 = vadd.f32 %v7179_v13, %v7178_v61  ;;  %v7231_v19 = vadd.f32 %v7230_v3, %v7229_v53 }
 0x60e   : > { %v7181_v49 = vrot.slane %v7180_v10, 4  ;;  %v7233_v27 = vadd.f32 %v7232_v54, %v7231_v19 }
 0x610   : > { %v7182_v32 = vadd.f32 %v7181_v49, %v7180_v10  ;;  %v7234_v39 = vrot.slane %v7233_v27, 4 }
 0x612   : > { %v7183_v58 = vrot.slane %v7182_v32, 2  ;;  %v7235_v18 = vadd.f32 %v7234_v39, %v7233_v27 }
 0x614   : > { %v7184_v41 = vadd.f32 %v7183_v58, %v7182_v32  ;;  %v7236_v5 = vrot.slane %v7235_v18, 2 }
 0x616   : > { %v7185_v50 = vrot.slane %v7184_v41, 1  ;;  %v7237_v4 = vadd.f32 %v7236_v5, %v7235_v18 }
 0x618   : > { %v7186_v16 = vadd.f32 %v7185_v50, %v7184_v41  ;;  %v7238_v42 = vrot.slane %v7237_v4, 1 }
 0x61a   : > { %v7240_v28 = vmul.f32 0.0078125, %v7186_v16  ;;  %v7239_v48 = vadd.f32 %v7238_v42, %v7237_v4 }
 0x61c   : > { %v7242_v14 = vmul.f32 %v7240_v28, %v7240_v28  ;;  %v7241_v0 = vmul.f32 0.0078125, %v7239_v48 }
 0x61e   : > { %v7243_v52 = vsub.f32 %v7241_v0, %v7242_v14 }
 0x620   : > { %v7244_v55 = vmax.f32 %v7243_v52, 0.0 }
 0x622   : > { %v7245_v17 = vadd.f32 1e-05, %v7244_v55 }
 0x624   : > { %8971 = vrsqrt.f32 %v7245_v17 }
 0x62e   : > { %v8972_v9 = vpop.eup %8971 }
 0x62f   : > { %v7247_v12 = vmul.f32 %v8972_v9, %v11118_v7 }
 0x631   : > { %v7248_v15 = vmul.f32 %v7247_v12, %v7240_v28  ;;  %v7256_v56 = vrot.slane %v7247_v12, %v11375_v37 }
 0x633   : > { %v7250_v45 = vrot.slane %v7248_v15, 7  ;;  %v7257_v24 = vmul.f32 %v7256_v56, %v11128_v62  ;;  %v7258_v46 = vmul.f32 %v7256_v56, %v11136_v30  ;;  %v7259_v21 = vmul.f32 %v7256_v56, %v11125_v8 }
 0x634   : > { %v7261_v44 = vmul.f32 %v7256_v56, %v11156_v40  ;;  %v7262_v57 = vmul.f32 %v7256_v56, %v11170_v6  ;;  %v7263_v34 = vmul.f32 %v7256_v56, %v11159_v36  ;;  %v7264_v1 = vmul.f32 %v7256_v56, %v11173_v59 }
 0x635   : > { %v7252_v38 = vsub.f32 %v11118_v7, %v7250_v45  ;;  %v7265_v20 = vmul.f32 %v7256_v56, %v11162_v35  ;;  %v7266_v51 = vmul.f32 %v7256_v56, %v11190_v11  ;;  %v7267_v62 = vmul.f32 %v7256_v56, %v11198_v63  ;;  %v11376_v7 = vld [vmem:[#allocation9_spill] sm:$0xff] }
 0x636   : > { %v7268_v30 = vmul.f32 %v7256_v56, %v11202_v2  ;;  %v7269_v8 = vmul.f32 %v7256_v56, %v11208_v60  ;;  %v7270_v40 = vmul.f32 %v7256_v56, %v11222_v33  ;;  %v7260_v6 = vmul.f32 %v7256_v56, %v11133_v47 }
 0x637   : > { %v7271_v36 = vmul.f32 %v7256_v56, %v11230_v29  ;;  %v7272_v22 = vmul.f32 %v7256_v56, %v7146_v43  ;;  %v7276_v25 = vrot.slane %v7252_v38, %v11376_v7 }
 0x639   : > { %v7277_v59 = vadd.f32 %v7276_v25, %v7257_v24  ;;  %v7278_v31 = vadd.f32 %v7276_v25, %v7258_v46  ;;  %v7279_v35 = vadd.f32 %v7276_v25, %v7259_v21  ;;  %v7280_v23 = vadd.f32 %v7276_v25, %v7260_v6 }
 0x63a   : > { %v7281_v11 = vadd.f32 %v7276_v25, %v7261_v44  ;;  %v7282_v61 = vadd.f32 %v7276_v25, %v7262_v57  ;;  %v7283_v63 = vadd.f32 %v7276_v25, %v7263_v34  ;;  %v7284_v26 = vadd.f32 %v7276_v25, %v7264_v1 }
 0x63b   : > { %v7285_v2 = vadd.f32 %v7276_v25, %v7265_v20  ;;  %v7286_v13 = vadd.f32 %v7276_v25, %v7266_v51  ;;  %v7287_v60 = vadd.f32 %v7276_v25, %v7267_v62  ;;  %v7288_v53 = vadd.f32 %v7276_v25, %v7268_v30 }
 0x63c   : > { %v7289_v33 = vadd.f32 %v7276_v25, %v7269_v8  ;;  %v7290_v3 = vadd.f32 %v7276_v25, %v7270_v40  ;;  %v7291_v47 = vadd.f32 %v7276_v25, %v7271_v36  ;;  %v7292_v10 = vadd.f32 %v7276_v25, %v7272_v22 }
 0x63d   : > { %v7293_v29 = vmax.f32 %v7277_v59, 0.0  ;;  %v7294_v43 = vmax.f32 %v7278_v31, 0.0  ;;  %v7295_v19 = vmax.f32 %v7279_v35, 0.0  ;;  %v7296_v54 = vmax.f32 %v7280_v23, 0.0 }
 0x63e   : > { %v7297_v49 = vmax.f32 %v7281_v11, 0.0  ;;  %v7298_v27 = vmax.f32 %v7282_v61, 0.0  ;;  %v7299_v32 = vmax.f32 %v7283_v63, 0.0  ;;  %v7300_v39 = vmax.f32 %v7284_v26, 0.0 }
 0x63f   : > { %v7301_v58 = vmax.f32 %v7285_v2, 0.0  ;;  %v7302_v18 = vmax.f32 %v7286_v13, 0.0  ;;  %v7303_v41 = vmax.f32 %v7287_v60, 0.0  ;;  %v7304_v5 = vmax.f32 %v7288_v53, 0.0  ;;  %7309 = vst.msk [vmem:[%s11340_s7] sm:$0xff] %vm7149_vm0, %v7293_v29  ;;  %7310 = vst.msk [vmem:[%s11340_s7 + $0x8] sm:$0xff] %vm7149_vm0, %v7294_v43 }
 0x640   : > { %7311 = vst.msk [vmem:[%s11340_s7 + $0x10] sm:$0xff] %vm7149_vm0, %v7295_v19  ;;  %7312 = vst.msk [vmem:[%s11340_s7 + $0x18] sm:$0xff] %vm7149_vm0, %v7296_v54  ;;  %v7305_v50 = vmax.f32 %v7289_v33, 0.0  ;;  %v7306_v4 = vmax.f32 %v7290_v3, 0.0  ;;  %v7307_v16 = vmax.f32 %v7291_v47, 0.0  ;;  %v7308_v42 = vmax.f32 %v7292_v10, 0.0 }
 0x641   : > { %7313 = vst.msk [vmem:[%s11340_s7 + $0x20] sm:$0xff] %vm7149_vm0, %v7297_v49  ;;  %7314 = vst.msk [vmem:[%s11340_s7 + $0x28] sm:$0xff] %vm7149_vm0, %v7298_v27 }
 0x642   : > { %7315 = vst.msk [vmem:[%s11340_s7 + $0x30] sm:$0xff] %vm7149_vm0, %v7299_v32  ;;  %7316 = vst.msk [vmem:[%s11340_s7 + $0x38] sm:$0xff] %vm7149_vm0, %v7300_v39 }
 0x643   : > { %7317 = vst.msk [vmem:[%s11340_s7 + $0x40] sm:$0xff] %vm7149_vm0, %v7301_v58  ;;  %7318 = vst.msk [vmem:[%s11340_s7 + $0x48] sm:$0xff] %vm7149_vm0, %v7302_v18 }
 0x644   : > { %7319 = vst.msk [vmem:[%s11340_s7 + $0x50] sm:$0xff] %vm7149_vm0, %v7303_v41  ;;  %7320 = vst.msk [vmem:[%s11340_s7 + $0x58] sm:$0xff] %vm7149_vm0, %v7304_v5 }
 0x645   : > { %7321 = vst.msk [vmem:[%s11340_s7 + $0x60] sm:$0xff] %vm7149_vm0, %v7305_v50  ;;  %7322 = vst.msk [vmem:[%s11340_s7 + $0x68] sm:$0xff] %vm7149_vm0, %v7306_v4 }
 0x646   : > { %7323 = vst.msk [vmem:[%s11340_s7 + $0x70] sm:$0xff] %vm7149_vm0, %v7307_v16  ;;  %7324 = vst.msk [vmem:[%s11340_s7 + $0x78] sm:$0xff] %vm7149_vm0, %v7308_v42 }
 0x647 PF: > { %s18_s24 = sadd.s32 1, %s9011_s24  }
 0x648   : > { %p15_p6 = scmp.ge.s32.totalorder %s18_s24, 4  }
 0x64a   :  { %17 = sbr.rel (!%p15_p6) target bundleno = 1 (0x1), region = 114 }
 0x651   :  { %7336 = vsyncpa [#allocation5], 1 }
 0x652   :  { %7338 = vsyncpa [#allocation5 + $0x1], 1 }

</bundles_post_ra>
